<compile_context>
chip_gen: v5e
topology: v5e:2x2
jax: 0.10.0
libtpu: 0.0.40
codegen_flags: <defaults>
</compile_context>

<pallas_src>
import functools
import math

import jax
import jax.numpy as jnp
from jax.experimental import pallas as pl
from jax.experimental.pallas import tpu as pltpu

N_EMB = 32        # n_embeddings
N_HEAD = 4        # n_head
HEAD_SIZE = N_EMB // N_HEAD
CONTEXT = 8       # context_size (== T here)
LN_EPS = 1e-5


def _layernorm(v, g, b):
    """LayerNorm over the last axis; v:(M,C) f32, g/b:(C,) f32."""
    mu = jnp.mean(v, axis=-1, keepdims=True)
    var = jnp.mean(jnp.square(v - mu), axis=-1, keepdims=True)
    return (v - mu) * jax.lax.rsqrt(var + LN_EPS) * g + b


def block_kernel(x_ref, vec_ref, wqkv_ref, wproj_ref, w1_ref, b1_ref, w2_ref,
                 o_ref, *, bb, seq):
    x = x_ref[...].astype(jnp.float32)          # (M, C), M = bb*seq
    M, C = x.shape
    hs = C // N_HEAD

    # Packed (8, C) vector params: rows = ln1_g, ln1_b, ln2_g, ln2_b, bproj, b2.
    ln1_g, ln1_b = vec_ref[0], vec_ref[1]
    ln2_g, ln2_b = vec_ref[2], vec_ref[3]
    bproj, b2 = vec_ref[4], vec_ref[5]

    # ---------------- x + sa(ln1(x)) ----------------
    xn = _layernorm(x, ln1_g, ln1_b)
    xn_bf = xn.astype(jnp.bfloat16)

    # Fused QKV: one big-M, N=3C matmul (scale already folded into Q columns).
    qkv = jnp.dot(xn_bf, wqkv_ref[...], preferred_element_type=jnp.float32)   # (M, 3C)
    qkv_bf = qkv.astype(jnp.bfloat16)
    q3 = qkv_bf[:, 0 * C:1 * C].reshape(bb, seq, C)
    k3 = qkv_bf[:, 1 * C:2 * C].reshape(bb, seq, C)
    v3 = qkv_bf[:, 2 * C:3 * C].reshape(bb, seq, C)

    row = jax.lax.broadcasted_iota(jnp.int32, (seq, seq), 0)
    col = jax.lax.broadcasted_iota(jnp.int32, (seq, seq), 1)
    causal = (col <= row)[None, :, :]           # (1, T, T) -> broadcasts over bb

    head_outs = []
    for h in range(N_HEAD):                     # static unroll over 4 heads
        lo, hi = h * hs, (h + 1) * hs
        qh, kh, vh = q3[:, :, lo:hi], k3[:, :, lo:hi], v3[:, :, lo:hi]
        wei = jnp.einsum("btd,bsd->bts", qh, kh,
                         preferred_element_type=jnp.float32)            # (bb, T, T)
        wei = jnp.where(causal, wei, -1e30)     # finite mask value: NaN-safe
        wei = wei - jnp.max(wei, axis=-1, keepdims=True)
        e = jnp.exp(wei)
        p = e * pl.reciprocal(jnp.sum(e, axis=-1, keepdims=True), approx=True)
        head_outs.append(jnp.einsum("bts,bsd->btd", p.astype(jnp.bfloat16), vh,
                                    preferred_element_type=jnp.float32))  # (bb,T,hs)

    # Lane-dim concat of head outputs, then ONE (M,C)x(C,C) projection matmul.
    att = jnp.concatenate(head_outs, axis=-1).reshape(M, C).astype(jnp.bfloat16)
    sa = jnp.dot(att, wproj_ref[...], preferred_element_type=jnp.float32)
    x1 = x + sa + bproj

    # ---------------- x1 + ffwd(ln2(x1)) ----------------
    xn2 = _layernorm(x1, ln2_g, ln2_b).astype(jnp.bfloat16)
    h1 = jnp.dot(xn2, w1_ref[...], preferred_element_type=jnp.float32) + b1_ref[0]
    h1 = jnp.maximum(h1, 0.0).astype(jnp.bfloat16)
    ff = jnp.dot(h1, w2_ref[...], preferred_element_type=jnp.float32) + b2
    # nn.Dropout(0.2) is identity in eval mode (inference semantics).
    o_ref[...] = (x1 + ff).astype(o_ref.dtype)


def _choose_bb(batch, seq, target):
    """Sequences per grid step: multiple of `align` so bb*seq is sublane aligned."""
    align = 8 // math.gcd(seq, 8)
    bb = max(1, min(target, batch))
    bb = max(align, (bb // align) * align)
    return bb


def block_forward(x, params, *, block_batch=512):
    B, T, C = x.shape
    assert C == N_EMB and T <= CONTEXT

    bb = _choose_bb(B, T, block_batch)
    b_pad = pl.cdiv(B, bb) * bb                 # pad ragged batches with whole seqs
    M = bb * T
    assert M % 8 == 0, "block rows must be sublane aligned"

    scale = jnp.float32(C) ** -0.5              # PyTorch code scales by n_embeddings**-0.5
    # Host-side weight prep: fuse QKV (scale folded into Q cols), bf16 matmul weights.
    wqkv = jnp.concatenate([params["wq"] * scale, params["wk"], params["wv"]],
                           axis=1).astype(jnp.bfloat16)                  # (C, 3C)
    wproj = params["wproj"].astype(jnp.bfloat16)                          # (C, C)
    w1 = params["w1"].astype(jnp.bfloat16)                                # (C, 4C)
    w2 = params["w2"].astype(jnp.bfloat16)                                # (4C, C)
    # Pack all (1, C) vector params into one (8, C) f32 slab.
    vecs = jnp.concatenate(
        [params["ln1_g"], params["ln1_b"], params["ln2_g"], params["ln2_b"],
         params["bproj"], params["b2"], jnp.zeros((2, C), jnp.float32)], axis=0)
    b1 = params["b1"]                                                     # (1, 4C)

    param_arrays = [vecs, wqkv, wproj, w1, b1, w2]

    def full_spec(a):
        return pl.BlockSpec(a.shape, lambda i: (0, 0))

    # Present activations as a 2-D lane/sublane-dense (B_pad*T, C) slab.
    x2 = x.reshape(B * T, C)
    if b_pad != B:
        x2 = jnp.pad(x2, ((0, (b_pad - B) * T), (0, 0)))

    in_specs = [pl.BlockSpec((M, C), lambda i: (i, 0))]
    in_specs += [full_spec(a) for a in param_arrays]

    out2 = pl.pallas_call(
        functools.partial(block_kernel, bb=bb, seq=T),
        out_shape=jax.ShapeDtypeStruct((b_pad * T, C), x.dtype),
        grid_spec=pltpu.PrefetchScalarGridSpec(
            num_scalar_prefetch=0,
            grid=(b_pad // bb,),
            in_specs=in_specs,
            out_specs=pl.BlockSpec((M, C), lambda i: (i, 0)),
        ),
        compiler_params=pltpu.CompilerParams(
            dimension_semantics=("parallel",),
            vmem_limit_bytes=48 * 1024 * 1024),
    )(x2, *param_arrays)
    return out2[:B * T].reshape(B, T, C)


def make_params(key):
    """Deterministic synthetic init. Weights stored as (in, out); 1-D params as (1, n)."""
    ks = jax.random.split(key, 8)
    w = lambda k, i, o: (jax.random.normal(k, (i, o), jnp.float32) * 0.02)
    C = N_EMB
    return {
        "ln1_g": jnp.ones((1, C), jnp.float32),
        "ln1_b": jnp.zeros((1, C), jnp.float32),
        # per-head K/Q/V (no bias) packed along output dim: (C, n_head*head_size) = (C, C)
        "wq": w(ks[0], C, C),
        "wk": w(ks[1], C, C),
        "wv": w(ks[2], C, C),
        "wproj": w(ks[3], C, C),
        "bproj": jnp.zeros((1, C), jnp.float32),
        "ln2_g": jnp.ones((1, C), jnp.float32),
        "ln2_b": jnp.zeros((1, C), jnp.float32),
        "w1": w(ks[4], C, 4 * C),
        "b1": jnp.zeros((1, 4 * C), jnp.float32),
        "w2": w(ks[5], 4 * C, C),
        "b2": jnp.zeros((1, C), jnp.float32),
    }


def ref_forward(x, p):
    """Pure-JAX f32 reference matching the PyTorch Block forward (dropout in eval)."""
    def ln(v, g, b):
        mu = v.mean(-1, keepdims=True)
        var = ((v - mu) ** 2).mean(-1, keepdims=True)
        return (v - mu) / jnp.sqrt(var + LN_EPS) * g[0] + b[0]

    B, T, C = x.shape
    hs = C // N_HEAD
    xn = ln(x, p["ln1_g"], p["ln1_b"])
    q, k, v = xn @ p["wq"], xn @ p["wk"], xn @ p["wv"]
    mask = jnp.tril(jnp.ones((T, T), bool))
    outs = []
    for h in range(N_HEAD):
        lo, hi = h * hs, (h + 1) * hs
        wei = jnp.einsum("btd,bsd->bts", q[..., lo:hi], k[..., lo:hi]) * C ** (-0.5)
        wei = jnp.where(mask, wei, -jnp.inf)
        wei = jax.nn.softmax(wei, axis=-1)
        outs.append(jnp.einsum("bts,bsd->btd", wei, v[..., lo:hi]))
    sa = jnp.concatenate(outs, -1) @ p["wproj"] + p["bproj"][0]
    x1 = x + sa
    xn2 = ln(x1, p["ln2_g"], p["ln2_b"])
    ff = jnp.maximum(xn2 @ p["w1"] + p["b1"][0], 0.0) @ p["w2"] + p["b2"][0]
    return x1 + ff


if __name__ == "__main__":
    key = jax.random.PRNGKey(0)
    kx, kp = jax.random.split(key)
    B, T, C = 128, CONTEXT, N_EMB
    x = jax.random.normal(kx, (B, T, C), jnp.float32)
    params = make_params(kp)

    # Main demo: 32 sequences per block -> grid of 4 parallel steps (keeps both
    # v7x TensorCores busy with 2 pipelined steps each); real workloads use the
    # larger default block_batch.
    out = jax.block_until_ready(block_forward(x, params, block_batch=32))
    ref = ref_forward(x, params)
    assert out.shape == (B, T, C)
    # Tolerance accounts for intentional bf16 MXU operands (f32 accumulation)
    # and the approx softmax reciprocal; math is otherwise identical to the ref.
    assert jnp.allclose(out, ref, rtol=3e-2, atol=3e-2), \
        f"max abs diff {jnp.max(jnp.abs(out - ref))}"

    # Ragged batch exercises the zero-padding path (B=13 not divisible by bb=8).
    xb = x[:13]
    out_r = jax.block_until_ready(block_forward(xb, params, block_batch=8))
    ref_r = ref_forward(xb, params)
    assert jnp.allclose(out_r, ref_r, rtol=3e-2, atol=3e-2), \
        f"ragged max abs diff {jnp.max(jnp.abs(out_r - ref_r))}"

    print("KERNEL_OK")
</pallas_src>

<mosaic_0001>
module attributes {stable_mosaic.version = 11 : i64} {
  func.func @block_kernel(%arg0: i32, %arg1: memref<256x32xf32, #tpu.memory_space<vmem>>, %arg2: memref<8x32xf32, #tpu.memory_space<vmem>>, %arg3: memref<32x96xbf16, #tpu.memory_space<vmem>>, %arg4: memref<32x32xbf16, #tpu.memory_space<vmem>>, %arg5: memref<32x128xbf16, #tpu.memory_space<vmem>>, %arg6: memref<1x128xf32, #tpu.memory_space<vmem>>, %arg7: memref<128x32xbf16, #tpu.memory_space<vmem>>, %arg8: memref<256x32xf32, #tpu.memory_space<vmem>>) attributes {dimension_semantics = [#tpu.dimension_semantics<parallel>], iteration_bounds = array<i64: 4>, scalar_prefetch = 0 : i64, scratch_operands = 0 : i64, tpu.core_type = #tpu.core_type<tc>, window_params = [{transform_indices = @transform_0, window_bounds = array<i64: 256, 32>}, {pipeline_mode = #tpu.pipeline_mode<synchronous>, transform_indices = @transform_1, window_bounds = array<i64: 8, 32>}, {pipeline_mode = #tpu.pipeline_mode<synchronous>, transform_indices = @transform_2, window_bounds = array<i64: 32, 96>}, {pipeline_mode = #tpu.pipeline_mode<synchronous>, transform_indices = @transform_3, window_bounds = array<i64: 32, 32>}, {pipeline_mode = #tpu.pipeline_mode<synchronous>, transform_indices = @transform_4, window_bounds = array<i64: 32, 128>}, {pipeline_mode = #tpu.pipeline_mode<synchronous>, transform_indices = @transform_5, window_bounds = array<i64: 1, 128>}, {pipeline_mode = #tpu.pipeline_mode<synchronous>, transform_indices = @transform_6, window_bounds = array<i64: 128, 32>}, {transform_indices = @transform_7, window_bounds = array<i64: 256, 32>}]} {
    %c0 = arith.constant 0 : index
    %c0_0 = arith.constant 0 : index
    %0 = vector.load %arg1[%c0, %c0_0] : memref<256x32xf32, #tpu.memory_space<vmem>>, vector<256x32xf32>
    %c0_1 = arith.constant 0 : index
    %c0_2 = arith.constant 0 : index
    %1 = vector.load %arg2[%c0_1, %c0_2] : memref<8x32xf32, #tpu.memory_space<vmem>>, vector<1x32xf32>
    %2 = vector.shape_cast %1 : vector<1x32xf32> to vector<32xf32>
    %c1 = arith.constant 1 : index
    %c0_3 = arith.constant 0 : index
    %3 = vector.load %arg2[%c1, %c0_3] : memref<8x32xf32, #tpu.memory_space<vmem>>, vector<1x32xf32>
    %4 = vector.shape_cast %3 : vector<1x32xf32> to vector<32xf32>
    %c2 = arith.constant 2 : index
    %c0_4 = arith.constant 0 : index
    %5 = vector.load %arg2[%c2, %c0_4] : memref<8x32xf32, #tpu.memory_space<vmem>>, vector<1x32xf32>
    %6 = vector.shape_cast %5 : vector<1x32xf32> to vector<32xf32>
    %c3 = arith.constant 3 : index
    %c0_5 = arith.constant 0 : index
    %7 = vector.load %arg2[%c3, %c0_5] : memref<8x32xf32, #tpu.memory_space<vmem>>, vector<1x32xf32>
    %8 = vector.shape_cast %7 : vector<1x32xf32> to vector<32xf32>
    %c4 = arith.constant 4 : index
    %c0_6 = arith.constant 0 : index
    %9 = vector.load %arg2[%c4, %c0_6] : memref<8x32xf32, #tpu.memory_space<vmem>>, vector<1x32xf32>
    %10 = vector.shape_cast %9 : vector<1x32xf32> to vector<32xf32>
    %c5 = arith.constant 5 : index
    %c0_7 = arith.constant 0 : index
    %11 = vector.load %arg2[%c5, %c0_7] : memref<8x32xf32, #tpu.memory_space<vmem>>, vector<1x32xf32>
    %12 = vector.shape_cast %11 : vector<1x32xf32> to vector<32xf32>
    %cst = arith.constant dense<0.000000e+00> : vector<256xf32>
    %13 = vector.multi_reduction <add>, %0, %cst [1] : vector<256x32xf32> to vector<256xf32>
    %14 = vector.shape_cast %13 : vector<256xf32> to vector<256x1xf32>
    %cst_8 = arith.constant 3.200000e+01 : f32
    %15 = vector.broadcast %cst_8 : f32 to vector<256x1xf32>
    %16 = arith.divf %14, %15 : vector<256x1xf32>
    %17 = vector.broadcast %16 : vector<256x1xf32> to vector<256x32xf32>
    %18 = arith.subf %0, %17 : vector<256x32xf32>
    %19 = arith.mulf %18, %18 : vector<256x32xf32>
    %cst_9 = arith.constant dense<0.000000e+00> : vector<256xf32>
    %20 = vector.multi_reduction <add>, %19, %cst_9 [1] : vector<256x32xf32> to vector<256xf32>
    %21 = vector.shape_cast %20 : vector<256xf32> to vector<256x1xf32>
    %cst_10 = arith.constant 3.200000e+01 : f32
    %22 = vector.broadcast %cst_10 : f32 to vector<256x1xf32>
    %23 = arith.divf %21, %22 : vector<256x1xf32>
    %24 = vector.broadcast %16 : vector<256x1xf32> to vector<256x32xf32>
    %25 = arith.subf %0, %24 : vector<256x32xf32>
    %cst_11 = arith.constant 9.99999974E-6 : f32
    %26 = vector.broadcast %cst_11 : f32 to vector<256x1xf32>
    %27 = arith.addf %23, %26 : vector<256x1xf32>
    %28 = math.rsqrt %27 : vector<256x1xf32>
    %29 = vector.broadcast %28 : vector<256x1xf32> to vector<256x32xf32>
    %30 = arith.mulf %25, %29 : vector<256x32xf32>
    %31 = vector.shape_cast %2 : vector<32xf32> to vector<1x32xf32>
    %32 = vector.broadcast %31 : vector<1x32xf32> to vector<256x32xf32>
    %33 = arith.mulf %30, %32 : vector<256x32xf32>
    %34 = vector.shape_cast %4 : vector<32xf32> to vector<1x32xf32>
    %35 = vector.broadcast %34 : vector<1x32xf32> to vector<256x32xf32>
    %36 = arith.addf %33, %35 : vector<256x32xf32>
    %37 = arith.truncf %36 : vector<256x32xf32> to vector<256x32xbf16>
    %c0_12 = arith.constant 0 : index
    %c0_13 = arith.constant 0 : index
    %38 = vector.load %arg3[%c0_12, %c0_13] : memref<32x96xbf16, #tpu.memory_space<vmem>>, vector<32x96xbf16>
    %cst_14 = arith.constant dense<0.000000e+00> : vector<256x96xf32>
    %39 = tpu.matmul %37, %38, %cst_14 {dimension_numbers = #tpu.dot_dimension_numbers<[1], [0], [0], [1], [0, 0, 1, 1], [], []>} : vector<256x32xbf16>, vector<32x96xbf16>, vector<256x96xf32> -> vector<256x96xf32>
    %40 = arith.truncf %39 : vector<256x96xf32> to vector<256x96xbf16>
    %41 = vector.extract_strided_slice %40 {offsets = [0, 0], sizes = [256, 32], strides = [1, 1]} : vector<256x96xbf16> to vector<256x32xbf16>
    %42 = vector.shape_cast %41 : vector<256x32xbf16> to vector<32x8x32xbf16>
    %43 = vector.extract_strided_slice %40 {offsets = [0, 32], sizes = [256, 32], strides = [1, 1]} : vector<256x96xbf16> to vector<256x32xbf16>
    %44 = vector.shape_cast %43 : vector<256x32xbf16> to vector<32x8x32xbf16>
    %45 = vector.extract_strided_slice %40 {offsets = [0, 64], sizes = [256, 32], strides = [1, 1]} : vector<256x96xbf16> to vector<256x32xbf16>
    %46 = vector.shape_cast %45 : vector<256x32xbf16> to vector<32x8x32xbf16>
    %47 = tpu.iota {dimensions = array<i32: 0>} : vector<8x8xi32>
    %48 = tpu.iota {dimensions = array<i32: 1>} : vector<8x8xi32>
    %49 = arith.cmpi sle, %48, %47 : vector<8x8xi32>
    %50 = vector.shape_cast %49 : vector<8x8xi1> to vector<1x8x8xi1>
    %51 = vector.extract_strided_slice %42 {offsets = [0, 0, 0], sizes = [32, 8, 8], strides = [1, 1, 1]} : vector<32x8x32xbf16> to vector<32x8x8xbf16>
    %52 = vector.extract_strided_slice %44 {offsets = [0, 0, 0], sizes = [32, 8, 8], strides = [1, 1, 1]} : vector<32x8x32xbf16> to vector<32x8x8xbf16>
    %53 = vector.extract_strided_slice %46 {offsets = [0, 0, 0], sizes = [32, 8, 8], strides = [1, 1, 1]} : vector<32x8x32xbf16> to vector<32x8x8xbf16>
    "tpu.trace_start"() <{level = 10 : i32, message = "btd,bsd->bts"}> : () -> ()
    %cst_15 = arith.constant dense<0.000000e+00> : vector<32x8x8xf32>
    %54 = tpu.matmul %51, %52, %cst_15 {dimension_numbers = #tpu.dot_dimension_numbers<[2], [2], [1], [1], [0, 0, 0, 1, 1, 1], [0], [0]>} : vector<32x8x8xbf16>, vector<32x8x8xbf16>, vector<32x8x8xf32> -> vector<32x8x8xf32>
    %cst_16 = arith.constant -1.000000e+30 : f32
    "tpu.trace_stop"() : () -> ()
    %55 = vector.shape_cast %50 : vector<1x8x8xi1> to vector<1x8x8xi1>
    %56 = vector.broadcast %55 : vector<1x8x8xi1> to vector<32x8x8xi1>
    %57 = vector.broadcast %cst_16 : f32 to vector<32x8x8xf32>
    %58 = arith.select %56, %54, %57 : vector<32x8x8xi1>, vector<32x8x8xf32>
    %cst_17 = arith.constant dense<0xFF800000> : vector<32x8xf32>
    %59 = vector.multi_reduction <maximumf>, %58, %cst_17 [2] : vector<32x8x8xf32> to vector<32x8xf32>
    %60 = vector.shape_cast %59 : vector<32x8xf32> to vector<32x8x1xf32>
    %61 = vector.broadcast %60 : vector<32x8x1xf32> to vector<32x8x8xf32>
    %62 = arith.subf %58, %61 : vector<32x8x8xf32>
    %63 = math.exp %62 : vector<32x8x8xf32>
    %cst_18 = arith.constant dense<0.000000e+00> : vector<32x8xf32>
    %64 = vector.multi_reduction <add>, %63, %cst_18 [2] : vector<32x8x8xf32> to vector<32x8xf32>
    %65 = vector.shape_cast %64 : vector<32x8xf32> to vector<32x8x1xf32>
    %66 = tpu.reciprocal %65 {approx = true} : vector<32x8x1xf32> -> vector<32x8x1xf32>
    %67 = vector.broadcast %66 : vector<32x8x1xf32> to vector<32x8x8xf32>
    %68 = arith.mulf %63, %67 : vector<32x8x8xf32>
    %69 = arith.truncf %68 : vector<32x8x8xf32> to vector<32x8x8xbf16>
    "tpu.trace_start"() <{level = 10 : i32, message = "bts,bsd->btd"}> : () -> ()
    %cst_19 = arith.constant dense<0.000000e+00> : vector<32x8x8xf32>
    %70 = tpu.matmul %69, %53, %cst_19 {dimension_numbers = #tpu.dot_dimension_numbers<[2], [1], [1], [2], [0, 0, 0, 1, 1, 2], [0], [0]>} : vector<32x8x8xbf16>, vector<32x8x8xbf16>, vector<32x8x8xf32> -> vector<32x8x8xf32>
    "tpu.trace_stop"() : () -> ()
    %71 = vector.extract_strided_slice %42 {offsets = [0, 0, 8], sizes = [32, 8, 8], strides = [1, 1, 1]} : vector<32x8x32xbf16> to vector<32x8x8xbf16>
    %72 = vector.extract_strided_slice %44 {offsets = [0, 0, 8], sizes = [32, 8, 8], strides = [1, 1, 1]} : vector<32x8x32xbf16> to vector<32x8x8xbf16>
    %73 = vector.extract_strided_slice %46 {offsets = [0, 0, 8], sizes = [32, 8, 8], strides = [1, 1, 1]} : vector<32x8x32xbf16> to vector<32x8x8xbf16>
    "tpu.trace_start"() <{level = 10 : i32, message = "btd,bsd->bts"}> : () -> ()
    %cst_20 = arith.constant dense<0.000000e+00> : vector<32x8x8xf32>
    %74 = tpu.matmul %71, %72, %cst_20 {dimension_numbers = #tpu.dot_dimension_numbers<[2], [2], [1], [1], [0, 0, 0, 1, 1, 1], [0], [0]>} : vector<32x8x8xbf16>, vector<32x8x8xbf16>, vector<32x8x8xf32> -> vector<32x8x8xf32>
    %cst_21 = arith.constant -1.000000e+30 : f32
    "tpu.trace_stop"() : () -> ()
    %75 = vector.shape_cast %50 : vector<1x8x8xi1> to vector<1x8x8xi1>
    %76 = vector.broadcast %75 : vector<1x8x8xi1> to vector<32x8x8xi1>
    %77 = vector.broadcast %cst_21 : f32 to vector<32x8x8xf32>
    %78 = arith.select %76, %74, %77 : vector<32x8x8xi1>, vector<32x8x8xf32>
    %cst_22 = arith.constant dense<0xFF800000> : vector<32x8xf32>
    %79 = vector.multi_reduction <maximumf>, %78, %cst_22 [2] : vector<32x8x8xf32> to vector<32x8xf32>
    %80 = vector.shape_cast %79 : vector<32x8xf32> to vector<32x8x1xf32>
    %81 = vector.broadcast %80 : vector<32x8x1xf32> to vector<32x8x8xf32>
    %82 = arith.subf %78, %81 : vector<32x8x8xf32>
    %83 = math.exp %82 : vector<32x8x8xf32>
    %cst_23 = arith.constant dense<0.000000e+00> : vector<32x8xf32>
    %84 = vector.multi_reduction <add>, %83, %cst_23 [2] : vector<32x8x8xf32> to vector<32x8xf32>
    %85 = vector.shape_cast %84 : vector<32x8xf32> to vector<32x8x1xf32>
    %86 = tpu.reciprocal %85 {approx = true} : vector<32x8x1xf32> -> vector<32x8x1xf32>
    %87 = vector.broadcast %86 : vector<32x8x1xf32> to vector<32x8x8xf32>
    %88 = arith.mulf %83, %87 : vector<32x8x8xf32>
    %89 = arith.truncf %88 : vector<32x8x8xf32> to vector<32x8x8xbf16>
    "tpu.trace_start"() <{level = 10 : i32, message = "bts,bsd->btd"}> : () -> ()
    %cst_24 = arith.constant dense<0.000000e+00> : vector<32x8x8xf32>
    %90 = tpu.matmul %89, %73, %cst_24 {dimension_numbers = #tpu.dot_dimension_numbers<[2], [1], [1], [2], [0, 0, 0, 1, 1, 2], [0], [0]>} : vector<32x8x8xbf16>, vector<32x8x8xbf16>, vector<32x8x8xf32> -> vector<32x8x8xf32>
    "tpu.trace_stop"() : () -> ()
    %91 = vector.extract_strided_slice %42 {offsets = [0, 0, 16], sizes = [32, 8, 8], strides = [1, 1, 1]} : vector<32x8x32xbf16> to vector<32x8x8xbf16>
    %92 = vector.extract_strided_slice %44 {offsets = [0, 0, 16], sizes = [32, 8, 8], strides = [1, 1, 1]} : vector<32x8x32xbf16> to vector<32x8x8xbf16>
    %93 = vector.extract_strided_slice %46 {offsets = [0, 0, 16], sizes = [32, 8, 8], strides = [1, 1, 1]} : vector<32x8x32xbf16> to vector<32x8x8xbf16>
    "tpu.trace_start"() <{level = 10 : i32, message = "btd,bsd->bts"}> : () -> ()
    %cst_25 = arith.constant dense<0.000000e+00> : vector<32x8x8xf32>
    %94 = tpu.matmul %91, %92, %cst_25 {dimension_numbers = #tpu.dot_dimension_numbers<[2], [2], [1], [1], [0, 0, 0, 1, 1, 1], [0], [0]>} : vector<32x8x8xbf16>, vector<32x8x8xbf16>, vector<32x8x8xf32> -> vector<32x8x8xf32>
    %cst_26 = arith.constant -1.000000e+30 : f32
    "tpu.trace_stop"() : () -> ()
    %95 = vector.shape_cast %50 : vector<1x8x8xi1> to vector<1x8x8xi1>
    %96 = vector.broadcast %95 : vector<1x8x8xi1> to vector<32x8x8xi1>
    %97 = vector.broadcast %cst_26 : f32 to vector<32x8x8xf32>
    %98 = arith.select %96, %94, %97 : vector<32x8x8xi1>, vector<32x8x8xf32>
    %cst_27 = arith.constant dense<0xFF800000> : vector<32x8xf32>
    %99 = vector.multi_reduction <maximumf>, %98, %cst_27 [2] : vector<32x8x8xf32> to vector<32x8xf32>
    %100 = vector.shape_cast %99 : vector<32x8xf32> to vector<32x8x1xf32>
    %101 = vector.broadcast %100 : vector<32x8x1xf32> to vector<32x8x8xf32>
    %102 = arith.subf %98, %101 : vector<32x8x8xf32>
    %103 = math.exp %102 : vector<32x8x8xf32>
    %cst_28 = arith.constant dense<0.000000e+00> : vector<32x8xf32>
    %104 = vector.multi_reduction <add>, %103, %cst_28 [2] : vector<32x8x8xf32> to vector<32x8xf32>
    %105 = vector.shape_cast %104 : vector<32x8xf32> to vector<32x8x1xf32>
    %106 = tpu.reciprocal %105 {approx = true} : vector<32x8x1xf32> -> vector<32x8x1xf32>
    %107 = vector.broadcast %106 : vector<32x8x1xf32> to vector<32x8x8xf32>
    %108 = arith.mulf %103, %107 : vector<32x8x8xf32>
    %109 = arith.truncf %108 : vector<32x8x8xf32> to vector<32x8x8xbf16>
    "tpu.trace_start"() <{level = 10 : i32, message = "bts,bsd->btd"}> : () -> ()
    %cst_29 = arith.constant dense<0.000000e+00> : vector<32x8x8xf32>
    %110 = tpu.matmul %109, %93, %cst_29 {dimension_numbers = #tpu.dot_dimension_numbers<[2], [1], [1], [2], [0, 0, 0, 1, 1, 2], [0], [0]>} : vector<32x8x8xbf16>, vector<32x8x8xbf16>, vector<32x8x8xf32> -> vector<32x8x8xf32>
    "tpu.trace_stop"() : () -> ()
    %111 = vector.extract_strided_slice %42 {offsets = [0, 0, 24], sizes = [32, 8, 8], strides = [1, 1, 1]} : vector<32x8x32xbf16> to vector<32x8x8xbf16>
    %112 = vector.extract_strided_slice %44 {offsets = [0, 0, 24], sizes = [32, 8, 8], strides = [1, 1, 1]} : vector<32x8x32xbf16> to vector<32x8x8xbf16>
    %113 = vector.extract_strided_slice %46 {offsets = [0, 0, 24], sizes = [32, 8, 8], strides = [1, 1, 1]} : vector<32x8x32xbf16> to vector<32x8x8xbf16>
    "tpu.trace_start"() <{level = 10 : i32, message = "btd,bsd->bts"}> : () -> ()
    %cst_30 = arith.constant dense<0.000000e+00> : vector<32x8x8xf32>
    %114 = tpu.matmul %111, %112, %cst_30 {dimension_numbers = #tpu.dot_dimension_numbers<[2], [2], [1], [1], [0, 0, 0, 1, 1, 1], [0], [0]>} : vector<32x8x8xbf16>, vector<32x8x8xbf16>, vector<32x8x8xf32> -> vector<32x8x8xf32>
    %cst_31 = arith.constant -1.000000e+30 : f32
    "tpu.trace_stop"() : () -> ()
    %115 = vector.shape_cast %50 : vector<1x8x8xi1> to vector<1x8x8xi1>
    %116 = vector.broadcast %115 : vector<1x8x8xi1> to vector<32x8x8xi1>
    %117 = vector.broadcast %cst_31 : f32 to vector<32x8x8xf32>
    %118 = arith.select %116, %114, %117 : vector<32x8x8xi1>, vector<32x8x8xf32>
    %cst_32 = arith.constant dense<0xFF800000> : vector<32x8xf32>
    %119 = vector.multi_reduction <maximumf>, %118, %cst_32 [2] : vector<32x8x8xf32> to vector<32x8xf32>
    %120 = vector.shape_cast %119 : vector<32x8xf32> to vector<32x8x1xf32>
    %121 = vector.broadcast %120 : vector<32x8x1xf32> to vector<32x8x8xf32>
    %122 = arith.subf %118, %121 : vector<32x8x8xf32>
    %123 = math.exp %122 : vector<32x8x8xf32>
    %cst_33 = arith.constant dense<0.000000e+00> : vector<32x8xf32>
    %124 = vector.multi_reduction <add>, %123, %cst_33 [2] : vector<32x8x8xf32> to vector<32x8xf32>
    %125 = vector.shape_cast %124 : vector<32x8xf32> to vector<32x8x1xf32>
    %126 = tpu.reciprocal %125 {approx = true} : vector<32x8x1xf32> -> vector<32x8x1xf32>
    %127 = vector.broadcast %126 : vector<32x8x1xf32> to vector<32x8x8xf32>
    %128 = arith.mulf %123, %127 : vector<32x8x8xf32>
    %129 = arith.truncf %128 : vector<32x8x8xf32> to vector<32x8x8xbf16>
    "tpu.trace_start"() <{level = 10 : i32, message = "bts,bsd->btd"}> : () -> ()
    %cst_34 = arith.constant dense<0.000000e+00> : vector<32x8x8xf32>
    %130 = tpu.matmul %129, %113, %cst_34 {dimension_numbers = #tpu.dot_dimension_numbers<[2], [1], [1], [2], [0, 0, 0, 1, 1, 2], [0], [0]>} : vector<32x8x8xbf16>, vector<32x8x8xbf16>, vector<32x8x8xf32> -> vector<32x8x8xf32>
    "tpu.trace_stop"() : () -> ()
    %131 = tpu.concatenate %70, %90, %110, %130 in 2 : vector<32x8x8xf32>, vector<32x8x8xf32>, vector<32x8x8xf32>, vector<32x8x8xf32> -> vector<32x8x32xf32>
    %132 = vector.shape_cast %131 : vector<32x8x32xf32> to vector<256x32xf32>
    %133 = arith.truncf %132 : vector<256x32xf32> to vector<256x32xbf16>
    %c0_35 = arith.constant 0 : index
    %c0_36 = arith.constant 0 : index
    %134 = vector.load %arg4[%c0_35, %c0_36] : memref<32x32xbf16, #tpu.memory_space<vmem>>, vector<32x32xbf16>
    %cst_37 = arith.constant dense<0.000000e+00> : vector<256x32xf32>
    %135 = tpu.matmul %133, %134, %cst_37 {dimension_numbers = #tpu.dot_dimension_numbers<[1], [0], [0], [1], [0, 0, 1, 1], [], []>} : vector<256x32xbf16>, vector<32x32xbf16>, vector<256x32xf32> -> vector<256x32xf32>
    %136 = arith.addf %0, %135 : vector<256x32xf32>
    %137 = vector.shape_cast %10 : vector<32xf32> to vector<1x32xf32>
    %138 = vector.broadcast %137 : vector<1x32xf32> to vector<256x32xf32>
    %139 = arith.addf %136, %138 : vector<256x32xf32>
    %cst_38 = arith.constant dense<0.000000e+00> : vector<256xf32>
    %140 = vector.multi_reduction <add>, %139, %cst_38 [1] : vector<256x32xf32> to vector<256xf32>
    %141 = vector.shape_cast %140 : vector<256xf32> to vector<256x1xf32>
    %cst_39 = arith.constant 3.200000e+01 : f32
    %142 = vector.broadcast %cst_39 : f32 to vector<256x1xf32>
    %143 = arith.divf %141, %142 : vector<256x1xf32>
    %144 = vector.broadcast %143 : vector<256x1xf32> to vector<256x32xf32>
    %145 = arith.subf %139, %144 : vector<256x32xf32>
    %146 = arith.mulf %145, %145 : vector<256x32xf32>
    %cst_40 = arith.constant dense<0.000000e+00> : vector<256xf32>
    %147 = vector.multi_reduction <add>, %146, %cst_40 [1] : vector<256x32xf32> to vector<256xf32>
    %148 = vector.shape_cast %147 : vector<256xf32> to vector<256x1xf32>
    %cst_41 = arith.constant 3.200000e+01 : f32
    %149 = vector.broadcast %cst_41 : f32 to vector<256x1xf32>
    %150 = arith.divf %148, %149 : vector<256x1xf32>
    %151 = vector.broadcast %143 : vector<256x1xf32> to vector<256x32xf32>
    %152 = arith.subf %139, %151 : vector<256x32xf32>
    %cst_42 = arith.constant 9.99999974E-6 : f32
    %153 = vector.broadcast %cst_42 : f32 to vector<256x1xf32>
    %154 = arith.addf %150, %153 : vector<256x1xf32>
    %155 = math.rsqrt %154 : vector<256x1xf32>
    %156 = vector.broadcast %155 : vector<256x1xf32> to vector<256x32xf32>
    %157 = arith.mulf %152, %156 : vector<256x32xf32>
    %158 = vector.shape_cast %6 : vector<32xf32> to vector<1x32xf32>
    %159 = vector.broadcast %158 : vector<1x32xf32> to vector<256x32xf32>
    %160 = arith.mulf %157, %159 : vector<256x32xf32>
    %161 = vector.shape_cast %8 : vector<32xf32> to vector<1x32xf32>
    %162 = vector.broadcast %161 : vector<1x32xf32> to vector<256x32xf32>
    %163 = arith.addf %160, %162 : vector<256x32xf32>
    %164 = arith.truncf %163 : vector<256x32xf32> to vector<256x32xbf16>
    %c0_43 = arith.constant 0 : index
    %c0_44 = arith.constant 0 : index
    %165 = vector.load %arg5[%c0_43, %c0_44] : memref<32x128xbf16, #tpu.memory_space<vmem>>, vector<32x128xbf16>
    %cst_45 = arith.constant dense<0.000000e+00> : vector<256x128xf32>
    %166 = tpu.matmul %164, %165, %cst_45 {dimension_numbers = #tpu.dot_dimension_numbers<[1], [0], [0], [1], [0, 0, 1, 1], [], []>} : vector<256x32xbf16>, vector<32x128xbf16>, vector<256x128xf32> -> vector<256x128xf32>
    %c0_46 = arith.constant 0 : index
    %c0_47 = arith.constant 0 : index
    %167 = vector.load %arg6[%c0_46, %c0_47] : memref<1x128xf32, #tpu.memory_space<vmem>>, vector<1x128xf32>
    %168 = vector.shape_cast %167 : vector<1x128xf32> to vector<128xf32>
    %169 = vector.shape_cast %168 : vector<128xf32> to vector<1x128xf32>
    %170 = vector.broadcast %169 : vector<1x128xf32> to vector<256x128xf32>
    %171 = arith.addf %166, %170 : vector<256x128xf32>
    %cst_48 = arith.constant 0.000000e+00 : f32
    %172 = vector.broadcast %cst_48 : f32 to vector<256x128xf32>
    %173 = arith.maximumf %171, %172 : vector<256x128xf32>
    %174 = arith.truncf %173 : vector<256x128xf32> to vector<256x128xbf16>
    %c0_49 = arith.constant 0 : index
    %c0_50 = arith.constant 0 : index
    %175 = vector.load %arg7[%c0_49, %c0_50] : memref<128x32xbf16, #tpu.memory_space<vmem>>, vector<128x32xbf16>
    %cst_51 = arith.constant dense<0.000000e+00> : vector<256x32xf32>
    %176 = tpu.matmul %174, %175, %cst_51 {dimension_numbers = #tpu.dot_dimension_numbers<[1], [0], [0], [1], [0, 0, 1, 1], [], []>} : vector<256x128xbf16>, vector<128x32xbf16>, vector<256x32xf32> -> vector<256x32xf32>
    %177 = vector.shape_cast %12 : vector<32xf32> to vector<1x32xf32>
    %178 = vector.broadcast %177 : vector<1x32xf32> to vector<256x32xf32>
    %179 = arith.addf %176, %178 : vector<256x32xf32>
    %180 = arith.addf %139, %179 : vector<256x32xf32>
    %c0_52 = arith.constant 0 : index
    %c0_53 = arith.constant 0 : index
    %181 = vector.load %arg8[%c0_52, %c0_53] : memref<256x32xf32, #tpu.memory_space<vmem>>, vector<256x32xf32>
    tpu.vector_store %arg8[%c0_52, %c0_53], %180 {strides = array<i32>} : memref<256x32xf32, #tpu.memory_space<vmem>>, vector<256x32xf32>,
    return
  }
  func.func @transform_0(%arg0: i32) -> (i32, i32) {
    %c0_i32 = arith.constant 0 : i32
    %c0_i32_0 = arith.constant 0 : i32
    return %arg0, %c0_i32 : i32, i32
  }
  func.func @transform_1(%arg0: i32) -> (i32, i32) {
    %c0_i32 = arith.constant 0 : i32
    %c0_i32_0 = arith.constant 0 : i32
    %c0_i32_1 = arith.constant 0 : i32
    return %c0_i32, %c0_i32_0 : i32, i32
  }
  func.func @transform_2(%arg0: i32) -> (i32, i32) {
    %c0_i32 = arith.constant 0 : i32
    %c0_i32_0 = arith.constant 0 : i32
    %c0_i32_1 = arith.constant 0 : i32
    return %c0_i32, %c0_i32_0 : i32, i32
  }
  func.func @transform_3(%arg0: i32) -> (i32, i32) {
    %c0_i32 = arith.constant 0 : i32
    %c0_i32_0 = arith.constant 0 : i32
    %c0_i32_1 = arith.constant 0 : i32
    return %c0_i32, %c0_i32_0 : i32, i32
  }
  func.func @transform_4(%arg0: i32) -> (i32, i32) {
    %c0_i32 = arith.constant 0 : i32
    %c0_i32_0 = arith.constant 0 : i32
    %c0_i32_1 = arith.constant 0 : i32
    return %c0_i32, %c0_i32_0 : i32, i32
  }
  func.func @transform_5(%arg0: i32) -> (i32, i32) {
    %c0_i32 = arith.constant 0 : i32
    %c0_i32_0 = arith.constant 0 : i32
    %c0_i32_1 = arith.constant 0 : i32
    return %c0_i32, %c0_i32_0 : i32, i32
  }
  func.func @transform_6(%arg0: i32) -> (i32, i32) {
    %c0_i32 = arith.constant 0 : i32
    %c0_i32_0 = arith.constant 0 : i32
    %c0_i32_1 = arith.constant 0 : i32
    return %c0_i32, %c0_i32_0 : i32, i32
  }
  func.func @transform_7(%arg0: i32) -> (i32, i32) {
    %c0_i32 = arith.constant 0 : i32
    %c0_i32_0 = arith.constant 0 : i32
    return %arg0, %c0_i32 : i32, i32
  }
}

</mosaic_0001>

<bundles_post_ra>
// kernel: tpu_custom_call.1
= control target key start
LH: loop header
LB: loop body
LE: loop exit
PB: predicated region body
PF: predicated region fallthrough
CT: control target
= control target key end

     0   :  { %s12029_s24 = smov 0   ;;  %s18421_s0 = inlined_call_operand.vmem [shape: f32[1024,32], index: 0, kind: input, shape index: {}]   ;;  %s18422_s1 = inlined_call_operand.vmem [shape: f32[8,32], index: 1, kind: input, shape index: {}]   ;;  %s18423_s2 = inlined_call_operand.vmem [shape: bf16[32,96], index: 2, kind: input, shape index: {}]   ;;  %s18424_s3 = inlined_call_operand.vmem [shape: bf16[32,32], index: 3, kind: input, shape index: {}]   ;;  %s18425_s4 = inlined_call_operand.vmem [shape: bf16[32,128], index: 4, kind: input, shape index: {}]   ;;  %s18426_s5 = inlined_call_operand.vmem [shape: f32[1,128], index: 5, kind: input, shape index: {}]   ;;  %s18427_s6 = inlined_call_operand.vmem [shape: bf16[128,32], index: 6, kind: input, shape index: {}]   ;;  %s18428_s7 = inlined_call_operand.vmem [shape: f32[1024,32], index: 7, kind: output, shape index: {}]  }
   0x1 LB: > { %s10618_s25 = sadd.s32 4294967295, %s11972_s24   ;;  %p10622_p0 = scmp.ge.s32.totalorder %s11972_s24, 1  ;;  %s11972_s24 = sphi %s12029_s24, %s17_s24  }
   0x2   : > { %p238_p1 = scmp.lt.s32.totalorder %s11972_s24, 5 }
   0x4   : > { %p239_p2 = pnand %p10622_p0, %p238_p1 }
   0x6   : > { %242 = sbr.rel (%p239_p2) target bundleno = 5161 (0x1429), region = 48 }
   0xb   : > { %s10623_s26 = sshll.u32 %s10618_s25, 5  ;;  %vm321_vm0 = vcmask 261120   ;;  %v11974_v60 = vmov 32.0   ;;  %s11975_s16 = smov 88  }
   0xc   : > { %p271_p3 = scmp.lt.s32.totalorder %s10623_s26, 127  ;;  %11285 = vrcp.f32 %v11974_v60  ;;  %s11976_s17 = smov 64  }
   0xd   : > { %s11977_s18 = smov 96   ;;  %s11978_s19 = smov 120  }
   0xe   : > { %s19186_s26 = smov (!%p271_p3, %s10623_s26), 127  ;;  %s11979_s25 = smov 56  }
   0xf   : > { %s10624_s27 = sshll.u32 %s19186_s26, 3  ;;  %s11980_s28 = smov 80  }
  0x10   : > { %s12045_s30 = scalar_lea.vmem %s18421_s0, %s10624_s27  ;;  %s11981_s29 = smov 112  }
  0x11   : > { %v12048_v0 = vld [vmem:[%s12045_s30 + $0x20] sm:$0xff]  ;;  %v12051_v1 = vld [vmem:[%s12045_s30 + $0x10] sm:$0xff]  ;;  %v12063_v6 = vld [vmem:[%s12045_s30 + $0x28] sm:$0xff]  ;;  %s11982_s8 = smov 48   ;;  %s11983_s9 = smov 72  }
  0x12   : > { %v12054_v2 = vld [vmem:[%s12045_s30] sm:$0xff]  ;;  %v334_v3 = vsel %vm321_vm0, %v12048_v0, 0.0  ;;  %v328_v4 = vsel %vm321_vm0, %v12051_v1, 0.0  ;;  %v12066_v7 = vld [vmem:[%s12045_s30 + $0x18] sm:$0xff]  ;;  %v12069_v8 = vld [vmem:[%s12045_s30 + $0x8] sm:$0xff]  ;;  %v337_v9 = vsel %vm321_vm0, %v12063_v6, 0.0  ;;  %v11286_v61 = vpop.eup %11285 }
  0x13   : > { %v322_v5 = vsel %vm321_vm0, %v12054_v2, 0.0  ;;  %335 = vadd.xlane.f32.xlu2 %v334_v3  ;;  %329 = vadd.xlane.f32.xlu1 %v328_v4  ;;  %v331_v10 = vsel %vm321_vm0, %v12066_v7, 0.0  ;;  %v325_v11 = vsel %vm321_vm0, %v12069_v8, 0.0  ;;  %v12078_v12 = vld [vmem:[%s12045_s30 + $0x30] sm:$0xff]  ;;  %v12081_v13 = vld [vmem:[%s12045_s30 + $0x48] sm:$0xff]  ;;  %v12084_v14 = vld [vmem:[%s12045_s30 + $0x38] sm:$0xff]  ;;  %vm423_vm1 = vweird.f32 %v11286_v61 }
  0x14   : > { %323 = vadd.xlane.f32.xlu0 %v322_v5  ;;  %v340_v15 = vsel %vm321_vm0, %v12078_v12, 0.0  ;;  %v349_v16 = vsel %vm321_vm0, %v12081_v13, 0.0  ;;  %v343_v17 = vsel %vm321_vm0, %v12084_v14, 0.0  ;;  %v12093_v18 = vld [vmem:[%s12045_s30 + $0x58] sm:$0xff]  ;;  %v12096_v19 = vld [vmem:[%s12045_s30 + $0x50] sm:$0xff]  ;;  %v12099_v20 = vld [vmem:[%s12045_s30 + $0x40] sm:$0xff] }
  0x15   : > { %v355_v21 = vsel %vm321_vm0, %v12093_v18, 0.0  ;;  %v352_v22 = vsel %vm321_vm0, %v12096_v19, 0.0  ;;  %v346_v23 = vsel %vm321_vm0, %v12099_v20, 0.0  ;;  %v12108_v24 = vld [vmem:[%s12045_s30 + $0x60] sm:$0xff]  ;;  %v12111_v25 = vld [vmem:[%s12045_s30 + $0x78] sm:$0xff]  ;;  %v12114_v26 = vld [vmem:[%s12045_s30 + $0x68] sm:$0xff] }
  0x16   : > { %v358_v27 = vsel %vm321_vm0, %v12108_v24, 0.0  ;;  %v367_v28 = vsel %vm321_vm0, %v12111_v25, 0.0  ;;  %v361_v29 = vsel %vm321_vm0, %v12114_v26, 0.0  ;;  %v12123_v30 = vld [vmem:[%s12045_s30 + $0x88] sm:$0xff]  ;;  %v12126_v31 = vld [vmem:[%s12045_s30 + $0x80] sm:$0xff]  ;;  %v12129_v32 = vld [vmem:[%s12045_s30 + $0x70] sm:$0xff] }
  0x17   : > { %v373_v33 = vsel %vm321_vm0, %v12123_v30, 0.0  ;;  %v370_v34 = vsel %vm321_vm0, %v12126_v31, 0.0  ;;  %v364_v35 = vsel %vm321_vm0, %v12129_v32, 0.0  ;;  %v12138_v36 = vld [vmem:[%s12045_s30 + $0xa8] sm:$0xff]  ;;  %v12141_v37 = vld [vmem:[%s12045_s30 + $0x90] sm:$0xff]  ;;  %v12144_v38 = vld [vmem:[%s12045_s30 + $0x98] sm:$0xff] }
  0x18   : > { %v385_v39 = vsel %vm321_vm0, %v12138_v36, 0.0  ;;  %v376_v40 = vsel %vm321_vm0, %v12141_v37, 0.0  ;;  %v379_v41 = vsel %vm321_vm0, %v12144_v38, 0.0  ;;  %v12153_v42 = vld [vmem:[%s12045_s30 + $0xb0] sm:$0xff]  ;;  %v12156_v43 = vld [vmem:[%s12045_s30 + $0xb8] sm:$0xff]  ;;  %v12159_v44 = vld [vmem:[%s12045_s30 + $0xa0] sm:$0xff] }
  0x19   : > { %v388_v45 = vsel %vm321_vm0, %v12153_v42, 0.0  ;;  %v391_v46 = vsel %vm321_vm0, %v12156_v43, 0.0  ;;  %v382_v47 = vsel %vm321_vm0, %v12159_v44, 0.0  ;;  %v12168_v48 = vld [vmem:[%s12045_s30 + $0xd8] sm:$0xff]  ;;  %v12171_v49 = vld [vmem:[%s12045_s30 + $0xc8] sm:$0xff]  ;;  %v12174_v50 = vld [vmem:[%s12045_s30 + $0xd0] sm:$0xff] }
  0x1a   : > { %v403_v51 = vsel %vm321_vm0, %v12168_v48, 0.0  ;;  %v397_v52 = vsel %vm321_vm0, %v12171_v49, 0.0  ;;  %v400_v53 = vsel %vm321_vm0, %v12174_v50, 0.0  ;;  %v12183_v54 = vld [vmem:[%s12045_s30 + $0xc0] sm:$0xff]  ;;  %v12193_v58 = vld [vmem:[%s12045_s30 + $0xe8] sm:$0xff]  ;;  %v419_v62 = vmul.f32 32.0, %v11286_v61 }
  0x1b   : > { %338 = vadd.xlane.f32.xlu2 %v337_v9  ;;  %332 = vadd.xlane.f32.xlu1 %v331_v10  ;;  %v12186_v55 = vld [vmem:[%s12045_s30 + $0xe0] sm:$0xff]  ;;  %v394_v56 = vsel %vm321_vm0, %v12183_v54, 0.0  ;;  %v409_v59 = vsel %vm321_vm0, %v12193_v58, 0.0  ;;  %s11984_s10 = smov 104   ;;  %s11985_s11 = smov 40  }
  0x1c   : > { %326 = vadd.xlane.f32.xlu0 %v325_v11  ;;  %v406_v57 = vsel %vm321_vm0, %v12186_v55, 0.0  ;;  %v420_v63 = vsub.f32 1.0, %v419_v62  ;;  %s11986_s12 = smov 8   ;;  %s11987_s13 = smov 24  }
  0x1d   : > { %s11988_s14 = smov 16  }
  0x1e   : > { %v421_v3 = vmul.f32 %v11286_v61, %v420_v63 }
  0x20   : > { %v422_v4 = vadd.f32 %v11286_v61, %v421_v3 }
  0x22   : > { %v12197_v5 = vsel %vm423_vm1, %v11286_v61, %v422_v4 }
  0x23   : > { %341 = vadd.xlane.f32.xlu2 %v340_v15  ;;  %350 = vadd.xlane.f32.xlu1 %v349_v16  ;;  %18607 = vst [vmem:[#allocation2_spill] sm:$0xff] %v12197_v5 }
  0x24   : > { %344 = vadd.xlane.f32.xlu0 %v343_v17 }
  0x2b   : > { %356 = vadd.xlane.f32.xlu2 %v355_v21  ;;  %353 = vadd.xlane.f32.xlu1 %v352_v22 }
  0x2c   : > { %347 = vadd.xlane.f32.xlu0 %v346_v23 }
  0x33   : > { %359 = vadd.xlane.f32.xlu2 %v358_v27  ;;  %368 = vadd.xlane.f32.xlu1 %v367_v28 }
  0x34   : > { %362 = vadd.xlane.f32.xlu0 %v361_v29 }
  0x3b   : > { %374 = vadd.xlane.f32.xlu2 %v373_v33  ;;  %371 = vadd.xlane.f32.xlu1 %v370_v34 }
  0x3c   : > { %365 = vadd.xlane.f32.xlu0 %v364_v35 }
  0x43   : > { %386 = vadd.xlane.f32.xlu1 %v385_v39  ;;  %377 = vadd.xlane.f32.xlu2 %v376_v40 }
  0x44   : > { %380 = vadd.xlane.f32.xlu0 %v379_v41 }
  0x4b   : > { %389 = vadd.xlane.f32.xlu1 %v388_v45  ;;  %392 = vadd.xlane.f32.xlu2 %v391_v46 }
  0x4c   : > { %383 = vadd.xlane.f32.xlu0 %v382_v47 }
  0x53   : > { %404 = vadd.xlane.f32.xlu1 %v403_v51  ;;  %398 = vadd.xlane.f32.xlu2 %v397_v52 }
  0x54   : > { %401 = vadd.xlane.f32.xlu0 %v400_v53 }
  0x5b   : > { %395 = vadd.xlane.f32.xlu1 %v394_v56 }
  0x5c   : > { %407 = vadd.xlane.f32.xlu0 %v406_v57 }
  0x63   : > { %410 = vadd.xlane.f32.xlu1 %v409_v59 }
  0x86   : > { %v336_v9 = vpop.xlane.xlu2 %335  ;;  %v330_v10 = vpop.xlane.xlu1 %329 }
  0x87   : > { %v324_v11 = vpop.xlane.xlu0 %323  ;;  %v429_v34 = vmul.f32 %v12197_v5, %v336_v9  ;;  %v427_v39 = vmul.f32 %v12197_v5, %v330_v10 }
  0x88   : > { %v425_v15 = vmul.f32 %v12197_v5, %v324_v11 }
  0x89   : > { %v12232_v51 = vsub.f32 %v12051_v1, %v427_v39 }
  0x8a   : > { %v12201_v16 = vsub.f32 %v12054_v2, %v425_v15 }
  0x8b   : > { %v491_v61 = vmul.f32 %v12232_v51, %v12232_v51 }
  0x8c   : > { %v489_v17 = vmul.f32 %v12201_v16, %v12201_v16 }
  0x8d   : > { %v527_v11 = vsel %vm321_vm0, %v491_v61, 0.0 }
  0x8e   : > { %v339_v21 = vpop.xlane.xlu2 %338  ;;  %v333_v22 = vpop.xlane.xlu1 %332  ;;  %v521_v23 = vsel %vm321_vm0, %v489_v17, 0.0 }
  0x8f   : > { %v430_v27 = vmul.f32 %v12197_v5, %v339_v21  ;;  %v428_v28 = vmul.f32 %v12197_v5, %v333_v22  ;;  %522 = vadd.xlane.f32.xlu0 %v521_v23  ;;  %v327_v29 = vpop.xlane.xlu0 %326 }
  0x90   : > { %v426_v33 = vmul.f32 %v12197_v5, %v327_v29 }
  0x91   : > { %v12211_v2 = vsub.f32 %v12063_v6, %v430_v27  ;;  %v12214_v35 = vsub.f32 %v12066_v7, %v428_v28  ;;  %v12227_v6 = vsub.f32 %v12048_v0, %v429_v34 }
  0x92   : > { %v12218_v40 = vsub.f32 %v12069_v8, %v426_v33 }
  0x93   : > { %v492_v41 = vmul.f32 %v12214_v35, %v12214_v35  ;;  %v494_v45 = vmul.f32 %v12211_v2, %v12211_v2  ;;  %v493_v1 = vmul.f32 %v12227_v6, %v12227_v6 }
  0x94   : > { %v490_v46 = vmul.f32 %v12218_v40, %v12218_v40 }
  0x95   : > { %v530_v7 = vsel %vm321_vm0, %v492_v41, 0.0  ;;  %v536_v47 = vsel %vm321_vm0, %v494_v45, 0.0  ;;  %v533_v4 = vsel %vm321_vm0, %v493_v1, 0.0 }
  0x96   : > { %v342_v8 = vpop.xlane.xlu2 %341  ;;  %531 = vadd.xlane.f32.xlu2 %v530_v7  ;;  %v351_v52 = vpop.xlane.xlu1 %350  ;;  %v524_v53 = vsel %vm321_vm0, %v490_v46, 0.0 }
  0x97   : > { %v431_v56 = vmul.f32 %v12197_v5, %v342_v8  ;;  %v434_v57 = vmul.f32 %v12197_v5, %v351_v52  ;;  %537 = vadd.xlane.f32.xlu0 %v536_v47  ;;  %525 = vadd.xlane.f32.xlu1 %v524_v53  ;;  %v345_v0 = vpop.xlane.xlu0 %344 }
  0x98   : > { %v432_v59 = vmul.f32 %v12197_v5, %v345_v0 }
  0x99   : > { %v12239_v60 = vsub.f32 %v12078_v12, %v431_v56  ;;  %v12246_v62 = vsub.f32 %v12081_v13, %v434_v57 }
  0x9a   : > { %v12251_v3 = vsub.f32 %v12084_v14, %v432_v59 }
  0x9b   : > { %v495_v63 = vmul.f32 %v12239_v60, %v12239_v60  ;;  %v498_v14 = vmul.f32 %v12246_v62, %v12246_v62 }
  0x9c   : > { %v496_v22 = vmul.f32 %v12251_v3, %v12251_v3 }
  0x9d   : > { %v539_v12 = vsel %vm321_vm0, %v495_v63, 0.0  ;;  %v548_v28 = vsel %vm321_vm0, %v498_v14, 0.0 }
  0x9e   : > { %v357_v9 = vpop.xlane.xlu2 %356  ;;  %534 = vadd.xlane.f32.xlu2 %v533_v4  ;;  %v354_v10 = vpop.xlane.xlu1 %353  ;;  %v542_v34 = vsel %vm321_vm0, %v496_v22, 0.0 }
  0x9f   : > { %v436_v15 = vmul.f32 %v12197_v5, %v357_v9  ;;  %v435_v13 = vmul.f32 %v12197_v5, %v354_v10  ;;  %540 = vadd.xlane.f32.xlu0 %v539_v12  ;;  %528 = vadd.xlane.f32.xlu1 %v527_v11  ;;  %v348_v17 = vpop.xlane.xlu0 %347 }
  0xa0   : > { %v433_v21 = vmul.f32 %v12197_v5, %v348_v17 }
  0xa1   : > { %v12264_v23 = vsub.f32 %v12093_v18, %v436_v15  ;;  %v12267_v27 = vsub.f32 %v12096_v19, %v435_v13 }
  0xa2   : > { %v12273_v33 = vsub.f32 %v12099_v20, %v433_v21 }
  0xa3   : > { %v500_v29 = vmul.f32 %v12264_v23, %v12264_v23  ;;  %v499_v7 = vmul.f32 %v12267_v27, %v12267_v27 }
  0xa4   : > { %v497_v47 = vmul.f32 %v12273_v33, %v12273_v33 }
  0xa5   : > { %v554_v39 = vsel %vm321_vm0, %v500_v29, 0.0  ;;  %v551_v53 = vsel %vm321_vm0, %v499_v7, 0.0 }
  0xa6   : > { %v360_v41 = vpop.xlane.xlu2 %359  ;;  %549 = vadd.xlane.f32.xlu2 %v548_v28  ;;  %v369_v45 = vpop.xlane.xlu1 %368  ;;  %v545_v0 = vsel %vm321_vm0, %v497_v47, 0.0 }
  0xa7   : > { %v437_v18 = vmul.f32 %v12197_v5, %v360_v41  ;;  %v440_v19 = vmul.f32 %v12197_v5, %v369_v45  ;;  %555 = vadd.xlane.f32.xlu0 %v554_v39  ;;  %543 = vadd.xlane.f32.xlu1 %v542_v34  ;;  %v363_v46 = vpop.xlane.xlu0 %362 }
  0xa8   : > { %v438_v20 = vmul.f32 %v12197_v5, %v363_v46 }
  0xa9   : > { %v12285_v8 = vsub.f32 %v12108_v24, %v437_v18  ;;  %v12288_v52 = vsub.f32 %v12111_v25, %v440_v19 }
  0xaa   : > { %v12294_v57 = vsub.f32 %v12114_v26, %v438_v20 }
  0xab   : > { %v501_v56 = vmul.f32 %v12285_v8, %v12285_v8  ;;  %v504_v4 = vmul.f32 %v12288_v52, %v12288_v52 }
  0xac   : > { %v502_v12 = vmul.f32 %v12294_v57, %v12294_v57 }
  0xad   : > { %v557_v59 = vsel %vm321_vm0, %v501_v56, 0.0  ;;  %v566_v11 = vsel %vm321_vm0, %v504_v4, 0.0 }
  0xae   : > { %v375_v1 = vpop.xlane.xlu2 %374  ;;  %552 = vadd.xlane.f32.xlu2 %v551_v53  ;;  %v372_v61 = vpop.xlane.xlu1 %371  ;;  %v560_v17 = vsel %vm321_vm0, %v502_v12, 0.0 }
  0xaf   : > { %v442_v24 = vmul.f32 %v12197_v5, %v375_v1  ;;  %v441_v25 = vmul.f32 %v12197_v5, %v372_v61  ;;  %558 = vadd.xlane.f32.xlu0 %v557_v59  ;;  %546 = vadd.xlane.f32.xlu1 %v545_v0  ;;  %v366_v63 = vpop.xlane.xlu0 %365  ;;  %v12348_v59 = vld [vmem:[%s12045_s30 + $0xf0] sm:$0xff] }
  0xb0   : > { %v439_v26 = vmul.f32 %v12197_v5, %v366_v63  ;;  %v412_v63 = vsel %vm321_vm0, %v12348_v59, 0.0 }
  0xb1   : > { %v12306_v9 = vsub.f32 %v12123_v30, %v442_v24  ;;  %v12309_v10 = vsub.f32 %v12126_v31, %v441_v25 }
  0xb2   : > { %v12315_v13 = vsub.f32 %v12129_v32, %v439_v26 }
  0xb3   : > { %v506_v15 = vmul.f32 %v12306_v9, %v12306_v9  ;;  %v505_v28 = vmul.f32 %v12309_v10, %v12309_v10 }
  0xb4   : > { %v503_v34 = vmul.f32 %v12315_v13, %v12315_v13 }
  0xb5   : > { %v572_v14 = vsel %vm321_vm0, %v506_v15, 0.0  ;;  %v569_v45 = vsel %vm321_vm0, %v505_v28, 0.0 }
  0xb6   : > { %567 = vadd.xlane.f32.xlu2 %v566_v11  ;;  %v387_v21 = vpop.xlane.xlu1 %386  ;;  %v378_v22 = vpop.xlane.xlu2 %377  ;;  %v563_v19 = vsel %vm321_vm0, %v503_v34, 0.0 }
  0xb7   : > { %573 = vadd.xlane.f32.xlu0 %v572_v14  ;;  %561 = vadd.xlane.f32.xlu1 %v560_v17  ;;  %v381_v30 = vpop.xlane.xlu0 %380  ;;  %v443_v31 = vmul.f32 %v12197_v5, %v378_v22  ;;  %v446_v29 = vmul.f32 %v12197_v5, %v387_v21 }
  0xb8   : > { %v444_v32 = vmul.f32 %v12197_v5, %v381_v30 }
  0xb9   : > { %v12330_v41 = vsub.f32 %v12141_v37, %v443_v31  ;;  %v12334_v18 = vsub.f32 %v12138_v36, %v446_v29 }
  0xba   : > { %v12327_v39 = vsub.f32 %v12144_v38, %v444_v32  ;;  %v12381_v32 = vld [vmem:[%s12045_s30 + $0xf8] sm:$0xff] }
  0xbb   : > { %18608 = vst [vmem:[#allocation3_spill] sm:$0xff] %v12334_v18  ;;  %v507_v37 = vmul.f32 %v12330_v41, %v12330_v41  ;;  %v510_v56 = vmul.f32 %v12334_v18, %v12334_v18 }
  0xbc   : > { %v508_v46 = vmul.f32 %v12327_v39, %v12327_v39 }
  0xbd   : > { %v575_v1 = vsel %vm321_vm0, %v507_v37, 0.0  ;;  %v584_v4 = vsel %vm321_vm0, %v510_v56, 0.0 }
  0xbe   : > { %570 = vadd.xlane.f32.xlu2 %v569_v45  ;;  %v390_v7 = vpop.xlane.xlu1 %389  ;;  %v578_v20 = vsel %vm321_vm0, %v508_v46, 0.0  ;;  %v393_v38 = vpop.xlane.xlu2 %392  ;;  %v415_v46 = vsel %vm321_vm0, %v12381_v32, 0.0 }
  0xbf   : > { %564 = vadd.xlane.f32.xlu1 %v563_v19  ;;  %579 = vadd.xlane.f32.xlu0 %v578_v20  ;;  %v384_v47 = vpop.xlane.xlu0 %383  ;;  %v447_v53 = vmul.f32 %v12197_v5, %v390_v7  ;;  %v448_v36 = vmul.f32 %v12197_v5, %v393_v38 }
  0xc0   : > { %v445_v0 = vmul.f32 %v12197_v5, %v384_v47 }
  0xc1   : > { %v12355_v24 = vsub.f32 %v12153_v42, %v447_v53  ;;  %v12358_v25 = vsub.f32 %v12156_v43, %v448_v36 }
  0xc2   : > { %v12352_v61 = vsub.f32 %v12159_v44, %v445_v0 }
  0xc3   : > { %18610 = vst [vmem:[#allocation5_spill] sm:$0xff] %v12355_v24  ;;  %v512_v43 = vmul.f32 %v12358_v25, %v12358_v25  ;;  %v511_v11 = vmul.f32 %v12355_v24, %v12355_v24 }
  0xc4   : > { %18609 = vst [vmem:[#allocation4_spill] sm:$0xff] %v12352_v61  ;;  %v509_v12 = vmul.f32 %v12352_v61, %v12352_v61 }
  0xc5   : > { %18611 = vst [vmem:[#allocation6_spill] sm:$0xff] %v12358_v25  ;;  %v590_v14 = vsel %vm321_vm0, %v512_v43, 0.0  ;;  %v587_v21 = vsel %vm321_vm0, %v511_v11, 0.0  ;;  %v10989_v11 = vld [vmem:[%s18423_s2] sm:$0xff] }
  0xc6   : > { %576 = vadd.xlane.f32.xlu2 %v575_v1  ;;  %v405_v26 = vpop.xlane.xlu1 %404  ;;  %v581_v15 = vsel %vm321_vm0, %v509_v12, 0.0  ;;  %v399_v38 = vpop.xlane.xlu2 %398 }
  0xc7   : > { %413 = vadd.xlane.f32.xlu1 %v412_v63  ;;  %585 = vadd.xlane.f32.xlu0 %v584_v4  ;;  %v402_v44 = vpop.xlane.xlu0 %401  ;;  %v452_v42 = vmul.f32 %v12197_v5, %v405_v26 }
  0xc8   : > { %v451_v31 = vmul.f32 %v12197_v5, %v402_v44 }
  0xc9   : > { %v12372_v17 = vsub.f32 %v12168_v48, %v452_v42  ;;  %v10990_v42 = vld [vmem:[%s18423_s2 + $0x8] sm:$0xff] }
  0xca   : > { %v12388_v45 = vsub.f32 %v12174_v50, %v451_v31  ;;  %v450_v50 = vmul.f32 %v12197_v5, %v399_v38  ;;  %1185 = vmatpush.bf16.msra.mxu0 %v10990_v42  ;;  %11003 = vmatpush.bf16.msra.mxu3 %v10990_v42 }
  0xcb   : > { %v516_v29 = vmul.f32 %v12372_v17, %v12372_v17 }
  0xcc   : > { %v515_v53 = vmul.f32 %v12388_v45, %v12388_v45  ;;  %v12409_v56 = vsub.f32 %v12171_v49, %v450_v50 }
  0xcd   : > { %v602_v7 = vsel %vm321_vm0, %v516_v29, 0.0 }
  0xce   : > { %v396_v22 = vpop.xlane.xlu1 %395  ;;  %582 = vadd.xlane.f32.xlu2 %v581_v15  ;;  %18613 = vst [vmem:[#allocation8_spill] sm:$0xff] %v12409_v56  ;;  %v599_v1 = vsel %vm321_vm0, %v515_v53, 0.0  ;;  %v514_v26 = vmul.f32 %v12409_v56, %v12409_v56  ;;  %1186 = vmatpush.bf16.msra.mxu0 %v10989_v11 }
  0xcf   : > { %v449_v30 = vmul.f32 %v12197_v5, %v396_v22  ;;  %591 = vadd.xlane.f32.xlu1 %v590_v14  ;;  %588 = vadd.xlane.f32.xlu0 %v587_v21  ;;  %v408_v28 = vpop.xlane.xlu0 %407 }
  0xd0   : > { %v453_v48 = vmul.f32 %v12197_v5, %v408_v28  ;;  %11004 = vmatpush.bf16.msra.mxu3 %v10989_v11 }
  0xd1   : > { %v12385_v34 = vsub.f32 %v12183_v54, %v449_v30 }
  0xd2   : > { %v12396_v20 = vsub.f32 %v12186_v55, %v453_v48 }
  0xd3   : > { %18612 = vst [vmem:[#allocation7_spill] sm:$0xff] %v12385_v34  ;;  %v513_v19 = vmul.f32 %v12385_v34, %v12385_v34 }
  0xd4   : > { %v517_v36 = vmul.f32 %v12396_v20, %v12396_v20 }
  0xd5   : > { %v593_v37 = vsel %vm321_vm0, %v513_v19, 0.0 }
  0xd6   : > { %v411_v47 = vpop.xlane.xlu1 %410  ;;  %416 = vadd.xlane.f32.xlu2 %v415_v46  ;;  %v605_v63 = vsel %vm321_vm0, %v517_v36, 0.0 }
  0xd7   : > { %v454_v54 = vmul.f32 %v12197_v5, %v411_v47  ;;  %594 = vadd.xlane.f32.xlu1 %v593_v37  ;;  %603 = vadd.xlane.f32.xlu0 %v602_v7 }
  0xd9   : > { %v12406_v55 = vsub.f32 %v12193_v58, %v454_v54  ;;  %v596_v58 = vsel %vm321_vm0, %v514_v26, 0.0 }
  0xdb   : > { %v518_v0 = vmul.f32 %v12406_v55, %v12406_v55 }
  0xdd   : > { %v608_v4 = vsel %vm321_vm0, %v518_v0, 0.0 }
  0xde   : > { %600 = vadd.xlane.f32.xlu2 %v599_v1 }
  0xdf   : > { %609 = vadd.xlane.f32.xlu1 %v608_v4  ;;  %606 = vadd.xlane.f32.xlu0 %v605_v63 }
  0xe6   : > { %597 = vadd.xlane.f32.xlu2 %v596_v58 }
 0x102   : > { %v523_v49 = vpop.xlane.xlu0 %522 }
 0x103   : > { %v617_v12 = vmul.f32 %v523_v49, %v12197_v5 }
 0x105   : > { %v649_v44 = vadd.f32 1e-05, %v617_v12 }
 0x107   : > { %11287 = vrsqrt.f32 %v649_v44  ;;  %vm687_vm2 = vweird.f32 %v649_v44 }
 0x109   : > { %v532_v43 = vpop.xlane.xlu2 %531 }
 0x10a   : > { %v526_v15 = vpop.xlane.xlu1 %525  ;;  %v538_v14 = vpop.xlane.xlu0 %537  ;;  %v620_v19 = vmul.f32 %v532_v43, %v12197_v5 }
 0x10b   : > { %v618_v21 = vmul.f32 %v526_v15, %v12197_v5 }
 0x10c   : > { %v12433_v54 = vadd.f32 1e-05, %v620_v19 }
 0x10d   : > { %v11288_v22 = vpop.eup %11287  ;;  %v650_v30 = vadd.f32 1e-05, %v618_v21 }
 0x10e   : > { %v682_v31 = vmul.f32 %v11288_v22, %v649_v44  ;;  %vm688_vm3 = vweird.f32 %v11288_v22  ;;  %vm717_vm12 = vweird.f32 %v12433_v54 }
 0x10f   : > { %11289 = vrsqrt.f32 %v650_v30  ;;  %vm689_vm4 = vmor %vm687_vm2, %vm688_vm3  ;;  %vm697_vm5 = vweird.f32 %v650_v30 }
 0x110   : > { %v683_v7 = vmul.f32 %v11288_v22, %v682_v31 }
 0x111   : > { %v535_v28 = vpop.xlane.xlu2 %534 }
 0x112   : > { %v529_v29 = vpop.xlane.xlu1 %528  ;;  %v12427_v48 = vpop.xlane.xlu0 %540  ;;  %v684_v50 = vmul.f32 0.5, %v683_v7  ;;  %v621_v19 = vmul.f32 %v535_v28, %v12197_v5 }
 0x113   : > { %v619_v46 = vmul.f32 %v529_v29, %v12197_v5  ;;  %v622_v29 = vmul.f32 %v538_v14, %v12197_v5 }
 0x114   : > { %v685_v4 = vsub.f32 1.5, %v684_v50  ;;  %v12462_v50 = vld [vmem:[%s18422_s1] ss:$0 sm:$0xff] }
 0x115   : > { %v11290_v38 = vpop.eup %11289  ;;  %v12431_v37 = vadd.f32 1e-05, %v619_v46 }
 0x116   : > { %v692_v47 = vmul.f32 %v11290_v38, %v650_v30  ;;  %v686_v49 = vmul.f32 %v11288_v22, %v685_v4  ;;  %vm698_vm6 = vweird.f32 %v11290_v38  ;;  %v12465_v30 = vadd.f32 1e-05, %v622_v29 }
 0x117   : > { %11291 = vrsqrt.f32 %v12431_v37  ;;  %vm699_vm7 = vmor %vm697_vm5, %vm698_vm6  ;;  %vm707_vm9 = vweird.f32 %v12431_v37 }
 0x118   : > { %v693_v53 = vmul.f32 %v11290_v38, %v692_v47  ;;  %11293 = vrsqrt.f32 %v12433_v54  ;;  %v690_v31 = vsel %vm689_vm4, %v11288_v22, %v686_v49  ;;  %vm737_vm14 = vweird.f32 %v12465_v30 }
 0x119   : > { %v12436_v36 = vpop.xlane.xlu2 %549  ;;  %v1001_v47 = vmul.f32 %v690_v31, %v12201_v16  ;;  %11295 = vrsqrt.f32 %v12465_v30 }
 0x11a   : > { %v544_v0 = vpop.xlane.xlu1 %543  ;;  %v12438_v1 = vpop.xlane.xlu0 %555  ;;  %v694_v63 = vmul.f32 0.5, %v693_v53  ;;  %v12467_v53 = vadd.f32 1e-05, %v621_v19 }
 0x11b   : > { %v1034_v16 = vmul.f32 %v12462_v50, %v1001_v47 }
 0x11c   : > { %v695_v58 = vsub.f32 1.5, %v694_v63  ;;  %11297 = vrsqrt.f32 %v12467_v53  ;;  %vm727_vm3 = vweird.f32 %v12467_v53 }
 0x11d   : > { %v12441_v26 = vpop.eup %11291 }
 0x11e   : > { %v12443_v12 = vpop.eup %11293  ;;  %v702_v42 = vmul.f32 %v12441_v26, %v12431_v37  ;;  %v696_v21 = vmul.f32 %v11290_v38, %v695_v58  ;;  %v12480_v58 = vld [vmem:[%s18422_s1 + $0x1] ss:$0 sm:$0xff]  ;;  %vm708_vm8 = vweird.f32 %v12441_v26 }
 0x11f   : > { %v712_v44 = vmul.f32 %v12443_v12, %v12433_v54  ;;  %v1067_v31 = vadd.f32 %v12480_v58, %v1034_v16  ;;  %vm718_vm10 = vweird.f32 %v12443_v12  ;;  %vm709_vm11 = vmor %vm707_vm9, %vm708_vm8 }
 0x120   : > { %v703_v46 = vmul.f32 %v12441_v26, %v702_v42  ;;  %v700_v7 = vsel %vm699_vm7, %v11290_v38, %v696_v21  ;;  %vm719_vm13 = vmor %vm717_vm12, %vm718_vm10 }
 0x121   : > { %v12447_v43 = vpop.xlane.xlu2 %552  ;;  %v713_v22 = vmul.f32 %v12443_v12, %v712_v44  ;;  %v1002_v28 = vmul.f32 %v700_v7, %v12218_v40  ;;  %v12491_v7 = vpop.eup %11295 }
 0x122   : > { %v12449_v11 = vpop.xlane.xlu1 %546  ;;  %v12451_v15 = vpop.xlane.xlu0 %558  ;;  %v704_v14 = vmul.f32 0.5, %v703_v46  ;;  %vm738_vm15 = vweird.f32 %v12491_v7 }
 0x123   : > { %v714_v49 = vmul.f32 0.5, %v713_v22  ;;  %v1035_v42 = vmul.f32 %v12462_v50, %v1002_v28  ;;  %v12497_v28 = vpop.eup %11297  ;;  %vm12565_vm2 = vmor %vm737_vm14, %vm738_vm15 }
 0x124   : > { %v705_v21 = vsub.f32 1.5, %v704_v14  ;;  %v623_v14 = vmul.f32 %v12427_v48, %v12197_v5  ;;  %v722_v37 = vmul.f32 %v12497_v28, %v12467_v53  ;;  %vm728_vm1 = vweird.f32 %v12497_v28 }
 0x125   : > { %v1068_v40 = vadd.f32 %v12480_v58, %v1035_v42  ;;  %v715_v44 = vsub.f32 1.5, %v714_v49  ;;  %v624_v49 = vmul.f32 %v544_v0, %v12197_v5  ;;  %vm729_vm4 = vmor %vm727_vm3, %vm728_vm1  ;;  %v627_v53 = vmul.f32 %v12447_v43, %v12197_v5 }
 0x126   : > { %v706_v29 = vmul.f32 %v12441_v26, %v705_v21  ;;  %v732_v21 = vmul.f32 %v12491_v7, %v12465_v30  ;;  %v12512_v48 = vadd.f32 1e-05, %v623_v14  ;;  %v723_v54 = vmul.f32 %v12497_v28, %v722_v37 }
 0x127   : > { %v1099_v19 = vpack.c.bf16 %v1068_v40, %v1067_v31  ;;  %v716_v16 = vmul.f32 %v12443_v12, %v715_v44  ;;  %v12515_v31 = vadd.f32 1e-05, %v624_v49  ;;  %v625_v37 = vmul.f32 %v12449_v11, %v12197_v5 }
 0x128   : > { %v710_v42 = vsel %vm709_vm11, %v12441_v26, %v706_v29  ;;  %v733_v26 = vmul.f32 %v12491_v7, %v732_v21  ;;  %11299 = vrsqrt.f32 %v12512_v48  ;;  %v724_v49 = vmul.f32 0.5, %v723_v54 }
 0x129   : > { %v12469_v63 = vpop.xlane.xlu2 %567  ;;  %10635 = vmatmul.msk.bf16.vlgmr.msra.gmra.mxu0 %vm321_vm0, %v1099_v19  ;;  %v720_v40 = vsel %vm719_vm13, %v12443_v12, %v716_v16  ;;  %v1003_v44 = vmul.f32 %v710_v42, %v12232_v51  ;;  %11301 = vrsqrt.f32 %v12515_v31  ;;  %v12551_v25 = vadd.f32 1e-05, %v625_v37 }
 0x12a   : > { %v12472_v4 = vpop.xlane.xlu1 %561  ;;  %v12474_v38 = vpop.xlane.xlu0 %573  ;;  %v1004_v14 = vmul.f32 %v720_v40, %v12214_v35  ;;  %v734_v51 = vmul.f32 0.5, %v733_v26  ;;  %v626_v35 = vmul.f32 %v12436_v36, %v12197_v5  ;;  %v725_v54 = vsub.f32 1.5, %v724_v49 }
 0x12b   : > { %v1036_v12 = vmul.f32 %v12462_v50, %v1003_v44  ;;  %11303 = vrsqrt.f32 %v12551_v25  ;;  %vm747_vm5 = vweird.f32 %v12512_v48  ;;  %vm757_vm9 = vweird.f32 %v12515_v31 }
 0x12c   : > { %v1037_v16 = vmul.f32 %v12462_v50, %v1004_v14  ;;  %v735_v26 = vsub.f32 1.5, %v734_v51  ;;  %v12556_v36 = vadd.f32 1e-05, %v626_v35  ;;  %v726_v51 = vmul.f32 %v12497_v28, %v725_v54 }
 0x12d   : > { %v1069_v42 = vadd.f32 %v12480_v58, %v1036_v12  ;;  %vm767_vm11 = vweird.f32 %v12551_v25 }
 0x12e   : > { %v1070_v34 = vadd.f32 %v12480_v58, %v1037_v16  ;;  %v12534_v56 = vpop.eup %11299  ;;  %11305 = vrsqrt.f32 %v12556_v36  ;;  %vm777_vm3 = vweird.f32 %v12556_v36 }
 0x12f   : > { %v12540_v44 = vpop.eup %11301  ;;  %v742_v16 = vmul.f32 %v12534_v56, %v12512_v48  ;;  %vm748_vm6 = vweird.f32 %v12534_v56 }
 0x130   : > { %v1100_v14 = vpack.c.bf16 %v1070_v34, %v1069_v42  ;;  %v736_v34 = vmul.f32 %v12491_v7, %v735_v26  ;;  %v730_v26 = vsel %vm729_vm4, %v12497_v28, %v726_v51  ;;  %v628_v28 = vmul.f32 %v12438_v1, %v12197_v5  ;;  %vm12624_vm8 = vmor %vm747_vm5, %vm748_vm6 }
 0x131   : > { %v12489_v46 = vpop.xlane.xlu2 %570  ;;  %v743_v30 = vmul.f32 %v12534_v56, %v742_v16  ;;  %vm758_vm7 = vweird.f32 %v12540_v44 }
 0x132   : > { %v12493_v47 = vpop.xlane.xlu1 %564  ;;  %v12495_v22 = vpop.xlane.xlu0 %579  ;;  %v740_v35 = vsel %vm12565_vm2, %v12491_v7, %v736_v34  ;;  %v12589_v34 = vadd.f32 1e-05, %v627_v53  ;;  %vm12632_vm10 = vmor %vm757_vm9, %vm758_vm7 }
 0x133   : > { %v744_v16 = vmul.f32 0.5, %v743_v30  ;;  %v1006_v24 = vmul.f32 %v740_v35, %v12211_v2  ;;  %v12585_v7 = vpop.eup %11303 }
 0x134   : > { %v12593_v43 = vpop.eup %11305  ;;  %v762_v35 = vmul.f32 %v12585_v7, %v12551_v25  ;;  %11307 = vrsqrt.f32 %v12589_v34  ;;  %vm768_vm12 = vweird.f32 %v12585_v7 }
 0x135   : > { %v745_v30 = vsub.f32 1.5, %v744_v16  ;;  %v772_v53 = vmul.f32 %v12593_v43, %v12556_v36  ;;  %vm778_vm15 = vweird.f32 %v12593_v43  ;;  %vm12685_vm1 = vmor %vm767_vm11, %vm768_vm12 }
 0x136   : > { %v763_v18 = vmul.f32 %v12585_v7, %v762_v35  ;;  %vm12704_vm4 = vmor %vm777_vm3, %vm778_vm15 }
 0x137   : > { %v746_v16 = vmul.f32 %v12534_v56, %v745_v30 }
 0x139   : > { %v12518_v0 = vpop.xlane.xlu2 %576  ;;  %10636 = vmatmul.msk.bf16.gmra.mxu0 %vm321_vm0, %v1100_v14  ;;  %v750_v35 = vsel %vm12624_vm8, %v12534_v56, %v746_v16 }
 0x13a   : > { %v414_v29 = vpop.xlane.xlu1 %413  ;;  %v12522_v19 = vpop.xlane.xlu0 %585 }
 0x13b   : > { %v455_v21 = vmul.f32 %v12197_v5, %v414_v29  ;;  %v12639_v48 = vpop.eup %11307 }
 0x13c   : > { %vm788_vm12 = vweird.f32 %v12639_v48 }
 0x13d   : > { %v12543_v12 = vsub.f32 %v12348_v59, %v455_v21  ;;  %v752_v59 = vmul.f32 %v12540_v44, %v12515_v31 }
 0x13f   : > { %18614 = vst [vmem:[#allocation9_spill] sm:$0xff] %v12543_v12  ;;  %v519_v49 = vmul.f32 %v12543_v12, %v12543_v12  ;;  %v753_v21 = vmul.f32 %v12540_v44, %v752_v59  ;;  %v1005_v59 = vmul.f32 %v730_v26, %v12227_v6 }
 0x141   : > { %v12538_v40 = vpop.xlane.xlu2 %582  ;;  %v611_v54 = vsel %vm321_vm0, %v519_v49, 0.0  ;;  %v754_v12 = vmul.f32 0.5, %v753_v21  ;;  %v1038_v51 = vmul.f32 %v12462_v50, %v1005_v59  ;;  %v1039_v21 = vmul.f32 %v12462_v50, %v1006_v24 }
 0x142   : > { %v12545_v29 = vpop.xlane.xlu1 %591  ;;  %v12547_v11 = vpop.xlane.xlu0 %588  ;;  %612 = vadd.xlane.f32.xlu2 %v611_v54  ;;  %v12605_v24 = vadd.f32 1e-05, %v628_v28 }
 0x143   : > { %v755_v2 = vsub.f32 1.5, %v754_v12  ;;  %v1071_v26 = vadd.f32 %v12480_v58, %v1038_v51  ;;  %v1072_v1 = vadd.f32 %v12480_v58, %v1039_v21 }
 0x144   : > { %vm797_vm15 = vweird.f32 %v12605_v24 }
 0x145   : > { %v1101_v59 = vpack.c.bf16 %v1072_v1, %v1071_v26  ;;  %v756_v21 = vmul.f32 %v12540_v44, %v755_v2  ;;  %v764_v26 = vmul.f32 0.5, %v763_v18  ;;  %v629_v18 = vmul.f32 %v12451_v15, %v12197_v5 }
 0x146   : > { %v630_v15 = vmul.f32 %v12472_v4, %v12197_v5 }
 0x147   : > { %v760_v31 = vsel %vm12632_vm10, %v12540_v44, %v756_v21  ;;  %v765_v16 = vsub.f32 1.5, %v764_v26 }
 0x148   : > { %v1008_v56 = vmul.f32 %v760_v31, %v12251_v3 }
 0x149   : > { %v417_v37 = vpop.xlane.xlu2 %416  ;;  %10637 = vmatmul.msk.bf16.gmra.mxu0 %vm321_vm0, %v1101_v59  ;;  %v766_v26 = vmul.f32 %v12585_v7, %v765_v16 }
 0x14a   : > { %v12579_v14 = vpop.xlane.xlu1 %594  ;;  %v604_v42 = vpop.xlane.xlu0 %603  ;;  %v456_v49 = vmul.f32 %v12197_v5, %v417_v37 }
 0x14b   : > { %18617 = vst [vmem:[#allocation10_spill] sm:$0xff] %v12579_v14  ;;  %v644_v6 = vmul.f32 %v604_v42, %v12197_v5  ;;  %v770_v25 = vsel %vm12685_vm1, %v12585_v7, %v766_v26  ;;  %vm787_vm1 = vweird.f32 %v12589_v34 }
 0x14c   : > { %v12609_v12 = vsub.f32 %v12381_v32, %v456_v49  ;;  %v773_v49 = vmul.f32 %v12593_v43, %v772_v53  ;;  %vm12769_vm3 = vmor %vm787_vm1, %vm788_vm12 }
 0x14d   : > { %v676_v42 = vadd.f32 1e-05, %v644_v6 }
 0x14e   : > { %18618 = vst [vmem:[#allocation11_spill] sm:$0xff] %v12609_v12  ;;  %v520_v30 = vmul.f32 %v12609_v12, %v12609_v12 }
 0x14f   : > { %11309 = vrsqrt.f32 %v676_v42  ;;  %vm957_vm13 = vweird.f32 %v676_v42 }
 0x151   : > { %v601_v54 = vpop.xlane.xlu2 %600 }
 0x152   : > { %v610_v37 = vpop.xlane.xlu1 %609  ;;  %v643_v28 = vmul.f32 %v601_v54, %v12197_v5  ;;  %v607_v1 = vpop.xlane.xlu0 %606  ;;  %v614_v54 = vsel %vm321_vm0, %v520_v30, 0.0 }
 0x153   : > { %v646_v51 = vmul.f32 %v610_v37, %v12197_v5  ;;  %v774_v37 = vmul.f32 0.5, %v773_v49  ;;  %615 = vadd.xlane.f32.xlu0 %v614_v54  ;;  %v645_v59 = vmul.f32 %v607_v1, %v12197_v5  ;;  %v1041_v49 = vmul.f32 %v12462_v50, %v1008_v56 }
 0x154   : > { %v12637_v2 = vadd.f32 1e-05, %v643_v28 }
 0x155   : > { %v12618_v61 = vadd.f32 1e-05, %v646_v51  ;;  %v11310_v53 = vpop.eup %11309  ;;  %v1007_v51 = vmul.f32 %v750_v35, %v12239_v60  ;;  %v12657_v21 = vadd.f32 1e-05, %v645_v59  ;;  %v775_v6 = vsub.f32 1.5, %v774_v37 }
 0x156   : > { %v952_v28 = vmul.f32 %v11310_v53, %v676_v42  ;;  %v782_v60 = vmul.f32 %v12639_v48, %v12589_v34  ;;  %vm958_vm14 = vweird.f32 %v11310_v53  ;;  %vm947_vm5 = vweird.f32 %v12637_v2 }
 0x157   : > { %11311 = vrsqrt.f32 %v12618_v61  ;;  %v1040_v32 = vmul.f32 %v12462_v50, %v1007_v51  ;;  %v1074_v51 = vadd.f32 %v12480_v58, %v1041_v49  ;;  %v776_v4 = vmul.f32 %v12593_v43, %v775_v6  ;;  %vm12691_vm2 = vmor %vm957_vm13, %vm958_vm14 }
 0x158   : > { %11313 = vrsqrt.f32 %v12605_v24  ;;  %v953_v3 = vmul.f32 %v11310_v53, %v952_v28  ;;  %v783_v56 = vmul.f32 %v12639_v48, %v782_v60  ;;  %v12689_v28 = vadd.f32 1e-05, %v630_v15 }
 0x159   : > { %11315 = vrsqrt.f32 %v12637_v2  ;;  %v1073_v59 = vadd.f32 %v12480_v58, %v1040_v32  ;;  %v12700_v60 = vadd.f32 1e-05, %v629_v18  ;;  %v780_v36 = vsel %vm12704_vm4, %v12593_v43, %v776_v4 }
 0x15a   : > { %11317 = vrsqrt.f32 %v12657_v21  ;;  %v954_v1 = vmul.f32 0.5, %v953_v3  ;;  %v784_v7 = vmul.f32 0.5, %v783_v56  ;;  %v1010_v4 = vmul.f32 %v780_v36, %v12246_v62 }
 0x15b   : > { %v1102_v3 = vpack.c.bf16 %v1074_v51, %v1073_v59  ;;  %11319 = vrsqrt.f32 %v12689_v28  ;;  %vm977_vm8 = vweird.f32 %v12618_v61  ;;  %vm967_vm10 = vweird.f32 %v12657_v21 }
 0x15c   : > { %v955_v16 = vsub.f32 1.5, %v954_v1  ;;  %11321 = vrsqrt.f32 %v12700_v60  ;;  %v1043_v62 = vmul.f32 %v12462_v50, %v1010_v4 }
 0x15d   : > { %v12653_v44 = vpop.eup %11311  ;;  %10638 = vmatmul.msk.bf16.gmra.mxu0 %vm321_vm0, %v1102_v3 }
 0x15e   : > { %v12661_v30 = vpop.eup %11313  ;;  %v972_v31 = vmul.f32 %v12653_v44, %v12618_v61  ;;  %v956_v12 = vmul.f32 %v11310_v53, %v955_v16  ;;  %vm978_vm9 = vweird.f32 %v12653_v44 }
 0x15f   : > { %v11316_v35 = vpop.eup %11315  ;;  %v792_v37 = vmul.f32 %v12661_v30, %v12605_v24  ;;  %vm12743_vm13 = vmor %vm977_vm8, %vm978_vm9  ;;  %vm817_vm8 = vweird.f32 %v12689_v28 }
 0x160   : > { %v942_v54 = vmul.f32 %v11316_v35, %v12637_v2  ;;  %v973_v49 = vmul.f32 %v12653_v44, %v972_v31  ;;  %v12702_v1 = vpop.eup %11317  ;;  %vm948_vm6 = vweird.f32 %v11316_v35  ;;  %v960_v18 = vsel %vm12691_vm2, %v11310_v53, %v956_v12 }
 0x161   : > { %v793_v14 = vmul.f32 %v12661_v30, %v792_v37  ;;  %v962_v26 = vmul.f32 %v12702_v1, %v12657_v21  ;;  %v1009_v2 = vmul.f32 %v770_v25, %v12273_v33  ;;  %vm949_vm7 = vmor %vm947_vm5, %vm948_vm6  ;;  %v1028_v51 = vmul.f32 %v960_v18, %v12372_v17 }
 0x162   : > { %v943_v6 = vmul.f32 %v11316_v35, %v942_v54  ;;  %v974_v37 = vmul.f32 0.5, %v973_v49  ;;  %v785_v53 = vsub.f32 1.5, %v784_v7  ;;  %vm968_vm11 = vweird.f32 %v12702_v1 }
 0x163   : > { %v963_v59 = vmul.f32 %v12702_v1, %v962_v26  ;;  %v794_v12 = vmul.f32 0.5, %v793_v14  ;;  %v1042_v32 = vmul.f32 %v12462_v50, %v1009_v2  ;;  %v1061_v17 = vmul.f32 %v12462_v50, %v1028_v51  ;;  %vm12752_vm14 = vmor %vm967_vm10, %vm968_vm11 }
 0x164   : > { %v944_v31 = vmul.f32 0.5, %v943_v6  ;;  %v975_v42 = vsub.f32 1.5, %v974_v37  ;;  %v12729_v6 = vpop.eup %11319  ;;  %v786_v36 = vmul.f32 %v12639_v48, %v785_v53  ;;  %v632_v26 = vmul.f32 %v12469_v63, %v12197_v5 }
 0x165   : > { %v964_v56 = vmul.f32 0.5, %v963_v59  ;;  %v795_v14 = vsub.f32 1.5, %v794_v12  ;;  %v12736_v3 = vpop.eup %11321  ;;  %v812_v7 = vmul.f32 %v12729_v6, %v12689_v28  ;;  %v1094_v61 = vadd.f32 %v12480_v58, %v1061_v17 }
 0x166   : > { %v945_v54 = vsub.f32 1.5, %v944_v31  ;;  %v976_v25 = vmul.f32 %v12653_v44, %v975_v42  ;;  %v1075_v31 = vadd.f32 %v12480_v58, %v1042_v32  ;;  %v1076_v37 = vadd.f32 %v12480_v58, %v1043_v62 }
 0x167   : > { %v965_v33 = vsub.f32 1.5, %v964_v56  ;;  %vm798_vm2 = vweird.f32 %v12661_v30  ;;  %v802_v2 = vmul.f32 %v12736_v3, %v12700_v60  ;;  %v790_v12 = vsel %vm12769_vm3, %v12639_v48, %v786_v36 }
 0x168   : > { %v946_v43 = vmul.f32 %v11316_v35, %v945_v54  ;;  %v796_v54 = vmul.f32 %v12661_v30, %v795_v14  ;;  %v980_v63 = vsel %vm12743_vm13, %v12653_v44, %v976_v25  ;;  %v1103_v4 = vpack.c.bf16 %v1076_v37, %v1075_v31  ;;  %vm799_vm4 = vmor %vm797_vm15, %vm798_vm2 }
 0x169   : > { %v966_v15 = vmul.f32 %v12702_v1, %v965_v33  ;;  %v813_v53 = vmul.f32 %v12729_v6, %v812_v7  ;;  %v12788_v56 = vadd.f32 1e-05, %v632_v26  ;;  %v1011_v48 = vmul.f32 %v790_v12, %v12267_v27 }
 0x16a   : > { %v950_v16 = vsel %vm949_vm7, %v11316_v35, %v946_v43  ;;  %v800_v44 = vsel %vm799_vm4, %v12661_v30, %v796_v54  ;;  %vm818_vm5 = vweird.f32 %v12729_v6  ;;  %vm807_vm6 = vweird.f32 %v12700_v60 }
 0x16b   : > { %v1027_v49 = vmul.f32 %v950_v16, %v12388_v45  ;;  %v631_v45 = vmul.f32 %v12493_v47, %v12197_v5  ;;  %v970_v43 = vsel %vm12752_vm14, %v12702_v1, %v966_v15  ;;  %v803_v1 = vmul.f32 %v12736_v3, %v802_v2  ;;  %vm819_vm9 = vmor %vm817_vm8, %vm818_vm5 }
 0x16c   : > { %v1029_v42 = vmul.f32 %v970_v43, %v12396_v20  ;;  %v1030_v16 = vmul.f32 %v980_v63, %v12406_v55  ;;  %v814_v32 = vmul.f32 0.5, %v813_v53  ;;  %v1012_v24 = vmul.f32 %v800_v44, %v12264_v23 }
 0x16d   : > { %v1060_v35 = vmul.f32 %v12462_v50, %v1027_v49  ;;  %v12773_v34 = vadd.f32 1e-05, %v631_v45  ;;  %10639 = vmatmul.msk.bf16.gmra.mxu0 %vm321_vm0, %v1103_v4  ;;  %v804_v33 = vmul.f32 0.5, %v803_v1  ;;  %v1044_v17 = vmul.f32 %v12462_v50, %v1011_v48 }
 0x16e   : > { %v1062_v49 = vmul.f32 %v12462_v50, %v1029_v42  ;;  %v1063_v30 = vmul.f32 %v12462_v50, %v1030_v16  ;;  %v815_v62 = vsub.f32 1.5, %v814_v32  ;;  %v1045_v55 = vmul.f32 %v12462_v50, %v1012_v24 }
 0x16f   : > { %v1093_v47 = vadd.f32 %v12480_v58, %v1060_v35  ;;  %11323 = vrsqrt.f32 %v12773_v34  ;;  %v805_v14 = vsub.f32 1.5, %v804_v33  ;;  %v633_v23 = vmul.f32 %v12489_v46, %v12197_v5 }
 0x170   : > { %11325 = vrsqrt.f32 %v12788_v56  ;;  %v1095_v27 = vadd.f32 %v12480_v58, %v1062_v49  ;;  %v1096_v35 = vadd.f32 %v12480_v58, %v1063_v30  ;;  %v1077_v25 = vadd.f32 %v12480_v58, %v1044_v17 }
 0x171   : > { %v1112_v59 = vpack.c.bf16 %v1094_v61, %v1093_v47  ;;  %v816_v21 = vmul.f32 %v12729_v6, %v815_v62  ;;  %vm808_vm7 = vweird.f32 %v12736_v3  ;;  %v634_v31 = vmul.f32 %v12474_v38, %v12197_v5 }
 0x172   : > { %v1078_v36 = vadd.f32 %v12480_v58, %v1045_v55  ;;  %v806_v46 = vmul.f32 %v12736_v3, %v805_v14  ;;  %v1113_v18 = vpack.c.bf16 %v1096_v35, %v1095_v27  ;;  %v12825_v47 = vadd.f32 1e-05, %v633_v23  ;;  %vm809_vm10 = vmor %vm807_vm6, %vm808_vm7 }
 0x173   : > { %10648 = vmatmul.msk.bf16.vlgmr.msra.gmra.mxu3 %vm321_vm0, %v1112_v59  ;;  %v820_v60 = vsel %vm819_vm9, %v12729_v6, %v816_v21  ;;  %v12830_v38 = vadd.f32 1e-05, %v634_v31  ;;  %v635_v53 = vmul.f32 %v12518_v0, %v12197_v5  ;;  %vm827_vm13 = vweird.f32 %v12773_v34 }
 0x174   : > { %v1104_v61 = vpack.c.bf16 %v1078_v36, %v1077_v25  ;;  %v810_v37 = vsel %vm809_vm10, %v12736_v3, %v806_v46  ;;  %11327 = vrsqrt.f32 %v12825_v47  ;;  %v1014_v54 = vmul.f32 %v820_v60, %v12294_v57 }
 0x175   : > { %v12802_v20 = vpop.eup %11323  ;;  %11329 = vrsqrt.f32 %v12830_v38  ;;  %v1013_v6 = vmul.f32 %v810_v37, %v12285_v8  ;;  %v636_v8 = vmul.f32 %v12495_v22, %v12197_v5  ;;  %v12854_v0 = vadd.f32 1e-05, %v635_v53 }
 0x176   : > { %v12807_v45 = vpop.eup %11325  ;;  %v822_v15 = vmul.f32 %v12802_v20, %v12773_v34  ;;  %v1047_v51 = vmul.f32 %v12462_v50, %v1014_v54  ;;  %vm828_vm11 = vweird.f32 %v12802_v20  ;;  %vm837_vm15 = vweird.f32 %v12788_v56 }
 0x177   : > { %v832_v7 = vmul.f32 %v12807_v45, %v12788_v56  ;;  %v1046_v4 = vmul.f32 %v12462_v50, %v1013_v6  ;;  %vm838_vm12 = vweird.f32 %v12807_v45  ;;  %vm829_vm14 = vmor %vm827_vm13, %vm828_vm11  ;;  %v12858_v22 = vadd.f32 1e-05, %v636_v8 }
 0x178   : > { %v823_v26 = vmul.f32 %v12802_v20, %v822_v15  ;;  %v1080_v44 = vadd.f32 %v12480_v58, %v1047_v51  ;;  %vm839_vm1 = vmor %vm837_vm15, %vm838_vm12  ;;  %11331 = vrsqrt.f32 %v12854_v0  ;;  %v637_v23 = vmul.f32 %v12538_v40, %v12197_v5 }
 0x179   : > { %v833_v28 = vmul.f32 %v12807_v45, %v832_v7  ;;  %v1079_v42 = vadd.f32 %v12480_v58, %v1046_v4  ;;  %11333 = vrsqrt.f32 %v12858_v22  ;;  %vm857_vm3 = vweird.f32 %v12830_v38 }
 0x17a   : > { %v824_v2 = vmul.f32 0.5, %v823_v26  ;;  %v11328_v43 = vpop.eup %11327  ;;  %v638_v21 = vmul.f32 %v12522_v19, %v12197_v5  ;;  %vm847_vm5 = vweird.f32 %v12825_v47  ;;  %v12884_v36 = vadd.f32 1e-05, %v637_v23 }
 0x17b   : > { %v834_v59 = vmul.f32 0.5, %v833_v28  ;;  %v11330_v3 = vpop.eup %11329  ;;  %v842_v57 = vmul.f32 %v11328_v43, %v12825_v47  ;;  %v1105_v32 = vpack.c.bf16 %v1080_v44, %v1079_v42  ;;  %vm848_vm2 = vweird.f32 %v11328_v43 }
 0x17c   : > { %v825_v63 = vsub.f32 1.5, %v824_v2  ;;  %v852_v48 = vmul.f32 %v11330_v3, %v12830_v38  ;;  %vm858_vm4 = vweird.f32 %v11330_v3  ;;  %vm849_vm6 = vmor %vm847_vm5, %vm848_vm2  ;;  %11335 = vrsqrt.f32 %v12884_v36 }
 0x17d   : > { %10640 = vmatmul.msk.bf16.gmra.mxu0 %vm321_vm0, %v1104_v61  ;;  %v835_v12 = vsub.f32 1.5, %v834_v59  ;;  %v843_v24 = vmul.f32 %v11328_v43, %v842_v57  ;;  %vm859_vm7 = vmor %vm857_vm3, %vm858_vm4  ;;  %v12887_v61 = vadd.f32 1e-05, %v638_v21  ;;  %v640_v51 = vmul.f32 %v12545_v29, %v12197_v5 }
 0x17e   : > { %v826_v1 = vmul.f32 %v12802_v20, %v825_v63  ;;  %v853_v30 = vmul.f32 %v11330_v3, %v852_v48  ;;  %v12867_v14 = vpop.eup %11331  ;;  %vm877_vm9 = vweird.f32 %v12858_v22  ;;  %vm867_vm11 = vweird.f32 %v12854_v0 }
 0x17f   : > { %v836_v16 = vmul.f32 %v12807_v45, %v835_v12  ;;  %v844_v17 = vmul.f32 0.5, %v843_v24  ;;  %11337 = vrsqrt.f32 %v12887_v61  ;;  %vm868_vm8 = vweird.f32 %v12867_v14 }
 0x180   : > { %v830_v33 = vsel %vm829_vm14, %v12802_v20, %v826_v1  ;;  %v854_v62 = vmul.f32 0.5, %v853_v30  ;;  %v12919_v44 = vadd.f32 1e-05, %v640_v51  ;;  %vm12922_vm12 = vmor %vm867_vm11, %vm868_vm8  ;;  %vm897_vm14 = vweird.f32 %v12887_v61 }
 0x181   : > { %v840_v49 = vsel %vm839_vm1, %v12807_v45, %v836_v16  ;;  %v1015_v34 = vmul.f32 %v830_v33, %v12315_v13  ;;  %v845_v55 = vsub.f32 1.5, %v844_v17  ;;  %v12870_v45 = vpop.eup %11333  ;;  %vm887_vm3 = vweird.f32 %v12884_v36 }
 0x182   : > { %v1016_v56 = vmul.f32 %v840_v49, %v12288_v52  ;;  %v855_v35 = vsub.f32 1.5, %v854_v62  ;;  %v862_v52 = vmul.f32 %v12867_v14, %v12854_v0  ;;  %v872_v40 = vmul.f32 %v12870_v45, %v12858_v22  ;;  %v12896_v2 = vpop.eup %11335 }
 0x183   : > { %10649 = vmatmul.msk.bf16.gmra.mxu3 %vm321_vm0, %v1113_v18  ;;  %v1048_v20 = vmul.f32 %v12462_v50, %v1015_v34  ;;  %v846_v25 = vmul.f32 %v11328_v43, %v845_v55  ;;  %v882_v12 = vmul.f32 %v12896_v2, %v12884_v36  ;;  %vm878_vm10 = vweird.f32 %v12870_v45 }
 0x184   : > { %v1049_v27 = vmul.f32 %v12462_v50, %v1016_v56  ;;  %v856_v31 = vmul.f32 %v11330_v3, %v855_v35  ;;  %v863_v18 = vmul.f32 %v12867_v14, %v862_v52  ;;  %v873_v60 = vmul.f32 %v12870_v45, %v872_v40  ;;  %vm879_vm13 = vmor %vm877_vm9, %vm878_vm10  ;;  %v18638_v35 = vld [vmem:[#allocation10_spill] sm:$0xff] }
 0x185   : > { %v1081_v13 = vadd.f32 %v12480_v58, %v1048_v20  ;;  %v850_v7 = vsel %vm849_vm6, %v11328_v43, %v846_v25  ;;  %v12901_v63 = vpop.eup %11337  ;;  %v883_v48 = vmul.f32 %v12896_v2, %v882_v12  ;;  %11339 = vrsqrt.f32 %v12919_v44 }
 0x186   : > { %v1082_v15 = vadd.f32 %v12480_v58, %v1049_v27  ;;  %v860_v19 = vsel %vm859_vm7, %v11330_v3, %v856_v31  ;;  %v1017_v47 = vmul.f32 %v850_v7, %v12309_v10  ;;  %v864_v26 = vmul.f32 0.5, %v863_v18 }
 0x187   : > { %v1018_v38 = vmul.f32 %v860_v19, %v12306_v9  ;;  %v874_v37 = vmul.f32 0.5, %v873_v60  ;;  %v639_v10 = vmul.f32 %v12547_v11, %v12197_v5  ;;  %v892_v53 = vmul.f32 %v12901_v63, %v12887_v61  ;;  %v18641_v61 = vld [vmem:[#allocation4_spill] sm:$0xff] }
 0x188   : > { %v1106_v46 = vpack.c.bf16 %v1082_v15, %v1081_v13  ;;  %v1050_v28 = vmul.f32 %v12462_v50, %v1017_v47  ;;  %v865_v54 = vsub.f32 1.5, %v864_v26  ;;  %v884_v49 = vmul.f32 0.5, %v883_v48 }
 0x189   : > { %v1051_v6 = vmul.f32 %v12462_v50, %v1018_v38  ;;  %v875_v59 = vsub.f32 1.5, %v874_v37  ;;  %v12926_v8 = vadd.f32 1e-05, %v639_v10  ;;  %v893_v33 = vmul.f32 %v12901_v63, %v892_v53 }
 0x18a   : > { %v1083_v9 = vadd.f32 %v12480_v58, %v1050_v28  ;;  %v866_v4 = vmul.f32 %v12867_v14, %v865_v54  ;;  %v885_v62 = vsub.f32 1.5, %v884_v49  ;;  %vm898_vm15 = vweird.f32 %v12901_v63  ;;  %v18642_v54 = vld [vmem:[#allocation3_spill] sm:$0xff] }
 0x18b   : > { %v1084_v29 = vadd.f32 %v12480_v58, %v1051_v6  ;;  %v876_v11 = vmul.f32 %v12870_v45, %v875_v59  ;;  %11341 = vrsqrt.f32 %v12926_v8  ;;  %v894_v34 = vmul.f32 0.5, %v893_v33  ;;  %v12948_v56 = vpop.eup %11339  ;;  %vm12974_vm2 = vmor %vm897_vm14, %vm898_vm15 }
 0x18c   : > { %v870_v16 = vsel %vm12922_vm12, %v12867_v14, %v866_v4  ;;  %v886_v25 = vmul.f32 %v12896_v2, %v885_v62  ;;  %vm888_vm1 = vweird.f32 %v12896_v2  ;;  %vm917_vm5 = vweird.f32 %v12919_v44  ;;  %v18646_v62 = vld [vmem:[#allocation6_spill] sm:$0xff] }
 0x18d   : > { %10641 = vmatmul.msk.bf16.gmra.mxu0 %vm321_vm0, %v1105_v32  ;;  %v1107_v42 = vpack.c.bf16 %v1084_v29, %v1083_v9  ;;  %v598_v32 = vpop.xlane.xlu2 %597  ;;  %v880_v24 = vsel %vm879_vm13, %v12870_v45, %v876_v11  ;;  %v1019_v22 = vmul.f32 %v870_v16, %v12330_v41  ;;  %v895_v27 = vsub.f32 1.5, %v894_v34  ;;  %vm889_vm4 = vmor %vm887_vm3, %vm888_vm1  ;;  %v18645_v34 = vld [vmem:[#allocation5_spill] sm:$0xff] }
 0x18e   : > { %v1020_v30 = vmul.f32 %v880_v24, %v12327_v39  ;;  %v641_v41 = vmul.f32 %v18638_v35, %v12197_v5  ;;  %v912_v39 = vmul.f32 %v12948_v56, %v12919_v44  ;;  %v642_v23 = vmul.f32 %v598_v32, %v12197_v5 }
 0x18f   : > { %v1052_v17 = vmul.f32 %v12462_v50, %v1019_v22  ;;  %v896_v31 = vmul.f32 %v12901_v63, %v895_v27  ;;  %v890_v19 = vsel %vm889_vm4, %v12896_v2, %v886_v25  ;;  %vm918_vm6 = vweird.f32 %v12948_v56 }
 0x190   : > { %v1053_v14 = vmul.f32 %v12462_v50, %v1020_v30  ;;  %v913_v18 = vmul.f32 %v12948_v56, %v912_v39  ;;  %v12985_v47 = vadd.f32 1e-05, %v641_v41  ;;  %v1021_v26 = vmul.f32 %v890_v19, %v18641_v61  ;;  %vm13013_vm9 = vmor %vm917_vm5, %vm918_vm6 }
 0x191   : > { %v12950_v20 = vpop.eup %11341  ;;  %v1085_v13 = vadd.f32 %v12480_v58, %v1052_v17  ;;  %v900_v36 = vsel %vm12974_vm2, %v12901_v63, %v896_v31  ;;  %vm907_vm7 = vweird.f32 %v12926_v8 }
 0x192   : > { %v902_v52 = vmul.f32 %v12950_v20, %v12926_v8  ;;  %v1086_v15 = vadd.f32 %v12480_v58, %v1053_v14  ;;  %v914_v37 = vmul.f32 0.5, %v913_v18  ;;  %v1022_v2 = vmul.f32 %v900_v36, %v18642_v54 }
 0x193   : > { %v1054_v59 = vmul.f32 %v12462_v50, %v1021_v26  ;;  %vm908_vm8 = vweird.f32 %v12950_v20  ;;  %vm927_vm1 = vweird.f32 %v12985_v47  ;;  %v11927_v26 = vld [vmem:[%s18422_s1] ss:$0 sm:$0xff] }
 0x194   : > { %v1108_v7 = vpack.c.bf16 %v1086_v15, %v1085_v13  ;;  %v903_v60 = vmul.f32 %v12950_v20, %v902_v52  ;;  %v915_v51 = vsub.f32 1.5, %v914_v37  ;;  %vm909_vm10 = vmor %vm907_vm7, %vm908_vm8  ;;  %vm1310_vm8 = vcmask 64512  }
 0x195   : > { %v1087_v11 = vadd.f32 %v12480_v58, %v1054_v59 }
 0x196   : > { %v904_v28 = vmul.f32 0.5, %v903_v60  ;;  %v916_v53 = vmul.f32 %v12948_v56, %v915_v51  ;;  %v11928_v51 = vld [vmem:[%s18422_s1 + $0x1] ss:$0 sm:$0xff] }
 0x198   : > { %v905_v10 = vsub.f32 1.5, %v904_v28  ;;  %v920_v24 = vsel %vm13013_vm9, %v12948_v56, %v916_v53  ;;  %v18651_v28 = vld [vmem:[#allocation8_spill] sm:$0xff] }
 0x19d   : > { %10642 = vmatmul.msk.bf16.gmra.mxu0 %vm321_vm0, %v1106_v46  ;;  %v12980_v46 = vadd.f32 1e-05, %v642_v23 }
 0x19f   : > { %vm937_vm14 = vweird.f32 %v12980_v46 }
 0x1a6   : > { %v1188_v43 = vpop.f32.mrf.mxu0 }
 0x1a7   : > { %v12910_v3 = vpack.c.bf16 %v1188_v43, %v1188_v43  ;;  %v1055_v43 = vmul.f32 %v12462_v50, %v1022_v2 }
 0x1a9   : > { %v1306_v57 = vunpack.c.l.b16 %v12910_v3  ;;  %v1088_v16 = vadd.f32 %v12480_v58, %v1055_v43 }
 0x1ab   : > { %v12932_v0 = vpack.c.b16 %v1306_v57, %v1306_v57  ;;  %v906_v57 = vmul.f32 %v12950_v20, %v905_v10  ;;  %v1109_v32 = vpack.c.bf16 %v1088_v16, %v1087_v11 }
 0x1ad   : > { %18637 = vst [vmem:[#allocation12_spill] sm:$0xff] %v12932_v0  ;;  %10643 = vmatmul.msk.bf16.gmra.mxu0 %vm321_vm0, %v1107_v42  ;;  %3167 = vrot.lane.b32.xlu0 %v12932_v0, %s11975_s16  ;;  %v910_v33 = vsel %vm909_vm10, %v12950_v20, %v906_v57  ;;  %vm2497_vm10 = vcmask 1043456  }
 0x1ae   : > { %2492 = vrot.lane.b32.xlu2 %v12932_v0, %s11976_s17  ;;  %1308 = vrot.lane.b32.xlu1 %v12932_v0, %s11977_s18  ;;  %v1023_v17 = vmul.f32 %v910_v33, %v18645_v34 }
 0x1b5   : > { %v613_v55 = vpop.xlane.xlu2 %612 }
 0x1b6   : > { %v647_v45 = vmul.f32 %v613_v55, %v12197_v5  ;;  %3165 = vrot.lane.b32.xlu1 %v12932_v0, %s11978_s19  ;;  %v1024_v55 = vmul.f32 %v920_v24, %v18646_v62 }
 0x1b8   : > { %v12968_v21 = vadd.f32 1e-05, %v647_v45  ;;  %v1056_v45 = vmul.f32 %v12462_v50, %v1023_v17  ;;  %v1057_v39 = vmul.f32 %v12462_v50, %v1024_v55 }
 0x1ba   : > { %11343 = vrsqrt.f32 %v12968_v21  ;;  %vm987_vm11 = vweird.f32 %v12968_v21  ;;  %v1089_v15 = vadd.f32 %v12480_v58, %v1056_v45  ;;  %v1090_v50 = vadd.f32 %v12480_v58, %v1057_v39  ;;  %v18650_v58 = vld [vmem:[#allocation11_spill] sm:$0xff] }
 0x1bb   : > { %11345 = vrsqrt.f32 %v12980_v46 }
 0x1bc   : > { %11347 = vrsqrt.f32 %v12985_v47  ;;  %v1110_v60 = vpack.c.bf16 %v1090_v50, %v1089_v15 }
 0x1bd   : > { %10644 = vmatmul.msk.bf16.gmra.mxu0 %vm321_vm0, %v1108_v7 }
 0x1c0   : > { %v12993_v38 = vpop.eup %11343 }
 0x1c1   : > { %v982_v6 = vmul.f32 %v12993_v38, %v12968_v21  ;;  %v13000_v63 = vpop.eup %11345  ;;  %vm988_vm12 = vweird.f32 %v12993_v38 }
 0x1c2   : > { %v13005_v9 = vpop.eup %11347  ;;  %v932_v1 = vmul.f32 %v13000_v63, %v12980_v46  ;;  %vm13035_vm13 = vmor %vm987_vm11, %vm988_vm12  ;;  %vm938_vm15 = vweird.f32 %v13000_v63  ;;  %v18649_v46 = vld [vmem:[#allocation9_spill] sm:$0xff]  ;;  %vm9086_vm11 = vcmask 195584   ;;  %vm9053_vm12 = vcmask 130048  }
 0x1c3   : > { %v983_v4 = vmul.f32 %v12993_v38, %v982_v6  ;;  %v922_v8 = vmul.f32 %v13005_v9, %v12985_v47  ;;  %vm928_vm2 = vweird.f32 %v13005_v9  ;;  %vm939_vm4 = vmor %vm937_vm14, %vm938_vm15  ;;  %v18652_v6 = vld [vmem:[#allocation7_spill] sm:$0xff] }
 0x1c4   : > { %v933_v22 = vmul.f32 %v13000_v63, %v932_v1  ;;  %vm929_vm5 = vmor %vm927_vm1, %vm928_vm2 }
 0x1c5   : > { %v984_v48 = vmul.f32 0.5, %v983_v4  ;;  %v923_v49 = vmul.f32 %v13005_v9, %v922_v8 }
 0x1c6   : > { %v616_v12 = vpop.xlane.xlu0 %615  ;;  %v934_v14 = vmul.f32 0.5, %v933_v22 }
 0x1c7   : > { %v648_v29 = vmul.f32 %v616_v12, %v12197_v5  ;;  %v985_v30 = vsub.f32 1.5, %v984_v48  ;;  %v924_v56 = vmul.f32 0.5, %v923_v49 }
 0x1c8   : > { %v935_v23 = vsub.f32 1.5, %v934_v14 }
 0x1c9   : > { %v680_v42 = vadd.f32 1e-05, %v648_v29  ;;  %v986_v20 = vmul.f32 %v12993_v38, %v985_v30  ;;  %v925_v25 = vsub.f32 1.5, %v924_v56  ;;  %v1190_v29 = vpop.f32.mrf.mxu0 }
 0x1ca   : > { %v936_v31 = vmul.f32 %v13000_v63, %v935_v23 }
 0x1cb   : > { %11349 = vrsqrt.f32 %v680_v42  ;;  %v990_v52 = vsel %vm13035_vm13, %v12993_v38, %v986_v20  ;;  %v926_v18 = vmul.f32 %v13005_v9, %v925_v25  ;;  %vm997_vm6 = vweird.f32 %v680_v42 }
 0x1cc   : > { %v1031_v7 = vmul.f32 %v990_v52, %v18649_v46  ;;  %v940_v47 = vsel %vm939_vm4, %v13000_v63, %v936_v31 }
 0x1cd   : > { %10645 = vmatmul.msk.bf16.gmra.mxu0 %vm321_vm0, %v1109_v32  ;;  %v930_v37 = vsel %vm929_vm5, %v13005_v9, %v926_v18  ;;  %v1026_v54 = vmul.f32 %v940_v47, %v18651_v28 }
 0x1ce   : > { %v1064_v38 = vmul.f32 %v11927_v26, %v1031_v7  ;;  %v1025_v59 = vmul.f32 %v930_v37, %v18652_v6 }
 0x1cf   : > { %v1059_v4 = vmul.f32 %v11927_v26, %v1026_v54 }
 0x1d0   : > { %v1097_v10 = vadd.f32 %v11928_v51, %v1064_v38  ;;  %v1058_v12 = vmul.f32 %v11927_v26, %v1025_v59 }
 0x1d1   : > { %v11350_v27 = vpop.eup %11349  ;;  %v1092_v11 = vadd.f32 %v11928_v51, %v1059_v4  ;;  %v1193_v1 = vpop.f32.mrf.mxu0 }
 0x1d2   : > { %v992_v35 = vmul.f32 %v11350_v27, %v680_v42  ;;  %vm998_vm3 = vweird.f32 %v11350_v27  ;;  %v1091_v53 = vadd.f32 %v11928_v51, %v1058_v12  ;;  %v13070_v42 = vpack.c.bf16 %v1190_v29, %v1190_v29 }
 0x1d3   : > { %vm999_vm7 = vmor %vm997_vm6, %vm998_vm3  ;;  %v13072_v16 = vpack.c.bf16 %v1193_v1, %v1193_v1 }
 0x1d4   : > { %v993_v13 = vmul.f32 %v11350_v27, %v992_v35  ;;  %v1111_v9 = vpack.c.bf16 %v1092_v11, %v1091_v53  ;;  %v1331_v24 = vunpack.c.l.b16 %v13070_v42 }
 0x1d5   : > { %v1355_v33 = vunpack.c.l.b16 %v13072_v16 }
 0x1d6   : > { %v994_v21 = vmul.f32 0.5, %v993_v13  ;;  %v13084_v22 = vpack.c.b16 %v1331_v24, %v1331_v24 }
 0x1d7   : > { %v13086_v49 = vpack.c.b16 %v1355_v33, %v1355_v33 }
 0x1d8   : > { %v995_v40 = vsub.f32 1.5, %v994_v21  ;;  %18654 = vst [vmem:[#allocation4_spill] sm:$0xff] %v13084_v22 }
 0x1d9   : > { %18655 = vst [vmem:[#allocation3_spill] sm:$0xff] %v13086_v49  ;;  %v1195_v30 = vpop.f32.mrf.mxu0 }
 0x1da   : > { %v996_v19 = vmul.f32 %v11350_v27, %v995_v40  ;;  %v13119_v39 = vpack.c.bf16 %v1195_v30, %v1195_v30 }
 0x1dc   : > { %v1000_v36 = vsel %vm999_vm7, %v11350_v27, %v996_v19  ;;  %v1379_v25 = vunpack.c.l.b16 %v13119_v39 }
 0x1dd   : > { %10646 = vmatmul.msk.bf16.gmra.mxu0 %vm321_vm0, %v1110_v60  ;;  %v1032_v61 = vmul.f32 %v1000_v36, %v18650_v58 }
 0x1de   : > { %v13133_v21 = vpack.c.b16 %v1379_v25, %v1379_v25 }
 0x1df   : > { %v1065_v2 = vmul.f32 %v11927_v26, %v1032_v61 }
 0x1e0   : > { %18659 = vst [vmem:[#allocation11_spill] sm:$0xff] %v13133_v21 }
 0x1e1   : > { %v1098_v63 = vadd.f32 %v11928_v51, %v1065_v2  ;;  %v1198_v55 = vpop.f32.mrf.mxu0 }
 0x1e2   : > { %v13106_v56 = vpack.c.bf16 %v1198_v55, %v1198_v55 }
 0x1e3   : > { %v1114_v43 = vpack.c.bf16 %v1098_v63, %v1097_v10 }
 0x1e4   : > { %v1403_v41 = vunpack.c.l.b16 %v13106_v56 }
 0x1e5   : > { %10650 = vmatmul.msk.bf16.gmra.mxu3 %vm321_vm0, %v1114_v43 }
 0x1e6   : > { %v13121_v23 = vpack.c.b16 %v1403_v41, %v1403_v41 }
 0x1e8   : > { %18658 = vst [vmem:[#allocation9_spill] sm:$0xff] %v13121_v23 }
 0x1e9   : > { %v1200_v45 = vpop.f32.mrf.mxu0 }
 0x1ea   : > { %v13123_v13 = vpack.c.bf16 %v1200_v45, %v1200_v45 }
 0x1ec   : > { %v1427_v52 = vunpack.c.l.b16 %v13123_v13 }
 0x1ed   : > { %10647 = vmatmul.msk.bf16.gmra.mxu0 %vm321_vm0, %v1111_v9 }
 0x1ee   : > { %v13135_v15 = vpack.c.b16 %v1427_v52, %v1427_v52 }
 0x1f0   : > { %18660 = vst [vmem:[#allocation8_spill] sm:$0xff] %v13135_v15 }
 0x1f1   : > { %v1203_v19 = vpop.f32.mrf.mxu0 }
 0x1f6   : > { %v1253_v44 = vpop.f32.mrf.mxu3 }
 0x1f7   : > { %v13067_v57 = vpack.c.bf16 %v1253_v44, %v1253_v44 }
 0x1f9   : > { %v1931_v8 = vunpack.c.l.b16 %v13067_v57  ;;  %v1205_v58 = vpop.f32.mrf.mxu0 }
 0x1fa   : > { %v13180_v61 = vpack.c.bf16 %v1205_v58, %v1205_v58 }
 0x1fb   : > { %v13074_v48 = vpack.c.b16 %v1931_v8, %v1931_v8 }
 0x1fc   : > { %v1475_v37 = vunpack.c.l.b16 %v13180_v61 }
 0x1fd   : > { %18653 = vst [vmem:[#allocation10_spill] sm:$0xff] %v13074_v48  ;;  %3765 = vrot.lane.b32.xlu1 %v13074_v48, %s11975_s16  ;;  %3039 = vrot.lane.b32.xlu2 %v13074_v48, %s11976_s17 }
 0x1fe   : > { %1933 = vrot.lane.b32.xlu0 %v13074_v48, %s11977_s18  ;;  %v1255_v32 = vpop.f32.mrf.mxu3  ;;  %v13193_v54 = vpack.c.b16 %v1475_v37, %v1475_v37 }
 0x1ff   : > { %v13094_v17 = vpack.c.bf16 %v1255_v32, %v1255_v32 }
 0x200   : > { %18666 = vst [vmem:[#allocation17_spill] sm:$0xff] %v13193_v54 }
 0x201   : > { %v1955_v14 = vunpack.c.l.b16 %v13094_v17  ;;  %v1208_v63 = vpop.f32.mrf.mxu0 }
 0x202   : > { %v13208_v12 = vpack.c.bf16 %v1208_v63, %v1208_v63 }
 0x203   : > { %v13108_v20 = vpack.c.b16 %v1955_v14, %v1955_v14  ;;  %v13239_v14 = vpack.c.bf16 %v1203_v19, %v1203_v19 }
 0x204   : > { %v1499_v1 = vunpack.c.l.b16 %v13208_v12 }
 0x205   : > { %2535 = vrot.lane.b32.xlu1 %v13086_v49, %s11976_s17  ;;  %1333 = vrot.lane.b32.xlu2 %v13084_v22, %s11977_s18  ;;  %18656 = vst [vmem:[#allocation5_spill] sm:$0xff] %v13108_v20  ;;  %v1451_v41 = vunpack.c.l.b16 %v13239_v14 }
 0x206   : > { %3763 = vrot.lane.b32.xlu0 %v13074_v48, %s11978_s19  ;;  %v1258_v34 = vpop.f32.mrf.mxu3  ;;  %v13226_v32 = vpack.c.b16 %v1499_v1, %v1499_v1 }
 0x207   : > { %v13096_v62 = vpack.c.bf16 %v1258_v34, %v1258_v34  ;;  %v13254_v52 = vpack.c.b16 %v1451_v41, %v1451_v41 }
 0x208   : > { %18672 = vst [vmem:[#allocation23_spill] sm:$0xff] %v13226_v32 }
 0x209   : > { %v1979_v27 = vunpack.c.l.b16 %v13096_v62  ;;  %v1210_v24 = vpop.f32.mrf.mxu0  ;;  %18675 = vst [vmem:[#allocation26_spill] sm:$0xff] %v13254_v52 }
 0x20b   : > { %v13110_v35 = vpack.c.b16 %v1979_v27, %v1979_v27 }
 0x20d   : > { %3213 = vrot.lane.b32.xlu1 %v13086_v49, %s11975_s16  ;;  %3190 = vrot.lane.b32.xlu2 %v13084_v22, %s11975_s16  ;;  %18657 = vst [vmem:[#allocation6_spill] sm:$0xff] %v13110_v35 }
 0x20e   : > { %2514 = vrot.lane.b32.xlu0 %v13084_v22, %s11976_s17  ;;  %v1260_v40 = vpop.f32.mrf.mxu3 }
 0x20f   : > { %v13150_v46 = vpack.c.bf16 %v1260_v40, %v1260_v40 }
 0x211   : > { %v2003_v7 = vunpack.c.l.b16 %v13150_v46  ;;  %v1213_v25 = vpop.f32.mrf.mxu0 }
 0x212   : > { %v13280_v58 = vpack.c.bf16 %v1213_v25, %v1213_v25 }
 0x213   : > { %v13157_v18 = vpack.c.b16 %v2003_v7, %v2003_v7 }
 0x215   : > { %1957 = vrot.lane.b32.xlu2 %v13108_v20, %s11977_s18  ;;  %1981 = vrot.lane.b32.xlu1 %v13110_v35, %s11977_s18  ;;  %18661 = vst [vmem:[#allocation7_spill] sm:$0xff] %v13157_v18 }
 0x216   : > { %3188 = vrot.lane.b32.xlu0 %v13084_v22, %s11978_s19 }
 0x219   : > { %v1215_v19 = vpop.f32.mrf.mxu0 }
 0x21a   : > { %v13294_v1 = vpack.c.bf16 %v1215_v19, %v1215_v19 }
 0x21d   : > { %3786 = vrot.lane.b32.xlu2 %v13108_v20, %s11978_s19  ;;  %1405 = vrot.lane.b32.xlu1 %v13121_v23, %s11977_s18 }
 0x21e   : > { %3060 = vrot.lane.b32.xlu0 %v13108_v20, %s11976_s17 }
 0x21f   : > { %v13189_v28 = vpop.permute.xlu0 %3167 }
 0x220   : > { %v1309_v50 = vpop.permute.xlu1 %1308  ;;  %18665 = vst [vmem:[#allocation16_spill] sm:$0xff] %v13189_v28 }
 0x221   : > { %v1315_v31 = vsel %vm1310_vm8, %v1309_v50, 0  ;;  %v13256_v50 = vpack.c.bf16 %v1210_v24, %v1210_v24  ;;  %v1218_v37 = vpop.f32.mrf.mxu0 }
 0x222   : > { %1324 = vmatpush.bf16.xpose.msrb.mxu3 %v1315_v31 }
 0x225   : > { %1381 = vrot.lane.b32.xlu2 %v13133_v21, %s11977_s18  ;;  %3280 = vrot.lane.b32.xlu1 %v13135_v15, %s11978_s19 }
 0x226   : > { %3788 = vrot.lane.b32.xlu0 %v13108_v20, %s11975_s16  ;;  %v13351_v20 = vpack.c.bf16 %v1218_v37, %v1218_v37 }
 0x228   : > { %v13184_v26 = vpop.permute.xlu1 %3165 }
 0x229   : > { %10651 = vmatmul.msk.bf16.vlgmr.msrb.gmra.mxu3 %vm1310_vm8, %v12910_v3  ;;  %v13171_v3 = vpop.permute.xlu2 %2492  ;;  %18663 = vst [vmem:[#allocation14_spill] sm:$0xff] %v13184_v26 }
 0x22d   : > { %3236 = vrot.lane.b32.xlu2 %v13133_v21, %s11975_s16 }
 0x22e   : > { %1357 = vrot.lane.b32.xlu0 %v13086_v49, %s11977_s18 }
 0x235   : > { %3234 = vrot.lane.b32.xlu2 %v13133_v21, %s11978_s19 }
 0x236   : > { %3211 = vrot.lane.b32.xlu0 %v13086_v49, %s11978_s19 }
 0x23d   : > { %3102 = vrot.lane.b32.xlu2 %v13157_v18, %s11976_s17 }
 0x23e   : > { %3081 = vrot.lane.b32.xlu0 %v13110_v35, %s11976_s17 }
 0x245   : > { %2577 = vrot.lane.b32.xlu2 %v13121_v23, %s11976_s17 }
 0x246   : > { %3811 = vrot.lane.b32.xlu0 %v13110_v35, %s11975_s16 }
 0x24d   : > { %3257 = vrot.lane.b32.xlu2 %v13121_v23, %s11978_s19 }
 0x24e   : > { %2556 = vrot.lane.b32.xlu0 %v13133_v21, %s11976_s17 }
 0x256   : > { %2005 = vrot.lane.b32.xlu0 %v13157_v18, %s11977_s18 }
 0x257   : > { %v13175_v60 = vpop.permute.xlu2 %3039 }
 0x258   : > { %18662 = vst [vmem:[#allocation13_spill] sm:$0xff] %v13175_v60 }
 0x25e   : > { %3259 = vrot.lane.b32.xlu0 %v13121_v23, %s11975_s16 }
 0x25f   : > { %v1334_v47 = vpop.permute.xlu2 %1333 }
 0x260   : > { %v1339_v36 = vsel %vm1310_vm8, %v1334_v47, 0 }
 0x261   : > { %1348 = vmatpush.bf16.xpose.msra.mxu2 %v1339_v36 }
 0x266   : > { %1429 = vrot.lane.b32.xlu0 %v13135_v15, %s11977_s18 }
 0x267   : > { %v13186_v38 = vpop.permute.xlu2 %3190 }
 0x268   : > { %18664 = vst [vmem:[#allocation15_spill] sm:$0xff] %v13186_v38  ;;  %10652 = vmatmul.msk.bf16.vlgmr.msra.gmra.mxu2 %vm1310_vm8, %v13070_v42  ;;  %v1263_v2 = vpop.f32.mrf.mxu3 }
 0x269   : > { %v13199_v59 = vpack.c.bf16 %v1263_v2, %v1263_v2 }
 0x26b   : > { %v2027_v43 = vunpack.c.l.b16 %v13199_v59 }
 0x26d   : > { %v13206_v4 = vpack.c.b16 %v2027_v43, %v2027_v43  ;;  %v1547_v43 = vunpack.c.l.b16 %v13280_v58 }
 0x26e   : > { %2640 = vrot.lane.b32.xlu0 %v13193_v54, %s11976_s17 }
 0x26f   : > { %v13197_v6 = vpop.permute.xlu1 %3765  ;;  %v13201_v51 = vpop.permute.xlu2 %1957  ;;  %18668 = vst [vmem:[#allocation19_spill] sm:$0xff] %v13206_v4  ;;  %2029 = vrot.lane.b32.xlu2 %v13206_v4, %s11977_s18 }
 0x270   : > { %18667 = vst [vmem:[#allocation18_spill] sm:$0xff] %v13197_v6  ;;  %v13203_v10 = vpop.permute.xlu0 %1933  ;;  %v1265_v29 = vpop.f32.mrf.mxu3 }
 0x271   : > { %v13216_v53 = vpack.c.bf16 %v1265_v29, %v1265_v29 }
 0x273   : > { %v2051_v8 = vunpack.c.l.b16 %v13216_v53 }
 0x275   : > { %v13224_v42 = vpack.c.b16 %v2051_v8, %v2051_v8  ;;  %v1220_v8 = vpop.f32.mrf.mxu0 }
 0x276   : > { %3326 = vrot.lane.b32.xlu0 %v13193_v54, %s11978_s19  ;;  %v13311_v25 = vpack.c.bf16 %v1220_v8, %v1220_v8 }
 0x277   : > { %v13214_v11 = vpop.permute.xlu1 %2535  ;;  %v13218_v9 = vpop.permute.xlu2 %3786  ;;  %18671 = vst [vmem:[#allocation22_spill] sm:$0xff] %v13224_v42  ;;  %3123 = vrot.lane.b32.xlu2 %v13206_v4, %s11976_s17  ;;  %2053 = vrot.lane.b32.xlu1 %v13224_v42, %s11977_s18 }
 0x278   : > { %18669 = vst [vmem:[#allocation20_spill] sm:$0xff] %v13218_v9  ;;  %v13220_v44 = vpop.permute.xlu0 %3763 }
 0x279   : > { %18670 = vst [vmem:[#allocation21_spill] sm:$0xff] %v13220_v44 }
 0x27e   : > { %1501 = vrot.lane.b32.xlu0 %v13226_v32, %s11977_s18 }
 0x27f   : > { %v13234_v33 = vpop.permute.xlu1 %3213  ;;  %v1382_v30 = vpop.permute.xlu2 %1381  ;;  %3857 = vrot.lane.b32.xlu2 %v13206_v4, %s11975_s16  ;;  %3880 = vrot.lane.b32.xlu1 %v13224_v42, %s11975_s16 }
 0x280   : > { %18673 = vst [vmem:[#allocation24_spill] sm:$0xff] %v13234_v33  ;;  %v13236_v34 = vpop.permute.xlu0 %2514  ;;  %v1387_v55 = vsel %vm1310_vm8, %v1382_v30, 0  ;;  %v1571_v30 = vunpack.c.l.b16 %v13294_v1 }
 0x281   : > { %1396 = vmatpush.bf16.xpose.msra.mxu1 %v1387_v55 }
 0x282   : > { %v13309_v41 = vpack.c.b16 %v1571_v30, %v1571_v30 }
 0x284   : > { %18683 = vst [vmem:[#allocation34_spill] sm:$0xff] %v13309_v41 }
 0x286   : > { %2661 = vrot.lane.b32.xlu0 %v13226_v32, %s11976_s17 }
 0x287   : > { %v13247_v27 = vpop.permute.xlu1 %1981  ;;  %2598 = vrot.lane.b32.xlu2 %v13135_v15, %s11976_s17  ;;  %3303 = vrot.lane.b32.xlu1 %v13254_v52, %s11978_s19  ;;  %v13288_v2 = vpop.permute.xlu2 %3236 }
 0x288   : > { %v13250_v45 = vpop.permute.xlu0 %3188  ;;  %10654 = vmatmul.msk.bf16.vlgmr.msra.gmra.mxu1 %vm1310_vm8, %v13119_v39  ;;  %v1523_v39 = vunpack.c.l.b16 %v13256_v50  ;;  %18679 = vst [vmem:[#allocation30_spill] sm:$0xff] %v13288_v2 }
 0x289   : > { %18674 = vst [vmem:[#allocation25_spill] sm:$0xff] %v13250_v45 }
 0x28a   : > { %v13268_v47 = vpack.c.b16 %v1523_v39, %v1523_v39 }
 0x28c   : > { %18677 = vst [vmem:[#allocation28_spill] sm:$0xff] %v13268_v47 }
 0x28e   : > { %3349 = vrot.lane.b32.xlu0 %v13226_v32, %s11978_s19 }
 0x28f   : > { %v1406_v31 = vpop.permute.xlu1 %1405  ;;  %3282 = vrot.lane.b32.xlu2 %v13135_v15, %s11975_s16  ;;  %1477 = vrot.lane.b32.xlu1 %v13193_v54, %s11977_s18  ;;  %v13307_v55 = vpop.permute.xlu2 %3234 }
 0x290   : > { %v13264_v40 = vpop.permute.xlu0 %3060  ;;  %v1411_v7 = vsel %vm1310_vm8, %v1406_v31, 0  ;;  %18682 = vst [vmem:[#allocation33_spill] sm:$0xff] %v13307_v55 }
 0x291   : > { %18676 = vst [vmem:[#allocation27_spill] sm:$0xff] %v13264_v40  ;;  %1420 = vmatpush.bf16.xpose.msrb.mxu2 %v1411_v7  ;;  %v1619_v7 = vunpack.c.l.b16 %v13311_v25 }
 0x296   : > { %2682 = vrot.lane.b32.xlu0 %v13268_v47, %s11976_s17 }
 0x297   : > { %3144 = vrot.lane.b32.xlu2 %v13224_v42, %s11976_s17  ;;  %3328 = vrot.lane.b32.xlu1 %v13193_v54, %s11975_s16  ;;  %v13322_v39 = vpop.permute.xlu2 %3102  ;;  %v13413_v28 = vpop.permute.xlu1 %3280 }
 0x298   : > { %v13276_v36 = vpop.permute.xlu0 %3788  ;;  %10655 = vmatmul.msk.bf16.vlgmr.msrb.gmra.mxu2 %vm1310_vm8, %v13106_v56  ;;  %v13292_v56 = vpack.c.b16 %v1547_v43, %v1547_v43  ;;  %18685 = vst [vmem:[#allocation36_spill] sm:$0xff] %v13322_v39 }
 0x299   : > { %18678 = vst [vmem:[#allocation29_spill] sm:$0xff] %v13276_v36 }
 0x29a   : > { %18680 = vst [vmem:[#allocation31_spill] sm:$0xff] %v13292_v56 }
 0x29b   : > { %18696 = vst [vmem:[#allocation47_spill] sm:$0xff] %v13413_v28 }
 0x29e   : > { %3374 = vrot.lane.b32.xlu0 %v13268_v47, %s11975_s16 }
 0x29f   : > { %1453 = vrot.lane.b32.xlu2 %v13254_v52, %s11977_s18  ;;  %3351 = vrot.lane.b32.xlu1 %v13226_v32, %s11975_s16 }
 0x2a0   : > { %v1358_v63 = vpop.permute.xlu0 %1357 }
 0x2a1   : > { %v1363_v29 = vsel %vm1310_vm8, %v1358_v63, 0  ;;  %v13326_v63 = vpack.c.b16 %v1619_v7, %v1619_v7  ;;  %v13341_v7 = vpop.permute.xlu2 %2577 }
 0x2a2   : > { %1372 = vmatpush.bf16.xpose.msra.mxu3 %v1363_v29 }
 0x2a3   : > { %18686 = vst [vmem:[#allocation37_spill] sm:$0xff] %v13326_v63 }
 0x2a6   : > { %3397 = vrot.lane.b32.xlu0 %v13292_v56, %s11975_s16 }
 0x2a7   : > { %2619 = vrot.lane.b32.xlu2 %v13254_v52, %s11976_s17  ;;  %1549 = vrot.lane.b32.xlu1 %v13292_v56, %s11977_s18 }
 0x2a8   : > { %v13302_v24 = vpop.permute.xlu0 %3211 }
 0x2a9   : > { %18681 = vst [vmem:[#allocation32_spill] sm:$0xff] %v13302_v24  ;;  %10653 = vmatmul.msk.bf16.vlgmr.msra.gmra.mxu3 %vm1310_vm8, %v13072_v16  ;;  %v1223_v16 = vpop.f32.mrf.mxu0  ;;  %v13360_v44 = vpop.permute.xlu2 %3257 }
 0x2aa   : > { %v13328_v43 = vpack.c.bf16 %v1223_v16, %v1223_v16  ;;  %18689 = vst [vmem:[#allocation40_spill] sm:$0xff] %v13360_v44 }
 0x2ac   : > { %v13324_v19 = vpop.f32.mrf.mxu3  ;;  %v1643_v8 = vunpack.c.l.b16 %v13328_v43 }
 0x2ae   : > { %1573 = vrot.lane.b32.xlu0 %v13309_v41, %s11977_s18  ;;  %v13339_v5 = vpack.c.b16 %v1643_v8, %v1643_v8 }
 0x2af   : > { %3305 = vrot.lane.b32.xlu2 %v13254_v52, %s11975_s16  ;;  %2703 = vrot.lane.b32.xlu1 %v13292_v56, %s11976_s17 }
 0x2b0   : > { %v13319_v31 = vpop.permute.xlu0 %3081  ;;  %18688 = vst [vmem:[#allocation39_spill] sm:$0xff] %v13339_v5 }
 0x2b1   : > { %18684 = vst [vmem:[#allocation35_spill] sm:$0xff] %v13319_v31  ;;  %v1225_v8 = vpop.f32.mrf.mxu0 }
 0x2b2   : > { %v13366_v37 = vpack.c.bf16 %v1225_v8, %v1225_v8 }
 0x2b4   : > { %v1328_v30 = vpop.f32.mrf.mxu3  ;;  %v1667_v44 = vunpack.c.l.b16 %v13366_v37 }
 0x2b5   : > { %v1595_v30 = vunpack.c.l.b16 %v13351_v20 }
 0x2b6   : > { %3464 = vrot.lane.b32.xlu0 %v13326_v63, %s11978_s19 }
 0x2b7   : > { %1525 = vrot.lane.b32.xlu2 %v13268_v47, %s11977_s18  ;;  %2724 = vrot.lane.b32.xlu1 %v13309_v41, %s11976_s17 }
 0x2b8   : > { %v13336_v29 = vpop.permute.xlu0 %3811 }
 0x2b9   : > { %18687 = vst [vmem:[#allocation38_spill] sm:$0xff] %v13336_v29  ;;  %v13364_v29 = vpack.c.b16 %v1595_v30, %v1595_v30  ;;  %v1228_v24 = vpop.f32.mrf.mxu0  ;;  %v13379_v30 = vpack.c.b16 %v1667_v44, %v1667_v44 }
 0x2bb   : > { %18690 = vst [vmem:[#allocation41_spill] sm:$0xff] %v13364_v29 }
 0x2bc   : > { %18692 = vst [vmem:[#allocation43_spill] sm:$0xff] %v13379_v30 }
 0x2be   : > { %1645 = vrot.lane.b32.xlu0 %v13339_v5, %s11977_s18 }
 0x2bf   : > { %3372 = vrot.lane.b32.xlu2 %v13268_v47, %s11978_s19  ;;  %3418 = vrot.lane.b32.xlu1 %v13309_v41, %s11978_s19 }
 0x2c0   : > { %v13349_v16 = vpop.permute.xlu0 %2556 }
 0x2c1   : > { %v1230_v26 = vpop.f32.mrf.mxu0 }
 0x2c6   : > { %2787 = vrot.lane.b32.xlu0 %v13339_v5, %s11976_s17 }
 0x2c7   : > { %3395 = vrot.lane.b32.xlu2 %v13292_v56, %s11978_s19  ;;  %2745 = vrot.lane.b32.xlu1 %v13364_v29, %s11976_s17 }
 0x2c8   : > { %v13362_v9 = vpop.permute.xlu0 %2005 }
 0x2c9   : > { %v13374_v6 = vpop.permute.xlu2 %2029 }
 0x2ce   : > { %3487 = vrot.lane.b32.xlu0 %v13339_v5, %s11978_s19 }
 0x2cf   : > { %3420 = vrot.lane.b32.xlu2 %v13309_v41, %s11975_s16  ;;  %3441 = vrot.lane.b32.xlu1 %v13364_v29, %s11978_s19 }
 0x2d0   : > { %v13376_v36 = vpop.permute.xlu0 %3259 }
 0x2d1   : > { %18691 = vst [vmem:[#allocation42_spill] sm:$0xff] %v13376_v36  ;;  %v13387_v8 = vpop.permute.xlu2 %3123  ;;  %v13390_v36 = vpack.c.bf16 %v1228_v24, %v1228_v24  ;;  %v13407_v24 = vpack.c.bf16 %v1230_v26, %v1230_v26 }
 0x2d2   : > { %18693 = vst [vmem:[#allocation44_spill] sm:$0xff] %v13387_v8 }
 0x2d3   : > { %v1691_v2 = vunpack.c.l.b16 %v13390_v36 }
 0x2d6   : > { %2808 = vrot.lane.b32.xlu0 %v13379_v30, %s11976_s17 }
 0x2d7   : > { %1597 = vrot.lane.b32.xlu2 %v13364_v29, %s11977_s18  ;;  %1621 = vrot.lane.b32.xlu1 %v13326_v63, %s11977_s18 }
 0x2d8   : > { %v1430_v55 = vpop.permute.xlu0 %1429 }
 0x2d9   : > { %v1435_v45 = vsel %vm1310_vm8, %v1430_v55, 0  ;;  %v13398_v44 = vpop.permute.xlu2 %3857  ;;  %v1233_v55 = vpop.f32.mrf.mxu0 }
 0x2da   : > { %1444 = vmatpush.bf16.xpose.msrb.mxu3 %v1435_v45  ;;  %18694 = vst [vmem:[#allocation45_spill] sm:$0xff] %v13398_v44  ;;  %v13405_v45 = vpack.c.b16 %v1691_v2, %v1691_v2  ;;  %v13426_v38 = vpack.c.bf16 %v1233_v55, %v1233_v55 }
 0x2dc   : > { %18695 = vst [vmem:[#allocation46_spill] sm:$0xff] %v13405_v45  ;;  %v1739_v39 = vunpack.c.l.b16 %v13426_v38 }
 0x2de   : > { %3512 = vrot.lane.b32.xlu0 %v13379_v30, %s11975_s16  ;;  %v13440_v40 = vpack.c.b16 %v1739_v39, %v1739_v39 }
 0x2df   : > { %3443 = vrot.lane.b32.xlu2 %v13364_v29, %s11975_s16  ;;  %3466 = vrot.lane.b32.xlu1 %v13326_v63, %s11975_s16 }
 0x2e0   : > { %v13400_v33 = vpop.permute.xlu0 %2640  ;;  %18700 = vst [vmem:[#allocation51_spill] sm:$0xff] %v13440_v40 }
 0x2e1   : > { %10656 = vmatmul.msk.bf16.vlgmr.msrb.gmra.mxu3 %vm1310_vm8, %v13123_v13  ;;  %v13417_v44 = vpop.permute.xlu2 %2598  ;;  %v1715_v13 = vunpack.c.l.b16 %v13407_v24  ;;  %v1235_v28 = vpop.f32.mrf.mxu0 }
 0x2e3   : > { %v13424_v2 = vpack.c.b16 %v1715_v13, %v1715_v13 }
 0x2e5   : > { %18698 = vst [vmem:[#allocation49_spill] sm:$0xff] %v13424_v2 }
 0x2e6   : > { %3535 = vrot.lane.b32.xlu0 %v13405_v45, %s11975_s16 }
 0x2e7   : > { %2766 = vrot.lane.b32.xlu2 %v13326_v63, %s11976_s17  ;;  %3489 = vrot.lane.b32.xlu1 %v13339_v5, %s11975_s16  ;;  %v13442_v63 = vpack.c.bf16 %v1235_v28, %v1235_v28 }
 0x2e8   : > { %v13419_v8 = vpop.permute.xlu0 %3326 }
 0x2e9   : > { %18697 = vst [vmem:[#allocation48_spill] sm:$0xff] %v13419_v8  ;;  %v13434_v48 = vpop.permute.xlu2 %3282  ;;  %v13436_v8 = vpop.permute.xlu1 %2053 }
 0x2ea   : > { %18699 = vst [vmem:[#allocation50_spill] sm:$0xff] %v13434_v48  ;;  %v1238_v39 = vpop.f32.mrf.mxu0 }
 0x2eb   : > { %v13422_v26 = vpop.f32.mrf.mxu2 }
 0x2ee   : > { %1717 = vrot.lane.b32.xlu0 %v13424_v2, %s11977_s18 }
 0x2ef   : > { %1669 = vrot.lane.b32.xlu2 %v13379_v30, %s11977_s18  ;;  %1693 = vrot.lane.b32.xlu1 %v13405_v45, %s11977_s18 }
 0x2f0   : > { %v1502_v13 = vpop.permute.xlu0 %1501 }
 0x2f1   : > { %v1507_v55 = vsel %vm1310_vm8, %v1502_v13, 0  ;;  %v13450_v48 = vpop.permute.xlu2 %3144  ;;  %v13452_v5 = vpop.permute.xlu1 %3880  ;;  %v1763_v13 = vunpack.c.l.b16 %v13442_v63 }
 0x2f2   : > { %1516 = vmatpush.bf16.xpose.msra.mxu3 %v1507_v55  ;;  %18701 = vst [vmem:[#allocation52_spill] sm:$0xff] %v13450_v48  ;;  %v13461_v55 = vpack.c.bf16 %v1238_v39, %v1238_v39  ;;  %v1240_v29 = vpop.f32.mrf.mxu0 }
 0x2f3   : > { %v1352_v31 = vpop.f32.mrf.mxu2  ;;  %18702 = vst [vmem:[#allocation53_spill] sm:$0xff] %v13452_v5  ;;  %v13459_v28 = vpack.c.b16 %v1763_v13, %v1763_v13 }
 0x2f4   : > { %v1787_v60 = vunpack.c.l.b16 %v13461_v55 }
 0x2f5   : > { %18704 = vst [vmem:[#allocation55_spill] sm:$0xff] %v13459_v28 }
 0x2f6   : > { %2871 = vrot.lane.b32.xlu0 %v13440_v40, %s11976_s17  ;;  %v13475_v39 = vpack.c.b16 %v1787_v60, %v1787_v60 }
 0x2f7   : > { %3510 = vrot.lane.b32.xlu2 %v13379_v30, %s11978_s19  ;;  %2829 = vrot.lane.b32.xlu1 %v13405_v45, %s11976_s17 }
 0x2f8   : > { %v13455_v31 = vpop.permute.xlu0 %2661  ;;  %18707 = vst [vmem:[#allocation58_spill] sm:$0xff] %v13475_v39 }
 0x2f9   : > { %18703 = vst [vmem:[#allocation54_spill] sm:$0xff] %v13455_v31  ;;  %10659 = vmatmul.msk.bf16.vlgmr.msra.gmra.mxu3 %vm1310_vm8, %v13208_v12  ;;  %v1454_v5 = vpop.permute.xlu2 %1453  ;;  %v13469_v48 = vpop.permute.xlu1 %3303 }
 0x2fa   : > { %18705 = vst [vmem:[#allocation56_spill] sm:$0xff] %v13469_v48  ;;  %v1459_v12 = vsel %vm1310_vm8, %v1454_v5, 0  ;;  %v1243_v47 = vpop.f32.mrf.mxu0 }
 0x2fb   : > { %1468 = vmatpush.bf16.xpose.msrb.mxu1 %v1459_v12  ;;  %v13492_v12 = vpack.c.bf16 %v1240_v29, %v1240_v29  ;;  %v13511_v41 = vpack.c.bf16 %v1243_v47, %v1243_v47 }
 0x2fe   : > { %3602 = vrot.lane.b32.xlu0 %v13459_v28, %s11978_s19 }
 0x2ff   : > { %3533 = vrot.lane.b32.xlu2 %v13405_v45, %s11978_s19  ;;  %3556 = vrot.lane.b32.xlu1 %v13424_v2, %s11978_s19 }
 0x300   : > { %v13473_v13 = vpop.permute.xlu0 %3349 }
 0x301   : > { %18706 = vst [vmem:[#allocation57_spill] sm:$0xff] %v13473_v13  ;;  %v13485_v48 = vpop.permute.xlu2 %2619  ;;  %v1478_v5 = vpop.permute.xlu1 %1477 }
 0x302   : > { %v1483_v13 = vsel %vm1310_vm8, %v1478_v5, 0  ;;  %10657 = vmatmul.msk.bf16.vlgmr.msrb.gmra.mxu1 %vm1310_vm8, %v13239_v14  ;;  %v1811_v14 = vunpack.c.l.b16 %v13492_v12  ;;  %v1245_v47 = vpop.f32.mrf.mxu0 }
 0x303   : > { %1492 = vmatpush.bf16.xpose.msra.mxu2 %v1483_v13  ;;  %v13529_v32 = vpack.c.bf16 %v1245_v47, %v1245_v47 }
 0x304   : > { %v13509_v13 = vpack.c.b16 %v1811_v14, %v1811_v14 }
 0x305   : > { %v13481_v30 = vpop.f32.mrf.mxu1 }
 0x306   : > { %1789 = vrot.lane.b32.xlu0 %v13475_v39, %s11977_s18  ;;  %18712 = vst [vmem:[#allocation63_spill] sm:$0xff] %v13509_v13 }
 0x307   : > { %2850 = vrot.lane.b32.xlu2 %v13424_v2, %s11976_s17  ;;  %3579 = vrot.lane.b32.xlu1 %v13440_v40, %s11978_s19 }
 0x308   : > { %v13490_v60 = vpop.permute.xlu0 %2682 }
 0x309   : > { %18708 = vst [vmem:[#allocation59_spill] sm:$0xff] %v13490_v60  ;;  %v13500_v5 = vpop.permute.xlu2 %3305  ;;  %v13502_v56 = vpop.permute.xlu1 %3328 }
 0x30a   : > { %18709 = vst [vmem:[#allocation60_spill] sm:$0xff] %v13500_v5  ;;  %10658 = vmatmul.msk.bf16.vlgmr.msra.gmra.mxu2 %vm1310_vm8, %v13180_v61  ;;  %v1835_v61 = vunpack.c.l.b16 %v13511_v41 }
 0x30b   : > { %18710 = vst [vmem:[#allocation61_spill] sm:$0xff] %v13502_v56 }
 0x30d   : > { %v1400_v45 = vpop.f32.mrf.mxu1 }
 0x30e   : > { %3625 = vrot.lane.b32.xlu0 %v13475_v39, %s11978_s19 }
 0x30f   : > { %3558 = vrot.lane.b32.xlu2 %v13424_v2, %s11975_s16  ;;  %1765 = vrot.lane.b32.xlu1 %v13459_v28, %s11977_s18  ;;  %v13527_v2 = vpack.c.b16 %v1835_v61, %v1835_v61 }
 0x310   : > { %v13507_v29 = vpop.permute.xlu0 %3374 }
 0x311   : > { %18711 = vst [vmem:[#allocation62_spill] sm:$0xff] %v13507_v29  ;;  %v1526_v45 = vpop.permute.xlu2 %1525  ;;  %v13519_v5 = vpop.permute.xlu1 %3351 }
 0x312   : > { %18713 = vst [vmem:[#allocation64_spill] sm:$0xff] %v13519_v5  ;;  %v1531_v29 = vsel %vm1310_vm8, %v1526_v45, 0 }
 0x313   : > { %1540 = vmatpush.bf16.xpose.msra.mxu1 %v1531_v29  ;;  %18715 = vst [vmem:[#allocation66_spill] sm:$0xff] %v13527_v2  ;;  %v1859_v29 = vunpack.c.l.b16 %v13529_v32 }
 0x315   : > { %v13544_v60 = vpack.c.b16 %v1859_v29, %v1859_v29  ;;  %v1248_v29 = vpop.f32.mrf.mxu0 }
 0x316   : > { %3650 = vrot.lane.b32.xlu0 %v13509_v13, %s11975_s16 }
 0x317   : > { %1741 = vrot.lane.b32.xlu2 %v13440_v40, %s11977_s18  ;;  %2892 = vrot.lane.b32.xlu1 %v13459_v28, %s11976_s17  ;;  %18717 = vst [vmem:[#allocation68_spill] sm:$0xff] %v13544_v60 }
 0x318   : > { %v13523_v14 = vpop.permute.xlu0 %3397 }
 0x319   : > { %18714 = vst [vmem:[#allocation65_spill] sm:$0xff] %v13523_v14  ;;  %v13537_v45 = vpop.permute.xlu2 %3372  ;;  %v1550_v14 = vpop.permute.xlu1 %1549 }
 0x31a   : > { %18716 = vst [vmem:[#allocation67_spill] sm:$0xff] %v13537_v45  ;;  %v1555_v5 = vsel %vm1310_vm8, %v1550_v14, 0  ;;  %10660 = vmatmul.msk.bf16.vlgmr.msra.gmra.mxu1 %vm1310_vm8, %v13256_v50 }
 0x31b   : > { %v13525_v56 = vpop.f32.mrf.mxu2  ;;  %1564 = vmatpush.bf16.xpose.msrb.mxu2 %v1555_v5 }
 0x31e   : > { %3673 = vrot.lane.b32.xlu0 %v13527_v2, %s11975_s16 }
 0x31f   : > { %3581 = vrot.lane.b32.xlu2 %v13440_v40, %s11975_s16  ;;  %3604 = vrot.lane.b32.xlu1 %v13459_v28, %s11975_s16  ;;  %v1250_v28 = vpop.f32.mrf.mxu0 }
 0x320   : > { %v1574_v61 = vpop.permute.xlu0 %1573 }
 0x321   : > { %v1579_v47 = vsel %vm1310_vm8, %v1574_v61, 0  ;;  %v13552_v14 = vpop.permute.xlu2 %3395  ;;  %v13554_v50 = vpop.permute.xlu1 %2703 }
 0x322   : > { %1588 = vmatpush.bf16.xpose.msrb.mxu3 %v1579_v47  ;;  %18718 = vst [vmem:[#allocation69_spill] sm:$0xff] %v13552_v14  ;;  %10661 = vmatmul.msk.bf16.vlgmr.msrb.gmra.mxu2 %vm1310_vm8, %v13280_v58 }
 0x323   : > { %v1424_v31 = vpop.f32.mrf.mxu2 }
 0x326   : > { %1861 = vrot.lane.b32.xlu0 %v13544_v60, %s11977_s18 }
 0x327   : > { %2913 = vrot.lane.b32.xlu2 %v13475_v39, %s11976_s17  ;;  %3627 = vrot.lane.b32.xlu1 %v13475_v39, %s11975_s16 }
 0x328   : > { %v13558_v5 = vpop.permute.xlu0 %3464 }
 0x329   : > { %18719 = vst [vmem:[#allocation70_spill] sm:$0xff] %v13558_v5  ;;  %10662 = vmatmul.msk.bf16.vlgmr.msrb.gmra.mxu3 %vm1310_vm8, %v13294_v1  ;;  %v13570_v61 = vpop.permute.xlu2 %3420  ;;  %v13572_v58 = vpop.permute.xlu1 %2724 }
 0x32a   : > { %18720 = vst [vmem:[#allocation71_spill] sm:$0xff] %v13570_v61 }
 0x32c   : > { %v13562_v31 = vpop.f32.mrf.mxu3 }
 0x32e   : > { %2976 = vrot.lane.b32.xlu0 %v13544_v60, %s11976_s17 }
 0x32f   : > { %1813 = vrot.lane.b32.xlu2 %v13509_v13, %s11977_s18  ;;  %1837 = vrot.lane.b32.xlu1 %v13527_v2, %s11977_s18 }
 0x330   : > { %v1646_v47 = vpop.permute.xlu0 %1645 }
 0x331   : > { %v1651_v5 = vsel %vm1310_vm8, %v1646_v47, 0  ;;  %v1598_v14 = vpop.permute.xlu2 %1597  ;;  %v13581_v45 = vpop.permute.xlu1 %3418 }
 0x332   : > { %1660 = vmatpush.bf16.xpose.msra.mxu3 %v1651_v5  ;;  %18721 = vst [vmem:[#allocation72_spill] sm:$0xff] %v13581_v45  ;;  %v1603_v61 = vsel %vm1310_vm8, %v1598_v14, 0  ;;  %v13588_v5 = vpack.c.bf16 %v1250_v28, %v1250_v28  ;;  %v13605_v28 = vpack.c.bf16 %v1248_v29, %v1248_v29 }
 0x333   : > { %1612 = vmatpush.bf16.xpose.msrb.mxu1 %v1603_v61 }
 0x334   : > { %v1376_v1 = vpop.f32.mrf.mxu3  ;;  %v1907_v61 = vunpack.c.l.b16 %v13588_v5 }
 0x336   : > { %3878 = vrot.lane.b32.xlu0 %v13224_v42, %s11978_s19  ;;  %v13607_v1 = vpack.c.b16 %v1907_v61, %v1907_v61 }
 0x337   : > { %2934 = vrot.lane.b32.xlu2 %v13509_v13, %s11976_s17  ;;  %2955 = vrot.lane.b32.xlu1 %v13527_v2, %s11976_s17 }
 0x338   : > { %v13584_v39 = vpop.permute.xlu0 %2787  ;;  %18724 = vst [vmem:[#allocation75_spill] sm:$0xff] %v13607_v1 }
 0x339   : > { %10665 = vmatmul.msk.bf16.vlgmr.msra.gmra.mxu3 %vm1310_vm8, %v13328_v43  ;;  %v13596_v14 = vpop.permute.xlu2 %3443  ;;  %v13598_v47 = vpop.permute.xlu1 %2745 }
 0x33a   : > { %18722 = vst [vmem:[#allocation73_spill] sm:$0xff] %v13596_v14  ;;  %10663 = vmatmul.msk.bf16.vlgmr.msrb.gmra.mxu1 %vm1310_vm8, %v13351_v20 }
 0x33e   : > { %4380 = vrot.lane.b32.xlu0 %v13133_v21, %s11979_s25  ;;  %v1883_v21 = vunpack.c.l.b16 %v13605_v28 }
 0x33f   : > { %3648 = vrot.lane.b32.xlu2 %v13509_v13, %s11978_s19  ;;  %3694 = vrot.lane.b32.xlu1 %v13544_v60, %s11978_s19 }
 0x340   : > { %v13603_v43 = vpop.permute.xlu0 %3487  ;;  %v13622_v29 = vpack.c.b16 %v1883_v21, %v1883_v21 }
 0x341   : > { %18723 = vst [vmem:[#allocation74_spill] sm:$0xff] %v13603_v43  ;;  %v13616_v42 = vpop.permute.xlu2 %2766  ;;  %v13618_v20 = vpop.permute.xlu1 %3441 }
 0x342   : > { %18725 = vst [vmem:[#allocation76_spill] sm:$0xff] %v13618_v20 }
 0x343   : > { %18726 = vst [vmem:[#allocation77_spill] sm:$0xff] %v13622_v29 }
 0x346   : > { %3018 = vrot.lane.b32.xlu0 %v13607_v1, %s11976_s17 }
 0x347   : > { %3671 = vrot.lane.b32.xlu2 %v13527_v2, %s11978_s19  ;;  %2997 = vrot.lane.b32.xlu1 %v13622_v29, %s11976_s17 }
 0x348   : > { %v13620_v43 = vpop.permute.xlu0 %2808 }
 0x349   : > { %v1670_v61 = vpop.permute.xlu2 %1669  ;;  %v1622_v45 = vpop.permute.xlu1 %1621 }
 0x34a   : > { %v1675_v14 = vsel %vm1310_vm8, %v1670_v61, 0  ;;  %v1627_v13 = vsel %vm1310_vm8, %v1622_v45, 0 }
 0x34b   : > { %1636 = vmatpush.bf16.xpose.msra.mxu2 %v1627_v13  ;;  %1684 = vmatpush.bf16.xpose.msra.mxu1 %v1675_v14 }
 0x34e   : > { %3740 = vrot.lane.b32.xlu0 %v13607_v1, %s11978_s19 }
 0x34f   : > { %3696 = vrot.lane.b32.xlu2 %v13544_v60, %s11975_s16  ;;  %3855 = vrot.lane.b32.xlu1 %v13206_v4, %s11978_s19 }
 0x350   : > { %v13632_v20 = vpop.permute.xlu0 %3512 }
 0x351   : > { %18727 = vst [vmem:[#allocation78_spill] sm:$0xff] %v13632_v20  ;;  %v13638_v21 = vpop.permute.xlu2 %3510  ;;  %v13640_v2 = vpop.permute.xlu1 %3466 }
 0x352   : > { %18728 = vst [vmem:[#allocation79_spill] sm:$0xff] %v13638_v21  ;;  %10664 = vmatmul.msk.bf16.vlgmr.msra.gmra.mxu2 %vm1310_vm8, %v13311_v25  ;;  %10666 = vmatmul.msk.bf16.vlgmr.msra.gmra.mxu1 %vm1310_vm8, %v13366_v37 }
 0x353   : > { %18729 = vst [vmem:[#allocation80_spill] sm:$0xff] %v13640_v2 }
 0x357   : > { %1885 = vrot.lane.b32.xlu2 %v13622_v29, %s11977_s18  ;;  %3832 = vrot.lane.b32.xlu1 %v13157_v18, %s11978_s19 }
 0x358   : > { %v13646_v45 = vpop.permute.xlu0 %3535 }
 0x359   : > { %18730 = vst [vmem:[#allocation81_spill] sm:$0xff] %v13646_v45  ;;  %v13652_v13 = vpop.permute.xlu2 %3533  ;;  %v13654_v14 = vpop.permute.xlu1 %3489 }
 0x35a   : > { %18731 = vst [vmem:[#allocation82_spill] sm:$0xff] %v13652_v13 }
 0x35b   : > { %18732 = vst [vmem:[#allocation83_spill] sm:$0xff] %v13654_v14  ;;  %v1300_v14 = vlaneseq }
 0x35d   : > { %v1303_v20 = vand.u32 127, %v1300_v14 }
 0x35f   : > { %3719 = vrot.lane.b32.xlu2 %v13622_v29, %s11975_s16  ;;  %4359 = vrot.lane.b32.xlu1 %v13086_v49, %s11979_s25 }
 0x360   : > { %v1718_v61 = vpop.permute.xlu0 %1717 }
 0x361   : > { %v1723_v4 = vsel %vm1310_vm8, %v1718_v61, 0  ;;  %v13663_v37 = vpop.permute.xlu2 %2850  ;;  %v1694_v21 = vpop.permute.xlu1 %1693  ;;  %v1301_v61 = vshrl.u32 %v1300_v14, 7 }
 0x362   : > { %1732 = vmatpush.bf16.xpose.msrb.mxu3 %v1723_v4  ;;  %v1699_v45 = vsel %vm1310_vm8, %v1694_v21, 0 }
 0x363   : > { %1708 = vmatpush.bf16.xpose.msrb.mxu2 %v1699_v45  ;;  %vm13682_vm9 = vcmp.le.s32.totalorder %v1303_v20, %v1301_v61 }
 0x364   : > { %v13657_v25 = vpop.f32.mrf.mxu3  ;;  %v13689_v45 = vsel %vm13682_vm9, %v13324_v19, -1e+30 }
 0x367   : > { %3834 = vrot.lane.b32.xlu2 %v13157_v18, %s11975_s16  ;;  %3717 = vrot.lane.b32.xlu1 %v13622_v29, %s11978_s19 }
 0x368   : > { %v13666_v13 = vpop.permute.xlu0 %2871 }
 0x369   : > { %10668 = vmatmul.msk.bf16.vlgmr.msrb.gmra.mxu3 %vm1310_vm8, %v13407_v24  ;;  %v13674_v49 = vpop.permute.xlu2 %3558  ;;  %v13676_v2 = vpop.permute.xlu1 %2829  ;;  %v18734_v24 = vmov 0 }
 0x36a   : > { %10667 = vmatmul.msk.bf16.vlgmr.msrb.gmra.mxu2 %vm1310_vm8, %v13390_v36  ;;  %v18735_v24 = vsel %vm13682_vm9, 4294967295, %v18734_v24  ;;  %v2108_v36 = vsel %vm1310_vm8, %v13689_v45, -inf }
 0x36b   : > { %18736 = vst [vmem:[#allocation85_spill] sm:$0xff] %v18735_v24 }
 0x36c   : > { %v1448_v4 = vpop.f32.mrf.mxu3 }
 0x36f   : > { %3809 = vrot.lane.b32.xlu2 %v13110_v35, %s11978_s19  ;;  %1909 = vrot.lane.b32.xlu1 %v13607_v1, %s11977_s18 }
 0x370   : > { %v13680_v21 = vpop.permute.xlu0 %3602 }
 0x371   : > { %18733 = vst [vmem:[#allocation84_spill] sm:$0xff] %v13680_v21  ;;  %v1742_v14 = vpop.permute.xlu2 %1741  ;;  %v13697_v4 = vpop.permute.xlu1 %3556 }
 0x372   : > { %18737 = vst [vmem:[#allocation86_spill] sm:$0xff] %v13697_v4  ;;  %v1747_v20 = vsel %vm1310_vm8, %v1742_v14, 0 }
 0x373   : > { %1756 = vmatpush.bf16.xpose.msrb.mxu1 %v1747_v20 }
 0x377   : > { %3742 = vrot.lane.b32.xlu1 %v13607_v1, %s11975_s16 }
 0x378   : > { %2109 = vmax.xlane.f32.xlu0 %v2108_v36  ;;  %v1790_v61 = vpop.permute.xlu0 %1789 }
 0x379   : > { %v1795_v19 = vsel %vm1310_vm8, %v1790_v61, 0  ;;  %v13705_v35 = vpop.permute.xlu2 %3581  ;;  %v13707_v29 = vpop.permute.xlu1 %3579 }
 0x37a   : > { %1804 = vmatpush.bf16.xpose.msra.mxu3 %v1795_v19  ;;  %18738 = vst [vmem:[#allocation87_spill] sm:$0xff] %v13707_v29  ;;  %10669 = vmatmul.msk.bf16.vlgmr.msrb.gmra.mxu1 %vm1310_vm8, %v13426_v38 }
 0x37c   : > { %v13701_v18 = vpop.f32.mrf.mxu3 }
 0x37f   : > { %v13715_v14 = vpop.f32.mrf.mxu1  ;;  %4464 = vrot.lane.b32.xlu1 %v13193_v54, %s11979_s25 }
 0x380   : > { %v13711_v21 = vpop.permute.xlu0 %3625 }
 0x381   : > { %18739 = vst [vmem:[#allocation88_spill] sm:$0xff] %v13711_v21  ;;  %10671 = vmatmul.msk.bf16.vlgmr.msra.gmra.mxu3 %vm1310_vm8, %v13461_v55  ;;  %v2914_v20 = vpop.permute.xlu2 %2913  ;;  %v1766_v61 = vpop.permute.xlu1 %1765 }
 0x382   : > { %v1771_v19 = vsel %vm1310_vm8, %v1766_v61, 0  ;;  %v2919_v1 = vsel %vm2497_vm10, %v2914_v20, 0 }
 0x383   : > { %1780 = vmatpush.bf16.xpose.msra.mxu2 %v1771_v19  ;;  %2928 = vmatpush.bf16.msrb.mxu0 %v2919_v1 }
 0x384   : > { %v1520_v36 = vpop.f32.mrf.mxu3 }
 0x387   : > { %v1472_v38 = vpop.f32.mrf.mxu1 }
 0x388   : > { %v13721_v29 = vpop.permute.xlu0 %3650 }
 0x389   : > { %18740 = vst [vmem:[#allocation89_spill] sm:$0xff] %v13721_v29  ;;  %v1814_v55 = vpop.permute.xlu2 %1813  ;;  %v13725_v36 = vpop.permute.xlu1 %2892 }
 0x38a   : > { %v1819_v54 = vsel %vm1310_vm8, %v1814_v55, 0  ;;  %10670 = vmatmul.msk.bf16.vlgmr.msra.gmra.mxu2 %vm1310_vm8, %v13442_v63  ;;  %v1939_v63 = vsel %vm1310_vm8, %v13203_v10, 0  ;;  %v2011_v10 = vsel %vm1310_vm8, %v13362_v9, 0 }
 0x38b   : > { %1828 = vmatpush.bf16.xpose.msra.mxu1 %v1819_v54  ;;  %v13748_v54 = vsel %vm13682_vm9, %v13422_v26, -1e+30 }
 0x38c   : > { %4338 = vrot.lane.b32.xlu0 %v13084_v22, %s11979_s25 }
 0x38d   : > { %v13732_v20 = vpop.f32.mrf.mxu2 }
 0x390   : > { %v13730_v21 = vpop.permute.xlu0 %3673 }
 0x391   : > { %18741 = vst [vmem:[#allocation90_spill] sm:$0xff] %v13730_v21  ;;  %v13736_v1 = vpop.permute.xlu2 %2934  ;;  %v13738_v61 = vpop.permute.xlu1 %3604 }
 0x392   : > { %10672 = vmatmul.msk.bf16.vlgmr.msra.gmra.mxu1 %vm1310_vm8, %v13492_v12 }
 0x394   : > { %4443 = vrot.lane.b32.xlu0 %v13254_v52, %s11979_s25  ;;  %v2111_v52 = vsel %vm1310_vm8, %v13748_v54, -inf }
 0x395   : > { %v1496_v55 = vpop.f32.mrf.mxu2 }
 0x397   : > { %v13752_v22 = vpop.f32.mrf.mxu1 }
 0x398   : > { %v1862_v19 = vpop.permute.xlu0 %1861  ;;  %2112 = vmax.xlane.f32.xlu2 %v2111_v52  ;;  %v13768_v52 = vsel %vm13682_vm9, %v13562_v31, -1e+30  ;;  %v13787_v31 = vsel %vm13682_vm9, %v13657_v25, -1e+30  ;;  %v13801_v25 = vsel %vm13682_vm9, %v13481_v30, -1e+30 }
 0x399   : > { %v1867_v38 = vsel %vm1310_vm8, %v1862_v19, 0  ;;  %v13754_v12 = vpop.permute.xlu2 %3648  ;;  %v13756_v19 = vpop.permute.xlu1 %3627  ;;  %v2114_v9 = vsel %vm1310_vm8, %v13768_v52, -inf }
 0x39a   : > { %1876 = vmatpush.bf16.xpose.msrb.mxu3 %v1867_v38  ;;  %18742 = vst [vmem:[#allocation91_spill] sm:$0xff] %v13754_v12 }
 0x39b   : > { %18743 = vst [vmem:[#allocation92_spill] sm:$0xff] %v13756_v19 }
 0x39f   : > { %v1544_v26 = vpop.f32.mrf.mxu1 }
 0x3a0   : > { %v2499_v26 = vsel %vm2497_vm10, %v13171_v3, 0  ;;  %v1963_v3 = vsel %vm1310_vm8, %v13201_v51, 0 }
 0x3a1   : > { %10674 = vmatmul.msk.bf16.vlgmr.msrb.gmra.mxu3 %vm1310_vm8, %v13529_v32  ;;  %v13762_v38 = vpop.permute.xlu2 %3671 }
 0x3a2   : > { %1948 = vmatpush.bf16.xpose.msra.mxu3 %v1939_v63  ;;  %18744 = vst [vmem:[#allocation93_spill] sm:$0xff] %v13762_v38  ;;  %v1838_v63 = vpop.permute.xlu1 %1837 }
 0x3a3   : > { %v1843_v55 = vsel %vm1310_vm8, %v1838_v63, 0 }
 0x3a4   : > { %1852 = vmatpush.bf16.xpose.msrb.mxu2 %v1843_v55 }
 0x3a5   : > { %v13770_v12 = vpop.f32.mrf.mxu2 }
 0x3a9   : > { %v13774_v32 = vpop.permute.xlu2 %3696  ;;  %2115 = vmax.xlane.f32.xlu1 %v2114_v9  ;;  %v2123_v9 = vsel %vm1310_vm8, %v13787_v31, -inf }
 0x3aa   : > { %2020 = vmatpush.bf16.xpose.msrb.mxu3 %v2011_v10  ;;  %18745 = vst [vmem:[#allocation94_spill] sm:$0xff] %v13774_v32  ;;  %v13776_v10 = vpop.permute.xlu1 %2955 }
 0x3ab   : > { %10673 = vmatmul.msk.bf16.vlgmr.msrb.gmra.mxu2 %vm1310_vm8, %v13511_v41 }
 0x3ac   : > { %v1590_v4 = vpop.f32.mrf.mxu3 }
 0x3ad   : > { %v1568_v63 = vpop.f32.mrf.mxu2 }
 0x3ae   : > { %v13808_v63 = vpop.permute.xlu0 %2976 }
 0x3b0   : > { %4317 = vrot.lane.b32.xlu2 %v12932_v0, %s11979_s25 }
 0x3b1   : > { %10677 = vmatmul.msk.bf16.vlgmr.msra.gmra.mxu3 %vm1310_vm8, %v13067_v57  ;;  %v1886_v41 = vpop.permute.xlu2 %1885  ;;  %2124 = vmax.xlane.f32.xlu1 %v2123_v9  ;;  %v2117_v9 = vsel %vm1310_vm8, %v13801_v25, -inf }
 0x3b2   : > { %2508 = vmatpush.bf16.msra.mxu3 %v2499_v26  ;;  %v13793_v38 = vpop.permute.xlu1 %3694  ;;  %v1891_v57 = vsel %vm1310_vm8, %v1886_v41, 0  ;;  %v13806_v26 = vsel %vm13682_vm9, %v13701_v18, -1e+30 }
 0x3b3   : > { %18746 = vst [vmem:[#allocation95_spill] sm:$0xff] %v13793_v38  ;;  %1900 = vmatpush.bf16.xpose.msrb.mxu1 %v1891_v57  ;;  %v2132_v51 = vsel %vm1310_vm8, %v13806_v26, -inf  ;;  %v2035_v57 = vsel %vm1310_vm8, %v13374_v6, 0 }
 0x3b4   : > { %v1592_v55 = vpop.f32.mrf.mxu3 }
 0x3b6   : > { %v13829_v6 = vpop.permute.xlu0 %3878 }
 0x3b7   : > { %v13812_v41 = vpop.f32.mrf.mxu1  ;;  %18747 = vst [vmem:[#allocation96_spill] sm:$0xff] %v13829_v6 }
 0x3b9   : > { %2133 = vmax.xlane.f32.xlu1 %v2132_v51 }
 0x3ba   : > { %v2998_v30 = vpop.permute.xlu1 %2997  ;;  %10675 = vmatmul.msk.bf16.vlgmr.msrb.gmra.mxu1 %vm1310_vm8, %v13605_v28 }
 0x3bb   : > { %1972 = vmatpush.bf16.xpose.msra.mxu1 %v1963_v3  ;;  %v3003_v18 = vsel %vm2497_vm10, %v2998_v30, 0  ;;  %v2562_v3 = vsel %vm2497_vm10, %v13349_v16, 0 }
 0x3bc   : > { %v1662_v55 = vpop.f32.mrf.mxu3  ;;  %3012 = vmatpush.bf16.msra.mxu0 %v3003_v18 }
 0x3bd   : > { %v13837_v16 = vsel %vm13682_vm9, %v1662_v55, -1e+30 }
 0x3be   : > { %2118 = vmax.xlane.f32.xlu0 %v2117_v9  ;;  %v13827_v9 = vsel %vm13682_vm9, %v1590_v4, -1e+30  ;;  %v13841_v4 = vpop.permute.xlu0 %4380 }
 0x3bf   : > { %v1616_v30 = vpop.f32.mrf.mxu1  ;;  %v2141_v28 = vsel %vm1310_vm8, %v13827_v9, -inf  ;;  %18749 = vst [vmem:[#allocation98_spill] sm:$0xff] %v13841_v4 }
 0x3c1   : > { %10680 = vmatmul.msk.bf16.vlgmr.msrb.gmra.mxu3 %vm1310_vm8, %v13150_v46  ;;  %2142 = vmax.xlane.f32.xlu1 %v2141_v28  ;;  %v2150_v46 = vsel %vm1310_vm8, %v13837_v16, -inf  ;;  %v13858_v28 = vsel %vm13682_vm9, %v13525_v56, -1e+30 }
 0x3c2   : > { %2571 = vmatpush.bf16.msrb.mxu3 %v2562_v3  ;;  %v2520_v3 = vsel %vm2497_vm10, %v13236_v34, 0 }
 0x3c3   : > { %2044 = vmatpush.bf16.xpose.msrb.mxu1 %v2035_v57  ;;  %v13833_v57 = vpop.permute.xlu1 %3855 }
 0x3c4   : > { %v1664_v51 = vpop.f32.mrf.mxu3  ;;  %18748 = vst [vmem:[#allocation97_spill] sm:$0xff] %v13833_v57 }
 0x3c6   : > { %v13853_v30 = vpop.permute.xlu0 %3018 }
 0x3c9   : > { %2151 = vmax.xlane.f32.xlu1 %v2150_v46 }
 0x3ca   : > { %10678 = vmatmul.msk.bf16.vlgmr.msra.gmra.mxu1 %vm1310_vm8, %v13094_v17  ;;  %v2120_v17 = vsel %vm1310_vm8, %v13858_v28, -inf }
 0x3cb   : > { %v13843_v18 = vpop.permute.xlu1 %3832  ;;  %2529 = vmatpush.bf16.msra.mxu1 %v2520_v3 }
 0x3cc   : > { %18750 = vst [vmem:[#allocation99_spill] sm:$0xff] %v13843_v18 }
 0x3ce   : > { %v13870_v0 = vpop.permute.xlu0 %3740 }
 0x3cf   : > { %v1686_v55 = vpop.f32.mrf.mxu1  ;;  %18753 = vst [vmem:[#allocation102_spill] sm:$0xff] %v13870_v0 }
 0x3d2   : > { %4422 = vrot.lane.b32.xlu0 %v13135_v15, %s11979_s25  ;;  %v2583_v15 = vsel %vm2497_vm10, %v13341_v7, 0 }
 0x3d3   : > { %v13851_v51 = vpop.permute.xlu1 %4359 }
 0x3d4   : > { %18751 = vst [vmem:[#allocation100_spill] sm:$0xff] %v13851_v51 }
 0x3d5   : > { %v13860_v46 = vpop.f32.mrf.mxu2 }
 0x3d7   : > { %v1688_v34 = vpop.f32.mrf.mxu1 }
 0x3d8   : > { %v1987_v34 = vsel %vm1310_vm8, %v13247_v27, 0 }
 0x3d9   : > { %2121 = vmax.xlane.f32.xlu2 %v2120_v17 }
 0x3da   : > { %10681 = vmatmul.msk.bf16.vlgmr.msrb.gmra.mxu1 %vm1310_vm8, %v13199_v59  ;;  %v2059_v59 = vsel %vm1310_vm8, %v13436_v8, 0  ;;  %v13893_v8 = vsel %vm13682_vm9, %v13715_v14, -1e+30  ;;  %v2541_v14 = vsel %vm2497_vm10, %v13214_v11, 0  ;;  %v13921_v11 = vsel %vm13682_vm9, %v13812_v41, -1e+30 }
 0x3db   : > { %v13864_v3 = vpop.permute.xlu1 %3717  ;;  %2592 = vmatpush.bf16.msrb.mxu1 %v2583_v15 }
 0x3dc   : > { %18752 = vst [vmem:[#allocation101_spill] sm:$0xff] %v13864_v3 }
 0x3dd   : > { %v1640_v56 = vpop.f32.mrf.mxu2 }
 0x3de   : > { %v13882_v56 = vpop.permute.xlu2 %3719 }
 0x3df   : > { %18754 = vst [vmem:[#allocation103_spill] sm:$0xff] %v13882_v56 }
 0x3e3   : > { %v1910_v57 = vpop.permute.xlu1 %1909 }
 0x3e4   : > { %v1915_v6 = vsel %vm1310_vm8, %v1910_v57, 0 }
 0x3e5   : > { %1924 = vmatpush.bf16.xpose.msra.mxu2 %v1915_v6 }
 0x3eb   : > { %v2110_v17 = vpop.xlane.xlu0 %2109 }
 0x3ec   : > { %v2204_v18 = vsub.f32 %v13689_v45, %v2110_v17  ;;  %v1734_v51 = vpop.f32.mrf.mxu3  ;;  %10676 = vmatmul.msk.bf16.vlgmr.msra.gmra.mxu2 %vm1310_vm8, %v13588_v5  ;;  %v2126_v5 = vsel %vm1310_vm8, %v13893_v8, -inf  ;;  %v13901_v17 = vpop.permute.xlu2 %3834 }
 0x3ed   : > { %1996 = vmatpush.bf16.xpose.msrb.mxu2 %v1987_v34  ;;  %v13880_v15 = vpop.f32.mrf.mxu2  ;;  %18755 = vst [vmem:[#allocation104_spill] sm:$0xff] %v13901_v17 }
 0x3ee   : > { %v2236_v7 = vmul.f32 1.442695, %v2204_v18  ;;  %v13899_v18 = vsel %vm13682_vm9, %v1734_v51, -1e+30 }
 0x3f0   : > { %11351 = vpow2.f32 %v2236_v7  ;;  %v2159_v7 = vsel %vm1310_vm8, %v13899_v18, -inf }
 0x3f1   : > { %4401 = vrot.lane.b32.xlu2 %v13121_v23, %s11979_s25 }
 0x3f4   : > { %v1736_v57 = vpop.f32.mrf.mxu3 }
 0x3f5   : > { %2068 = vmatpush.bf16.xpose.msra.mxu2 %v2059_v59  ;;  %v1712_v6 = vpop.f32.mrf.mxu2  ;;  %v13910_v59 = vsel %vm13682_vm9, %v13752_v22, -1e+30  ;;  %v2144_v22 = vsel %vm1310_vm8, %v13921_v11, -inf }
 0x3f6   : > { %v13884_v27 = vpop.eup %11351  ;;  %v2135_v51 = vsel %vm1310_vm8, %v13910_v59, -inf  ;;  %v2604_v6 = vsel %vm2497_vm10, %v13417_v44, 0  ;;  %v13940_v44 = vpop.permute.xlu1 %3742 }
 0x3f7   : > { %v2300_v45 = vsel %vm1310_vm8, %v13884_v27, 0.0  ;;  %v1758_v34 = vpop.f32.mrf.mxu1  ;;  %18757 = vst [vmem:[#allocation106_spill] sm:$0xff] %v13940_v44 }
 0x3f8   : > { %2301 = vadd.xlane.f32.xlu1 %v2300_v45 }
 0x3fc   : > { %2127 = vmax.xlane.f32.xlu0 %v2126_v5  ;;  %10679 = vmatmul.msk.bf16.vlgmr.msrb.gmra.mxu2 %vm1310_vm8, %v13096_v62  ;;  %v13923_v5 = vpop.permute.xlu2 %3809 }
 0x3fd   : > { %2550 = vmatpush.bf16.msrb.mxu2 %v2541_v14  ;;  %18756 = vst [vmem:[#allocation105_spill] sm:$0xff] %v13923_v5 }
 0x3ff   : > { %v1760_v45 = vpop.f32.mrf.mxu1 }
 0x400   : > { %2160 = vmax.xlane.f32.xlu1 %v2159_v7  ;;  %v13931_v7 = vsel %vm13682_vm9, %v1686_v55, -1e+30 }
 0x404   : > { %2136 = vmax.xlane.f32.xlu0 %v2135_v51  ;;  %v13916_v57 = vpop.f32.mrf.mxu3  ;;  %v2153_v51 = vsel %vm1310_vm8, %v13931_v7, -inf }
 0x40b   : > { %v2113_v41 = vpop.xlane.xlu2 %2112 }
 0x40c   : > { %2145 = vmax.xlane.f32.xlu0 %v2144_v22  ;;  %v1808_v62 = vpop.f32.mrf.mxu3  ;;  %10682 = vmatmul.msk.bf16.vlgmr.msra.gmra.mxu2 %vm1310_vm8, %v13216_v53  ;;  %v2205_v14 = vsub.f32 %v13748_v54, %v2113_v41  ;;  %v13947_v53 = vsel %vm13682_vm9, %v13732_v20, -1e+30  ;;  %v13964_v20 = vsel %vm13682_vm9, %v13770_v12, -1e+30 }
 0x40d   : > { %2613 = vmatpush.bf16.msra.mxu2 %v2604_v6  ;;  %v1782_v45 = vpop.f32.mrf.mxu2  ;;  %v2129_v41 = vsel %vm1310_vm8, %v13947_v53, -inf }
 0x40e   : > { %v2238_v22 = vmul.f32 1.442695, %v2205_v14  ;;  %v13953_v14 = vpop.permute.xlu0 %4338 }
 0x40f   : > { %v13938_v62 = vpop.f32.mrf.mxu1  ;;  %18758 = vst [vmem:[#allocation107_spill] sm:$0xff] %v13953_v14 }
 0x410   : > { %11353 = vpow2.f32 %v2238_v22  ;;  %v13959_v22 = vsel %vm13682_vm9, %v1758_v34, -1e+30  ;;  %v13977_v34 = vsel %vm13682_vm9, %v13860_v46, -1e+30 }
 0x411   : > { %v2147_v4 = vsel %vm1310_vm8, %v13977_v34, -inf }
 0x414   : > { %2154 = vmax.xlane.f32.xlu0 %v2153_v51  ;;  %v13955_v51 = vpop.permute.xlu1 %4464 }
 0x415   : > { %v1784_v55 = vpop.f32.mrf.mxu2  ;;  %18759 = vst [vmem:[#allocation108_spill] sm:$0xff] %v13955_v51 }
 0x416   : > { %v13942_v23 = vpop.eup %11353 }
 0x417   : > { %v1832_v54 = vpop.f32.mrf.mxu1  ;;  %v2303_v6 = vsel %vm1310_vm8, %v13942_v23, 0.0 }
 0x418   : > { %v2162_v54 = vsel %vm1310_vm8, %v13959_v22, -inf }
 0x41a   : > { %2130 = vmax.xlane.f32.xlu2 %v2129_v41  ;;  %v13972_v41 = vpop.permute.xlu0 %4443 }
 0x41b   : > { %18760 = vst [vmem:[#allocation109_spill] sm:$0xff] %v13972_v41  ;;  %v13986_v41 = vsel %vm13682_vm9, %v13880_v15, -1e+30 }
 0x41c   : > { %2304 = vadd.xlane.f32.xlu0 %v2303_v6  ;;  %v2138_v6 = vsel %vm1310_vm8, %v13964_v20, -inf  ;;  %v2116_v51 = vpop.xlane.xlu1 %2115 }
 0x41d   : > { %v2206_v5 = vsub.f32 %v13768_v52, %v2116_v51  ;;  %v2156_v52 = vsel %vm1310_vm8, %v13986_v41, -inf }
 0x422   : > { %2139 = vmax.xlane.f32.xlu2 %v2138_v6 }
 0x424   : > { %v13966_v55 = vpop.f32.mrf.mxu3  ;;  %2163 = vmax.xlane.f32.xlu0 %v2162_v54  ;;  %v2240_v54 = vmul.f32 1.442695, %v2206_v5  ;;  %v2125_v5 = vpop.xlane.xlu1 %2124 }
 0x426   : > { %11355 = vpow2.f32 %v2240_v54  ;;  %v14006_v54 = vsel %vm13682_vm9, %v13916_v57, -1e+30 }
 0x42a   : > { %2148 = vmax.xlane.f32.xlu2 %v2147_v4 }
 0x42c   : > { %v1880_v12 = vpop.f32.mrf.mxu3  ;;  %v13992_v4 = vpop.eup %11355 }
 0x42d   : > { %v2134_v57 = vpop.xlane.xlu1 %2133 }
 0x42e   : > { %v1854_v6 = vpop.f32.mrf.mxu2  ;;  %v2212_v17 = vsub.f32 %v13806_v26, %v2134_v57 }
 0x431   : > { %v2119_v0 = vpop.xlane.xlu0 %2118 }
 0x432   : > { %v2207_v14 = vsub.f32 %v13801_v25, %v2119_v0  ;;  %2157 = vmax.xlane.f32.xlu2 %v2156_v52 }
 0x434   : > { %v2242_v3 = vmul.f32 1.442695, %v2207_v14  ;;  %v13988_v46 = vpop.f32.mrf.mxu3  ;;  %v2209_v14 = vsub.f32 %v13787_v31, %v2125_v5 }
 0x435   : > { %v2143_v26 = vpop.xlane.xlu1 %2142 }
 0x436   : > { %11357 = vpow2.f32 %v2242_v3  ;;  %v1856_v51 = vpop.f32.mrf.mxu2  ;;  %v2306_v3 = vsel %vm1310_vm8, %v13992_v4, 0.0  ;;  %v2246_v52 = vmul.f32 1.442695, %v2209_v14 }
 0x437   : > { %v13996_v12 = vpop.f32.mrf.mxu1  ;;  %v14010_v51 = vsel %vm13682_vm9, %v1782_v45, -1e+30 }
 0x438   : > { %11359 = vpow2.f32 %v2246_v52  ;;  %v2165_v5 = vsel %vm1310_vm8, %v14010_v51, -inf  ;;  %v2252_v52 = vmul.f32 1.442695, %v2212_v17 }
 0x43a   : > { %2307 = vadd.xlane.f32.xlu2 %v2306_v3  ;;  %11361 = vpow2.f32 %v2252_v52 }
 0x43c   : > { %v13994_v0 = vpop.eup %11357  ;;  %v1952_v25 = vpop.f32.mrf.mxu3 }
 0x43d   : > { %v2309_v15 = vsel %vm1310_vm8, %v13994_v0, 0.0  ;;  %v2168_v25 = vsel %vm1310_vm8, %v14006_v54, -inf }
 0x43e   : > { %2310 = vadd.xlane.f32.xlu1 %v2309_v15  ;;  %v14018_v15 = vpop.permute.xlu2 %4317  ;;  %v14020_v14 = vpop.eup %11359 }
 0x43f   : > { %v1904_v38 = vpop.f32.mrf.mxu1  ;;  %18761 = vst [vmem:[#allocation110_spill] sm:$0xff] %v14018_v15 }
 0x440   : > { %v2315_v38 = vsel %vm1310_vm8, %v14020_v14, 0.0  ;;  %v14034_v57 = vpop.eup %11361 }
 0x442   : > { %2166 = vmax.xlane.f32.xlu2 %v2165_v5  ;;  %v14030_v5 = vsel %vm13682_vm9, %v1854_v6, -1e+30  ;;  %v14049_v6 = vpop.xlane.xlu1 %2151 }
 0x444   : > { %v14014_v31 = vpop.f32.mrf.mxu3 }
 0x446   : > { %2169 = vmax.xlane.f32.xlu1 %v2168_v25 }
 0x447   : > { %v14022_v3 = vpop.f32.mrf.mxu1 }
 0x44a   : > { %2316 = vadd.xlane.f32.xlu2 %v2315_v38 }
 0x44c   : > { %v2024_v45 = vpop.f32.mrf.mxu3  ;;  %v2122_v25 = vpop.xlane.xlu2 %2121 }
 0x44d   : > { %v2208_v44 = vsub.f32 %v13858_v28, %v2122_v25  ;;  %v2174_v45 = vsel %vm1310_vm8, %v14030_v5, -inf  ;;  %v14053_v25 = vpop.permute.xlu0 %4422 }
 0x44e   : > { %18762 = vst [vmem:[#allocation111_spill] sm:$0xff] %v14053_v25 }
 0x44f   : > { %v2244_v15 = vmul.f32 1.442695, %v2208_v44  ;;  %v1976_v56 = vpop.f32.mrf.mxu1  ;;  %v14047_v44 = vsel %vm13682_vm9, %v13938_v62, -1e+30 }
 0x450   : > { %v2324_v56 = vsel %vm1310_vm8, %v14034_v57, 0.0  ;;  %v2171_v52 = vsel %vm1310_vm8, %v14047_v44, -inf }
 0x451   : > { %11363 = vpow2.f32 %v2244_v15 }
 0x452   : > { %2175 = vmax.xlane.f32.xlu2 %v2174_v45 }
 0x457   : > { %v14036_v38 = vpop.eup %11363  ;;  %v14038_v17 = vpop.f32.mrf.mxu1 }
 0x458   : > { %v2312_v28 = vsel %vm1310_vm8, %v14036_v38, 0.0 }
 0x459   : > { %2313 = vadd.xlane.f32.xlu0 %v2312_v28 }
 0x45a   : > { %2325 = vadd.xlane.f32.xlu2 %v2324_v56 }
 0x45f   : > { %v2048_v15 = vpop.f32.mrf.mxu1 }
 0x461   : > { %2172 = vmax.xlane.f32.xlu0 %v2171_v52  ;;  %v2625_v52 = vsel %vm2497_vm10, %v13485_v48, 0  ;;  %v14075_v48 = vsel %vm13682_vm9, %v13966_v55, -1e+30 }
 0x46b   : > { %v2302_v45 = vpop.xlane.xlu1 %2301 }
 0x46c   : > { %11365 = vrcp.f32 %v2302_v45 }
 0x46f   : > { %v2128_v28 = vpop.xlane.xlu0 %2127  ;;  %v1926_v62 = vpop.f32.mrf.mxu2 }
 0x470   : > { %v2210_v21 = vsub.f32 %v13893_v8, %v2128_v28  ;;  %v14059_v19 = vsel %vm13682_vm9, %v1926_v62, -1e+30  ;;  %v2177_v62 = vsel %vm1310_vm8, %v14075_v48, -inf }
 0x471   : > { %v2183_v25 = vsel %vm1310_vm8, %v14059_v19, -inf }
 0x472   : > { %v11366_v56 = vpop.eup %11365  ;;  %v2248_v32 = vmul.f32 1.442695, %v2210_v21  ;;  %2184 = vmax.xlane.f32.xlu2 %v2183_v25 }
 0x473   : > { %v2428_v29 = vmul.f32 %v11366_v56, %v13884_v27 }
 0x474   : > { %11367 = vpow2.f32 %v2248_v32 }
 0x475   : > { %v2460_v15 = vpack.c.bf16 %v2428_v29, %v2428_v29  ;;  %v2215_v29 = vsub.f32 %v13827_v9, %v2143_v26 }
 0x477   : > { %10683 = vmatmul.msk.bf16.vlgmr.msra.gmra.mxu3 %vm1310_vm8, %v2460_v15  ;;  %v2137_v8 = vpop.xlane.xlu0 %2136  ;;  %v1928_v45 = vpop.f32.mrf.mxu2  ;;  %v2258_v56 = vmul.f32 1.442695, %v2215_v29  ;;  %v14098_v29 = vsel %vm13682_vm9, %v13988_v46, -1e+30 }
 0x478   : > { %2634 = vmatpush.bf16.msra.mxu3 %v2625_v52  ;;  %v2213_v27 = vsub.f32 %v13910_v59, %v2137_v8  ;;  %v14089_v8 = vpop.permute.xlu2 %4401 }
 0x479   : > { %18763 = vst [vmem:[#allocation112_spill] sm:$0xff] %v14089_v8 }
 0x47a   : > { %v14066_v21 = vpop.eup %11367  ;;  %v2254_v28 = vmul.f32 1.442695, %v2213_v27 }
 0x47b   : > { %v2318_v32 = vsel %vm1310_vm8, %v14066_v21, 0.0 }
 0x47c   : > { %2319 = vadd.xlane.f32.xlu1 %v2318_v32  ;;  %11369 = vpow2.f32 %v2254_v28 }
 0x47d   : > { %11371 = vpow2.f32 %v2258_v56 }
 0x47f   : > { %v2146_v25 = vpop.xlane.xlu0 %2145  ;;  %v1998_v59 = vpop.f32.mrf.mxu2 }
 0x480   : > { %v14081_v15 = vsel %vm13682_vm9, %v1998_v59, -1e+30  ;;  %v2216_v56 = vsub.f32 %v13921_v11, %v2146_v25  ;;  %v14113_v25 = vsel %vm13682_vm9, %v14014_v31, -1e+30 }
 0x481   : > { %v2192_v9 = vsel %vm1310_vm8, %v14081_v15, -inf }
 0x482   : > { %2193 = vmax.xlane.f32.xlu2 %v2192_v9  ;;  %v14085_v52 = vpop.eup %11369 }
 0x483   : > { %v14087_v55 = vpop.eup %11371  ;;  %v2327_v45 = vsel %vm1310_vm8, %v14085_v52, 0.0 }
 0x484   : > { %2178 = vmax.xlane.f32.xlu1 %v2177_v62  ;;  %v2333_v32 = vsel %vm1310_vm8, %v14087_v55, 0.0  ;;  %v2186_v62 = vsel %vm1310_vm8, %v14098_v29, -inf }
 0x487   : > { %v2155_v26 = vpop.xlane.xlu0 %2154  ;;  %v2000_v27 = vpop.f32.mrf.mxu2 }
 0x48a   : > { %2334 = vadd.xlane.f32.xlu2 %v2333_v32  ;;  %v2260_v32 = vmul.f32 1.442695, %v2216_v56 }
 0x48c   : > { %2328 = vadd.xlane.f32.xlu1 %v2327_v45 }
 0x48d   : > { %v2131_v59 = vpop.xlane.xlu2 %2130 }
 0x48e   : > { %v2211_v27 = vsub.f32 %v13947_v53, %v2131_v59 }
 0x48f   : > { %v2305_v28 = vpop.xlane.xlu0 %2304  ;;  %v2070_v9 = vpop.f32.mrf.mxu2 }
 0x490   : > { %11373 = vrcp.f32 %v2305_v28  ;;  %v14106_v45 = vsel %vm13682_vm9, %v2070_v9, -1e+30  ;;  %v2250_v8 = vmul.f32 1.442695, %v2211_v27  ;;  %v2218_v28 = vsub.f32 %v13837_v16, %v14049_v6 }
 0x491   : > { %v2201_v46 = vsel %vm1310_vm8, %v14106_v45, -inf  ;;  %v2646_v27 = vsel %vm2497_vm10, %v13400_v33, 0  ;;  %v2219_v6 = vsub.f32 %v13931_v7, %v2155_v26  ;;  %v14135_v33 = vsel %vm13682_vm9, %v13996_v12, -1e+30  ;;  %v2161_v7 = vpop.xlane.xlu1 %2160 }
 0x492   : > { %2202 = vmax.xlane.f32.xlu2 %v2201_v46  ;;  %11375 = vpow2.f32 %v2250_v8  ;;  %v2264_v8 = vmul.f32 1.442695, %v2218_v28  ;;  %v2180_v28 = vsel %vm1310_vm8, %v14135_v33, -inf  ;;  %v14147_v12 = vsel %vm13682_vm9, %v14022_v3, -1e+30 }
 0x493   : > { %11377 = vpow2.f32 %v2260_v32 }
 0x494   : > { %2187 = vmax.xlane.f32.xlu1 %v2186_v62  ;;  %v2195_v62 = vsel %vm1310_vm8, %v14113_v25, -inf  ;;  %11379 = vpow2.f32 %v2264_v8  ;;  %v2221_v8 = vsub.f32 %v13899_v18, %v2161_v7 }
 0x495   : > { %v2140_v56 = vpop.xlane.xlu2 %2139 }
 0x496   : > { %v11374_v11 = vpop.eup %11373 }
 0x497   : > { %v2429_v53 = vmul.f32 %v11374_v11, %v13942_v23  ;;  %v2072_v9 = vpop.f32.mrf.mxu2  ;;  %v2266_v11 = vmul.f32 1.442695, %v2219_v6 }
 0x498   : > { %v14123_v31 = vpop.eup %11375 }
 0x499   : > { %v2461_v59 = vpack.c.bf16 %v2429_v53, %v2429_v53  ;;  %v2321_v23 = vsel %vm1310_vm8, %v14123_v31, 0.0  ;;  %v14127_v16 = vpop.eup %11377  ;;  %v2214_v53 = vsub.f32 %v13964_v20, %v2140_v56  ;;  %11381 = vpow2.f32 %v2266_v11 }
 0x49a   : > { %2322 = vadd.xlane.f32.xlu0 %v2321_v23  ;;  %v2336_v32 = vsel %vm1310_vm8, %v14127_v16, 0.0 }
 0x49b   : > { %10684 = vmatmul.msk.bf16.vlgmr.msra.gmra.mxu1 %vm1310_vm8, %v2461_v59  ;;  %v2256_v26 = vmul.f32 1.442695, %v2214_v53 }
 0x49c   : > { %2196 = vmax.xlane.f32.xlu1 %v2195_v62  ;;  %2655 = vmatpush.bf16.msra.mxu1 %v2646_v27  ;;  %v14140_v62 = vpop.eup %11379  ;;  %v2189_v27 = vsel %vm1310_vm8, %v14147_v12, -inf }
 0x49d   : > { %v2149_v46 = vpop.xlane.xlu2 %2148  ;;  %v2342_v9 = vsel %vm1310_vm8, %v14140_v62, 0.0  ;;  %11383 = vpow2.f32 %v2256_v26 }
 0x49f   : > { %v14153_v23 = vpop.eup %11381 }
 0x4a0   : > { %v2345_v3 = vsel %vm1310_vm8, %v14153_v23, 0.0 }
 0x4a2   : > { %2181 = vmax.xlane.f32.xlu0 %v2180_v28  ;;  %v2217_v28 = vsub.f32 %v13977_v34, %v2149_v46  ;;  %v14171_v34 = vsel %vm13682_vm9, %v14038_v17, -1e+30 }
 0x4a3   : > { %v2198_v17 = vsel %vm1310_vm8, %v14171_v34, -inf }
 0x4a4   : > { %2337 = vadd.xlane.f32.xlu1 %v2336_v32  ;;  %v2270_v32 = vmul.f32 1.442695, %v2221_v8 }
 0x4a5   : > { %v2158_v59 = vpop.xlane.xlu2 %2157 }
 0x4a6   : > { %v2220_v20 = vsub.f32 %v13986_v41, %v2158_v59  ;;  %v14157_v41 = vpop.eup %11383 }
 0x4a7   : > { %v2330_v18 = vsel %vm1310_vm8, %v14157_v41, 0.0 }
 0x4a8   : > { %v2268_v56 = vmul.f32 1.442695, %v2220_v20  ;;  %v2262_v20 = vmul.f32 1.442695, %v2217_v28 }
 0x4aa   : > { %11385 = vpow2.f32 %v2268_v56  ;;  %2190 = vmax.xlane.f32.xlu0 %v2189_v27  ;;  %v2164_v56 = vpop.xlane.xlu0 %2163 }
 0x4ab   : > { %v2222_v28 = vsub.f32 %v13959_v22, %v2164_v56 }
 0x4ac   : > { %2343 = vadd.xlane.f32.xlu1 %v2342_v9 }
 0x4ad   : > { %v2308_v11 = vpop.xlane.xlu2 %2307 }
 0x4b0   : > { %v14159_v53 = vpop.eup %11385 }
 0x4b1   : > { %v2311_v6 = vpop.xlane.xlu1 %2310  ;;  %v2348_v7 = vsel %vm1310_vm8, %v14159_v53, 0.0 }
 0x4b2   : > { %11387 = vrcp.f32 %v2311_v6  ;;  %2331 = vadd.xlane.f32.xlu0 %v2330_v18  ;;  %2349 = vadd.xlane.f32.xlu2 %v2348_v7  ;;  %v18765_v18 = vld [vmem:[#allocation54_spill] sm:$0xff] }
 0x4b3   : > { %11389 = vrcp.f32 %v2308_v11  ;;  %v18764_v11 = vld [vmem:[#allocation59_spill] sm:$0xff]  ;;  %v2667_v7 = vsel %vm2497_vm10, %v18765_v18, 0 }
 0x4b4   : > { %2346 = vadd.xlane.f32.xlu1 %v2345_v3  ;;  %11391 = vpow2.f32 %v2270_v32  ;;  %v2688_v3 = vsel %vm2497_vm10, %v18764_v11, 0 }
 0x4b5   : > { %v2167_v6 = vpop.xlane.xlu2 %2166  ;;  %11393 = vpow2.f32 %v2262_v20 }
 0x4b6   : > { %v2223_v46 = vsub.f32 %v14010_v51, %v2167_v6 }
 0x4b8   : > { %v11388_v26 = vpop.eup %11387 }
 0x4b9   : > { %v2431_v59 = vmul.f32 %v11388_v26, %v13994_v0  ;;  %v11390_v9 = vpop.eup %11389  ;;  %v2272_v26 = vmul.f32 1.442695, %v2222_v28  ;;  %v2170_v22 = vpop.xlane.xlu1 %2169 }
 0x4ba   : > { %v2430_v27 = vmul.f32 %v11390_v9, %v13992_v4  ;;  %v14174_v32 = vpop.eup %11391  ;;  %v2274_v4 = vmul.f32 1.442695, %v2223_v46  ;;  %2199 = vmax.xlane.f32.xlu0 %v2198_v17  ;;  %v2224_v56 = vsub.f32 %v14006_v54, %v2170_v22  ;;  %v2730_v54 = vsel %vm2497_vm10, %v13572_v58, 0 }
 0x4bb   : > { %v2463_v8 = vpack.c.bf16 %v2431_v59, %v2431_v59  ;;  %v2351_v51 = vsel %vm1310_vm8, %v14174_v32, 0.0  ;;  %v14187_v9 = vpop.eup %11393 }
 0x4bc   : > { %v2462_v0 = vpack.c.bf16 %v2430_v27, %v2430_v27  ;;  %11395 = vpow2.f32 %v2274_v4  ;;  %2352 = vadd.xlane.f32.xlu2 %v2351_v51  ;;  %v2339_v27 = vsel %vm1310_vm8, %v14187_v9, 0.0  ;;  %v2276_v46 = vmul.f32 1.442695, %v2224_v56 }
 0x4bd   : > { %10686 = vmatmul.msk.bf16.vlgmr.msrb.gmra.mxu3 %vm1310_vm8, %v2463_v8  ;;  %v2317_v59 = vpop.xlane.xlu2 %2316 }
 0x4be   : > { %2697 = vmatpush.bf16.msrb.mxu3 %v2688_v3  ;;  %10685 = vmatmul.msk.bf16.vlgmr.msrb.gmra.mxu2 %vm1310_vm8, %v2462_v0  ;;  %11397 = vrcp.f32 %v2317_v59 }
 0x4bf   : > { %2676 = vmatpush.bf16.msrb.mxu2 %v2667_v7  ;;  %11399 = vpow2.f32 %v2272_v26 }
 0x4c0   : > { %11401 = vpow2.f32 %v2276_v46  ;;  %v2709_v46 = vsel %vm2497_vm10, %v13554_v50, 0  ;;  %v18767_v50 = vld [vmem:[#allocation34_spill] sm:$0xff] }
 0x4c2   : > { %v14189_v20 = vpop.eup %11395  ;;  %2340 = vadd.xlane.f32.xlu0 %v2339_v27 }
 0x4c3   : > { %v2357_v8 = vsel %vm1310_vm8, %v14189_v20, 0.0 }
 0x4c4   : > { %2358 = vadd.xlane.f32.xlu1 %v2357_v8  ;;  %v11398_v6 = vpop.eup %11397 }
 0x4c5   : > { %v2433_v11 = vmul.f32 %v11398_v6, %v14020_v14  ;;  %v14197_v3 = vpop.xlane.xlu2 %2175  ;;  %v14199_v0 = vpop.eup %11399 }
 0x4c6   : > { %v2354_v4 = vsel %vm1310_vm8, %v14199_v0, 0.0  ;;  %v14206_v14 = vpop.eup %11401 }
 0x4c7   : > { %v2465_v28 = vpack.c.bf16 %v2433_v11, %v2433_v11  ;;  %v2360_v17 = vsel %vm1310_vm8, %v14206_v14, 0.0  ;;  %v2793_v11 = vsel %vm2497_vm10, %v13584_v39, 0 }
 0x4ca   : > { %2355 = vadd.xlane.f32.xlu0 %v2354_v4 }
 0x4cc   : > { %v2314_v18 = vpop.xlane.xlu0 %2313 }
 0x4cd   : > { %11403 = vrcp.f32 %v2314_v18  ;;  %v2326_v7 = vpop.xlane.xlu2 %2325 }
 0x4ce   : > { %10688 = vmatmul.msk.bf16.vlgmr.msra.gmra.mxu2 %vm1310_vm8, %v2465_v28  ;;  %11405 = vrcp.f32 %v2326_v7 }
 0x4cf   : > { %2739 = vmatpush.bf16.msra.mxu2 %v2730_v54 }
 0x4d2   : > { %2361 = vadd.xlane.f32.xlu0 %v2360_v17 }
 0x4d3   : > { %v11404_v51 = vpop.eup %11403 }
 0x4d4   : > { %v11406_v26 = vpop.eup %11405  ;;  %v2432_v58 = vmul.f32 %v11404_v51, %v14036_v38  ;;  %v2173_v22 = vpop.xlane.xlu0 %2172 }
 0x4d5   : > { %v2436_v59 = vmul.f32 %v11406_v26, %v14034_v57  ;;  %v2225_v56 = vsub.f32 %v14047_v44, %v2173_v22  ;;  %v18766_v57 = vld [vmem:[#allocation23_spill] sm:$0xff] }
 0x4d6   : > { %v2464_v27 = vpack.c.bf16 %v2432_v58, %v2432_v58  ;;  %v2751_v58 = vsel %vm2497_vm10, %v13598_v47, 0 }
 0x4d7   : > { %v2468_v8 = vpack.c.bf16 %v2436_v59, %v2436_v59  ;;  %v2278_v6 = vmul.f32 1.442695, %v2225_v56  ;;  %v18769_v59 = vld [vmem:[#allocation31_spill] sm:$0xff] }
 0x4d8   : > { %10687 = vmatmul.msk.bf16.vlgmr.msrb.gmra.mxu1 %vm1310_vm8, %v2464_v27 }
 0x4d9   : > { %11407 = vpow2.f32 %v2278_v6  ;;  %2718 = vmatpush.bf16.msrb.mxu1 %v2709_v46 }
 0x4dd   : > { %4485 = vrot.lane.b32.xlu1 %v18766_v57, %s11979_s25 }
 0x4de   : > { %10691 = vmatmul.msk.bf16.vlgmr.msrb.gmra.mxu2 %vm1310_vm8, %v2468_v8  ;;  %v2226_v8 = vsub.f32 %v14030_v5, %v14197_v3  ;;  %v2814_v5 = vsel %vm2497_vm10, %v13620_v43, 0 }
 0x4df   : > { %2802 = vmatpush.bf16.msrb.mxu2 %v2793_v11  ;;  %v14221_v38 = vpop.eup %11407 }
 0x4e0   : > { %v2363_v44 = vsel %vm1310_vm8, %v14221_v38, 0.0 }
 0x4e1   : > { %2364 = vadd.xlane.f32.xlu2 %v2363_v44  ;;  %v18770_v44 = vld [vmem:[#allocation28_spill] sm:$0xff] }
 0x4e5   : > { %v2185_v39 = vpop.xlane.xlu2 %2184 }
 0x4e6   : > { %4548 = vrot.lane.b32.xlu0 %v18767_v50, %s11979_s25 }
 0x4ef   : > { %v2320_v28 = vpop.xlane.xlu1 %2319 }
 0x4f0   : > { %11409 = vrcp.f32 %v2320_v28 }
 0x4f5   : > { %v14228_v17 = vpop.xlane.xlu2 %2193 }
 0x4f6   : > { %v11410_v54 = vpop.eup %11409 }
 0x4f7   : > { %v2434_v4 = vmul.f32 %v11410_v54, %v14066_v21  ;;  %v2179_v18 = vpop.xlane.xlu1 %2178  ;;  %v2229_v21 = vsub.f32 %v14059_v19, %v2185_v39 }
 0x4f8   : > { %v2227_v51 = vsub.f32 %v14075_v48, %v2179_v18 }
 0x4f9   : > { %v2466_v7 = vpack.c.bf16 %v2434_v4, %v2434_v4  ;;  %4527 = vrot.lane.b32.xlu2 %v18769_v59, %s11979_s25  ;;  %v2286_v6 = vmul.f32 1.442695, %v2229_v21  ;;  %v2280_v4 = vmul.f32 1.442695, %v2226_v8 }
 0x4fa   : > { %v14231_v26 = vpop.f32.mrf.mxu3  ;;  %v2282_v22 = vmul.f32 1.442695, %v2227_v51 }
 0x4fb   : > { %18768 = vst [vmem:[#allocation59_spill] sm:$0xff] %v14231_v26  ;;  %10689 = vmatmul.msk.bf16.vlgmr.msra.gmra.mxu3 %vm1310_vm8, %v2466_v7 }
 0x4fc   : > { %2760 = vmatpush.bf16.msra.mxu3 %v2751_v58 }
 0x4fd   : > { %v2335_v27 = vpop.xlane.xlu2 %2334 }
 0x4ff   : > { %v2329_v56 = vpop.xlane.xlu1 %2328 }
 0x500   : > { %11411 = vrcp.f32 %v2329_v56 }
 0x501   : > { %11413 = vpow2.f32 %v2282_v22  ;;  %4506 = vrot.lane.b32.xlu2 %v18770_v44, %s11979_s25 }
 0x502   : > { %11415 = vrcp.f32 %v2335_v27  ;;  %v2512_v48 = vpop.f32.mrf.mxu3 }
 0x503   : > { %11417 = vpow2.f32 %v2286_v6 }
 0x504   : > { %11419 = vpow2.f32 %v2280_v4 }
 0x505   : > { %v2203_v27 = vpop.xlane.xlu2 %2202 }
 0x506   : > { %v11412_v47 = vpop.eup %11411 }
 0x507   : > { %v14241_v46 = vpop.eup %11413  ;;  %v2437_v11 = vmul.f32 %v11412_v47, %v14085_v52  ;;  %v2188_v28 = vpop.xlane.xlu1 %2187  ;;  %v2877_v52 = vsel %vm2497_vm10, %v13666_v13, 0 }
 0x508   : > { %v11416_v54 = vpop.eup %11415  ;;  %v2369_v18 = vsel %vm1310_vm8, %v14241_v46, 0.0  ;;  %v2230_v47 = vsub.f32 %v14098_v29, %v2188_v28 }
 0x509   : > { %v2439_v19 = vmul.f32 %v11416_v54, %v14087_v55  ;;  %v2469_v39 = vpack.c.bf16 %v2437_v11, %v2437_v11  ;;  %2370 = vadd.xlane.f32.xlu1 %v2369_v18  ;;  %v14255_v55 = vpop.eup %11417  ;;  %v2235_v54 = vsub.f32 %v14106_v45, %v2203_v27  ;;  %v2835_v45 = vsel %vm2497_vm10, %v13676_v2, 0 }
 0x50a   : > { %v14257_v51 = vpop.eup %11419  ;;  %v2375_v43 = vsel %vm1310_vm8, %v14255_v55, 0.0 }
 0x50b   : > { %v2471_v3 = vpack.c.bf16 %v2439_v19, %v2439_v19  ;;  %10692 = vmatmul.msk.bf16.vlgmr.msrb.gmra.mxu3 %vm1310_vm8, %v2469_v39  ;;  %v2366_v22 = vsel %vm1310_vm8, %v14257_v51, 0.0 }
 0x50c   : > { %2823 = vmatpush.bf16.msrb.mxu3 %v2814_v5  ;;  %v2772_v5 = vsel %vm2497_vm10, %v13616_v42, 0 }
 0x50d   : > { %10694 = vmatmul.msk.bf16.vlgmr.msra.gmra.mxu2 %vm1310_vm8, %v2471_v3  ;;  %v2323_v58 = vpop.xlane.xlu0 %2322  ;;  %v2288_v3 = vmul.f32 1.442695, %v2230_v47 }
 0x50e   : > { %2886 = vmatpush.bf16.msra.mxu2 %v2877_v52  ;;  %11421 = vrcp.f32 %v2323_v58  ;;  %v2232_v52 = vsub.f32 %v14081_v15, %v14228_v17 }
 0x50f   : > { %v2197_v7 = vpop.xlane.xlu1 %2196 }
 0x510   : > { %2367 = vadd.xlane.f32.xlu0 %v2366_v22  ;;  %v2233_v22 = vsub.f32 %v14113_v25, %v2197_v7  ;;  %v2961_v25 = vsel %vm2497_vm10, %v13776_v10, 0 }
 0x511   : > { %2376 = vadd.xlane.f32.xlu1 %v2375_v43 }
 0x514   : > { %v11422_v21 = vpop.eup %11421 }
 0x515   : > { %v2182_v48 = vpop.xlane.xlu0 %2181  ;;  %v2435_v8 = vmul.f32 %v11422_v21, %v14123_v31 }
 0x516   : > { %v2228_v6 = vsub.f32 %v14135_v33, %v2182_v48  ;;  %v2298_v33 = vmul.f32 1.442695, %v2235_v54 }
 0x517   : > { %v2338_v56 = vpop.xlane.xlu1 %2337  ;;  %v2467_v4 = vpack.c.bf16 %v2435_v8, %v2435_v8  ;;  %v2294_v8 = vmul.f32 1.442695, %v2233_v22 }
 0x518   : > { %11423 = vrcp.f32 %v2338_v56  ;;  %v14263_v13 = vpop.f32.mrf.mxu1  ;;  %v2284_v19 = vmul.f32 1.442695, %v2228_v6 }
 0x519   : > { %18771 = vst [vmem:[#allocation54_spill] sm:$0xff] %v14263_v13  ;;  %10690 = vmatmul.msk.bf16.vlgmr.msra.gmra.mxu1 %vm1310_vm8, %v2467_v4 }
 0x51a   : > { %11425 = vpow2.f32 %v2284_v19  ;;  %2781 = vmatpush.bf16.msra.mxu1 %v2772_v5  ;;  %v2898_v5 = vsel %vm2497_vm10, %v13725_v36, 0 }
 0x51d   : > { %v2191_v28 = vpop.xlane.xlu0 %2190 }
 0x51e   : > { %v11424_v11 = vpop.eup %11423 }
 0x51f   : > { %v2440_v39 = vmul.f32 %v11424_v11, %v14127_v16  ;;  %v2344_v18 = vpop.xlane.xlu1 %2343  ;;  %v2231_v16 = vsub.f32 %v14147_v12, %v2191_v28  ;;  %v2292_v12 = vmul.f32 1.442695, %v2232_v52  ;;  %v2856_v28 = vsel %vm2497_vm10, %v13663_v37, 0 }
 0x520   : > { %11427 = vrcp.f32 %v2344_v18  ;;  %v2533_v29 = vpop.f32.mrf.mxu1  ;;  %v14277_v42 = vpop.eup %11425 }
 0x521   : > { %v2472_v31 = vpack.c.bf16 %v2440_v39, %v2440_v39  ;;  %11429 = vpow2.f32 %v2288_v3  ;;  %v2290_v43 = vmul.f32 1.442695, %v2231_v16  ;;  %v2372_v2 = vsel %vm1310_vm8, %v14277_v42, 0.0 }
 0x522   : > { %11431 = vpow2.f32 %v2298_v33  ;;  %2373 = vadd.xlane.f32.xlu0 %v2372_v2 }
 0x523   : > { %10695 = vmatmul.msk.bf16.vlgmr.msra.gmra.mxu3 %vm1310_vm8, %v2472_v31  ;;  %11433 = vpow2.f32 %v2290_v43 }
 0x524   : > { %2844 = vmatpush.bf16.msra.mxu3 %v2835_v45 }
 0x525   : > { %v2332_v15 = vpop.xlane.xlu0 %2331  ;;  %v2350_v54 = vpop.xlane.xlu2 %2349 }
 0x526   : > { %v11428_v58 = vpop.eup %11427 }
 0x527   : > { %v2347_v56 = vpop.xlane.xlu1 %2346  ;;  %v2442_v21 = vmul.f32 %v11428_v58, %v14140_v62  ;;  %v14285_v48 = vpop.eup %11429 }
 0x528   : > { %11435 = vrcp.f32 %v2347_v56  ;;  %v14287_v17 = vpop.eup %11431  ;;  %v2378_v47 = vsel %vm1310_vm8, %v14285_v48, 0.0 }
 0x529   : > { %v2474_v27 = vpack.c.bf16 %v2442_v21, %v2442_v21  ;;  %11437 = vrcp.f32 %v2332_v15  ;;  %v14292_v7 = vpop.eup %11433  ;;  %v2393_v6 = vsel %vm1310_vm8, %v14287_v17, 0.0  ;;  %v2940_v15 = vsel %vm2497_vm10, %v13736_v1, 0 }
 0x52a   : > { %11439 = vpow2.f32 %v2292_v12  ;;  %v2381_v11 = vsel %vm1310_vm8, %v14292_v7, 0.0  ;;  %2394 = vadd.xlane.f32.xlu2 %v2393_v6  ;;  %2379 = vadd.xlane.f32.xlu0 %v2378_v47  ;;  %v2982_v12 = vsel %vm2497_vm10, %v13808_v63, 0 }
 0x52b   : > { %10697 = vmatmul.msk.bf16.vlgmr.msrb.gmra.mxu2 %vm1310_vm8, %v2474_v27  ;;  %11441 = vpow2.f32 %v2294_v8  ;;  %2382 = vadd.xlane.f32.xlu1 %v2381_v11 }
 0x52c   : > { %2970 = vmatpush.bf16.msrb.mxu2 %v2961_v25  ;;  %11443 = vrcp.f32 %v2350_v54  ;;  %v18774_v25 = vld [vmem:[#allocation41_spill] sm:$0xff] }
 0x52d   : > { %v2200_v39 = vpop.xlane.xlu0 %2199 }
 0x52e   : > { %v11436_v62 = vpop.eup %11435  ;;  %v2234_v31 = vsub.f32 %v14171_v34, %v2200_v39 }
 0x52f   : > { %v2443_v10 = vmul.f32 %v11436_v62, %v14153_v23  ;;  %v11438_v19 = vpop.eup %11437 }
 0x530   : > { %v14301_v18 = vpop.eup %11439  ;;  %v2438_v3 = vmul.f32 %v11438_v19, %v14157_v41  ;;  %v2296_v29 = vmul.f32 1.442695, %v2234_v31  ;;  %v18776_v19 = vld [vmem:[#allocation13_spill] sm:$0xff] }
 0x531   : > { %v2475_v4 = vpack.c.bf16 %v2443_v10, %v2443_v10  ;;  %v14308_v33 = vpop.eup %11441  ;;  %v2384_v45 = vsel %vm1310_vm8, %v14301_v18, 0.0  ;;  %v18775_v10 = vld [vmem:[#allocation43_spill] sm:$0xff]  ;;  %v3045_v39 = vsel %vm2497_vm10, %v18776_v19, 0 }
 0x532   : > { %v2470_v23 = vpack.c.bf16 %v2438_v3, %v2438_v3  ;;  %11445 = vpow2.f32 %v2296_v29  ;;  %2385 = vadd.xlane.f32.xlu0 %v2384_v45  ;;  %v2387_v36 = vsel %vm1310_vm8, %v14308_v33, 0.0  ;;  %v11444_v41 = vpop.eup %11443  ;;  %v18779_v45 = vld [vmem:[#allocation27_spill] sm:$0xff] }
 0x533   : > { %10698 = vmatmul.msk.bf16.vlgmr.msrb.gmra.mxu3 %vm1310_vm8, %v2475_v4  ;;  %2388 = vadd.xlane.f32.xlu1 %v2387_v36  ;;  %v2444_v52 = vmul.f32 %v11444_v41, %v14159_v53  ;;  %v2353_v53 = vpop.xlane.xlu2 %2352 }
 0x534   : > { %2907 = vmatpush.bf16.msrb.mxu3 %v2898_v5  ;;  %10693 = vmatmul.msk.bf16.vlgmr.msrb.gmra.mxu1 %vm1310_vm8, %v2470_v23  ;;  %v18777_v5 = vld [vmem:[#allocation46_spill] sm:$0xff] }
 0x535   : > { %2865 = vmatpush.bf16.msrb.mxu1 %v2856_v28  ;;  %v2341_v34 = vpop.xlane.xlu0 %2340  ;;  %v2476_v58 = vpack.c.bf16 %v2444_v52, %v2444_v52  ;;  %v18780_v28 = vld [vmem:[#allocation37_spill] sm:$0xff] }
 0x536   : > { %11447 = vrcp.f32 %v2341_v34  ;;  %v18781_v34 = vld [vmem:[#allocation35_spill] sm:$0xff] }
 0x537   : > { %v2359_v22 = vpop.xlane.xlu1 %2358  ;;  %v3087_v52 = vsel %vm2497_vm10, %v18781_v34, 0 }
 0x538   : > { %v14317_v16 = vpop.eup %11445 }
 0x539   : > { %v2390_v43 = vsel %vm1310_vm8, %v14317_v16, 0.0 }
 0x53b   : > { %2391 = vadd.xlane.f32.xlu1 %v2390_v43 }
 0x53c   : > { %v11448_v56 = vpop.eup %11447 }
 0x53d   : > { %v2356_v21 = vpop.xlane.xlu0 %2355  ;;  %v2441_v27 = vmul.f32 %v11448_v56, %v14187_v9 }
 0x53e   : > { %11449 = vrcp.f32 %v2356_v21  ;;  %v18784_v21 = vld [vmem:[#allocation55_spill] sm:$0xff] }
 0x53f   : > { %11451 = vrcp.f32 %v2359_v22  ;;  %v2473_v8 = vpack.c.bf16 %v2441_v27, %v2441_v27 }
 0x540   : > { %v14322_v37 = vpop.f32.mrf.mxu3  ;;  %11453 = vrcp.f32 %v2353_v53 }
 0x541   : > { %18772 = vst [vmem:[#allocation113_spill] sm:$0xff] %v14322_v37  ;;  %v14324_v2 = vpop.f32.mrf.mxu2 }
 0x542   : > { %18773 = vst [vmem:[#allocation114_spill] sm:$0xff] %v14324_v2  ;;  %4569 = vrot.lane.b32.xlu2 %v18774_v25, %s11979_s25 }
 0x543   : > { %10699 = vmatmul.msk.bf16.vlgmr.msra.gmra.mxu3 %vm1310_vm8, %v2476_v58 }
 0x544   : > { %2991 = vmatpush.bf16.msra.mxu3 %v2982_v12  ;;  %10696 = vmatmul.msk.bf16.vlgmr.msra.gmra.mxu1 %vm1310_vm8, %v2473_v8  ;;  %v11450_v63 = vpop.eup %11449  ;;  %v18786_v8 = vld [vmem:[#allocation49_spill] sm:$0xff] }
 0x545   : > { %2949 = vmatpush.bf16.msra.mxu1 %v2940_v15  ;;  %v11452_v6 = vpop.eup %11451  ;;  %v2446_v47 = vmul.f32 %v11450_v63, %v14199_v0  ;;  %v2362_v11 = vpop.xlane.xlu0 %2361  ;;  %v18787_v15 = vld [vmem:[#allocation36_spill] sm:$0xff]  ;;  %v18788_v63 = vld [vmem:[#allocation58_spill] sm:$0xff] }
 0x546   : > { %11455 = vrcp.f32 %v2362_v11  ;;  %4632 = vrot.lane.b32.xlu0 %v18775_v10, %s11979_s25  ;;  %v2447_v1 = vmul.f32 %v11452_v6, %v14189_v20  ;;  %v11454_v4 = vpop.eup %11453  ;;  %v3066_v20 = vsel %vm2497_vm10, %v18779_v45, 0  ;;  %v18790_v6 = vld [vmem:[#allocation63_spill] sm:$0xff]  ;;  %v18791_v11 = vld [vmem:[#allocation10_spill] sm:$0xff]  ;;  %v18793_v45 = vld [vmem:[#allocation52_spill] sm:$0xff] }
 0x547   : > { %v2478_v54 = vpack.c.bf16 %v2446_v47, %v2446_v47  ;;  %v2445_v0 = vmul.f32 %v11454_v4, %v14174_v32  ;;  %v3024_v32 = vsel %vm2497_vm10, %v13853_v30, 0 }
 0x548   : > { %v2575_v62 = vpop.f32.mrf.mxu3  ;;  %v2479_v31 = vpack.c.bf16 %v2447_v1, %v2447_v1 }
 0x549   : > { %v2554_v9 = vpop.f32.mrf.mxu2  ;;  %10701 = vmatmul.msk.bf16.vlgmr.msra.gmra.mxu2 %vm1310_vm8, %v2478_v54  ;;  %v2477_v41 = vpack.c.bf16 %v2445_v0, %v2445_v0  ;;  %v3108_v62 = vsel %vm2497_vm10, %v18787_v15, 0 }
 0x54a   : > { %3054 = vmatpush.bf16.msra.mxu2 %v3045_v39  ;;  %4653 = vrot.lane.b32.xlu2 %v18777_v5, %s11979_s25  ;;  %v18789_v9 = vld [vmem:[#allocation66_spill] sm:$0xff] }
 0x54c   : > { %v11456_v3 = vpop.eup %11455 }
 0x54d   : > { %v2448_v29 = vmul.f32 %v11456_v3, %v14206_v14  ;;  %v18782_v14 = vld [vmem:[#allocation39_spill] sm:$0xff] }
 0x54e   : > { %4590 = vrot.lane.b32.xlu0 %v18780_v28, %s11979_s25 }
 0x54f   : > { %v2480_v36 = vpack.c.bf16 %v2448_v29, %v2448_v29  ;;  %v14383_v47 = vpop.permute.xlu1 %4485 }
 0x551   : > { %v14345_v23 = vpop.f32.mrf.mxu2  ;;  %10703 = vmatmul.msk.bf16.vlgmr.msrb.gmra.mxu0 %vm1310_vm8, %v2480_v36 }
 0x552   : > { %18778 = vst [vmem:[#allocation13_spill] sm:$0xff] %v14345_v23  ;;  %3096 = vmatpush.bf16.msrb.mxu0 %v3087_v52  ;;  %4800 = vrot.lane.b32.xlu2 %v13544_v60, %s11979_s25 }
 0x553   : > { %10702 = vmatmul.msk.bf16.vlgmr.msrb.gmra.mxu3 %vm1310_vm8, %v2479_v31 }
 0x554   : > { %3075 = vmatpush.bf16.msrb.mxu3 %v3066_v20  ;;  %10700 = vmatmul.msk.bf16.vlgmr.msrb.gmra.mxu1 %vm1310_vm8, %v2477_v41  ;;  %v2365_v58 = vpop.xlane.xlu2 %2364  ;;  %v3150_v20 = vsel %vm2497_vm10, %v18793_v45, 0 }
 0x555   : > { %3033 = vmatpush.bf16.msrb.mxu1 %v3024_v32  ;;  %4611 = vrot.lane.b32.xlu1 %v18782_v14, %s11979_s25  ;;  %11457 = vrcp.f32 %v2365_v58  ;;  %v14363_v22 = vpop.f32.mrf.mxu1  ;;  %v18796_v58 = vld [vmem:[#allocation15_spill] sm:$0xff] }
 0x556   : > { %18783 = vst [vmem:[#allocation27_spill] sm:$0xff] %v14363_v22  ;;  %4695 = vrot.lane.b32.xlu0 %v13440_v40, %s11979_s25 }
 0x558   : > { %v14389_v4 = vpop.permute.xlu0 %4548 }
 0x559   : > { %v2617_v43 = vpop.f32.mrf.mxu2 }
 0x55b   : > { %v11458_v56 = vpop.eup %11457 }
 0x55c   : > { %v2449_v30 = vmul.f32 %v11458_v56, %v14221_v38  ;;  %v3196_v56 = vsel %vm1310_vm8, %v18796_v58, 0 }
 0x55d   : > { %4716 = vrot.lane.b32.xlu1 %v18784_v21, %s11979_s25  ;;  %v2596_v27 = vpop.f32.mrf.mxu1 }
 0x55e   : > { %v2481_v53 = vpack.c.bf16 %v2449_v30, %v2449_v30  ;;  %4674 = vrot.lane.b32.xlu0 %v18786_v8, %s11979_s25  ;;  %v18797_v27 = vld [vmem:[#allocation44_spill] sm:$0xff] }
 0x561   : > { %v14370_v12 = vpop.f32.mrf.mxu2 }
 0x562   : > { %18785 = vst [vmem:[#allocation35_spill] sm:$0xff] %v14370_v12 }
 0x564   : > { %10704 = vmatmul.msk.bf16.vlgmr.msra.gmra.mxu1 %vm1310_vm8, %v2481_v53  ;;  %v3129_v53 = vsel %vm2497_vm10, %v18797_v27, 0 }
 0x565   : > { %3117 = vmatpush.bf16.msra.mxu1 %v3108_v62  ;;  %4737 = vrot.lane.b32.xlu1 %v18788_v63, %s11979_s25 }
 0x566   : > { %4779 = vrot.lane.b32.xlu0 %v18789_v9, %s11979_s25 }
 0x569   : > { %v2680_v38 = vpop.f32.mrf.mxu2 }
 0x56a   : > { %v14407_v38 = vpop.permute.xlu2 %4527 }
 0x56e   : > { %4758 = vrot.lane.b32.xlu0 %v18790_v6, %s11979_s25 }
 0x576   : > { %4863 = vrot.lane.b32.xlu0 %v18791_v11, %s11979_s25 }
 0x57c   : > { %v2371_v54 = vpop.xlane.xlu1 %2370 }
 0x57d   : > { %11459 = vrcp.f32 %v2371_v54 }
 0x57e   : > { %v14387_v1 = vpop.f32.mrf.mxu3 }
 0x57f   : > { %18792 = vst [vmem:[#allocation36_spill] sm:$0xff] %v14387_v1 }
 0x583   : > { %v11460_v19 = vpop.eup %11459  ;;  %v2368_v29 = vpop.xlane.xlu0 %2367 }
 0x584   : > { %v2451_v39 = vmul.f32 %v11460_v19, %v14241_v46  ;;  %v2377_v3 = vpop.xlane.xlu1 %2376 }
 0x585   : > { %11461 = vrcp.f32 %v2377_v3 }
 0x586   : > { %v2638_v0 = vpop.f32.mrf.mxu3  ;;  %v2483_v31 = vpack.c.bf16 %v2451_v39, %v2451_v39  ;;  %11463 = vrcp.f32 %v2368_v29  ;;  %v14412_v29 = vpop.permute.xlu2 %4506 }
 0x588   : > { %10706 = vmatmul.msk.bf16.vlgmr.msra.gmra.mxu3 %vm1310_vm8, %v2483_v31 }
 0x589   : > { %3159 = vmatpush.bf16.msra.mxu3 %v3150_v20  ;;  %v18800_v20 = vld [vmem:[#allocation16_spill] sm:$0xff] }
 0x58b   : > { %v11462_v36 = vpop.eup %11461 }
 0x58c   : > { %v2453_v41 = vmul.f32 %v11462_v36, %v14255_v55  ;;  %v11464_v52 = vpop.eup %11463  ;;  %v3173_v36 = vsel %vm1310_vm8, %v18800_v20, 0 }
 0x58d   : > { %v2450_v43 = vmul.f32 %v11464_v52, %v14257_v51 }
 0x58e   : > { %v14396_v34 = vpop.f32.mrf.mxu3  ;;  %v2485_v32 = vpack.c.bf16 %v2453_v41, %v2453_v41 }
 0x58f   : > { %18794 = vst [vmem:[#allocation52_spill] sm:$0xff] %v14396_v34  ;;  %v2482_v30 = vpack.c.bf16 %v2450_v43, %v2450_v43 }
 0x590   : > { %v14398_v46 = vpop.f32.mrf.mxu2  ;;  %10708 = vmatmul.msk.bf16.vlgmr.msrb.gmra.mxu1 %vm1310_vm8, %v2485_v32 }
 0x591   : > { %18795 = vst [vmem:[#allocation115_spill] sm:$0xff] %v14398_v46  ;;  %3205 = vmatpush.bf16.xpose.msrb.mxu1 %v3196_v56  ;;  %10705 = vmatmul.msk.bf16.vlgmr.msrb.gmra.mxu2 %vm1310_vm8, %v2482_v30 }
 0x592   : > { %3138 = vmatpush.bf16.msrb.mxu2 %v3129_v53 }
 0x595   : > { %v2374_v62 = vpop.xlane.xlu0 %2373 }
 0x596   : > { %v2701_v55 = vpop.f32.mrf.mxu3  ;;  %11465 = vrcp.f32 %v2374_v62  ;;  %v14409_v51 = vpop.f32.mrf.mxu1 }
 0x597   : > { %18798 = vst [vmem:[#allocation15_spill] sm:$0xff] %v14409_v51 }
 0x598   : > { %v2743_v15 = vpop.f32.mrf.mxu2 }
 0x599   : > { %v18802_v15 = vld [vmem:[#allocation30_spill] sm:$0xff] }
 0x59a   : > { %v3242_v62 = vsel %vm1310_vm8, %v18802_v15, 0 }
 0x59c   : > { %v11466_v54 = vpop.eup %11465 }
 0x59d   : > { %v2452_v19 = vmul.f32 %v11466_v54, %v14277_v42  ;;  %v2380_v39 = vpop.xlane.xlu0 %2379  ;;  %v2395_v56 = vpop.xlane.xlu2 %2394  ;;  %v18803_v54 = vld [vmem:[#allocation24_spill] sm:$0xff] }
 0x59e   : > { %v2383_v3 = vpop.xlane.xlu1 %2382  ;;  %v2659_v31 = vpop.f32.mrf.mxu1 }
 0x59f   : > { %v2484_v0 = vpack.c.bf16 %v2452_v19, %v2452_v19  ;;  %11467 = vrcp.f32 %v2383_v3  ;;  %v3219_v19 = vsel %vm1310_vm8, %v18803_v54, 0  ;;  %v18808_v54 = vld [vmem:[#allocation61_spill] sm:$0xff] }
 0x5a0   : > { %11469 = vrcp.f32 %v2380_v39 }
 0x5a1   : > { %10707 = vmatmul.msk.bf16.vlgmr.msra.gmra.mxu0 %vm1310_vm8, %v2484_v0 }
 0x5a2   : > { %3182 = vmatpush.bf16.xpose.msra.mxu0 %v3173_v36 }
 0x5a5   : > { %v11468_v41 = vpop.eup %11467  ;;  %v2386_v52 = vpop.xlane.xlu0 %2385 }
 0x5a6   : > { %v14414_v45 = vpop.f32.mrf.mxu3  ;;  %v11470_v32 = vpop.eup %11469  ;;  %v2455_v42 = vmul.f32 %v11468_v41, %v14292_v7  ;;  %11471 = vrcp.f32 %v2386_v52  ;;  %v18805_v52 = vld [vmem:[#allocation42_spill] sm:$0xff] }
 0x5a7   : > { %18799 = vst [vmem:[#allocation44_spill] sm:$0xff] %v14414_v45  ;;  %v2389_v43 = vpop.xlane.xlu1 %2388  ;;  %v2454_v58 = vmul.f32 %v11470_v32, %v14285_v48  ;;  %v3265_v32 = vsel %vm1310_vm8, %v18805_v52, 0  ;;  %v14783_v11 = vpop.permute.xlu2 %4569 }
 0x5a8   : > { %11473 = vrcp.f32 %v2389_v43  ;;  %v2487_v30 = vpack.c.bf16 %v2455_v42, %v2455_v42 }
 0x5a9   : > { %v2486_v53 = vpack.c.bf16 %v2454_v58, %v2454_v58  ;;  %11475 = vrcp.f32 %v2395_v56  ;;  %v18807_v58 = vld [vmem:[#allocation50_spill] sm:$0xff] }
 0x5aa   : > { %10710 = vmatmul.msk.bf16.vlgmr.msrb.gmra.mxu3 %vm1310_vm8, %v2487_v30 }
 0x5ab   : > { %10709 = vmatmul.msk.bf16.vlgmr.msra.gmra.mxu2 %vm1310_vm8, %v2486_v53  ;;  %3251 = vmatpush.bf16.xpose.msrb.mxu3 %v3242_v62 }
 0x5ac   : > { %v11472_v48 = vpop.eup %11471  ;;  %3228 = vmatpush.bf16.xpose.msra.mxu2 %v3219_v19  ;;  %v3334_v19 = vsel %vm1310_vm8, %v18808_v54, 0 }
 0x5ad   : > { %v2456_v39 = vmul.f32 %v11472_v48, %v14301_v18  ;;  %v3288_v18 = vsel %vm1310_vm8, %v18807_v58, 0  ;;  %v18809_v48 = vld [vmem:[#allocation60_spill] sm:$0xff] }
 0x5ae   : > { %v2764_v27 = vpop.f32.mrf.mxu3  ;;  %v14421_v55 = vpop.f32.mrf.mxu2 }
 0x5af   : > { %18801 = vst [vmem:[#allocation16_spill] sm:$0xff] %v14421_v55  ;;  %v11474_v7 = vpop.eup %11473  ;;  %v2392_v0 = vpop.xlane.xlu1 %2391  ;;  %v2488_v31 = vpack.c.bf16 %v2456_v39, %v2456_v39  ;;  %v18811_v39 = vld [vmem:[#allocation64_spill] sm:$0xff] }
 0x5b0   : > { %v2457_v3 = vmul.f32 %v11474_v7, %v14308_v33  ;;  %11477 = vrcp.f32 %v2392_v0  ;;  %v11476_v41 = vpop.eup %11475  ;;  %v3311_v7 = vsel %vm1310_vm8, %v18809_v48, 0  ;;  %v14807_v9 = vpop.permute.xlu2 %4653 }
 0x5b1   : > { %v14431_v20 = vpop.f32.mrf.mxu1  ;;  %10711 = vmatmul.msk.bf16.vlgmr.msrb.gmra.mxu0 %vm1310_vm8, %v2488_v31  ;;  %v2459_v33 = vmul.f32 %v11476_v41, %v14287_v17  ;;  %v18814_v31 = vld [vmem:[#allocation62_spill] sm:$0xff]  ;;  %v18815_v41 = vld [vmem:[#allocation25_spill] sm:$0xff] }
 0x5b2   : > { %18804 = vst [vmem:[#allocation30_spill] sm:$0xff] %v14431_v20  ;;  %v2489_v36 = vpack.c.bf16 %v2457_v3, %v2457_v3  ;;  %3274 = vmatpush.bf16.xpose.msrb.mxu0 %v3265_v32  ;;  %v18812_v3 = vld [vmem:[#allocation14_spill] sm:$0xff] }
 0x5b3   : > { %v2491_v53 = vpack.c.bf16 %v2459_v33, %v2459_v33  ;;  %v18818_v33 = vld [vmem:[#allocation65_spill] sm:$0xff] }
 0x5b4   : > { %10712 = vmatmul.msk.bf16.vlgmr.msra.gmra.mxu1 %vm1310_vm8, %v2489_v36  ;;  %v3380_v36 = vsel %vm1310_vm8, %v18814_v31, 0 }
 0x5b5   : > { %3297 = vmatpush.bf16.xpose.msra.mxu1 %v3288_v18  ;;  %v18817_v18 = vld [vmem:[#allocation33_spill] sm:$0xff] }
 0x5b6   : > { %v2806_v42 = vpop.f32.mrf.mxu2  ;;  %v14436_v43 = vpop.f32.mrf.mxu3 }
 0x5b7   : > { %18806 = vst [vmem:[#allocation24_spill] sm:$0xff] %v14436_v43  ;;  %v11478_v56 = vpop.eup %11477  ;;  %v18816_v42 = vld [vmem:[#allocation71_spill] sm:$0xff] }
 0x5b8   : > { %v2458_v30 = vmul.f32 %v11478_v56, %v14317_v16  ;;  %v3357_v16 = vsel %vm1310_vm8, %v18811_v39, 0  ;;  %v3426_v58 = vsel %vm1310_vm8, %v18816_v42, 0  ;;  %v3403_v56 = vsel %vm1310_vm8, %v18818_v33, 0  ;;  %v18829_v42 = vld [vmem:[#allocation48_spill] sm:$0xff]  ;;  %v14817_v10 = vpop.permute.xlu2 %4800 }
 0x5b9   : > { %v2722_v27 = vpop.f32.mrf.mxu1  ;;  %v18831_v33 = vld [vmem:[#allocation56_spill] sm:$0xff] }
 0x5ba   : > { %v2490_v15 = vpack.c.bf16 %v2458_v30, %v2458_v30  ;;  %10714 = vmatmul.msk.bf16.vlgmr.msra.gmra.mxu3 %vm1310_vm8, %v2491_v53  ;;  %v18819_v30 = vld [vmem:[#allocation32_spill] sm:$0xff] }
 0x5bb   : > { %3343 = vmatpush.bf16.xpose.msra.mxu3 %v3334_v19  ;;  %v18824_v19 = vld [vmem:[#allocation40_spill] sm:$0xff] }
 0x5bc   : > { %10713 = vmatmul.msk.bf16.vlgmr.msrb.gmra.mxu2 %vm1310_vm8, %v2490_v15 }
 0x5bd   : > { %3320 = vmatpush.bf16.xpose.msrb.mxu2 %v3311_v7  ;;  %v18826_v7 = vld [vmem:[#allocation80_spill] sm:$0xff] }
 0x5be   : > { %v2827_v62 = vpop.f32.mrf.mxu3  ;;  %v3472_v39 = vsel %vm1310_vm8, %v18826_v7, 0  ;;  %v18835_v7 = vld [vmem:[#allocation67_spill] sm:$0xff] }
 0x5bf   : > { %v18823_v62 = vld [vmem:[#allocation73_spill] sm:$0xff] }
 0x5c0   : > { %v3449_v54 = vsel %vm1310_vm8, %v18823_v62, 0 }
 0x5c1   : > { %v14449_v17 = vpop.f32.mrf.mxu1  ;;  %10715 = vmatmul.msk.bf16.vlgmr.msra.gmra.mxu0 %vm1310_vm8, %v18812_v3 }
 0x5c2   : > { %18810 = vst [vmem:[#allocation42_spill] sm:$0xff] %v14449_v17  ;;  %3366 = vmatpush.bf16.xpose.msra.mxu0 %v3357_v16  ;;  %v18827_v16 = vld [vmem:[#allocation47_spill] sm:$0xff] }
 0x5c4   : > { %10716 = vmatmul.msk.bf16.vlgmr.msrb.gmra.mxu1 %vm1310_vm8, %v18815_v41 }
 0x5c5   : > { %3389 = vmatpush.bf16.xpose.msrb.mxu1 %v3380_v36 }
 0x5c6   : > { %v14455_v0 = vpop.f32.mrf.mxu3 }
 0x5c7   : > { %18813 = vst [vmem:[#allocation50_spill] sm:$0xff] %v14455_v0  ;;  %v14749_v51 = vpop.permute.xlu1 %4611 }
 0x5c9   : > { %v2785_v52 = vpop.f32.mrf.mxu1 }
 0x5ca   : > { %10718 = vmatmul.msk.bf16.vlgmr.msrb.gmra.mxu3 %vm1310_vm8, %v18817_v18  ;;  %v18828_v52 = vld [vmem:[#allocation78_spill] sm:$0xff] }
 0x5cb   : > { %3435 = vmatpush.bf16.xpose.msrb.mxu3 %v3426_v58  ;;  %v18830_v58 = vld [vmem:[#allocation83_spill] sm:$0xff] }
 0x5cc   : > { %10717 = vmatmul.msk.bf16.vlgmr.msra.gmra.mxu2 %vm1310_vm8, %v18819_v30  ;;  %v14469_v27 = vpop.f32.mrf.mxu2  ;;  %v3495_v18 = vsel %vm1310_vm8, %v18830_v58, 0  ;;  %v18833_v30 = vld [vmem:[#allocation81_spill] sm:$0xff] }
 0x5cd   : > { %3412 = vmatpush.bf16.xpose.msra.mxu2 %v3403_v56  ;;  %18820 = vst [vmem:[#allocation61_spill] sm:$0xff] %v14469_v27  ;;  %v3541_v62 = vsel %vm1310_vm8, %v18833_v30, 0 }
 0x5ce   : > { %v2848_v32 = vpop.f32.mrf.mxu3  ;;  %v14471_v53 = vpop.f32.mrf.mxu0 }
 0x5cf   : > { %18821 = vst [vmem:[#allocation60_spill] sm:$0xff] %v14471_v53  ;;  %v3518_v32 = vsel %vm1310_vm8, %v18828_v52, 0  ;;  %v18839_v52 = vld [vmem:[#allocation76_spill] sm:$0xff] }
 0x5d1   : > { %v14473_v15 = vpop.f32.mrf.mxu1  ;;  %10719 = vmatmul.msk.bf16.vlgmr.msrb.gmra.mxu0 %vm1310_vm8, %v18824_v19  ;;  %v3564_v19 = vsel %vm1310_vm8, %v13674_v49, 0  ;;  %v18838_v49 = vld [vmem:[#allocation92_spill] sm:$0xff] }
 0x5d2   : > { %18822 = vst [vmem:[#allocation64_spill] sm:$0xff] %v14473_v15  ;;  %3458 = vmatpush.bf16.xpose.msrb.mxu0 %v3449_v54  ;;  %v18834_v54 = vld [vmem:[#allocation57_spill] sm:$0xff] }
 0x5d4   : > { %10720 = vmatmul.msk.bf16.vlgmr.msra.gmra.mxu1 %vm1310_vm8, %v18827_v16  ;;  %v2890_v3 = vpop.f32.mrf.mxu2  ;;  %v3610_v16 = vsel %vm1310_vm8, %v13738_v61, 0 }
 0x5d5   : > { %3481 = vmatpush.bf16.xpose.msra.mxu1 %v3472_v39  ;;  %v18836_v3 = vld [vmem:[#allocation72_spill] sm:$0xff] }
 0x5d6   : > { %v14479_v48 = vpop.f32.mrf.mxu3  ;;  %v2932_v31 = vpop.f32.mrf.mxu0 }
 0x5d7   : > { %18825 = vst [vmem:[#allocation14_spill] sm:$0xff] %v14479_v48  ;;  %v3587_v31 = vsel %vm1310_vm8, %v13705_v35, 0  ;;  %v18842_v35 = vld [vmem:[#allocation94_spill] sm:$0xff] }
 0x5d8   : > { %v3702_v58 = vsel %vm1310_vm8, %v18842_v35, 0 }
 0x5d9   : > { %v2869_v36 = vpop.f32.mrf.mxu1 }
 0x5da   : > { %10722 = vmatmul.msk.bf16.vlgmr.msra.gmra.mxu3 %vm1310_vm8, %v18829_v42  ;;  %v18837_v36 = vld [vmem:[#allocation69_spill] sm:$0xff]  ;;  %v18841_v42 = vld [vmem:[#allocation70_spill] sm:$0xff] }
 0x5db   : > { %3527 = vmatpush.bf16.xpose.msra.mxu3 %v3518_v32  ;;  %v18840_v32 = vld [vmem:[#allocation89_spill] sm:$0xff] }
 0x5dc   : > { %10721 = vmatmul.msk.bf16.vlgmr.msrb.gmra.mxu2 %vm1310_vm8, %v18831_v33  ;;  %v3656_v61 = vsel %vm1310_vm8, %v18840_v32, 0  ;;  %v18844_v33 = vld [vmem:[#allocation90_spill] sm:$0xff] }
 0x5dd   : > { %3504 = vmatpush.bf16.xpose.msrb.mxu2 %v3495_v18  ;;  %v18843_v18 = vld [vmem:[#allocation79_spill] sm:$0xff]  ;;  %v3679_v30 = vsel %vm1310_vm8, %v18844_v33, 0  ;;  %v18854_v32 = vld [vmem:[#allocation18_spill] sm:$0xff] }
 0x5de   : > { %v2911_v41 = vpop.f32.mrf.mxu3 }
 0x5df   : > { %v3633_v41 = vsel %vm1310_vm8, %v18838_v49, 0  ;;  %v18852_v49 = vld [vmem:[#allocation29_spill] sm:$0xff] }
 0x5e1   : > { %v14493_v56 = vpop.f32.mrf.mxu1  ;;  %10723 = vmatmul.msk.bf16.vlgmr.msra.gmra.mxu0 %vm1310_vm8, %v18834_v54  ;;  %v18846_v54 = vld [vmem:[#allocation103_spill] sm:$0xff] }
 0x5e2   : > { %18832 = vst [vmem:[#allocation62_spill] sm:$0xff] %v14493_v56  ;;  %3550 = vmatpush.bf16.xpose.msra.mxu0 %v3541_v62  ;;  %v18845_v62 = vld [vmem:[#allocation74_spill] sm:$0xff] }
 0x5e4   : > { %10724 = vmatmul.msk.bf16.vlgmr.msrb.gmra.mxu1 %vm1310_vm8, %v18835_v7  ;;  %v18847_v7 = vld [vmem:[#allocation82_spill] sm:$0xff] }
 0x5e5   : > { %3573 = vmatpush.bf16.xpose.msrb.mxu1 %v3564_v19  ;;  %v3725_v19 = vsel %vm1310_vm8, %v18846_v54, 0 }
 0x5e9   : > { %v2953_v39 = vpop.f32.mrf.mxu1 }
 0x5ea   : > { %10726 = vmatmul.msk.bf16.vlgmr.msrb.gmra.mxu3 %vm1310_vm8, %v18836_v3  ;;  %v18848_v39 = vld [vmem:[#allocation106_spill] sm:$0xff] }
 0x5eb   : > { %3619 = vmatpush.bf16.xpose.msrb.mxu3 %v3610_v16  ;;  %v3748_v16 = vsel %vm1310_vm8, %v18848_v39, 0  ;;  %v18849_v3 = vld [vmem:[#allocation86_spill] sm:$0xff]  ;;  %v18861_v39 = vld [vmem:[#allocation53_spill] sm:$0xff] }
 0x5ec   : > { %10725 = vmatmul.msk.bf16.vlgmr.msra.gmra.mxu2 %vm1310_vm8, %v18837_v36 }
 0x5ed   : > { %3596 = vmatpush.bf16.xpose.msra.mxu2 %v3587_v31 }
 0x5f1   : > { %10727 = vmatmul.msk.bf16.vlgmr.msrb.gmra.mxu0 %vm1310_vm8, %v18839_v52  ;;  %v18853_v52 = vld [vmem:[#allocation84_spill] sm:$0xff] }
 0x5f2   : > { %3642 = vmatpush.bf16.xpose.msrb.mxu0 %v3633_v41  ;;  %v3794_v41 = vsel %vm1310_vm8, %v18852_v49, 0 }
 0x5f4   : > { %10728 = vmatmul.msk.bf16.vlgmr.msra.gmra.mxu1 %vm1310_vm8, %v18841_v42  ;;  %v18855_v42 = vld [vmem:[#allocation87_spill] sm:$0xff] }
 0x5f5   : > { %3665 = vmatpush.bf16.xpose.msra.mxu1 %v3656_v61  ;;  %v3771_v61 = vsel %vm1310_vm8, %v18854_v32, 0  ;;  %v18864_v32 = vld [vmem:[#allocation93_spill] sm:$0xff] }
 0x5fa   : > { %10730 = vmatmul.msk.bf16.vlgmr.msra.gmra.mxu3 %vm1310_vm8, %v18843_v18 }
 0x5fb   : > { %3711 = vmatpush.bf16.xpose.msra.mxu3 %v3702_v58  ;;  %v18856_v58 = vld [vmem:[#allocation38_spill] sm:$0xff] }
 0x5fc   : > { %10729 = vmatmul.msk.bf16.vlgmr.msrb.gmra.mxu2 %vm1310_vm8, %v18845_v62  ;;  %v3817_v18 = vsel %vm1310_vm8, %v18856_v58, 0  ;;  %v18858_v62 = vld [vmem:[#allocation104_spill] sm:$0xff]  ;;  %v18867_v58 = vld [vmem:[#allocation101_spill] sm:$0xff] }
 0x5fd   : > { %3688 = vmatpush.bf16.xpose.msrb.mxu2 %v3679_v30  ;;  %v18857_v30 = vld [vmem:[#allocation88_spill] sm:$0xff]  ;;  %v3840_v54 = vsel %vm1310_vm8, %v18858_v62, 0 }
 0x601   : > { %10731 = vmatmul.msk.bf16.vlgmr.msra.gmra.mxu0 %vm1310_vm8, %v18847_v7 }
 0x602   : > { %3734 = vmatpush.bf16.xpose.msra.mxu0 %v3725_v19  ;;  %v18859_v19 = vld [vmem:[#allocation91_spill] sm:$0xff] }
 0x604   : > { %10732 = vmatmul.msk.bf16.vlgmr.msrb.gmra.mxu1 %vm1310_vm8, %v18849_v3  ;;  %v18862_v3 = vld [vmem:[#allocation95_spill] sm:$0xff] }
 0x605   : > { %3757 = vmatpush.bf16.xpose.msrb.mxu1 %v3748_v16  ;;  %v3886_v16 = vsel %vm1310_vm8, %v18861_v39, 0  ;;  %v18871_v39 = vld [vmem:[#allocation20_spill] sm:$0xff] }
 0x60a   : > { %10734 = vmatmul.msk.bf16.vlgmr.msrb.gmra.mxu3 %vm1310_vm8, %v18853_v52 }
 0x60b   : > { %v14535_v31 = vpop.f32.mrf.mxu3  ;;  %3803 = vmatpush.bf16.xpose.msrb.mxu3 %v3794_v41  ;;  %v18863_v41 = vld [vmem:[#allocation45_spill] sm:$0xff] }
 0x60c   : > { %18850 = vst [vmem:[#allocation25_spill] sm:$0xff] %v14535_v31  ;;  %10733 = vmatmul.msk.bf16.vlgmr.msra.gmra.mxu2 %vm1310_vm8, %v18855_v42  ;;  %v3863_v52 = vsel %vm1310_vm8, %v18863_v41, 0  ;;  %v18866_v42 = vld [vmem:[#allocation110_spill] sm:$0xff] }
 0x60d   : > { %v14537_v36 = vpop.f32.mrf.mxu1  ;;  %3780 = vmatpush.bf16.xpose.msra.mxu2 %v3771_v61 }
 0x60e   : > { %18851 = vst [vmem:[#allocation71_spill] sm:$0xff] %v14537_v36 }
 0x611   : > { %10735 = vmatmul.msk.bf16.vlgmr.msrb.gmra.mxu0 %vm1310_vm8, %v18857_v30  ;;  %v18869_v30 = vld [vmem:[#allocation102_spill] sm:$0xff] }
 0x612   : > { %3826 = vmatpush.bf16.xpose.msrb.mxu0 %v3817_v18  ;;  %v18868_v18 = vld [vmem:[#allocation107_spill] sm:$0xff] }
 0x613   : > { %v2995_v35 = vpop.f32.mrf.mxu3 }
 0x614   : > { %10736 = vmatmul.msk.bf16.vlgmr.msra.gmra.mxu1 %vm1310_vm8, %v18859_v19  ;;  %v14555_v7 = vpop.f32.mrf.mxu2  ;;  %v4323_v35 = vsel %vm2497_vm10, %v18866_v42, 0 }
 0x615   : > { %v3037_v33 = vpop.f32.mrf.mxu1  ;;  %18860 = vst [vmem:[#allocation33_spill] sm:$0xff] %v14555_v7  ;;  %3849 = vmatpush.bf16.xpose.msra.mxu1 %v3840_v54  ;;  %v18870_v54 = vld [vmem:[#allocation98_spill] sm:$0xff] }
 0x616   : > { %v4344_v33 = vsel %vm2497_vm10, %v18868_v18, 0  ;;  %v4386_v19 = vsel %vm2497_vm10, %v18870_v54, 0  ;;  %v18879_v18 = vld [vmem:[#allocation105_spill] sm:$0xff] }
 0x61a   : > { %10738 = vmatmul.msk.bf16.vlgmr.msra.gmra.mxu3 %vm1310_vm8, %v18862_v3 }
 0x61b   : > { %3895 = vmatpush.bf16.xpose.msra.mxu3 %v3886_v16  ;;  %v18872_v16 = vld [vmem:[#allocation100_spill] sm:$0xff] }
 0x61c   : > { %v2974_v49 = vpop.f32.mrf.mxu2  ;;  %10737 = vmatmul.msk.bf16.vlgmr.msrb.gmra.mxu2 %vm1310_vm8, %v18864_v32  ;;  %v4365_v3 = vsel %vm2497_vm10, %v18872_v16, 0 }
 0x61d   : > { %3872 = vmatpush.bf16.xpose.msrb.mxu2 %v3863_v52  ;;  %v18873_v49 = vld [vmem:[#allocation21_spill] sm:$0xff] }
 0x61e   : > { %v14565_v61 = vpop.f32.mrf.mxu0 }
 0x61f   : > { %18865 = vst [vmem:[#allocation65_spill] sm:$0xff] %v14565_v61 }
 0x621   : > { %10739 = vmatmul.msk.bf16.vlgmr.msra.gmra.mxu0 %vm1310_vm8, %v18867_v58 }
 0x622   : > { %4332 = vmatpush.bf16.msra.mxu0 %v4323_v35  ;;  %v18878_v35 = vld [vmem:[#allocation112_spill] sm:$0xff] }
 0x623   : > { %v4407_v58 = vsel %vm2497_vm10, %v18878_v35, 0  ;;  %v18884_v35 = vld [vmem:[#allocation109_spill] sm:$0xff] }
 0x624   : > { %10740 = vmatmul.msk.bf16.vlgmr.msrb.gmra.mxu1 %vm1310_vm8, %v18869_v30 }
 0x625   : > { %4353 = vmatpush.bf16.msrb.mxu1 %v4344_v33  ;;  %v18880_v33 = vld [vmem:[#allocation111_spill] sm:$0xff] }
 0x626   : > { %v3016_v62 = vpop.f32.mrf.mxu0  ;;  %v4428_v30 = vsel %vm2497_vm10, %v18880_v33, 0 }
 0x627   : > { %v18881_v62 = vld [vmem:[#allocation99_spill] sm:$0xff] }
 0x62a   : > { %10742 = vmatmul.msk.bf16.vlgmr.msrb.gmra.mxu3 %vm1310_vm8, %v18871_v39 }
 0x62b   : > { %4395 = vmatpush.bf16.msrb.mxu3 %v4386_v19 }
 0x62c   : > { %10741 = vmatmul.msk.bf16.vlgmr.msra.gmra.mxu2 %vm1310_vm8, %v18873_v49 }
 0x62d   : > { %4374 = vmatpush.bf16.msra.mxu2 %v4365_v3  ;;  %v14583_v41 = vpop.f32.mrf.mxu3  ;;  %v18882_v3 = vld [vmem:[#allocation108_spill] sm:$0xff] }
 0x62e   : > { %18874 = vst [vmem:[#allocation32_spill] sm:$0xff] %v14583_v41  ;;  %v14585_v52 = vpop.f32.mrf.mxu2  ;;  %v14587_v32 = vpop.f32.mrf.mxu0  ;;  %v4470_v49 = vsel %vm2497_vm10, %v18882_v3, 0 }
 0x62f   : > { %18875 = vst [vmem:[#allocation73_spill] sm:$0xff] %v14585_v52 }
 0x630   : > { %18876 = vst [vmem:[#allocation40_spill] sm:$0xff] %v14587_v32  ;;  %v18883_v32 = vld [vmem:[#allocation96_spill] sm:$0xff] }
 0x631   : > { %v14589_v42 = vpop.f32.mrf.mxu1  ;;  %10743 = vmatmul.msk.bf16.vlgmr.msrb.gmra.mxu0 %vm1310_vm8, %v18879_v18  ;;  %v4449_v18 = vsel %vm2497_vm10, %v18884_v35, 0 }
 0x632   : > { %18877 = vst [vmem:[#allocation80_spill] sm:$0xff] %v14589_v42  ;;  %4416 = vmatpush.bf16.msrb.mxu0 %v4407_v58  ;;  %v18885_v42 = vld [vmem:[#allocation97_spill] sm:$0xff] }
 0x634   : > { %10744 = vmatmul.msk.bf16.vlgmr.msra.gmra.mxu1 %vm1310_vm8, %v18881_v62 }
 0x635   : > { %4437 = vmatpush.bf16.msra.mxu1 %v4428_v30  ;;  %v3079_v54 = vpop.f32.mrf.mxu3 }
 0x636   : > { %v3058_v19 = vpop.f32.mrf.mxu2  ;;  %v3100_v39 = vpop.f32.mrf.mxu0 }
 0x639   : > { %v3121_v16 = vpop.f32.mrf.mxu1 }
 0x63a   : > { %10746 = vmatmul.msk.bf16.vlgmr.msra.gmra.mxu3 %vm1310_vm8, %v18883_v32 }
 0x63b   : > { %4479 = vmatpush.bf16.msra.mxu3 %v4470_v49 }
 0x63c   : > { %10745 = vmatmul.msk.bf16.vlgmr.msrb.gmra.mxu2 %vm1310_vm8, %v18885_v42 }
 0x63d   : > { %4458 = vmatpush.bf16.msrb.mxu2 %v4449_v18  ;;  %v14607_v58 = vpop.f32.mrf.mxu3 }
 0x63e   : > { %18886 = vst [vmem:[#allocation47_spill] sm:$0xff] %v14607_v58  ;;  %v3184_v30 = vpop.f32.mrf.mxu0 }
 0x63f   : > { %v14609_v33 = vpop.f32.mrf.mxu2  ;;  %v14613_v62 = vsel %vm13682_vm9, %v3184_v30, -1e+30 }
 0x640   : > { %18887 = vst [vmem:[#allocation78_spill] sm:$0xff] %v14609_v33  ;;  %v3933_v32 = vsel %vm1310_vm8, %v14613_v62, -inf }
 0x641   : > { %v3207_v54 = vpop.f32.mrf.mxu1  ;;  %3934 = vmax.xlane.f32.xlu1 %v3933_v32 }
 0x642   : > { %v14619_v19 = vsel %vm13682_vm9, %v3207_v54, -1e+30 }
 0x643   : > { %v3936_v42 = vsel %vm1310_vm8, %v14619_v19, -inf }
 0x644   : > { %3937 = vmax.xlane.f32.xlu0 %v3936_v42 }
 0x645   : > { %v3163_v39 = vpop.f32.mrf.mxu3 }
 0x646   : > { %v3186_v3 = vpop.f32.mrf.mxu0 }
 0x647   : > { %v3142_v16 = vpop.f32.mrf.mxu2 }
 0x649   : > { %v3209_v49 = vpop.f32.mrf.mxu1 }
 0x64d   : > { %v3253_v35 = vpop.f32.mrf.mxu3 }
 0x64e   : > { %v3276_v30 = vpop.f32.mrf.mxu0  ;;  %v14641_v16 = vsel %vm13682_vm9, %v3253_v35, -1e+30 }
 0x64f   : > { %v3230_v18 = vpop.f32.mrf.mxu2  ;;  %v14637_v42 = vsel %vm13682_vm9, %v3276_v30, -1e+30  ;;  %v3942_v41 = vsel %vm1310_vm8, %v14641_v16, -inf }
 0x650   : > { %v14625_v33 = vsel %vm13682_vm9, %v3230_v18, -1e+30 }
 0x651   : > { %v3299_v58 = vpop.f32.mrf.mxu1  ;;  %v3939_v54 = vsel %vm1310_vm8, %v14625_v33, -inf }
 0x652   : > { %v14631_v52 = vsel %vm13682_vm9, %v3299_v58, -1e+30  ;;  %3940 = vmax.xlane.f32.xlu0 %v3939_v54  ;;  %v3945_v58 = vsel %vm1310_vm8, %v14637_v42, -inf }
 0x653   : > { %v3948_v32 = vsel %vm1310_vm8, %v14631_v52, -inf }
 0x654   : > { %3949 = vmax.xlane.f32.xlu2 %v3948_v32 }
 0x655   : > { %v3255_v39 = vpop.f32.mrf.mxu3 }
 0x656   : > { %v3278_v49 = vpop.f32.mrf.mxu0 }
 0x657   : > { %v3232_v3 = vpop.f32.mrf.mxu2 }
 0x659   : > { %v3301_v18 = vpop.f32.mrf.mxu1 }
 0x65a   : > { %3946 = vmax.xlane.f32.xlu0 %v3945_v58 }
 0x65c   : > { %3943 = vmax.xlane.f32.xlu2 %v3942_v41 }
 0x65d   : > { %v3345_v54 = vpop.f32.mrf.mxu3 }
 0x65e   : > { %v3368_v30 = vpop.f32.mrf.mxu0  ;;  %v14661_v58 = vsel %vm13682_vm9, %v3345_v54, -1e+30 }
 0x65f   : > { %v3322_v32 = vpop.f32.mrf.mxu2  ;;  %v3954_v7 = vsel %vm1310_vm8, %v14661_v58, -inf }
 0x660   : > { %v14649_v39 = vsel %vm13682_vm9, %v3322_v32, -1e+30  ;;  %v14665_v32 = vsel %vm13682_vm9, %v3368_v30, -1e+30 }
 0x661   : > { %v3391_v35 = vpop.f32.mrf.mxu1  ;;  %v3951_v49 = vsel %vm1310_vm8, %v14649_v39, -inf  ;;  %v3957_v31 = vsel %vm1310_vm8, %v14665_v32, -inf }
 0x662   : > { %v14653_v3 = vsel %vm13682_vm9, %v3391_v35, -1e+30 }
 0x663   : > { %v3960_v18 = vsel %vm1310_vm8, %v14653_v3, -inf }
 0x664   : > { %3952 = vmax.xlane.f32.xlu2 %v3951_v49  ;;  %3961 = vmax.xlane.f32.xlu1 %v3960_v18 }
 0x665   : > { %v3347_v41 = vpop.f32.mrf.mxu3 }
 0x666   : > { %v3370_v35 = vpop.f32.mrf.mxu0 }
 0x667   : > { %v3324_v61 = vpop.f32.mrf.mxu2 }
 0x669   : > { %v3393_v36 = vpop.f32.mrf.mxu1 }
 0x66a   : > { %v14679_v36 = vpop.permute.xlu0 %4632 }
 0x66c   : > { %3955 = vmax.xlane.f32.xlu1 %v3954_v7  ;;  %3958 = vmax.xlane.f32.xlu2 %v3957_v31 }
 0x66d   : > { %v3437_v49 = vpop.f32.mrf.mxu3 }
 0x66e   : > { %v3460_v41 = vpop.f32.mrf.mxu0 }
 0x66f   : > { %v3414_v18 = vpop.f32.mrf.mxu2  ;;  %v14691_v53 = vsel %vm13682_vm9, %v3460_v41, -1e+30 }
 0x670   : > { %v14673_v54 = vsel %vm13682_vm9, %v3414_v18, -1e+30  ;;  %v14687_v18 = vsel %vm13682_vm9, %v3437_v49, -1e+30  ;;  %v3969_v0 = vsel %vm1310_vm8, %v14691_v53, -inf }
 0x671   : > { %v3483_v30 = vpop.f32.mrf.mxu1  ;;  %v3963_v35 = vsel %vm1310_vm8, %v14673_v54, -inf  ;;  %v3966_v48 = vsel %vm1310_vm8, %v14687_v18, -inf }
 0x672   : > { %v14677_v61 = vsel %vm13682_vm9, %v3483_v30, -1e+30 }
 0x673   : > { %v3972_v31 = vsel %vm1310_vm8, %v14677_v61, -inf }
 0x674   : > { %3964 = vmax.xlane.f32.xlu1 %v3963_v35  ;;  %3973 = vmax.xlane.f32.xlu0 %v3972_v31  ;;  %v14697_v35 = vpop.permute.xlu0 %4590 }
 0x675   : > { %v3439_v7 = vpop.f32.mrf.mxu3 }
 0x676   : > { %v3462_v56 = vpop.f32.mrf.mxu0 }
 0x677   : > { %v3416_v30 = vpop.f32.mrf.mxu2 }
 0x679   : > { %v3485_v27 = vpop.f32.mrf.mxu1 }
 0x67c   : > { %3967 = vmax.xlane.f32.xlu0 %v3966_v48  ;;  %3970 = vmax.xlane.f32.xlu1 %v3969_v0  ;;  %v14717_v15 = vpop.permute.xlu0 %4695 }
 0x67d   : > { %v3529_v31 = vpop.f32.mrf.mxu3 }
 0x67e   : > { %v14701_v7 = vsel %vm13682_vm9, %v3529_v31, -1e+30  ;;  %v3552_v41 = vpop.f32.mrf.mxu0 }
 0x67f   : > { %v3506_v49 = vpop.f32.mrf.mxu2  ;;  %v3978_v56 = vsel %vm1310_vm8, %v14701_v7, -inf  ;;  %v14721_v55 = vsel %vm13682_vm9, %v3552_v41, -1e+30 }
 0x680   : > { %v14705_v27 = vsel %vm13682_vm9, %v3506_v49, -1e+30  ;;  %3979 = vmax.xlane.f32.xlu2 %v3978_v56  ;;  %v3981_v56 = vsel %vm1310_vm8, %v14721_v55, -inf }
 0x681   : > { %v3575_v30 = vpop.f32.mrf.mxu1  ;;  %v3975_v48 = vsel %vm1310_vm8, %v14705_v27, -inf }
 0x682   : > { %v14711_v0 = vsel %vm13682_vm9, %v3575_v30, -1e+30 }
 0x683   : > { %v3984_v31 = vsel %vm1310_vm8, %v14711_v0, -inf }
 0x684   : > { %3976 = vmax.xlane.f32.xlu0 %v3975_v48  ;;  %3985 = vmax.xlane.f32.xlu1 %v3984_v31  ;;  %v14725_v12 = vpop.permute.xlu0 %4674 }
 0x685   : > { %v3531_v49 = vpop.f32.mrf.mxu3 }
 0x686   : > { %v3554_v45 = vpop.f32.mrf.mxu0 }
 0x687   : > { %v3508_v43 = vpop.f32.mrf.mxu2 }
 0x689   : > { %v3577_v30 = vpop.f32.mrf.mxu1 }
 0x68c   : > { %3982 = vmax.xlane.f32.xlu0 %v3981_v56  ;;  %v14753_v22 = vpop.permute.xlu0 %4779 }
 0x68d   : > { %v3621_v17 = vpop.f32.mrf.mxu3 }
 0x68e   : > { %v3644_v46 = vpop.f32.mrf.mxu0 }
 0x68f   : > { %v3598_v20 = vpop.f32.mrf.mxu2  ;;  %v14733_v41 = vsel %vm13682_vm9, %v3644_v46, -1e+30  ;;  %v14747_v46 = vsel %vm13682_vm9, %v3621_v17, -1e+30 }
 0x690   : > { %v14729_v48 = vsel %vm13682_vm9, %v3598_v20, -1e+30  ;;  %v3993_v31 = vsel %vm1310_vm8, %v14733_v41, -inf }
 0x691   : > { %v3667_v43 = vpop.f32.mrf.mxu1  ;;  %v3987_v45 = vsel %vm1310_vm8, %v14729_v48, -inf  ;;  %3994 = vmax.xlane.f32.xlu2 %v3993_v31 }
 0x692   : > { %v14741_v49 = vsel %vm13682_vm9, %v3667_v43, -1e+30  ;;  %3988 = vmax.xlane.f32.xlu1 %v3987_v45  ;;  %v3990_v43 = vsel %vm1310_vm8, %v14747_v46, -inf }
 0x693   : > { %v3996_v30 = vsel %vm1310_vm8, %v14741_v49, -inf }
 0x694   : > { %3997 = vmax.xlane.f32.xlu0 %v3996_v30 }
 0x695   : > { %v3623_v20 = vpop.f32.mrf.mxu3 }
 0x696   : > { %v3646_v34 = vpop.f32.mrf.mxu0 }
 0x697   : > { %v3600_v56 = vpop.f32.mrf.mxu2 }
 0x698   : > { %v14767_v56 = vpop.permute.xlu1 %4716 }
 0x699   : > { %v3669_v1 = vpop.f32.mrf.mxu1  ;;  %3991 = vmax.xlane.f32.xlu2 %v3990_v43  ;;  %v14769_v43 = vpop.permute.xlu0 %4758 }
 0x69d   : > { %v3713_v23 = vpop.f32.mrf.mxu3 }
 0x69e   : > { %v3736_v31 = vpop.f32.mrf.mxu0 }
 0x69f   : > { %v3690_v45 = vpop.f32.mrf.mxu2  ;;  %v14761_v17 = vsel %vm13682_vm9, %v3736_v31, -1e+30 }
 0x6a0   : > { %v14757_v30 = vsel %vm13682_vm9, %v3690_v45, -1e+30  ;;  %v4005_v20 = vsel %vm1310_vm8, %v14761_v17, -inf  ;;  %v14773_v45 = vsel %vm13682_vm9, %v3713_v23, -1e+30  ;;  %v14785_v23 = vpop.permute.xlu1 %4737 }
 0x6a1   : > { %v3759_v1 = vpop.f32.mrf.mxu1  ;;  %v3999_v34 = vsel %vm1310_vm8, %v14757_v30, -inf  ;;  %4006 = vmax.xlane.f32.xlu1 %v4005_v20  ;;  %v14787_v63 = vpop.permute.xlu0 %4863 }
 0x6a2   : > { %4000 = vmax.xlane.f32.xlu0 %v3999_v34  ;;  %v14777_v31 = vsel %vm13682_vm9, %v3759_v1, -1e+30  ;;  %v4002_v34 = vsel %vm1310_vm8, %v14773_v45, -inf }
 0x6a3   : > { %v4008_v20 = vsel %vm1310_vm8, %v14777_v31, -inf }
 0x6a5   : > { %v3715_v2 = vpop.f32.mrf.mxu3 }
 0x6a6   : > { %v3738_v26 = vpop.f32.mrf.mxu0 }
 0x6a7   : > { %v3692_v37 = vpop.f32.mrf.mxu2 }
 0x6a9   : > { %v3761_v13 = vpop.f32.mrf.mxu1  ;;  %4003 = vmax.xlane.f32.xlu1 %v4002_v34 }
 0x6aa   : > { %4009 = vmax.xlane.f32.xlu0 %v4008_v20 }
 0x6ad   : > { %v3805_v1 = vpop.f32.mrf.mxu3 }
 0x6ae   : > { %v14791_v26 = vsel %vm13682_vm9, %v3805_v1, -1e+30  ;;  %v3828_v13 = vpop.f32.mrf.mxu0 }
 0x6af   : > { %v3782_v6 = vpop.f32.mrf.mxu2  ;;  %v4014_v2 = vsel %vm1310_vm8, %v14791_v26, -inf  ;;  %v14811_v8 = vsel %vm13682_vm9, %v3828_v13, -1e+30 }
 0x6b0   : > { %v14795_v37 = vsel %vm13682_vm9, %v3782_v6, -1e+30  ;;  %4015 = vmax.xlane.f32.xlu2 %v4014_v2 }
 0x6b1   : > { %v3851_v20 = vpop.f32.mrf.mxu1  ;;  %v4011_v34 = vsel %vm1310_vm8, %v14795_v37, -inf }
 0x6b2   : > { %v14803_v60 = vsel %vm13682_vm9, %v3851_v20, -1e+30  ;;  %4012 = vmax.xlane.f32.xlu0 %v4011_v34  ;;  %v4017_v34 = vsel %vm1310_vm8, %v14811_v8, -inf }
 0x6b3   : > { %v4020_v1 = vsel %vm1310_vm8, %v14803_v60, -inf }
 0x6b4   : > { %4021 = vmax.xlane.f32.xlu1 %v4020_v1  ;;  %v3935_v6 = vpop.xlane.xlu1 %3934 }
 0x6b5   : > { %v3807_v21 = vpop.f32.mrf.mxu3  ;;  %v4029_v5 = vsub.f32 %v14613_v62, %v3935_v6 }
 0x6b6   : > { %v3830_v2 = vpop.f32.mrf.mxu0 }
 0x6b7   : > { %v3938_v40 = vpop.xlane.xlu0 %3937  ;;  %v3784_v28 = vpop.f32.mrf.mxu2  ;;  %v4061_v25 = vmul.f32 1.442695, %v4029_v5 }
 0x6b8   : > { %v4030_v20 = vsub.f32 %v14619_v19, %v3938_v40 }
 0x6b9   : > { %v3853_v14 = vpop.f32.mrf.mxu1  ;;  %11479 = vpow2.f32 %v4061_v25 }
 0x6ba   : > { %v4063_v1 = vmul.f32 1.442695, %v4030_v20  ;;  %4018 = vmax.xlane.f32.xlu0 %v4017_v34 }
 0x6bc   : > { %11481 = vpow2.f32 %v4063_v1 }
 0x6bd   : > { %v3897_v13 = vpop.f32.mrf.mxu3 }
 0x6be   : > { %v14836_v2 = vsel %vm13682_vm9, %v3897_v13, -1e+30 }
 0x6bf   : > { %v3874_v21 = vpop.f32.mrf.mxu2  ;;  %v14819_v57 = vpop.eup %11479 }
 0x6c0   : > { %v14823_v28 = vsel %vm13682_vm9, %v3874_v21, -1e+30  ;;  %v4125_v25 = vsel %vm1310_vm8, %v14819_v57, 0.0 }
 0x6c1   : > { %v4023_v5 = vsel %vm1310_vm8, %v14823_v28, -inf }
 0x6c2   : > { %v14825_v40 = vpop.eup %11481  ;;  %4024 = vmax.xlane.f32.xlu1 %v4023_v5  ;;  %4126 = vadd.xlane.f32.xlu0 %v4125_v25  ;;  %v4026_v5 = vsel %vm1310_vm8, %v14836_v2, -inf }
 0x6c3   : > { %v4128_v14 = vsel %vm1310_vm8, %v14825_v40, 0.0 }
 0x6c4   : > { %4129 = vadd.xlane.f32.xlu2 %v4128_v14 }
 0x6c5   : > { %v3941_v62 = vpop.xlane.xlu0 %3940  ;;  %v3899_v6 = vpop.f32.mrf.mxu3 }
 0x6c6   : > { %v4031_v19 = vsub.f32 %v14625_v33, %v3941_v62 }
 0x6c7   : > { %v3950_v20 = vpop.xlane.xlu2 %3949  ;;  %v3876_v34 = vpop.f32.mrf.mxu2 }
 0x6c8   : > { %v4065_v1 = vmul.f32 1.442695, %v4031_v19  ;;  %v4034_v21 = vsub.f32 %v14631_v52, %v3950_v20 }
 0x6ca   : > { %11483 = vpow2.f32 %v4065_v1  ;;  %v4071_v25 = vmul.f32 1.442695, %v4034_v21 }
 0x6cc   : > { %4027 = vmax.xlane.f32.xlu2 %v4026_v5  ;;  %11485 = vpow2.f32 %v4071_v25 }
 0x6cd   : > { %v3947_v14 = vpop.xlane.xlu0 %3946 }
 0x6ce   : > { %v4033_v44 = vsub.f32 %v14637_v42, %v3947_v14 }
 0x6cf   : > { %v3944_v33 = vpop.xlane.xlu2 %3943 }
 0x6d0   : > { %v14842_v62 = vpop.eup %11483  ;;  %v4069_v6 = vmul.f32 1.442695, %v4033_v44  ;;  %v4032_v13 = vsub.f32 %v14641_v16, %v3944_v33 }
 0x6d1   : > { %v4131_v52 = vsel %vm1310_vm8, %v14842_v62, 0.0 }
 0x6d2   : > { %11487 = vpow2.f32 %v4069_v6  ;;  %v4067_v19 = vmul.f32 1.442695, %v4032_v13  ;;  %v14847_v1 = vpop.eup %11485 }
 0x6d3   : > { %v4140_v25 = vsel %vm1310_vm8, %v14847_v1, 0.0 }
 0x6d4   : > { %4132 = vadd.xlane.f32.xlu2 %v4131_v52  ;;  %11489 = vpow2.f32 %v4067_v19 }
 0x6d7   : > { %v3953_v20 = vpop.xlane.xlu2 %3952  ;;  %v3962_v34 = vpop.xlane.xlu1 %3961 }
 0x6d8   : > { %v4035_v21 = vsub.f32 %v14649_v39, %v3953_v20  ;;  %v14850_v42 = vpop.eup %11487  ;;  %v4038_v44 = vsub.f32 %v14653_v3, %v3962_v34 }
 0x6d9   : > { %v4137_v16 = vsel %vm1310_vm8, %v14850_v42, 0.0 }
 0x6da   : > { %v4073_v5 = vmul.f32 1.442695, %v4035_v21  ;;  %4138 = vadd.xlane.f32.xlu1 %v4137_v16  ;;  %v4079_v14 = vmul.f32 1.442695, %v4038_v44  ;;  %v14857_v33 = vpop.eup %11489 }
 0x6db   : > { %v4134_v19 = vsel %vm1310_vm8, %v14857_v33, 0.0 }
 0x6dc   : > { %11491 = vpow2.f32 %v4073_v5  ;;  %4141 = vadd.xlane.f32.xlu2 %v4140_v25 }
 0x6dd   : > { %11493 = vpow2.f32 %v4079_v14 }
 0x6df   : > { %v3956_v6 = vpop.xlane.xlu1 %3955  ;;  %v3959_v39 = vpop.xlane.xlu2 %3958 }
 0x6e0   : > { %v4037_v13 = vsub.f32 %v14665_v32, %v3959_v39  ;;  %v4036_v20 = vsub.f32 %v14661_v58, %v3956_v6 }
 0x6e2   : > { %v14860_v52 = vpop.eup %11491  ;;  %v4077_v3 = vmul.f32 1.442695, %v4037_v13  ;;  %4135 = vadd.xlane.f32.xlu1 %v4134_v19  ;;  %v4075_v44 = vmul.f32 1.442695, %v4036_v20 }
 0x6e3   : > { %v4143_v34 = vsel %vm1310_vm8, %v14860_v52, 0.0  ;;  %v14867_v21 = vpop.eup %11493 }
 0x6e4   : > { %4144 = vadd.xlane.f32.xlu2 %v4143_v34  ;;  %11495 = vpow2.f32 %v4077_v3  ;;  %v4152_v58 = vsel %vm1310_vm8, %v14867_v21, 0.0 }
 0x6e5   : > { %11497 = vpow2.f32 %v4075_v44 }
 0x6e7   : > { %v3965_v5 = vpop.xlane.xlu1 %3964  ;;  %v3974_v32 = vpop.xlane.xlu0 %3973 }
 0x6e8   : > { %v4039_v16 = vsub.f32 %v14673_v54, %v3965_v5  ;;  %v4042_v25 = vsub.f32 %v14677_v61, %v3974_v32 }
 0x6ea   : > { %v4081_v14 = vmul.f32 1.442695, %v4039_v16  ;;  %v4087_v39 = vmul.f32 1.442695, %v4042_v25  ;;  %v14873_v6 = vpop.eup %11495  ;;  %4153 = vadd.xlane.f32.xlu1 %v4152_v58 }
 0x6eb   : > { %v4149_v13 = vsel %vm1310_vm8, %v14873_v6, 0.0  ;;  %v14879_v20 = vpop.eup %11497 }
 0x6ec   : > { %11499 = vpow2.f32 %v4081_v14  ;;  %4150 = vadd.xlane.f32.xlu0 %v4149_v13  ;;  %v4146_v25 = vsel %vm1310_vm8, %v14879_v20, 0.0 }
 0x6ed   : > { %11501 = vpow2.f32 %v4087_v39 }
 0x6ef   : > { %v3971_v3 = vpop.xlane.xlu1 %3970  ;;  %v3968_v19 = vpop.xlane.xlu0 %3967 }
 0x6f0   : > { %v4041_v54 = vsub.f32 %v14691_v53, %v3971_v3  ;;  %v4040_v61 = vsub.f32 %v14687_v18, %v3968_v19 }
 0x6f2   : > { %v14881_v34 = vpop.eup %11499  ;;  %v4085_v5 = vmul.f32 1.442695, %v4041_v54  ;;  %v4083_v32 = vmul.f32 1.442695, %v4040_v61 }
 0x6f3   : > { %v14883_v44 = vpop.eup %11501  ;;  %v4155_v16 = vsel %vm1310_vm8, %v14881_v34, 0.0 }
 0x6f4   : > { %11503 = vpow2.f32 %v4085_v5  ;;  %4156 = vadd.xlane.f32.xlu1 %v4155_v16  ;;  %v4164_v53 = vsel %vm1310_vm8, %v14883_v44, 0.0  ;;  %4147 = vadd.xlane.f32.xlu0 %v4146_v25  ;;  %v3980_v5 = vpop.xlane.xlu2 %3979 }
 0x6f5   : > { %11505 = vpow2.f32 %v4083_v32  ;;  %4165 = vadd.xlane.f32.xlu2 %v4164_v53  ;;  %v4044_v25 = vsub.f32 %v14701_v7, %v3980_v5 }
 0x6f7   : > { %v3977_v18 = vpop.xlane.xlu0 %3976  ;;  %v3986_v14 = vpop.xlane.xlu1 %3985 }
 0x6f8   : > { %v4043_v39 = vsub.f32 %v14705_v27, %v3977_v18  ;;  %v4046_v19 = vsub.f32 %v14711_v0, %v3986_v14  ;;  %v4091_v14 = vmul.f32 1.442695, %v4044_v25 }
 0x6fa   : > { %v14892_v58 = vpop.eup %11503  ;;  %v4089_v13 = vmul.f32 1.442695, %v4043_v39  ;;  %v4095_v32 = vmul.f32 1.442695, %v4046_v19 }
 0x6fb   : > { %v14894_v3 = vpop.eup %11505  ;;  %v4161_v54 = vsel %vm1310_vm8, %v14892_v58, 0.0 }
 0x6fc   : > { %v4158_v61 = vsel %vm1310_vm8, %v14894_v3, 0.0  ;;  %11507 = vpow2.f32 %v4089_v13  ;;  %4162 = vadd.xlane.f32.xlu0 %v4161_v54 }
 0x6fd   : > { %4159 = vadd.xlane.f32.xlu2 %v4158_v61  ;;  %11509 = vpow2.f32 %v4095_v32 }
 0x6ff   : > { %v3983_v16 = vpop.xlane.xlu0 %3982 }
 0x700   : > { %v4045_v27 = vsub.f32 %v14721_v55, %v3983_v16 }
 0x702   : > { %v4093_v53 = vmul.f32 1.442695, %v4045_v27  ;;  %v14903_v18 = vpop.eup %11507 }
 0x703   : > { %v4167_v0 = vsel %vm1310_vm8, %v14903_v18, 0.0  ;;  %v14908_v61 = vpop.eup %11509 }
 0x704   : > { %11511 = vpow2.f32 %v4093_v53  ;;  %v3995_v13 = vpop.xlane.xlu2 %3994  ;;  %v4176_v27 = vsel %vm1310_vm8, %v14908_v61, 0.0 }
 0x705   : > { %4168 = vadd.xlane.f32.xlu2 %v4167_v0  ;;  %v3989_v39 = vpop.xlane.xlu1 %3988  ;;  %v4049_v7 = vsub.f32 %v14733_v41, %v3995_v13  ;;  %11513 = vpow2.f32 %v4091_v14 }
 0x706   : > { %v4047_v54 = vsub.f32 %v14729_v48, %v3989_v39 }
 0x707   : > { %v3998_v19 = vpop.xlane.xlu0 %3997  ;;  %v4101_v48 = vmul.f32 1.442695, %v4049_v7 }
 0x708   : > { %v4097_v55 = vmul.f32 1.442695, %v4047_v54  ;;  %v4050_v32 = vsub.f32 %v14741_v49, %v3998_v19 }
 0x70a   : > { %v14911_v5 = vpop.eup %11511  ;;  %11515 = vpow2.f32 %v4097_v55  ;;  %v4103_v25 = vmul.f32 1.442695, %v4050_v32 }
 0x70b   : > { %v4173_v16 = vsel %vm1310_vm8, %v14911_v5, 0.0  ;;  %v14919_v41 = vpop.eup %11513  ;;  %11517 = vpow2.f32 %v4101_v48 }
 0x70c   : > { %4174 = vadd.xlane.f32.xlu1 %v4173_v16  ;;  %v3992_v53 = vpop.xlane.xlu2 %3991  ;;  %11519 = vpow2.f32 %v4103_v25  ;;  %v4170_v14 = vsel %vm1310_vm8, %v14919_v41, 0.0 }
 0x70d   : > { %4177 = vadd.xlane.f32.xlu2 %v4176_v27  ;;  %v4048_v0 = vsub.f32 %v14747_v46, %v3992_v53 }
 0x70f   : > { %v4099_v49 = vmul.f32 1.442695, %v4048_v0 }
 0x710   : > { %v14921_v39 = vpop.eup %11515 }
 0x711   : > { %11521 = vpow2.f32 %v4099_v49  ;;  %v4179_v13 = vsel %vm1310_vm8, %v14921_v39, 0.0  ;;  %v14927_v19 = vpop.eup %11517 }
 0x712   : > { %v14930_v7 = vpop.eup %11519  ;;  %v4185_v53 = vsel %vm1310_vm8, %v14927_v19, 0.0 }
 0x713   : > { %v4188_v25 = vsel %vm1310_vm8, %v14930_v7, 0.0 }
 0x714   : > { %4171 = vadd.xlane.f32.xlu1 %v4170_v14  ;;  %v4007_v55 = vpop.xlane.xlu1 %4006 }
 0x715   : > { %4180 = vadd.xlane.f32.xlu2 %v4179_v13  ;;  %v4001_v54 = vpop.xlane.xlu0 %4000  ;;  %v4053_v27 = vsub.f32 %v14761_v17, %v4007_v55 }
 0x716   : > { %v4051_v46 = vsub.f32 %v14757_v30, %v4001_v54 }
 0x717   : > { %v14932_v32 = vpop.eup %11521  ;;  %v4109_v30 = vmul.f32 1.442695, %v4053_v27 }
 0x718   : > { %v4105_v16 = vmul.f32 1.442695, %v4051_v46  ;;  %v4182_v48 = vsel %vm1310_vm8, %v14932_v32, 0.0 }
 0x719   : > { %4183 = vadd.xlane.f32.xlu0 %v4182_v48  ;;  %v18891_v48 = vld [vmem:[#allocation77_spill] sm:$0xff] }
 0x71a   : > { %11523 = vpow2.f32 %v4105_v16  ;;  %v18890_v16 = vld [vmem:[#allocation75_spill] sm:$0xff] }
 0x71b   : > { %11525 = vpow2.f32 %v4109_v30 }
 0x71c   : > { %4189 = vadd.xlane.f32.xlu1 %v4188_v25  ;;  %v4004_v27 = vpop.xlane.xlu1 %4003 }
 0x71d   : > { %4186 = vadd.xlane.f32.xlu2 %v4185_v53  ;;  %v4010_v0 = vpop.xlane.xlu0 %4009 }
 0x720   : > { %v14941_v49 = vpop.eup %11523 }
 0x721   : > { %18888 = vst [vmem:[#allocation48_spill] sm:$0xff] %v14941_v49  ;;  %v4191_v17 = vsel %vm1310_vm8, %v14941_v49, 0.0  ;;  %v14945_v13 = vpop.eup %11525  ;;  %v4491_v49 = vsel %vm2497_vm10, %v14383_v47, 0  ;;  %v4054_v47 = vsub.f32 %v14777_v31, %v4010_v0 }
 0x722   : > { %18889 = vst [vmem:[#allocation83_spill] sm:$0xff] %v14945_v13  ;;  %v4197_v54 = vsel %vm1310_vm8, %v14945_v13, 0.0 }
 0x723   : > { %v4016_v55 = vpop.xlane.xlu2 %4015 }
 0x724   : > { %4192 = vadd.xlane.f32.xlu1 %v4191_v17 }
 0x725   : > { %v4013_v14 = vpop.xlane.xlu0 %4012 }
 0x726   : > { %v4055_v31 = vsub.f32 %v14795_v37, %v4013_v14 }
 0x727   : > { %v14955_v24 = vpop.xlane.xlu1 %4021 }
 0x72c   : > { %4198 = vadd.xlane.f32.xlu1 %v4197_v54 }
 0x72d   : > { %v14949_v46 = vpop.xlane.xlu0 %4018  ;;  %4842 = vrot.lane.b32.xlu0 %v18890_v16, %s11979_s25 }
 0x735   : > { %4821 = vrot.lane.b32.xlu2 %v18891_v48, %s11979_s25  ;;  %v4127_v25 = vpop.xlane.xlu0 %4126 }
 0x736   : > { %11527 = vrcp.f32 %v4127_v25  ;;  %v4512_v25 = vsel %vm2497_vm10, %v14412_v29, 0 }
 0x737   : > { %v4130_v53 = vpop.xlane.xlu2 %4129 }
 0x738   : > { %11529 = vrcp.f32 %v4130_v53  ;;  %v4025_v53 = vpop.xlane.xlu1 %4024 }
 0x73c   : > { %v11528_v30 = vpop.eup %11527 }
 0x73d   : > { %v4253_v54 = vmul.f32 %v11528_v30, %v14819_v57  ;;  %v18892_v57 = vld [vmem:[#allocation5_spill] sm:$0xff] }
 0x73e   : > { %v11530_v17 = vpop.eup %11529 }
 0x73f   : > { %v4254_v50 = vmul.f32 %v11530_v17, %v14825_v40  ;;  %v14959_v59 = vpop.xlane.xlu2 %4027  ;;  %v4285_v13 = vpack.c.bf16 %v4253_v54, %v4253_v54  ;;  %v4052_v40 = vsub.f32 %v14773_v45, %v4004_v27  ;;  %v4111_v54 = vmul.f32 1.442695, %v4054_v47 }
 0x740   : > { %v4533_v45 = vsel %vm2497_vm10, %v14407_v38, 0 }
 0x741   : > { %v4286_v16 = vpack.c.bf16 %v4254_v50, %v4254_v50  ;;  %10747 = vmatmul.msk.bf16.vlgmr.msra.gmra.mxu0 %vm1310_vm8, %v4285_v13  ;;  %v4107_v50 = vmul.f32 1.442695, %v4052_v40  ;;  %v4056_v13 = vsub.f32 %v14791_v26, %v4016_v55 }
 0x742   : > { %4500 = vmatpush.bf16.msra.mxu0 %v4491_v49 }
 0x743   : > { %10748 = vmatmul.msk.bf16.vlgmr.msrb.gmra.mxu1 %vm1310_vm8, %v4286_v16  ;;  %v4115_v48 = vmul.f32 1.442695, %v4056_v13 }
 0x744   : > { %4521 = vmatpush.bf16.msrb.mxu1 %v4512_v25 }
 0x745   : > { %4884 = vrot.lane.b32.xlu1 %v18892_v57, %s11979_s25 }
 0x747   : > { %v4133_v30 = vpop.xlane.xlu2 %4132 }
 0x748   : > { %11531 = vrcp.f32 %v4133_v30 }
 0x749   : > { %11533 = vpow2.f32 %v4107_v50  ;;  %v4113_v50 = vmul.f32 1.442695, %v4055_v31 }
 0x74d   : > { %v4139_v29 = vpop.xlane.xlu1 %4138 }
 0x74e   : > { %v11532_v17 = vpop.eup %11531  ;;  %11535 = vrcp.f32 %v4139_v29 }
 0x74f   : > { %v4255_v16 = vmul.f32 %v11532_v17, %v14842_v62  ;;  %v4142_v49 = vpop.xlane.xlu2 %4141  ;;  %v14976_v27 = vpop.eup %11533  ;;  %v4059_v62 = vsub.f32 %v14823_v28, %v4025_v53  ;;  %v4575_v28 = vsel %vm2497_vm10, %v14783_v11, 0  ;;  %v4060_v53 = vsub.f32 %v14836_v2, %v14959_v59 }
 0x750   : > { %11537 = vrcp.f32 %v4142_v49  ;;  %v4194_v17 = vsel %vm1310_vm8, %v14976_v27, 0.0  ;;  %v4057_v11 = vsub.f32 %v14811_v8, %v14949_v46 }
 0x751   : > { %v4287_v25 = vpack.c.bf16 %v4255_v16, %v4255_v16  ;;  %11539 = vpow2.f32 %v4111_v54 }
 0x752   : > { %11541 = vpow2.f32 %v4115_v48  ;;  %v4121_v48 = vmul.f32 1.442695, %v4059_v62  ;;  %v4117_v31 = vmul.f32 1.442695, %v4057_v11 }
 0x753   : > { %10749 = vmatmul.msk.bf16.vlgmr.msra.gmra.mxu2 %vm1310_vm8, %v4287_v25  ;;  %v4123_v25 = vmul.f32 1.442695, %v4060_v53 }
 0x754   : > { %4542 = vmatpush.bf16.msra.mxu2 %v4533_v45  ;;  %v11536_v26 = vpop.eup %11535 }
 0x755   : > { %v4257_v55 = vmul.f32 %v11536_v26, %v14850_v42  ;;  %v4136_v40 = vpop.xlane.xlu1 %4135  ;;  %v4058_v26 = vsub.f32 %v14803_v60, %v14955_v24 }
 0x756   : > { %v11538_v0 = vpop.eup %11537  ;;  %11543 = vrcp.f32 %v4136_v40 }
 0x757   : > { %v4258_v30 = vmul.f32 %v11538_v0, %v14847_v1  ;;  %v4145_v38 = vpop.xlane.xlu2 %4144  ;;  %v4289_v47 = vpack.c.bf16 %v4257_v55, %v4257_v55  ;;  %4195 = vadd.xlane.f32.xlu0 %v4194_v17  ;;  %v14984_v14 = vpop.eup %11539  ;;  %v4596_v1 = vsel %vm2497_vm10, %v14697_v35, 0 }
 0x758   : > { %11545 = vrcp.f32 %v4145_v38  ;;  %v14992_v42 = vpop.eup %11541  ;;  %v4200_v29 = vsel %vm1310_vm8, %v14984_v14, 0.0 }
 0x759   : > { %v4290_v37 = vpack.c.bf16 %v4258_v30, %v4258_v30  ;;  %10751 = vmatmul.msk.bf16.vlgmr.msrb.gmra.mxu0 %vm1310_vm8, %v4289_v47  ;;  %11547 = vpow2.f32 %v4113_v50  ;;  %v4206_v2 = vsel %vm1310_vm8, %v14992_v42, 0.0 }
 0x75a   : > { %4584 = vmatpush.bf16.msrb.mxu0 %v4575_v28  ;;  %11549 = vpow2.f32 %v4121_v48 }
 0x75b   : > { %10752 = vmatmul.msk.bf16.vlgmr.msra.gmra.mxu1 %vm1310_vm8, %v4290_v37 }
 0x75c   : > { %4605 = vmatpush.bf16.msra.mxu1 %v4596_v1  ;;  %v11544_v13 = vpop.eup %11543 }
 0x75d   : > { %v4256_v35 = vmul.f32 %v11544_v13, %v14857_v33  ;;  %v4154_v49 = vpop.xlane.xlu1 %4153  ;;  %v4554_v33 = vsel %vm2497_vm10, %v14389_v4, 0 }
 0x75e   : > { %v11546_v16 = vpop.eup %11545  ;;  %4201 = vadd.xlane.f32.xlu2 %v4200_v29  ;;  %11551 = vrcp.f32 %v4154_v49 }
 0x75f   : > { %v4259_v54 = vmul.f32 %v11546_v16, %v14860_v52  ;;  %v4288_v45 = vpack.c.bf16 %v4256_v35, %v4256_v35  ;;  %v4151_v59 = vpop.xlane.xlu0 %4150  ;;  %4207 = vadd.xlane.f32.xlu0 %v4206_v2  ;;  %v15004_v46 = vpop.eup %11547  ;;  %v4617_v52 = vsel %vm2497_vm10, %v14749_v51, 0  ;;  %v4119_v51 = vmul.f32 1.442695, %v4058_v26 }
 0x760   : > { %11553 = vrcp.f32 %v4151_v59  ;;  %v15014_v0 = vpop.eup %11549  ;;  %v4203_v4 = vsel %vm1310_vm8, %v15004_v46, 0.0 }
 0x761   : > { %v4291_v8 = vpack.c.bf16 %v4259_v54, %v4259_v54  ;;  %10750 = vmatmul.msk.bf16.vlgmr.msrb.gmra.mxu3 %vm1310_vm8, %v4288_v45  ;;  %11555 = vpow2.f32 %v4123_v25  ;;  %v4215_v50 = vsel %vm1310_vm8, %v15014_v0, 0.0  ;;  %v4701_v54 = vsel %vm2497_vm10, %v14717_v15, 0 }
 0x762   : > { %4563 = vmatpush.bf16.msrb.mxu3 %v4554_v33  ;;  %11557 = vpow2.f32 %v4117_v31  ;;  %v4743_v33 = vsel %vm2497_vm10, %v14785_v23, 0  ;;  %v4785_v23 = vsel %vm2497_vm10, %v14753_v22, 0 }
 0x763   : > { %10753 = vmatmul.msk.bf16.vlgmr.msrb.gmra.mxu2 %vm1310_vm8, %v4291_v8  ;;  %v4764_v8 = vsel %vm2497_vm10, %v14769_v43, 0 }
 0x764   : > { %4626 = vmatpush.bf16.msrb.mxu2 %v4617_v52  ;;  %v11552_v62 = vpop.eup %11551  ;;  %v18893_v52 = vld [vmem:[#allocation19_spill] sm:$0xff] }
 0x765   : > { %v4262_v55 = vmul.f32 %v11552_v62, %v14867_v21  ;;  %v4680_v21 = vsel %vm2497_vm10, %v14725_v12, 0 }
 0x766   : > { %4204 = vadd.xlane.f32.xlu2 %v4203_v4  ;;  %v11554_v40 = vpop.eup %11553 }
 0x767   : > { %v4157_v30 = vpop.xlane.xlu1 %4156  ;;  %v4261_v60 = vmul.f32 %v11554_v40, %v14873_v6  ;;  %v4148_v38 = vpop.xlane.xlu0 %4147  ;;  %v4294_v47 = vpack.c.bf16 %v4262_v55, %v4262_v55  ;;  %4216 = vadd.xlane.f32.xlu0 %v4215_v50  ;;  %v4659_v6 = vsel %vm2497_vm10, %v14807_v9, 0  ;;  %v18895_v50 = vld [vmem:[#allocation22_spill] sm:$0xff] }
 0x768   : > { %11559 = vrcp.f32 %v4157_v30  ;;  %v4166_v24 = vpop.xlane.xlu2 %4165  ;;  %v15022_v17 = vpop.eup %11555 }
 0x769   : > { %v4293_v37 = vpack.c.bf16 %v4261_v60, %v4261_v60  ;;  %11561 = vrcp.f32 %v4148_v38  ;;  %v15024_v28 = vpop.eup %11557  ;;  %v4218_v48 = vsel %vm1310_vm8, %v15022_v17, 0.0 }
 0x76a   : > { %11563 = vpow2.f32 %v4119_v51  ;;  %v4209_v53 = vsel %vm1310_vm8, %v15024_v28, 0.0  ;;  %v4722_v51 = vsel %vm2497_vm10, %v14767_v56, 0 }
 0x76b   : > { %10756 = vmatmul.msk.bf16.vlgmr.msrb.gmra.mxu1 %vm1310_vm8, %v4294_v47  ;;  %11565 = vrcp.f32 %v4166_v24  ;;  %10755 = vmatmul.msk.bf16.vlgmr.msra.gmra.mxu0 %vm1310_vm8, %v4293_v37 }
 0x76c   : > { %4689 = vmatpush.bf16.msrb.mxu1 %v4680_v21  ;;  %4668 = vmatpush.bf16.msra.mxu0 %v4659_v6  ;;  %v18896_v21 = vld [vmem:[#allocation6_spill] sm:$0xff] }
 0x76e   : > { %v11560_v1 = vpop.eup %11559  ;;  %4219 = vadd.xlane.f32.xlu2 %v4218_v48 }
 0x76f   : > { %v4263_v12 = vmul.f32 %v11560_v1, %v14881_v34  ;;  %4210 = vadd.xlane.f32.xlu1 %v4209_v53  ;;  %v11562_v13 = vpop.eup %11561  ;;  %v4163_v29 = vpop.xlane.xlu0 %4162  ;;  %v4638_v34 = vsel %vm2497_vm10, %v14679_v36, 0 }
 0x770   : > { %v4160_v11 = vpop.xlane.xlu2 %4159  ;;  %v15037_v9 = vpop.eup %11563  ;;  %v4260_v35 = vmul.f32 %v11562_v13, %v14879_v20  ;;  %11567 = vrcp.f32 %v4163_v29 }
 0x771   : > { %v4295_v16 = vpack.c.bf16 %v4263_v12, %v4263_v12  ;;  %v11566_v49 = vpop.eup %11565  ;;  %v4212_v59 = vsel %vm1310_vm8, %v15037_v9, 0.0  ;;  %11569 = vrcp.f32 %v4160_v11  ;;  %v18898_v12 = vld [vmem:[#allocation3_spill] sm:$0xff] }
 0x772   : > { %v4292_v25 = vpack.c.bf16 %v4260_v35, %v4260_v35  ;;  %v4266_v45 = vmul.f32 %v11566_v49, %v14883_v44  ;;  %v18899_v35 = vld [vmem:[#allocation12_spill] sm:$0xff] }
 0x773   : > { %10757 = vmatmul.msk.bf16.vlgmr.msra.gmra.mxu2 %vm1310_vm8, %v4295_v16  ;;  %v4869_v16 = vsel %vm2497_vm10, %v14787_v63, 0 }
 0x774   : > { %4710 = vmatpush.bf16.msra.mxu2 %v4701_v54  ;;  %10754 = vmatmul.msk.bf16.vlgmr.msra.gmra.mxu3 %vm1310_vm8, %v4292_v25  ;;  %v4298_v15 = vpack.c.bf16 %v4266_v45, %v4266_v45 }
 0x775   : > { %4647 = vmatpush.bf16.msra.mxu3 %v4638_v34  ;;  %v18900_v34 = vld [vmem:[#allocation4_spill] sm:$0xff] }
 0x776   : > { %4213 = vadd.xlane.f32.xlu2 %v4212_v59  ;;  %v11568_v20 = vpop.eup %11567 }
 0x777   : > { %v4265_v31 = vmul.f32 %v11568_v20, %v14892_v58  ;;  %v11570_v44 = vpop.eup %11569 }
 0x778   : > { %v4169_v2 = vpop.xlane.xlu2 %4168  ;;  %v4264_v58 = vmul.f32 %v11570_v44, %v14894_v3 }
 0x779   : > { %11571 = vrcp.f32 %v4169_v2  ;;  %v4297_v36 = vpack.c.bf16 %v4265_v31, %v4265_v31 }
 0x77a   : > { %v4296_v40 = vpack.c.bf16 %v4264_v58, %v4264_v58  ;;  %v18902_v58 = vld [vmem:[#allocation26_spill] sm:$0xff] }
 0x77b   : > { %10760 = vmatmul.msk.bf16.vlgmr.msra.gmra.mxu1 %vm1310_vm8, %v4298_v15  ;;  %10759 = vmatmul.msk.bf16.vlgmr.msrb.gmra.mxu0 %vm1310_vm8, %v4297_v36  ;;  %v18901_v15 = vld [vmem:[#allocation48_spill] sm:$0xff] }
 0x77c   : > { %4773 = vmatpush.bf16.msra.mxu1 %v4764_v8  ;;  %4947 = vrot.lane.b32.xlu0 %v18893_v52, %s11979_s25 }
 0x77d   : > { %4752 = vmatpush.bf16.msrb.mxu0 %v4743_v33 }
 0x77f   : > { %v11572_v26 = vpop.eup %11571  ;;  %v4175_v62 = vpop.xlane.xlu1 %4174 }
 0x780   : > { %v4267_v43 = vmul.f32 %v11572_v26, %v14903_v18  ;;  %v4178_v4 = vpop.xlane.xlu2 %4177  ;;  %11573 = vrcp.f32 %v4175_v62  ;;  %v18894_v18 = vld [vmem:[#allocation7_spill] sm:$0xff] }
 0x781   : > { %11575 = vrcp.f32 %v4178_v4  ;;  %v18903_v62 = vld [vmem:[#allocation83_spill] sm:$0xff]  ;;  %v18904_v4 = vld [vmem:[#allocation9_spill] sm:$0xff] }
 0x782   : > { %v4299_v55 = vpack.c.bf16 %v4267_v43, %v4267_v43 }
 0x784   : > { %10761 = vmatmul.msk.bf16.vlgmr.msrb.gmra.mxu2 %vm1310_vm8, %v4299_v55  ;;  %10758 = vmatmul.msk.bf16.vlgmr.msrb.gmra.mxu3 %vm1310_vm8, %v4296_v40  ;;  %v18905_v55 = vld [vmem:[#allocation17_spill] sm:$0xff] }
 0x785   : > { %4794 = vmatpush.bf16.msrb.mxu2 %v4785_v23  ;;  %4731 = vmatpush.bf16.msrb.mxu3 %v4722_v51  ;;  %v18906_v23 = vld [vmem:[#allocation8_spill] sm:$0xff]  ;;  %v18907_v51 = vld [vmem:[#allocation31_spill] sm:$0xff] }
 0x786   : > { %v11574_v3 = vpop.eup %11573  ;;  %4926 = vrot.lane.b32.xlu0 %v18894_v18, %s11979_s25 }
 0x787   : > { %v11576_v30 = vpop.eup %11575  ;;  %v4269_v60 = vmul.f32 %v11574_v3, %v14911_v5  ;;  %v4172_v24 = vpop.xlane.xlu1 %4171  ;;  %v18897_v5 = vld [vmem:[#allocation11_spill] sm:$0xff] }
 0x788   : > { %v4270_v38 = vmul.f32 %v11576_v30, %v14908_v61  ;;  %v4181_v22 = vpop.xlane.xlu2 %4180  ;;  %11577 = vrcp.f32 %v4172_v24  ;;  %4968 = vrot.lane.b32.xlu1 %v18895_v50, %s11979_s25  ;;  %v18909_v24 = vld [vmem:[#allocation28_spill] sm:$0xff] }
 0x789   : > { %v4301_v56 = vpack.c.bf16 %v4269_v60, %v4269_v60  ;;  %11579 = vrcp.f32 %v4181_v22  ;;  %v18908_v60 = vld [vmem:[#allocation34_spill] sm:$0xff] }
 0x78a   : > { %v4302_v47 = vpack.c.bf16 %v4270_v38, %v4270_v38 }
 0x78b   : > { %10763 = vmatmul.msk.bf16.vlgmr.msra.gmra.mxu0 %vm1310_vm8, %v4301_v56  ;;  %v18912_v56 = vld [vmem:[#allocation23_spill] sm:$0xff] }
 0x78c   : > { %10764 = vmatmul.msk.bf16.vlgmr.msrb.gmra.mxu1 %vm1310_vm8, %v4302_v47  ;;  %v4184_v29 = vpop.xlane.xlu0 %4183 }
 0x78e   : > { %v11578_v37 = vpop.eup %11577  ;;  %4905 = vrot.lane.b32.xlu2 %v18896_v21, %s11979_s25  ;;  %5060 = vrot.lane.b32.xlu0 %v18897_v5, %s11980_s28 }
 0x78f   : > { %v11580_v61 = vpop.eup %11579  ;;  %v4268_v6 = vmul.f32 %v11578_v37, %v14919_v41  ;;  %v4190_v48 = vpop.xlane.xlu1 %4189  ;;  %v4806_v41 = vsel %vm2497_vm10, %v14817_v10, 0 }
 0x790   : > { %v4271_v1 = vmul.f32 %v11580_v61, %v14921_v39  ;;  %v4187_v53 = vpop.xlane.xlu2 %4186  ;;  %11581 = vrcp.f32 %v4190_v48  ;;  %5037 = vrot.lane.b32.xlu1 %v18898_v12, %s11980_s28  ;;  %v18913_v48 = vld [vmem:[#allocation43_spill] sm:$0xff] }
 0x791   : > { %v4300_v13 = vpack.c.bf16 %v4268_v6, %v4268_v6  ;;  %11583 = vrcp.f32 %v4187_v53 }
 0x792   : > { %v4303_v11 = vpack.c.bf16 %v4271_v1, %v4271_v1  ;;  %11585 = vrcp.f32 %v4184_v29  ;;  %v18914_v1 = vld [vmem:[#allocation39_spill] sm:$0xff] }
 0x794   : > { %10765 = vmatmul.msk.bf16.vlgmr.msra.gmra.mxu2 %vm1310_vm8, %v4303_v11  ;;  %10762 = vmatmul.msk.bf16.vlgmr.msra.gmra.mxu3 %vm1310_vm8, %v4300_v13 }
 0x795   : > { %4878 = vmatpush.bf16.msra.mxu2 %v4869_v16  ;;  %4815 = vmatpush.bf16.msra.mxu3 %v4806_v41  ;;  %v18915_v16 = vld [vmem:[#allocation41_spill] sm:$0xff] }
 0x796   : > { %v11582_v39 = vpop.eup %11581  ;;  %4991 = vrot.lane.b32.xlu2 %v18899_v35, %s11980_s28  ;;  %5035 = vrot.lane.b32.xlu0 %v18898_v12, %s11981_s29 }
 0x797   : > { %v11584_v49 = vpop.eup %11583  ;;  %v4274_v54 = vmul.f32 %v11582_v39, %v14930_v7  ;;  %v4193_v63 = vpop.xlane.xlu1 %4192 }
 0x798   : > { %v4273_v25 = vmul.f32 %v11584_v49, %v14927_v19  ;;  %v4822_v10 = vpop.permute.xlu2 %4821  ;;  %11587 = vrcp.f32 %v4193_v63  ;;  %5014 = vrot.lane.b32.xlu1 %v18900_v34, %s11980_s28  ;;  %v11586_v2 = vpop.eup %11585 }
 0x799   : > { %v4306_v45 = vpack.c.bf16 %v4274_v54, %v4274_v54  ;;  %v4827_v59 = vsel %vm2497_vm10, %v4822_v10, 0  ;;  %v4272_v19 = vmul.f32 %v11586_v2, %v14932_v32 }
 0x79a   : > { %v4305_v20 = vpack.c.bf16 %v4273_v25, %v4273_v25  ;;  %4836 = vmatpush.bf16.msra.mxu0 %v4827_v59  ;;  %v18919_v25 = vld [vmem:[#allocation37_spill] sm:$0xff] }
 0x79b   : > { %v4304_v26 = vpack.c.bf16 %v4272_v19, %v4272_v19 }
 0x79c   : > { %10768 = vmatmul.msk.bf16.vlgmr.msra.gmra.mxu1 %vm1310_vm8, %v4306_v45  ;;  %10767 = vmatmul.msk.bf16.vlgmr.msrb.gmra.mxu0 %vm1310_vm8, %v4305_v20 }
 0x79e   : > { %v11588_v7 = vpop.eup %11587  ;;  %5058 = vrot.lane.b32.xlu2 %v18897_v5, %s11981_s29  ;;  %5012 = vrot.lane.b32.xlu0 %v18900_v34, %s11981_s29 }
 0x79f   : > { %v4275_v31 = vmul.f32 %v11588_v7, %v18901_v15  ;;  %v4199_v8 = vpop.xlane.xlu1 %4198  ;;  %v4843_v44 = vpop.permute.xlu0 %4842 }
 0x7a0   : > { %11589 = vrcp.f32 %v4199_v8  ;;  %4989 = vrot.lane.b32.xlu1 %v18899_v35, %s11981_s29  ;;  %v4848_v33 = vsel %vm2497_vm10, %v4843_v44, 0 }
 0x7a1   : > { %v4307_v36 = vpack.c.bf16 %v4275_v31, %v4275_v31  ;;  %4857 = vmatpush.bf16.msrb.mxu1 %v4848_v33 }
 0x7a4   : > { %10769 = vmatmul.msk.bf16.vlgmr.msrb.gmra.mxu2 %vm1310_vm8, %v4307_v36  ;;  %10766 = vmatmul.msk.bf16.vlgmr.msrb.gmra.mxu3 %vm1310_vm8, %v4304_v26 }
 0x7a6   : > { %v11590_v32 = vpop.eup %11589  ;;  %5129 = vrot.lane.b32.xlu2 %v18902_v58, %s11980_s28  ;;  %5083 = vrot.lane.b32.xlu0 %v18904_v4, %s11980_s28 }
 0x7a7   : > { %v4277_v43 = vmul.f32 %v11590_v32, %v18903_v62 }
 0x7a8   : > { %5152 = vrot.lane.b32.xlu1 %v18905_v55, %s11980_s28 }
 0x7a9   : > { %v4309_v40 = vpack.c.bf16 %v4277_v43, %v4277_v43  ;;  %v18921_v43 = vld [vmem:[#allocation51_spill] sm:$0xff] }
 0x7ac   : > { %10771 = vmatmul.msk.bf16.vlgmr.msra.gmra.mxu0 %vm1310_vm8, %v4309_v40 }
 0x7ae   : > { %5106 = vrot.lane.b32.xlu2 %v18906_v23, %s11980_s28  ;;  %5150 = vrot.lane.b32.xlu0 %v18905_v55, %s11981_s29 }
 0x7b0   : > { %5127 = vrot.lane.b32.xlu1 %v18902_v58, %s11981_s29 }
 0x7b6   : > { %5081 = vrot.lane.b32.xlu2 %v18904_v4, %s11981_s29  ;;  %5221 = vrot.lane.b32.xlu0 %v18907_v51, %s11980_s28 }
 0x7b7   : > { %v4885_v3 = vpop.permute.xlu1 %4884 }
 0x7b8   : > { %v4890_v30 = vsel %vm2497_vm10, %v4885_v3, 0  ;;  %5104 = vrot.lane.b32.xlu1 %v18906_v23, %s11981_s29  ;;  %v18925_v3 = vld [vmem:[#allocation55_spill] sm:$0xff] }
 0x7b9   : > { %4899 = vmatpush.bf16.msrb.mxu3 %v4890_v30 }
 0x7be   : > { %5244 = vrot.lane.b32.xlu2 %v18908_v60, %s11980_s28  ;;  %5198 = vrot.lane.b32.xlu0 %v18909_v24, %s11980_s28  ;;  %v15135_v38 = vpop.f32.mrf.mxu0 }
 0x7bf   : > { %18910 = vst [vmem:[#allocation56_spill] sm:$0xff] %v15135_v38 }
 0x7c0   : > { %v15137_v22 = vpop.f32.mrf.mxu1  ;;  %5175 = vrot.lane.b32.xlu1 %v18912_v56, %s11980_s28 }
 0x7c1   : > { %18911 = vst [vmem:[#allocation81_spill] sm:$0xff] %v15137_v22 }
 0x7c6   : > { %5219 = vrot.lane.b32.xlu2 %v18907_v51, %s11981_s29  ;;  %5173 = vrot.lane.b32.xlu0 %v18912_v56, %s11981_s29  ;;  %v4336_v37 = vpop.f32.mrf.mxu0 }
 0x7c8   : > { %v4357_v61 = vpop.f32.mrf.mxu1  ;;  %5242 = vrot.lane.b32.xlu1 %v18908_v60, %s11981_s29 }
 0x7ca   : > { %v4196_v6 = vpop.xlane.xlu0 %4195 }
 0x7cb   : > { %11591 = vrcp.f32 %v4196_v6 }
 0x7ce   : > { %5196 = vrot.lane.b32.xlu2 %v18909_v24, %s11981_s29  ;;  %5336 = vrot.lane.b32.xlu0 %v18913_v48, %s11980_s28 }
 0x7d0   : > { %5313 = vrot.lane.b32.xlu1 %v18914_v1, %s11980_s28 }
 0x7d1   : > { %v4202_v53 = vpop.xlane.xlu2 %4201  ;;  %v11592_v13 = vpop.eup %11591 }
 0x7d2   : > { %11593 = vrcp.f32 %v4202_v53  ;;  %v4276_v11 = vmul.f32 %v11592_v13, %v14976_v27  ;;  %v4208_v41 = vpop.xlane.xlu0 %4207 }
 0x7d3   : > { %11595 = vrcp.f32 %v4208_v41 }
 0x7d4   : > { %v4308_v29 = vpack.c.bf16 %v4276_v11, %v4276_v11  ;;  %v18927_v11 = vld [vmem:[#allocation49_spill] sm:$0xff] }
 0x7d6   : > { %5267 = vrot.lane.b32.xlu2 %v18915_v16, %s11980_s28  ;;  %v15158_v39 = vpop.f32.mrf.mxu2  ;;  %5311 = vrot.lane.b32.xlu0 %v18914_v1, %s11981_s29  ;;  %v15162_v49 = vpop.f32.mrf.mxu0 }
 0x7d7   : > { %18916 = vst [vmem:[#allocation57_spill] sm:$0xff] %v15158_v39  ;;  %10770 = vmatmul.msk.bf16.vlgmr.msra.gmra.mxu3 %vm1310_vm8, %v4308_v29 }
 0x7d8   : > { %18917 = vst [vmem:[#allocation67_spill] sm:$0xff] %v15162_v49  ;;  %v11594_v54 = vpop.eup %11593  ;;  %v15164_v63 = vpop.f32.mrf.mxu1  ;;  %5290 = vrot.lane.b32.xlu1 %v18919_v25, %s11980_s28 }
 0x7d9   : > { %18918 = vst [vmem:[#allocation72_spill] sm:$0xff] %v15164_v63  ;;  %v4278_v27 = vmul.f32 %v11594_v54, %v14984_v14  ;;  %v4205_v45 = vpop.xlane.xlu2 %4204  ;;  %v11596_v2 = vpop.eup %11595 }
 0x7da   : > { %11597 = vrcp.f32 %v4205_v45  ;;  %v4280_v8 = vmul.f32 %v11596_v2, %v14992_v42  ;;  %v4217_v44 = vpop.xlane.xlu0 %4216  ;;  %v18923_v42 = vld [vmem:[#allocation46_spill] sm:$0xff] }
 0x7db   : > { %v4310_v59 = vpack.c.bf16 %v4278_v27, %v4278_v27  ;;  %11599 = vrcp.f32 %v4217_v44 }
 0x7dc   : > { %v4312_v32 = vpack.c.bf16 %v4280_v8, %v4280_v8 }
 0x7dd   : > { %10772 = vmatmul.msk.bf16.vlgmr.msrb.gmra.mxu1 %vm1310_vm8, %v4310_v59 }
 0x7de   : > { %5334 = vrot.lane.b32.xlu2 %v18913_v48, %s11981_s29  ;;  %v4378_v20 = vpop.f32.mrf.mxu2  ;;  %5288 = vrot.lane.b32.xlu0 %v18919_v25, %s11981_s29  ;;  %v4420_v7 = vpop.f32.mrf.mxu0 }
 0x7e0   : > { %v11598_v19 = vpop.eup %11597  ;;  %v4441_v14 = vpop.f32.mrf.mxu1  ;;  %5265 = vrot.lane.b32.xlu1 %v18915_v16, %s11981_s29 }
 0x7e1   : > { %v4279_v15 = vmul.f32 %v11598_v19, %v15004_v46  ;;  %v4220_v31 = vpop.xlane.xlu2 %4219  ;;  %v11600_v6 = vpop.eup %11599 }
 0x7e2   : > { %v4211_v33 = vpop.xlane.xlu1 %4210  ;;  %v4283_v41 = vmul.f32 %v11600_v6, %v15014_v0 }
 0x7e3   : > { %v4311_v36 = vpack.c.bf16 %v4279_v15, %v4279_v15  ;;  %11601 = vrcp.f32 %v4211_v33 }
 0x7e4   : > { %v15181_v26 = vpop.f32.mrf.mxu3  ;;  %v4315_v0 = vpack.c.bf16 %v4283_v41, %v4283_v41 }
 0x7e5   : > { %18920 = vst [vmem:[#allocation69_spill] sm:$0xff] %v15181_v26  ;;  %10773 = vmatmul.msk.bf16.vlgmr.msra.gmra.mxu2 %vm1310_vm8, %v4311_v36 }
 0x7e6   : > { %5405 = vrot.lane.b32.xlu2 %v18921_v43, %s11980_s28  ;;  %v15188_v40 = vpop.f32.mrf.mxu2  ;;  %5359 = vrot.lane.b32.xlu0 %v18923_v42, %s11980_s28 }
 0x7e7   : > { %18922 = vst [vmem:[#allocation92_spill] sm:$0xff] %v15188_v40  ;;  %10774 = vmatmul.msk.bf16.vlgmr.msrb.gmra.mxu3 %vm1310_vm8, %v4312_v32 }
 0x7e8   : > { %v15192_v46 = vpop.f32.mrf.mxu1  ;;  %5428 = vrot.lane.b32.xlu1 %v18925_v3, %s11980_s28  ;;  %v15197_v37 = vpop.f32.mrf.mxu0 }
 0x7e9   : > { %18924 = vst [vmem:[#allocation76_spill] sm:$0xff] %v15192_v46  ;;  %v4214_v30 = vpop.xlane.xlu2 %4213  ;;  %v11602_v53 = vpop.eup %11601 }
 0x7ea   : > { %18926 = vst [vmem:[#allocation89_spill] sm:$0xff] %v15197_v37  ;;  %11603 = vrcp.f32 %v4214_v30  ;;  %v4281_v27 = vmul.f32 %v11602_v53, %v15024_v28 }
 0x7eb   : > { %11605 = vrcp.f32 %v4220_v31  ;;  %v18929_v31 = vld [vmem:[#allocation66_spill] sm:$0xff] }
 0x7ec   : > { %v4399_v13 = vpop.f32.mrf.mxu3  ;;  %v4313_v19 = vpack.c.bf16 %v4281_v27, %v4281_v27 }
 0x7ee   : > { %5382 = vrot.lane.b32.xlu2 %v18927_v11, %s11980_s28  ;;  %v4462_v29 = vpop.f32.mrf.mxu2  ;;  %5426 = vrot.lane.b32.xlu0 %v18925_v3, %s11981_s29  ;;  %v4948_v54 = vpop.permute.xlu0 %4947 }
 0x7ef   : > { %v4953_v59 = vsel %vm2497_vm10, %v4948_v54, 0 }
 0x7f0   : > { %v4525_v45 = vpop.f32.mrf.mxu1  ;;  %5403 = vrot.lane.b32.xlu1 %v18921_v43, %s11981_s29  ;;  %v4504_v2 = vpop.f32.mrf.mxu0  ;;  %4962 = vmatpush.bf16.msrb.mxu2 %v4953_v59 }
 0x7f1   : > { %v4906_v20 = vpop.permute.xlu2 %4905  ;;  %v11604_v14 = vpop.eup %11603  ;;  %v18933_v45 = vld [vmem:[#allocation68_spill] sm:$0xff] }
 0x7f2   : > { %v4911_v7 = vsel %vm2497_vm10, %v4906_v20, 0  ;;  %v11606_v15 = vpop.eup %11605  ;;  %v4282_v8 = vmul.f32 %v11604_v14, %v15037_v9  ;;  %v18934_v20 = vld [vmem:[#allocation63_spill] sm:$0xff] }
 0x7f3   : > { %4920 = vmatpush.bf16.msrb.mxu0 %v4911_v7  ;;  %v4284_v33 = vmul.f32 %v11606_v15, %v15022_v17 }
 0x7f4   : > { %v4314_v17 = vpack.c.bf16 %v4282_v8, %v4282_v8 }
 0x7f5   : > { %10777 = vmatmul.msk.bf16.vlgmr.msrb.gmra.mxu2 %vm1310_vm8, %v4315_v0  ;;  %v4316_v27 = vpack.c.bf16 %v4284_v33, %v4284_v33  ;;  %v18935_v0 = vld [vmem:[#allocation58_spill] sm:$0xff] }
 0x7f6   : > { %5357 = vrot.lane.b32.xlu2 %v18923_v42, %s11981_s29  ;;  %10775 = vmatmul.msk.bf16.vlgmr.msrb.gmra.mxu0 %vm1310_vm8, %v4313_v19  ;;  %v15215_v28 = vpop.f32.mrf.mxu2 }
 0x7f7   : > { %18928 = vst [vmem:[#allocation70_spill] sm:$0xff] %v15215_v28  ;;  %5497 = vrot.lane.b32.xlu0 %v18929_v31, %s11980_s28  ;;  %v15220_v36 = vpop.f32.mrf.mxu3 }
 0x7f8   : > { %18930 = vst [vmem:[#allocation94_spill] sm:$0xff] %v15220_v36  ;;  %v15222_v44 = vpop.f32.mrf.mxu1  ;;  %5380 = vrot.lane.b32.xlu1 %v18927_v11, %s11981_s29  ;;  %v4927_v6 = vpop.permute.xlu0 %4926 }
 0x7f9   : > { %18931 = vst [vmem:[#allocation79_spill] sm:$0xff] %v15222_v44  ;;  %v4992_v30 = vpop.permute.xlu2 %4991  ;;  %v15230_v13 = vpop.f32.mrf.mxu0  ;;  %v4932_v9 = vsel %vm2497_vm10, %v4927_v6, 0 }
 0x7fa   : > { %v4997_v53 = vsel %vm1310_vm8, %v4992_v30, 0  ;;  %18932 = vst [vmem:[#allocation90_spill] sm:$0xff] %v15230_v13  ;;  %v4969_v29 = vpop.permute.xlu1 %4968  ;;  %4941 = vmatpush.bf16.msra.mxu1 %v4932_v9 }
 0x7fb   : > { %v4974_v54 = vsel %vm2497_vm10, %v4969_v29, 0  ;;  %5006 = vmatpush.bf16.xpose.msra.mxu0 %v4997_v53 }
 0x7fc   : > { %4983 = vmatpush.bf16.msra.mxu3 %v4974_v54 }
 0x7fd   : > { %10776 = vmatmul.msk.bf16.vlgmr.msra.gmra.mxu1 %vm1310_vm8, %v4314_v17 }
 0x7fe   : > { %5520 = vrot.lane.b32.xlu2 %v18933_v45, %s11980_s28  ;;  %v4546_v59 = vpop.f32.mrf.mxu2 }
 0x7ff   : > { %5474 = vrot.lane.b32.xlu0 %v18934_v20, %s11980_s28  ;;  %10778 = vmatmul.msk.bf16.vlgmr.msra.gmra.mxu3 %vm1310_vm8, %v4316_v27  ;;  %v4483_v2 = vpop.f32.mrf.mxu3 }
 0x800   : > { %v4609_v7 = vpop.f32.mrf.mxu1  ;;  %5451 = vrot.lane.b32.xlu1 %v18935_v0, %s11980_s28  ;;  %v5061_v14 = vpop.permute.xlu0 %5060 }
 0x801   : > { %v5059_v19 = vpop.permute.xlu2 %5058  ;;  %v4588_v15 = vpop.f32.mrf.mxu0  ;;  %v5066_v8 = vsel %vm1310_vm8, %v5061_v14, 0 }
 0x802   : > { %v5038_v33 = vpop.permute.xlu1 %5037  ;;  %5075 = vmatpush.bf16.xpose.msrb.mxu3 %v5066_v8 }
 0x803   : > { %v5043_v30 = vsel %vm1310_vm8, %v5038_v33, 0  ;;  %v18940_v33 = vld [vmem:[#allocation10_spill] sm:$0xff] }
 0x804   : > { %5052 = vmatpush.bf16.xpose.msra.mxu2 %v5043_v30 }
 0x806   : > { %5495 = vrot.lane.b32.xlu2 %v18929_v31, %s11981_s29 }
 0x807   : > { %5449 = vrot.lane.b32.xlu0 %v18935_v0, %s11981_s29  ;;  %v15250_v6 = vpop.f32.mrf.mxu2  ;;  %v15252_v53 = vpop.f32.mrf.mxu3 }
 0x808   : > { %18936 = vst [vmem:[#allocation74_spill] sm:$0xff] %v15250_v6  ;;  %5518 = vrot.lane.b32.xlu1 %v18933_v45, %s11981_s29  ;;  %v5036_v59 = vpop.permute.xlu0 %5035 }
 0x809   : > { %18937 = vst [vmem:[#allocation103_spill] sm:$0xff] %v15252_v53  ;;  %v15258_v29 = vpop.f32.mrf.mxu1  ;;  %v5130_v54 = vpop.permute.xlu2 %5129 }
 0x80a   : > { %18938 = vst [vmem:[#allocation82_spill] sm:$0xff] %v15258_v29  ;;  %v5135_v17 = vsel %vm1310_vm8, %v5130_v54, 0  ;;  %v15261_v27 = vpop.f32.mrf.mxu0  ;;  %v5015_v7 = vpop.permute.xlu1 %5014 }
 0x80b   : > { %18939 = vst [vmem:[#allocation106_spill] sm:$0xff] %v15261_v27  ;;  %v5020_v14 = vsel %vm1310_vm8, %v5015_v7, 0  ;;  %10781 = vmatmul.msk.bf16.vlgmr.msra.gmra.mxu2 %vm1310_vm8, %v5036_v59 }
 0x80c   : > { %5144 = vmatpush.bf16.xpose.msrb.mxu2 %v5135_v17  ;;  %5029 = vmatpush.bf16.xpose.msrb.mxu1 %v5020_v14 }
 0x80e   : > { %5472 = vrot.lane.b32.xlu2 %v18934_v20, %s11981_s29 }
 0x80f   : > { %5612 = vrot.lane.b32.xlu0 %v18892_v57, %s11980_s28  ;;  %v4630_v15 = vpop.f32.mrf.mxu2  ;;  %10782 = vmatmul.msk.bf16.vlgmr.msrb.gmra.mxu3 %vm1310_vm8, %v5059_v19  ;;  %v4567_v8 = vpop.f32.mrf.mxu3 }
 0x810   : > { %5589 = vrot.lane.b32.xlu1 %v18940_v33, %s11980_s28  ;;  %v5013_v59 = vpop.permute.xlu0 %5012  ;;  %v18941_v15 = vld [vmem:[#allocation77_spill] sm:$0xff] }
 0x811   : > { %v4693_v30 = vpop.f32.mrf.mxu1  ;;  %v5107_v54 = vpop.permute.xlu2 %5106 }
 0x812   : > { %v5112_v17 = vsel %vm1310_vm8, %v5107_v54, 0  ;;  %v4672_v7 = vpop.f32.mrf.mxu0  ;;  %v4990_v14 = vpop.permute.xlu1 %4989  ;;  %v18944_v30 = vld [vmem:[#allocation75_spill] sm:$0xff] }
 0x813   : > { %10779 = vmatmul.msk.bf16.vlgmr.msra.gmra.mxu0 %vm1310_vm8, %v4990_v14  ;;  %10780 = vmatmul.msk.bf16.vlgmr.msrb.gmra.mxu1 %vm1310_vm8, %v5013_v59 }
 0x814   : > { %5121 = vmatpush.bf16.xpose.msra.mxu1 %v5112_v17 }
 0x816   : > { %5543 = vrot.lane.b32.xlu2 %v18941_v15, %s11980_s28 }
 0x817   : > { %5587 = vrot.lane.b32.xlu0 %v18940_v33, %s11981_s29  ;;  %v15281_v19 = vpop.f32.mrf.mxu2  ;;  %v15283_v8 = vpop.f32.mrf.mxu3 }
 0x818   : > { %18942 = vst [vmem:[#allocation86_spill] sm:$0xff] %v15281_v19  ;;  %5566 = vrot.lane.b32.xlu1 %v18944_v30, %s11980_s28  ;;  %v5084_v14 = vpop.permute.xlu0 %5083 }
 0x819   : > { %18943 = vst [vmem:[#allocation29_spill] sm:$0xff] %v15283_v8  ;;  %v15289_v17 = vpop.f32.mrf.mxu1  ;;  %v5082_v7 = vpop.permute.xlu2 %5081  ;;  %v5089_v41 = vsel %vm1310_vm8, %v5084_v14, 0 }
 0x81a   : > { %18945 = vst [vmem:[#allocation84_spill] sm:$0xff] %v15289_v17  ;;  %v15291_v59 = vpop.f32.mrf.mxu0  ;;  %v5153_v9 = vpop.permute.xlu1 %5152  ;;  %5098 = vmatpush.bf16.xpose.msrb.mxu0 %v5089_v41 }
 0x81b   : > { %18946 = vst [vmem:[#allocation18_spill] sm:$0xff] %v15291_v59  ;;  %v5158_v61 = vsel %vm1310_vm8, %v5153_v9, 0 }
 0x81c   : > { %5167 = vmatpush.bf16.xpose.msra.mxu3 %v5158_v61 }
 0x81e   : > { %5610 = vrot.lane.b32.xlu2 %v18892_v57, %s11981_s29 }
 0x81f   : > { %5564 = vrot.lane.b32.xlu0 %v18944_v30, %s11981_s29  ;;  %v4714_v54 = vpop.f32.mrf.mxu2  ;;  %v4651_v32 = vpop.f32.mrf.mxu3 }
 0x820   : > { %5541 = vrot.lane.b32.xlu1 %v18941_v15, %s11981_s29  ;;  %v5151_v47 = vpop.permute.xlu0 %5150 }
 0x821   : > { %v4777_v10 = vpop.f32.mrf.mxu1  ;;  %v5245_v2 = vpop.permute.xlu2 %5244 }
 0x822   : > { %v5250_v14 = vsel %vm1310_vm8, %v5245_v2, 0  ;;  %v4756_v62 = vpop.f32.mrf.mxu0  ;;  %v5128_v9 = vpop.permute.xlu1 %5127 }
 0x823   : > { %10783 = vmatmul.msk.bf16.vlgmr.msrb.gmra.mxu0 %vm1310_vm8, %v5082_v7  ;;  %10785 = vmatmul.msk.bf16.vlgmr.msrb.gmra.mxu2 %vm1310_vm8, %v5128_v9 }
 0x824   : > { %5259 = vmatpush.bf16.xpose.msrb.mxu3 %v5250_v14 }
 0x825   : > { %10786 = vmatmul.msk.bf16.vlgmr.msra.gmra.mxu3 %vm1310_vm8, %v5151_v47 }
 0x826   : > { %5681 = vrot.lane.b32.xlu2 %v18893_v52, %s11980_s28 }
 0x827   : > { %5635 = vrot.lane.b32.xlu0 %v18896_v21, %s11980_s28  ;;  %v15311_v10 = vpop.f32.mrf.mxu2  ;;  %v15313_v61 = vpop.f32.mrf.mxu3 }
 0x828   : > { %18947 = vst [vmem:[#allocation87_spill] sm:$0xff] %v15311_v10  ;;  %5704 = vrot.lane.b32.xlu1 %v18895_v50, %s11980_s28  ;;  %v5222_v47 = vpop.permute.xlu0 %5221 }
 0x829   : > { %18948 = vst [vmem:[#allocation38_spill] sm:$0xff] %v15313_v61  ;;  %v5220_v32 = vpop.permute.xlu2 %5219  ;;  %v5227_v2 = vsel %vm1310_vm8, %v5222_v47, 0 }
 0x82a   : > { %v15319_v41 = vpop.f32.mrf.mxu0  ;;  %v5105_v54 = vpop.permute.xlu1 %5104  ;;  %5236 = vmatpush.bf16.xpose.msra.mxu2 %v5227_v2 }
 0x82b   : > { %18949 = vst [vmem:[#allocation88_spill] sm:$0xff] %v15319_v41  ;;  %10784 = vmatmul.msk.bf16.vlgmr.msra.gmra.mxu1 %vm1310_vm8, %v5105_v54 }
 0x82e   : > { %5658 = vrot.lane.b32.xlu2 %v18894_v18, %s11980_s28 }
 0x82f   : > { %5702 = vrot.lane.b32.xlu0 %v18895_v50, %s11981_s29  ;;  %v4798_v7 = vpop.f32.mrf.mxu2  ;;  %v4735_v14 = vpop.f32.mrf.mxu3 }
 0x830   : > { %5679 = vrot.lane.b32.xlu1 %v18893_v52, %s11981_s29  ;;  %v5199_v59 = vpop.permute.xlu0 %5198 }
 0x831   : > { %v5197_v9 = vpop.permute.xlu2 %5196  ;;  %v5204_v47 = vsel %vm1310_vm8, %v5199_v59, 0 }
 0x832   : > { %v4840_v62 = vpop.f32.mrf.mxu0  ;;  %v5176_v17 = vpop.permute.xlu1 %5175  ;;  %5213 = vmatpush.bf16.xpose.msrb.mxu1 %v5204_v47 }
 0x833   : > { %v5181_v2 = vsel %vm1310_vm8, %v5176_v17, 0  ;;  %10789 = vmatmul.msk.bf16.vlgmr.msra.gmra.mxu2 %vm1310_vm8, %v5220_v32 }
 0x834   : > { %5190 = vmatpush.bf16.xpose.msra.mxu0 %v5181_v2 }
 0x836   : > { %5633 = vrot.lane.b32.xlu2 %v18896_v21, %s11981_s29 }
 0x838   : > { %5656 = vrot.lane.b32.xlu1 %v18894_v18, %s11981_s29  ;;  %v5174_v62 = vpop.permute.xlu0 %5173 }
 0x839   : > { %v5268_v54 = vpop.permute.xlu2 %5267 }
 0x83a   : > { %v5273_v7 = vsel %vm1310_vm8, %v5268_v54, 0  ;;  %v5243_v14 = vpop.permute.xlu1 %5242 }
 0x83b   : > { %10787 = vmatmul.msk.bf16.vlgmr.msra.gmra.mxu0 %vm1310_vm8, %v5174_v62  ;;  %10788 = vmatmul.msk.bf16.vlgmr.msrb.gmra.mxu1 %vm1310_vm8, %v5197_v9 }
 0x83c   : > { %5282 = vmatpush.bf16.xpose.msrb.mxu0 %v5273_v7  ;;  %10790 = vmatmul.msk.bf16.vlgmr.msrb.gmra.mxu3 %vm1310_vm8, %v5243_v14 }
 0x840   : > { %v5337_v59 = vpop.permute.xlu0 %5336 }
 0x841   : > { %v5335_v17 = vpop.permute.xlu2 %5334  ;;  %v5342_v32 = vsel %vm1310_vm8, %v5337_v59, 0 }
 0x842   : > { %v5314_v47 = vpop.permute.xlu1 %5313  ;;  %5351 = vmatpush.bf16.xpose.msra.mxu3 %v5342_v32 }
 0x843   : > { %v5319_v2 = vsel %vm1310_vm8, %v5314_v47, 0 }
 0x844   : > { %5328 = vmatpush.bf16.xpose.msrb.mxu2 %v5319_v2 }
 0x848   : > { %v5312_v61 = vpop.permute.xlu0 %5311 }
 0x849   : > { %v5406_v19 = vpop.permute.xlu2 %5405 }
 0x84a   : > { %v5411_v54 = vsel %vm1310_vm8, %v5406_v19, 0  ;;  %v5291_v7 = vpop.permute.xlu1 %5290 }
 0x84b   : > { %v5296_v62 = vsel %vm1310_vm8, %v5291_v7, 0  ;;  %10793 = vmatmul.msk.bf16.vlgmr.msrb.gmra.mxu2 %vm1310_vm8, %v5312_v61 }
 0x84c   : > { %5420 = vmatpush.bf16.xpose.msra.mxu2 %v5411_v54  ;;  %10794 = vmatmul.msk.bf16.vlgmr.msra.gmra.mxu3 %vm1310_vm8, %v5335_v17 }
 0x84d   : > { %5305 = vmatpush.bf16.xpose.msra.mxu1 %v5296_v62 }
 0x850   : > { %v5289_v59 = vpop.permute.xlu0 %5288 }
 0x851   : > { %v5383_v9 = vpop.permute.xlu2 %5382 }
 0x852   : > { %v5388_v14 = vsel %vm1310_vm8, %v5383_v9, 0  ;;  %v5266_v47 = vpop.permute.xlu1 %5265 }
 0x853   : > { %10791 = vmatmul.msk.bf16.vlgmr.msrb.gmra.mxu0 %vm1310_vm8, %v5266_v47 }
 0x854   : > { %10792 = vmatmul.msk.bf16.vlgmr.msra.gmra.mxu1 %vm1310_vm8, %v5289_v59 }
 0x855   : > { %5397 = vmatpush.bf16.xpose.msrb.mxu1 %v5388_v14 }
 0x858   : > { %v5360_v32 = vpop.permute.xlu0 %5359 }
 0x859   : > { %v5358_v19 = vpop.permute.xlu2 %5357  ;;  %v5365_v54 = vsel %vm1310_vm8, %v5360_v32, 0 }
 0x85a   : > { %v15349_v2 = vpop.f32.mrf.mxu1  ;;  %v5429_v17 = vpop.permute.xlu1 %5428  ;;  %5374 = vmatpush.bf16.xpose.msra.mxu0 %v5365_v54 }
 0x85b   : > { %18950 = vst [vmem:[#allocation104_spill] sm:$0xff] %v15349_v2  ;;  %v15354_v7 = vpop.f32.mrf.mxu3  ;;  %v5434_v62 = vsel %vm1310_vm8, %v5429_v17, 0 }
 0x85c   : > { %18951 = vst [vmem:[#allocation91_spill] sm:$0xff] %v15354_v7  ;;  %5443 = vmatpush.bf16.xpose.msrb.mxu3 %v5434_v62 }
 0x860   : > { %v5427_v47 = vpop.permute.xlu0 %5426 }
 0x861   : > { %v5521_v14 = vpop.permute.xlu2 %5520 }
 0x862   : > { %v5526_v59 = vsel %vm1310_vm8, %v5521_v14, 0  ;;  %v4861_v27 = vpop.f32.mrf.mxu1  ;;  %v5404_v29 = vpop.permute.xlu1 %5403 }
 0x863   : > { %v4819_v32 = vpop.f32.mrf.mxu3  ;;  %10795 = vmatmul.msk.bf16.vlgmr.msra.gmra.mxu0 %vm1310_vm8, %v5358_v19  ;;  %10797 = vmatmul.msk.bf16.vlgmr.msra.gmra.mxu2 %vm1310_vm8, %v5404_v29 }
 0x864   : > { %5535 = vmatpush.bf16.xpose.msra.mxu3 %v5526_v59 }
 0x865   : > { %10798 = vmatmul.msk.bf16.vlgmr.msrb.gmra.mxu3 %vm1310_vm8, %v5427_v47 }
 0x868   : > { %v15363_v17 = vpop.f32.mrf.mxu2 }
 0x869   : > { %18952 = vst [vmem:[#allocation53_spill] sm:$0xff] %v15363_v17  ;;  %v5496_v54 = vpop.permute.xlu2 %5495  ;;  %v5498_v61 = vpop.permute.xlu0 %5497 }
 0x86a   : > { %v5503_v62 = vsel %vm1310_vm8, %v5498_v61, 0  ;;  %v5381_v9 = vpop.permute.xlu1 %5380 }
 0x86b   : > { %v15366_v41 = vpop.f32.mrf.mxu3  ;;  %5512 = vmatpush.bf16.xpose.msrb.mxu2 %v5503_v62  ;;  %10796 = vmatmul.msk.bf16.vlgmr.msrb.gmra.mxu1 %vm1310_vm8, %v5381_v9 }
 0x86c   : > { %18953 = vst [vmem:[#allocation95_spill] sm:$0xff] %v15366_v41 }
 0x870   : > { %v4882_v19 = vpop.f32.mrf.mxu2 }
 0x871   : > { %v5473_v14 = vpop.permute.xlu2 %5472  ;;  %v5475_v29 = vpop.permute.xlu0 %5474 }
 0x872   : > { %v5480_v59 = vsel %vm1310_vm8, %v5475_v29, 0  ;;  %v5452_v47 = vpop.permute.xlu1 %5451 }
 0x873   : > { %v15372_v32 = vpop.f32.mrf.mxu0  ;;  %v5457_v2 = vsel %vm1310_vm8, %v5452_v47, 0  ;;  %5489 = vmatpush.bf16.xpose.msra.mxu1 %v5480_v59  ;;  %10801 = vmatmul.msk.bf16.vlgmr.msrb.gmra.mxu2 %vm1310_vm8, %v5496_v54  ;;  %v4903_v61 = vpop.f32.mrf.mxu3 }
 0x874   : > { %18954 = vst [vmem:[#allocation45_spill] sm:$0xff] %v15372_v32  ;;  %5466 = vmatpush.bf16.xpose.msrb.mxu0 %v5457_v2 }
 0x878   : > { %v15376_v62 = vpop.f32.mrf.mxu2 }
 0x879   : > { %18955 = vst [vmem:[#allocation93_spill] sm:$0xff] %v15376_v62  ;;  %v5544_v9 = vpop.permute.xlu2 %5543  ;;  %v5450_v19 = vpop.permute.xlu0 %5449 }
 0x87a   : > { %v5549_v27 = vsel %vm1310_vm8, %v5544_v9, 0  ;;  %v5519_v17 = vpop.permute.xlu1 %5518  ;;  %v15379_v29 = vpop.f32.mrf.mxu1 }
 0x87b   : > { %v4924_v41 = vpop.f32.mrf.mxu0  ;;  %18956 = vst [vmem:[#allocation110_spill] sm:$0xff] %v15379_v29  ;;  %10799 = vmatmul.msk.bf16.vlgmr.msrb.gmra.mxu0 %vm1310_vm8, %v5450_v19  ;;  %10800 = vmatmul.msk.bf16.vlgmr.msra.gmra.mxu1 %vm1310_vm8, %v5473_v14 }
 0x87c   : > { %5558 = vmatpush.bf16.xpose.msra.mxu0 %v5549_v27  ;;  %10802 = vmatmul.msk.bf16.vlgmr.msra.gmra.mxu3 %vm1310_vm8, %v5519_v17 }
 0x880   : > { %v4966_v2 = vpop.f32.mrf.mxu2 }
 0x881   : > { %v5611_v59 = vpop.permute.xlu2 %5610  ;;  %v5613_v47 = vpop.permute.xlu0 %5612 }
 0x882   : > { %v15386_v61 = vpop.f32.mrf.mxu3  ;;  %v5618_v9 = vsel %vm1310_vm8, %v5613_v47, 0  ;;  %v5590_v41 = vpop.permute.xlu1 %5589 }
 0x883   : > { %18957 = vst [vmem:[#allocation101_spill] sm:$0xff] %v15386_v61  ;;  %v5595_v19 = vsel %vm1310_vm8, %v5590_v41, 0  ;;  %v4945_v10 = vpop.f32.mrf.mxu1  ;;  %5627 = vmatpush.bf16.xpose.msrb.mxu3 %v5618_v9 }
 0x884   : > { %5604 = vmatpush.bf16.xpose.msra.mxu2 %v5595_v19 }
 0x889   : > { %v5682_v14 = vpop.permute.xlu2 %5681  ;;  %v5588_v17 = vpop.permute.xlu0 %5587 }
 0x88a   : > { %v5687_v54 = vsel %vm1310_vm8, %v5682_v14, 0  ;;  %v4987_v2 = vpop.f32.mrf.mxu3  ;;  %v5567_v32 = vpop.permute.xlu1 %5566 }
 0x88b   : > { %v5572_v29 = vsel %vm1310_vm8, %v5567_v32, 0  ;;  %10805 = vmatmul.msk.bf16.vlgmr.msra.gmra.mxu2 %vm1310_vm8, %v5588_v17 }
 0x88c   : > { %5696 = vmatpush.bf16.xpose.msrb.mxu2 %v5687_v54  ;;  %10806 = vmatmul.msk.bf16.vlgmr.msrb.gmra.mxu3 %vm1310_vm8, %v5611_v59 }
 0x88d   : > { %5581 = vmatpush.bf16.xpose.msrb.mxu1 %v5572_v29 }
 0x88e   : > { %v5054_v47 = vpop.f32.mrf.mxu2 }
 0x88f   : > { %v15398_v10 = vsel %vm13682_vm9, %v5054_v47, -1e+30 }
 0x890   : > { %v5763_v9 = vsel %vm1310_vm8, %v15398_v10, -inf  ;;  %v5008_v19 = vpop.f32.mrf.mxu0  ;;  %v5031_v54 = vpop.f32.mrf.mxu1 }
 0x891   : > { %v5659_v41 = vpop.permute.xlu2 %5658  ;;  %v15405_v32 = vsel %vm13682_vm9, %v5008_v19, -1e+30  ;;  %v5565_v17 = vpop.permute.xlu0 %5564  ;;  %5764 = vmax.xlane.f32.xlu1 %v5763_v9  ;;  %v15411_v59 = vsel %vm13682_vm9, %v5031_v54, -1e+30 }
 0x892   : > { %v5664_v14 = vsel %vm1310_vm8, %v5659_v41, 0  ;;  %v5757_v29 = vsel %vm1310_vm8, %v15405_v32, -inf  ;;  %v5542_v2 = vpop.permute.xlu1 %5541  ;;  %v5077_v47 = vpop.f32.mrf.mxu3  ;;  %v5760_v41 = vsel %vm1310_vm8, %v15411_v59, -inf }
 0x893   : > { %5758 = vmax.xlane.f32.xlu0 %v5757_v29  ;;  %10803 = vmatmul.msk.bf16.vlgmr.msra.gmra.mxu0 %vm1310_vm8, %v5542_v2  ;;  %v15419_v19 = vsel %vm13682_vm9, %v5077_v47, -1e+30 }
 0x894   : > { %5761 = vmax.xlane.f32.xlu2 %v5760_v41  ;;  %10804 = vmatmul.msk.bf16.vlgmr.msrb.gmra.mxu1 %vm1310_vm8, %v5565_v17 }
 0x895   : > { %5673 = vmatpush.bf16.xpose.msra.mxu1 %v5664_v14  ;;  %v5766_v14 = vsel %vm1310_vm8, %v15419_v19, -inf }
 0x896   : > { %v5056_v9 = vpop.f32.mrf.mxu2 }
 0x898   : > { %v5010_v62 = vpop.f32.mrf.mxu0  ;;  %v5033_v54 = vpop.f32.mrf.mxu1 }
 0x899   : > { %v5636_v61 = vpop.permute.xlu0 %5635  ;;  %v5634_v62 = vpop.permute.xlu2 %5633 }
 0x89a   : > { %v5641_v7 = vsel %vm1310_vm8, %v5636_v61, 0  ;;  %v5705_v6 = vpop.permute.xlu1 %5704  ;;  %v5079_v29 = vpop.f32.mrf.mxu3 }
 0x89b   : > { %v5710_v2 = vsel %vm1310_vm8, %v5705_v6, 0  ;;  %5650 = vmatpush.bf16.xpose.msrb.mxu0 %v5641_v7  ;;  %5767 = vmax.xlane.f32.xlu0 %v5766_v14 }
 0x89c   : > { %5719 = vmatpush.bf16.xpose.msra.mxu3 %v5710_v2 }
 0x8a0   : > { %v5100_v17 = vpop.f32.mrf.mxu0 }
 0x8a1   : > { %v15427_v47 = vsel %vm13682_vm9, %v5100_v17, -1e+30  ;;  %v5703_v54 = vpop.permute.xlu0 %5702 }
 0x8a2   : > { %v5769_v41 = vsel %vm1310_vm8, %v15427_v47, -inf  ;;  %v5680_v9 = vpop.permute.xlu1 %5679 }
 0x8a3   : > { %5770 = vmax.xlane.f32.xlu2 %v5769_v41  ;;  %10807 = vmatmul.msk.bf16.vlgmr.msrb.gmra.mxu0 %vm1310_vm8, %v5634_v62 }
 0x8a4   : > { %10809 = vmatmul.msk.bf16.vlgmr.msrb.gmra.mxu2 %vm1310_vm8, %v5680_v9  ;;  %10810 = vmatmul.msk.bf16.vlgmr.msra.gmra.mxu3 %vm1310_vm8, %v5703_v54 }
 0x8a6   : > { %v5146_v6 = vpop.f32.mrf.mxu2 }
 0x8a7   : > { %v15436_v7 = vsel %vm13682_vm9, %v5146_v6, -1e+30 }
 0x8a8   : > { %v5169_v61 = vpop.f32.mrf.mxu3  ;;  %v5775_v14 = vsel %vm1310_vm8, %v15436_v7, -inf  ;;  %v5102_v2 = vpop.f32.mrf.mxu0 }
 0x8a9   : > { %v15442_v29 = vsel %vm13682_vm9, %v5169_v61, -1e+30  ;;  %v5123_v17 = vpop.f32.mrf.mxu1  ;;  %5776 = vmax.xlane.f32.xlu0 %v5775_v14 }
 0x8aa   : > { %v15446_v62 = vsel %vm13682_vm9, %v5123_v17, -1e+30  ;;  %v5778_v41 = vsel %vm1310_vm8, %v15442_v29, -inf  ;;  %v5657_v54 = vpop.permute.xlu1 %5656 }
 0x8ab   : > { %v5772_v9 = vsel %vm1310_vm8, %v15446_v62, -inf  ;;  %5779 = vmax.xlane.f32.xlu2 %v5778_v41  ;;  %10808 = vmatmul.msk.bf16.vlgmr.msra.gmra.mxu1 %vm1310_vm8, %v5657_v54 }
 0x8ac   : > { %5773 = vmax.xlane.f32.xlu1 %v5772_v9 }
 0x8ae   : > { %v5148_v6 = vpop.f32.mrf.mxu2 }
 0x8b0   : > { %v5171_v61 = vpop.f32.mrf.mxu3 }
 0x8b1   : > { %v5125_v2 = vpop.f32.mrf.mxu1 }
 0x8b6   : > { %v5238_v8 = vpop.f32.mrf.mxu2 }
 0x8b7   : > { %v15455_v17 = vsel %vm13682_vm9, %v5238_v8, -1e+30 }
 0x8b8   : > { %v5787_v14 = vsel %vm1310_vm8, %v15455_v17, -inf  ;;  %v5192_v13 = vpop.f32.mrf.mxu0 }
 0x8b9   : > { %v5215_v44 = vpop.f32.mrf.mxu1  ;;  %v15461_v28 = vsel %vm13682_vm9, %v5192_v13, -1e+30  ;;  %5788 = vmax.xlane.f32.xlu2 %v5787_v14 }
 0x8ba   : > { %v15465_v41 = vsel %vm13682_vm9, %v5215_v44, -1e+30  ;;  %v5781_v9 = vsel %vm1310_vm8, %v15461_v28, -inf }
 0x8bb   : > { %v5784_v8 = vsel %vm1310_vm8, %v15465_v41, -inf  ;;  %5782 = vmax.xlane.f32.xlu1 %v5781_v9 }
 0x8bc   : > { %5785 = vmax.xlane.f32.xlu0 %v5784_v8 }
 0x8be   : > { %v5240_v54 = vpop.f32.mrf.mxu2 }
 0x8bf   : > { %v5261_v6 = vpop.f32.mrf.mxu3 }
 0x8c0   : > { %v5194_v61 = vpop.f32.mrf.mxu0 }
 0x8c1   : > { %v5217_v2 = vpop.f32.mrf.mxu1 }
 0x8c7   : > { %v5263_v53 = vpop.f32.mrf.mxu3 }
 0x8ce   : > { %v5330_v13 = vpop.f32.mrf.mxu2 }
 0x8cf   : > { %v15471_v37 = vpop.f32.mrf.mxu3  ;;  %v15515_v22 = vsel %vm13682_vm9, %v5330_v13, -1e+30 }
 0x8d0   : > { %6162 = vrot.lane.b32.xlu0 %v18900_v34, %s11982_s8  ;;  %v5284_v44 = vpop.f32.mrf.mxu0 }
 0x8d1   : > { %v5307_v14 = vpop.f32.mrf.mxu1  ;;  %v15499_v39 = vsel %vm13682_vm9, %v5284_v44, -1e+30 }
 0x8d2   : > { %v15477_v46 = vsel %vm13682_vm9, %v5307_v14, -1e+30 }
 0x8d3   : > { %v5796_v9 = vsel %vm1310_vm8, %v15477_v46, -inf }
 0x8d4   : > { %5797 = vmax.xlane.f32.xlu2 %v5796_v9  ;;  %6141 = vrot.lane.b32.xlu1 %v18899_v35, %s11982_s8 }
 0x8d6   : > { %v5332_v53 = vpop.f32.mrf.mxu2 }
 0x8d7   : > { %v5355_v8 = vpop.f32.mrf.mxu3 }
 0x8d8   : > { %v5286_v54 = vpop.f32.mrf.mxu0 }
 0x8d9   : > { %v5309_v61 = vpop.f32.mrf.mxu1 }
 0x8e0   : > { %v5376_v2 = vpop.f32.mrf.mxu0 }
 0x8e1   : > { %v15485_v40 = vsel %vm13682_vm9, %v5376_v2, -1e+30 }
 0x8e2   : > { %v5805_v14 = vsel %vm1310_vm8, %v15485_v40, -inf }
 0x8e3   : > { %5806 = vmax.xlane.f32.xlu2 %v5805_v14 }
 0x8e6   : > { %v5422_v36 = vpop.f32.mrf.mxu2 }
 0x8e8   : > { %v15489_v49 = vpop.f32.mrf.mxu3  ;;  %v5378_v9 = vpop.f32.mrf.mxu0 }
 0x8e9   : > { %v5399_v63 = vpop.f32.mrf.mxu1  ;;  %v5793_v9 = vsel %vm1310_vm8, %v15499_v39, -inf }
 0x8ea   : > { %v15493_v53 = vsel %vm13682_vm9, %v5399_v63, -1e+30  ;;  %v15507_v63 = vsel %vm13682_vm9, %v5261_v6, -1e+30  ;;  %v5799_v6 = vsel %vm1310_vm8, %v15515_v22, -inf }
 0x8eb   : > { %v5808_v8 = vsel %vm1310_vm8, %v15493_v53, -inf }
 0x8ec   : > { %5809 = vmax.xlane.f32.xlu2 %v5808_v8  ;;  %v5790_v8 = vsel %vm1310_vm8, %v15507_v63, -inf }
 0x8ee   : > { %v5424_v54 = vpop.f32.mrf.mxu2 }
 0x8f0   : > { %v5447_v61 = vpop.f32.mrf.mxu3 }
 0x8f1   : > { %v5401_v2 = vpop.f32.mrf.mxu1 }
 0x8f6   : > { %v15501_v14 = vpop.f32.mrf.mxu2 }
 0x8f8   : > { %v5468_v26 = vpop.f32.mrf.mxu0 }
 0x8f9   : > { %v5491_v38 = vpop.f32.mrf.mxu1 }
 0x8fa   : > { %5794 = vmax.xlane.f32.xlu0 %v5793_v9 }
 0x8fe   : > { %5791 = vmax.xlane.f32.xlu1 %v5790_v8  ;;  %v5516_v54 = vpop.f32.mrf.mxu2 }
 0x8ff   : > { %v15511_v61 = vpop.f32.mrf.mxu3  ;;  %v15524_v54 = vsel %vm13682_vm9, %v5422_v36, -1e+30 }
 0x900   : > { %v5470_v44 = vpop.f32.mrf.mxu0  ;;  %v5811_v13 = vsel %vm1310_vm8, %v15524_v54, -inf }
 0x901   : > { %v5493_v2 = vpop.f32.mrf.mxu1 }
 0x904   : > { %6183 = vrot.lane.b32.xlu2 %v18898_v12, %s11982_s8 }
 0x906   : > { %5800 = vmax.xlane.f32.xlu1 %v5799_v6 }
 0x907   : > { %v5762_v9 = vpop.xlane.xlu2 %5761  ;;  %v5539_v50 = vpop.f32.mrf.mxu3 }
 0x908   : > { %v5854_v8 = vsub.f32 %v15411_v59, %v5762_v9 }
 0x90a   : > { %v5887_v44 = vmul.f32 1.442695, %v5854_v8 }
 0x90c   : > { %11607 = vpow2.f32 %v5887_v44  ;;  %v5759_v44 = vpop.xlane.xlu0 %5758 }
 0x90e   : > { %6204 = vrot.lane.b32.xlu0 %v18897_v5, %s11982_s8  ;;  %5812 = vmax.xlane.f32.xlu1 %v5811_v13  ;;  %v15530_v2 = vpop.f32.mrf.mxu2  ;;  %v5853_v13 = vsub.f32 %v15405_v32, %v5759_v44 }
 0x90f   : > { %v15532_v6 = vpop.f32.mrf.mxu3 }
 0x910   : > { %v15534_v50 = vpop.f32.mrf.mxu0  ;;  %v5885_v12 = vmul.f32 1.442695, %v5853_v13 }
 0x911   : > { %v15536_v59 = vpop.f32.mrf.mxu1 }
 0x912   : > { %v15538_v9 = vpop.eup %11607  ;;  %11609 = vpow2.f32 %v5885_v12  ;;  %v15561_v12 = vsel %vm13682_vm9, %v5468_v26, -1e+30 }
 0x913   : > { %v5952_v36 = vsel %vm1310_vm8, %v15538_v9, 0.0 }
 0x914   : > { %v5768_v33 = vpop.xlane.xlu0 %5767 }
 0x916   : > { %5953 = vadd.xlane.f32.xlu1 %v5952_v36  ;;  %v5608_v8 = vpop.f32.mrf.mxu2 }
 0x917   : > { %v5631_v34 = vpop.f32.mrf.mxu3 }
 0x918   : > { %v5562_v21 = vpop.f32.mrf.mxu0  ;;  %v15549_v57 = vpop.eup %11609 }
 0x919   : > { %v5585_v52 = vpop.f32.mrf.mxu1  ;;  %v5949_v21 = vsel %vm1310_vm8, %v15549_v57, 0.0  ;;  %v5771_v34 = vpop.xlane.xlu2 %5770 }
 0x91a   : > { %v15555_v52 = vpop.xlane.xlu1 %5764  ;;  %v5857_v13 = vsub.f32 %v15427_v47, %v5771_v34  ;;  %v5856_v34 = vsub.f32 %v15419_v19, %v5768_v33 }
 0x920   : > { %v15543_v5 = vpop.f32.mrf.mxu0 }
 0x922   : > { %v5774_v26 = vpop.xlane.xlu1 %5773 }
 0x923   : > { %v5858_v0 = vsub.f32 %v15446_v62, %v5774_v26 }
 0x927   : > { %v15545_v35 = vpop.f32.mrf.mxu2  ;;  %v15547_v18 = vpop.f32.mrf.mxu3 }
 0x928   : > { %v5654_v15 = vpop.f32.mrf.mxu0  ;;  %v15551_v36 = vpop.f32.mrf.mxu1 }
 0x929   : > { %v15563_v15 = vpop.xlane.xlu0 %5776 }
 0x92d   : > { %5950 = vadd.xlane.f32.xlu2 %v5949_v21  ;;  %v15569_v21 = vsel %vm13682_vm9, %v15471_v37, -1e+30  ;;  %v15585_v37 = vsel %vm13682_vm9, %v15489_v49, -1e+30 }
 0x92e   : > { %v5783_v30 = vpop.xlane.xlu1 %5782 }
 0x92f   : > { %v5700_v32 = vpop.f32.mrf.mxu2  ;;  %v5723_v8 = vpop.f32.mrf.mxu3  ;;  %6246 = vrot.lane.b32.xlu1 %v18906_v23, %s11982_s8  ;;  %v5893_v23 = vmul.f32 1.442695, %v5857_v13  ;;  %v5814_v13 = vsel %vm1310_vm8, %v15585_v37, -inf }
 0x930   : > { %v5677_v44 = vpop.f32.mrf.mxu1  ;;  %v5817_v32 = vsel %vm1310_vm8, %v15561_v12, -inf  ;;  %v5802_v8 = vsel %vm1310_vm8, %v15569_v21, -inf }
 0x931   : > { %v15577_v44 = vsel %vm13682_vm9, %v5491_v38, -1e+30  ;;  %v15579_v47 = vpop.xlane.xlu0 %5785  ;;  %11611 = vpow2.f32 %v5893_v23  ;;  %v5780_v38 = vpop.xlane.xlu2 %5779 }
 0x932   : > { %18959 = vst [vmem:[#allocation107_spill] sm:$0xff] %v15577_v44 }
 0x935   : > { %5818 = vmax.xlane.f32.xlu2 %v5817_v32  ;;  %v5820_v32 = vsel %vm1310_vm8, %v15577_v44, -inf }
 0x937   : > { %v15591_v45 = vpop.eup %11611 }
 0x938   : > { %5803 = vmax.xlane.f32.xlu0 %v5802_v8  ;;  %v5891_v8 = vmul.f32 1.442695, %v5856_v34  ;;  %v5961_v49 = vsel %vm1310_vm8, %v15591_v45, 0.0 }
 0x939   : > { %v5789_v19 = vpop.xlane.xlu2 %5788 }
 0x93a   : > { %11613 = vpow2.f32 %v5891_v8 }
 0x93d   : > { %5821 = vmax.xlane.f32.xlu2 %v5820_v32 }
 0x940   : > { %5815 = vmax.xlane.f32.xlu0 %v5814_v13  ;;  %v15598_v20 = vpop.eup %11613  ;;  %v5895_v13 = vmul.f32 1.442695, %v5858_v0 }
 0x941   : > { %v5958_v8 = vsel %vm1310_vm8, %v15598_v20, 0.0 }
 0x942   : > { %v6163_v33 = vpop.permute.xlu0 %6162  ;;  %11615 = vpow2.f32 %v5895_v13 }
 0x943   : > { %v6168_v23 = vsel %vm2497_vm10, %v6163_v33, 0 }
 0x944   : > { %6177 = vmatpush.bf16.msrb.mxu1 %v6168_v23  ;;  %v5860_v23 = vsub.f32 %v15442_v29, %v5780_v38  ;;  %v5863_v29 = vsub.f32 %v15455_v17, %v5789_v19 }
 0x945   : > { %5962 = vadd.xlane.f32.xlu2 %v5961_v49 }
 0x946   : > { %v6142_v32 = vpop.permute.xlu1 %6141  ;;  %v5899_v49 = vmul.f32 1.442695, %v5860_v23  ;;  %v5905_v13 = vmul.f32 1.442695, %v5863_v29 }
 0x947   : > { %v6147_v34 = vsel %vm2497_vm10, %v6142_v32, 0  ;;  %v15602_v33 = vpop.xlane.xlu2 %5797 }
 0x948   : > { %6156 = vmatpush.bf16.msra.mxu0 %v6147_v34  ;;  %v15607_v62 = vpop.eup %11615  ;;  %11617 = vpow2.f32 %v5899_v49 }
 0x949   : > { %v5964_v0 = vsel %vm1310_vm8, %v15607_v62, 0.0  ;;  %11619 = vpow2.f32 %v5905_v13 }
 0x94d   : > { %5959 = vadd.xlane.f32.xlu2 %v5958_v8  ;;  %v15627_v8 = vsel %vm13682_vm9, %v15511_v61, -1e+30  ;;  %v5855_v61 = vsub.f32 %v15398_v10, %v15555_v52 }
 0x94e   : > { %v15615_v32 = vpop.eup %11617  ;;  %v5826_v17 = vsel %vm1310_vm8, %v15627_v8, -inf }
 0x94f   : > { %v5970_v38 = vsel %vm1310_vm8, %v15615_v32, 0.0  ;;  %v15632_v19 = vpop.eup %11619 }
 0x954   : > { %6225 = vrot.lane.b32.xlu0 %v18904_v4, %s11982_s8 }
 0x956   : > { %v15609_v26 = vpop.xlane.xlu2 %5806 }
 0x959   : > { %5965 = vadd.xlane.f32.xlu1 %v5964_v0  ;;  %v5979_v0 = vsel %vm1310_vm8, %v15632_v19, 0.0 }
 0x95c   : > { %6267 = vrot.lane.b32.xlu0 %v18902_v58, %s11982_s8 }
 0x95f   : > { %v15617_v34 = vpop.xlane.xlu2 %5809 }
 0x961   : > { %5971 = vadd.xlane.f32.xlu1 %v5970_v38  ;;  %v5889_v38 = vmul.f32 1.442695, %v5855_v61  ;;  %v15667_v61 = vsel %vm13682_vm9, %v15501_v14, -1e+30 }
 0x963   : > { %11621 = vpow2.f32 %v5889_v38  ;;  %v15672_v38 = vsel %vm13682_vm9, %v15534_v50, -1e+30 }
 0x964   : > { %v5829_v14 = vsel %vm1310_vm8, %v15672_v38, -inf }
 0x965   : > { %6288 = vrot.lane.b32.xlu2 %v18905_v55, %s11982_s8 }
 0x967   : > { %v6184_v23 = vpop.permute.xlu2 %6183 }
 0x968   : > { %v6189_v49 = vsel %vm2497_vm10, %v6184_v23, 0  ;;  %v5859_v23 = vsub.f32 %v15436_v7, %v15563_v15 }
 0x969   : > { %6198 = vmatpush.bf16.msra.mxu2 %v6189_v49  ;;  %5827 = vmax.xlane.f32.xlu1 %v5826_v17  ;;  %v5861_v49 = vsub.f32 %v15461_v28, %v5783_v30 }
 0x96a   : > { %v5897_v17 = vmul.f32 1.442695, %v5859_v23 }
 0x96b   : > { %v5901_v55 = vmul.f32 1.442695, %v5861_v49  ;;  %v5823_v49 = vsel %vm1310_vm8, %v15667_v61, -inf }
 0x96c   : > { %11623 = vpow2.f32 %v5897_v17 }
 0x96d   : > { %v15638_v58 = vpop.xlane.xlu0 %5794  ;;  %11625 = vpow2.f32 %v5901_v55 }
 0x971   : > { %v5792_v29 = vpop.xlane.xlu1 %5791  ;;  %5980 = vadd.xlane.f32.xlu1 %v5979_v0  ;;  %v15646_v0 = vpop.eup %11621 }
 0x972   : > { %v5955_v10 = vsel %vm1310_vm8, %v15646_v0, 0.0  ;;  %v15652_v7 = vpop.eup %11623 }
 0x973   : > { %v15654_v52 = vpop.eup %11625  ;;  %v5967_v55 = vsel %vm1310_vm8, %v15652_v7, 0.0 }
 0x979   : > { %v15640_v13 = vpop.xlane.xlu1 %5800 }
 0x980   : > { %v6205_v4 = vpop.permute.xlu0 %6204 }
 0x981   : > { %v6210_v31 = vsel %vm2497_vm10, %v6205_v4, 0  ;;  %v15648_v44 = vpop.xlane.xlu1 %5812  ;;  %v5862_v4 = vsub.f32 %v15465_v41, %v15579_v47  ;;  %v5864_v47 = vsub.f32 %v15507_v63, %v5792_v29 }
 0x982   : > { %6219 = vmatpush.bf16.msrb.mxu3 %v6210_v31  ;;  %v5973_v31 = vsel %vm1310_vm8, %v15654_v52, 0.0 }
 0x983   : > { %v5903_v30 = vmul.f32 1.442695, %v5862_v4  ;;  %v5907_v50 = vmul.f32 1.442695, %v5864_v47 }
 0x986   : > { %5956 = vadd.xlane.f32.xlu0 %v5955_v10 }
 0x989   : > { %v5954_v28 = vpop.xlane.xlu1 %5953 }
 0x98a   : > { %11627 = vrcp.f32 %v5954_v28  ;;  %6309 = vrot.lane.b32.xlu1 %v18912_v56, %s11982_s8 }
 0x98b   : > { %11629 = vpow2.f32 %v5903_v30 }
 0x98c   : > { %11631 = vpow2.f32 %v5907_v50 }
 0x98e   : > { %5974 = vadd.xlane.f32.xlu2 %v5973_v31  ;;  %5968 = vadd.xlane.f32.xlu0 %v5967_v55 }
 0x990   : > { %v11628_v15 = vpop.eup %11627 }
 0x991   : > { %v6078_v41 = vmul.f32 %v11628_v15, %v15538_v9  ;;  %v15683_v17 = vpop.eup %11629  ;;  %v15688_v9 = vsel %vm13682_vm9, %v15536_v59, -1e+30 }
 0x992   : > { %6372 = vrot.lane.b32.xlu1 %v18908_v60, %s11982_s8  ;;  %v5832_v63 = vsel %vm1310_vm8, %v15688_v9, -inf  ;;  %v5976_v29 = vsel %vm1310_vm8, %v15683_v17, 0.0  ;;  %v15694_v28 = vpop.eup %11631 }
 0x993   : > { %v6110_v23 = vpack.c.bf16 %v6078_v41, %v6078_v41  ;;  %v5982_v59 = vsel %vm1310_vm8, %v15694_v28, 0.0 }
 0x995   : > { %10812 = vmatmul.msk.bf16.vlgmr.msrb.gmra.mxu1 %vm1310_vm8, %v6110_v23  ;;  %v5867_v23 = vsub.f32 %v15515_v22, %v15640_v13 }
 0x996   : > { %5830 = vmax.xlane.f32.xlu2 %v5829_v14  ;;  %5824 = vmax.xlane.f32.xlu0 %v5823_v49 }
 0x997   : > { %v5913_v14 = vmul.f32 1.442695, %v5867_v23 }
 0x99e   : > { %5833 = vmax.xlane.f32.xlu2 %v5832_v63  ;;  %5977 = vadd.xlane.f32.xlu0 %v5976_v29 }
 0x9a0   : > { %v5951_v10 = vpop.xlane.xlu2 %5950 }
 0x9a1   : > { %11633 = vrcp.f32 %v5951_v10  ;;  %v6247_v4 = vpop.permute.xlu1 %6246 }
 0x9a2   : > { %v6252_v31 = vsel %vm2497_vm10, %v6247_v4, 0  ;;  %11635 = vpow2.f32 %v5913_v14 }
 0x9a3   : > { %6261 = vmatpush.bf16.msra.mxu1 %v6252_v31 }
 0x9a6   : > { %5983 = vadd.xlane.f32.xlu0 %v5982_v59 }
 0x9a7   : > { %v11634_v55 = vpop.eup %11633 }
 0x9a8   : > { %v6077_v30 = vmul.f32 %v11634_v55, %v15549_v57  ;;  %v15700_v15 = vpop.xlane.xlu2 %5818  ;;  %v15712_v57 = vsel %vm13682_vm9, %v15532_v6, -1e+30  ;;  %v15720_v29 = vpop.eup %11635 }
 0x9a9   : > { %v5838_v63 = vsel %vm1310_vm8, %v15712_v57, -inf  ;;  %v5991_v6 = vsel %vm1310_vm8, %v15720_v29, 0.0 }
 0x9aa   : > { %v6109_v41 = vpack.c.bf16 %v6077_v30, %v6077_v30 }
 0x9ab   : > { %v5804_v49 = vpop.xlane.xlu0 %5803 }
 0x9ac   : > { %10811 = vmatmul.msk.bf16.vlgmr.msra.gmra.mxu0 %vm1310_vm8, %v6109_v41 }
 0x9b0   : > { %v15703_v47 = vpop.xlane.xlu2 %5821 }
 0x9b3   : > { %v15718_v22 = vpop.xlane.xlu0 %5815 }
 0x9b6   : > { %6351 = vrot.lane.b32.xlu2 %v18907_v51, %s11982_s8 }
 0x9b8   : > { %v5963_v50 = vpop.xlane.xlu2 %5962 }
 0x9b9   : > { %11637 = vrcp.f32 %v5963_v50 }
 0x9ba   : > { %6330 = vrot.lane.b32.xlu0 %v18909_v24, %s11982_s8 }
 0x9bc   : > { %5839 = vmax.xlane.f32.xlu1 %v5838_v63 }
 0x9bf   : > { %v11638_v10 = vpop.eup %11637 }
 0x9c0   : > { %v5960_v13 = vpop.xlane.xlu2 %5959  ;;  %v6081_v4 = vmul.f32 %v11638_v10, %v15591_v45  ;;  %v5865_v45 = vsub.f32 %v15499_v39, %v15638_v58 }
 0x9c1   : > { %11639 = vrcp.f32 %v5960_v13 }
 0x9c2   : > { %v6113_v23 = vpack.c.bf16 %v6081_v4, %v6081_v4 }
 0x9c4   : > { %5992 = vadd.xlane.f32.xlu1 %v5991_v6 }
 0x9c6   : > { %v6226_v31 = vpop.permute.xlu0 %6225 }
 0x9c7   : > { %v11640_v59 = vpop.eup %11639  ;;  %v6231_v55 = vsel %vm2497_vm10, %v6226_v31, 0 }
 0x9c8   : > { %v6080_v30 = vmul.f32 %v11640_v59, %v15598_v20  ;;  %v6289_v41 = vpop.permute.xlu2 %6288  ;;  %6240 = vmatpush.bf16.msrb.mxu0 %v6231_v55  ;;  %v5909_v20 = vmul.f32 1.442695, %v5865_v45  ;;  %v5866_v55 = vsub.f32 %v15477_v46, %v15602_v33  ;;  %v5868_v46 = vsub.f32 %v15569_v21, %v5804_v49 }
 0x9c9   : > { %v6294_v14 = vsel %vm2497_vm10, %v6289_v41, 0  ;;  %v15765_v21 = vsel %vm13682_vm9, %v15551_v36, -1e+30  ;;  %v5870_v36 = vsub.f32 %v15493_v53, %v15617_v34  ;;  %v5872_v53 = vsub.f32 %v15585_v37, %v15718_v22 }
 0x9ca   : > { %v6112_v50 = vpack.c.bf16 %v6080_v30, %v6080_v30  ;;  %6303 = vmatpush.bf16.msra.mxu3 %v6294_v14  ;;  %v5911_v41 = vmul.f32 1.442695, %v5866_v55  ;;  %v15747_v14 = vsel %vm13682_vm9, %v15530_v2, -1e+30  ;;  %v5915_v45 = vmul.f32 1.442695, %v5868_v46 }
 0x9cb   : > { %10815 = vmatmul.msk.bf16.vlgmr.msrb.gmra.mxu0 %vm1310_vm8, %v6113_v23  ;;  %v5835_v33 = vsel %vm1310_vm8, %v15747_v14, -inf  ;;  %v5919_v55 = vmul.f32 1.442695, %v5870_v36  ;;  %v5923_v22 = vmul.f32 1.442695, %v5872_v53 }
 0x9cc   : > { %10814 = vmatmul.msk.bf16.vlgmr.msrb.gmra.mxu3 %vm1310_vm8, %v6112_v50  ;;  %v5966_v63 = vpop.xlane.xlu1 %5965 }
 0x9cd   : > { %11641 = vrcp.f32 %v5966_v63  ;;  %v5844_v63 = vsel %vm1310_vm8, %v15765_v21, -inf }
 0x9ce   : > { %v6268_v13 = vpop.permute.xlu0 %6267  ;;  %11643 = vpow2.f32 %v5909_v20 }
 0x9cf   : > { %v6273_v10 = vsel %vm2497_vm10, %v6268_v13, 0 }
 0x9d0   : > { %6282 = vmatpush.bf16.msrb.mxu2 %v6273_v10 }
 0x9d3   : > { %v11642_v6 = vpop.eup %11641 }
 0x9d4   : > { %v6082_v4 = vmul.f32 %v11642_v6, %v15607_v62  ;;  %v5972_v31 = vpop.xlane.xlu1 %5971  ;;  %v15737_v58 = vpop.eup %11643 }
 0x9d5   : > { %11645 = vrcp.f32 %v5972_v31  ;;  %v5985_v62 = vsel %vm1310_vm8, %v15737_v58, 0.0 }
 0x9d6   : > { %v6114_v59 = vpack.c.bf16 %v6082_v4, %v6082_v4  ;;  %11647 = vpow2.f32 %v5911_v41 }
 0x9d7   : > { %11649 = vpow2.f32 %v5915_v45 }
 0x9d8   : > { %10816 = vmatmul.msk.bf16.vlgmr.msra.gmra.mxu1 %vm1310_vm8, %v6114_v59 }
 0x9db   : > { %v11646_v39 = vpop.eup %11645 }
 0x9dc   : > { %v6084_v30 = vmul.f32 %v11646_v39, %v15615_v32  ;;  %v15756_v32 = vsel %vm13682_vm9, %v15543_v5, -1e+30  ;;  %v15760_v2 = vpop.eup %11647  ;;  %v15767_v49 = vpop.xlane.xlu1 %5827 }
 0x9dd   : > { %6393 = vrot.lane.b32.xlu1 %v18915_v16, %s11982_s8  ;;  %v5841_v50 = vsel %vm1310_vm8, %v15756_v32, -inf  ;;  %v5988_v5 = vsel %vm1310_vm8, %v15760_v2, 0.0  ;;  %v15773_v13 = vpop.eup %11649 }
 0x9de   : > { %v6116_v23 = vpack.c.bf16 %v6084_v30, %v6084_v30  ;;  %v5994_v10 = vsel %vm1310_vm8, %v15773_v13, 0.0 }
 0x9df   : > { %5986 = vadd.xlane.f32.xlu2 %v5985_v62 }
 0x9e0   : > { %10818 = vmatmul.msk.bf16.vlgmr.msra.gmra.mxu3 %vm1310_vm8, %v6116_v23  ;;  %v15784_v23 = vsel %vm13682_vm9, %v15545_v35, -1e+30 }
 0x9e4   : > { %5836 = vmax.xlane.f32.xlu0 %v5835_v33  ;;  %v5981_v20 = vpop.xlane.xlu1 %5980 }
 0x9e7   : > { %5842 = vmax.xlane.f32.xlu2 %v5841_v50 }
 0x9ec   : > { %5989 = vadd.xlane.f32.xlu0 %v5988_v5 }
 0x9ef   : > { %5845 = vmax.xlane.f32.xlu2 %v5844_v63 }
 0x9f4   : > { %5995 = vadd.xlane.f32.xlu0 %v5994_v10 }
 0x9f9   : > { %v5957_v6 = vpop.xlane.xlu0 %5956 }
 0x9fa   : > { %11651 = vrcp.f32 %v5957_v6 }
 0x9fc   : > { %v6310_v4 = vpop.permute.xlu1 %6309 }
 0x9fd   : > { %v6315_v31 = vsel %vm2497_vm10, %v6310_v4, 0 }
 0x9fe   : > { %6324 = vmatpush.bf16.msra.mxu0 %v6315_v31 }
 0xa00   : > { %v11652_v59 = vpop.eup %11651 }
 0xa01   : > { %v6079_v39 = vmul.f32 %v11652_v59, %v15646_v0  ;;  %v5975_v30 = vpop.xlane.xlu2 %5974  ;;  %v5969_v41 = vpop.xlane.xlu0 %5968  ;;  %v5847_v0 = vsel %vm1310_vm8, %v15784_v23, -inf }
 0xa02   : > { %11653 = vrcp.f32 %v5975_v30 }
 0xa03   : > { %v6111_v62 = vpack.c.bf16 %v6079_v39, %v6079_v39  ;;  %11655 = vpow2.f32 %v5919_v55 }
 0xa04   : > { %v6373_v46 = vpop.permute.xlu1 %6372  ;;  %11657 = vrcp.f32 %v5969_v41 }
 0xa05   : > { %10813 = vmatmul.msk.bf16.vlgmr.msra.gmra.mxu2 %vm1310_vm8, %v6111_v62  ;;  %v6378_v34 = vsel %vm2497_vm10, %v6373_v46, 0  ;;  %11659 = vpow2.f32 %v5923_v22  ;;  %v5869_v46 = vsub.f32 %v15485_v40, %v15609_v26 }
 0xa06   : > { %6387 = vmatpush.bf16.msrb.mxu3 %v6378_v34  ;;  %11661 = vrcp.f32 %v5981_v20 }
 0xa07   : > { %6435 = vrot.lane.b32.xlu2 %v18914_v1, %s11982_s8  ;;  %5848 = vmax.xlane.f32.xlu1 %v5847_v0  ;;  %v5917_v0 = vmul.f32 1.442695, %v5869_v46 }
 0xa08   : > { %v11654_v33 = vpop.eup %11653  ;;  %6414 = vrot.lane.b32.xlu0 %v18919_v25, %s11982_s8 }
 0xa09   : > { %v6085_v35 = vmul.f32 %v11654_v33, %v15654_v52  ;;  %v15797_v50 = vpop.xlane.xlu2 %5830  ;;  %v15799_v37 = vpop.xlane.xlu0 %5824 }
 0xa0a   : > { %v15801_v45 = vpop.eup %11655 }
 0xa0b   : > { %v6117_v5 = vpack.c.bf16 %v6085_v35, %v6085_v35  ;;  %v11658_v63 = vpop.eup %11657  ;;  %v6000_v6 = vsel %vm1310_vm8, %v15801_v45, 0.0 }
 0xa0c   : > { %v6083_v10 = vmul.f32 %v11658_v63, %v15652_v7  ;;  %v15811_v31 = vpop.eup %11659 }
 0xa0d   : > { %10819 = vmatmul.msk.bf16.vlgmr.msra.gmra.mxu0 %vm1310_vm8, %v6117_v5  ;;  %v6006_v7 = vsel %vm1310_vm8, %v15811_v31, 0.0  ;;  %v11662_v41 = vpop.eup %11661 }
 0xa0e   : > { %v6115_v4 = vpack.c.bf16 %v6083_v10, %v6083_v10  ;;  %v6087_v53 = vmul.f32 %v11662_v41, %v15632_v19 }
 0xa0f   : > { %6001 = vadd.xlane.f32.xlu1 %v6000_v6 }
 0xa10   : > { %6456 = vrot.lane.b32.xlu0 %v18913_v48, %s11982_s8  ;;  %v6119_v33 = vpack.c.bf16 %v6087_v53, %v6087_v53 }
 0xa11   : > { %v15809_v52 = vpop.xlane.xlu2 %5833  ;;  %v5978_v36 = vpop.xlane.xlu0 %5977 }
 0xa12   : > { %v15813_v59 = vpop.f32.mrf.mxu1 }
 0xa13   : > { %18960 = vst [vmem:[#allocation102_spill] sm:$0xff] %v15813_v59 }
 0xa15   : > { %10817 = vmatmul.msk.bf16.vlgmr.msrb.gmra.mxu2 %vm1310_vm8, %v6115_v4 }
 0xa17   : > { %6007 = vadd.xlane.f32.xlu1 %v6006_v7  ;;  %v15843_v7 = vsel %vm13682_vm9, %v15547_v18, -1e+30  ;;  %v5873_v18 = vsub.f32 %v15561_v12, %v15700_v15 }
 0xa19   : > { %v6352_v55 = vpop.permute.xlu2 %6351  ;;  %v5984_v39 = vpop.xlane.xlu0 %5983 }
 0xa1a   : > { %v6357_v30 = vsel %vm2497_vm10, %v6352_v55, 0  ;;  %11663 = vrcp.f32 %v5984_v39  ;;  %v6181_v62 = vpop.f32.mrf.mxu1  ;;  %v5850_v55 = vsel %vm1310_vm8, %v15843_v7, -inf }
 0xa1b   : > { %6366 = vmatpush.bf16.msra.mxu2 %v6357_v30  ;;  %11665 = vrcp.f32 %v5978_v36  ;;  %v5871_v36 = vsub.f32 %v15524_v54, %v15648_v44  ;;  %v5925_v62 = vmul.f32 1.442695, %v5873_v18 }
 0xa1c   : > { %11667 = vpow2.f32 %v5917_v0 }
 0xa20   : > { %v11664_v34 = vpop.eup %11663 }
 0xa21   : > { %v6088_v20 = vmul.f32 %v11664_v34, %v15694_v28  ;;  %v11666_v22 = vpop.eup %11665 }
 0xa22   : > { %v6086_v26 = vmul.f32 %v11666_v22, %v15683_v17  ;;  %v15830_v19 = vpop.eup %11667  ;;  %v5921_v17 = vmul.f32 1.442695, %v5871_v36 }
 0xa23   : > { %v6120_v35 = vpack.c.bf16 %v6088_v20, %v6088_v20  ;;  %v5997_v6 = vsel %vm1310_vm8, %v15830_v19, 0.0  ;;  %v5876_v20 = vsub.f32 %v15627_v8, %v15767_v49 }
 0xa24   : > { %v6118_v10 = vpack.c.bf16 %v6086_v26, %v6086_v26  ;;  %11669 = vpow2.f32 %v5921_v17  ;;  %v5875_v17 = vsub.f32 %v15667_v61, %v15799_v37 }
 0xa25   : > { %10821 = vmatmul.msk.bf16.vlgmr.msra.gmra.mxu2 %vm1310_vm8, %v6119_v33  ;;  %10822 = vmatmul.msk.bf16.vlgmr.msrb.gmra.mxu3 %vm1310_vm8, %v6120_v35  ;;  %11671 = vpow2.f32 %v5925_v62  ;;  %v5931_v35 = vmul.f32 1.442695, %v5876_v20 }
 0xa29   : > { %v15825_v5 = vpop.f32.mrf.mxu0 }
 0xa2a   : > { %18961 = vst [vmem:[#allocation98_spill] sm:$0xff] %v15825_v5  ;;  %v15847_v39 = vpop.eup %11669 }
 0xa2b   : > { %v6003_v44 = vsel %vm1310_vm8, %v15847_v39, 0.0  ;;  %v15868_v12 = vpop.eup %11671 }
 0xa2c   : > { %v6331_v28 = vpop.permute.xlu0 %6330 }
 0xa2d   : > { %v6336_v63 = vsel %vm2497_vm10, %v6331_v28, 0 }
 0xa2e   : > { %6345 = vmatpush.bf16.msrb.mxu1 %v6336_v63  ;;  %v6009_v63 = vsel %vm1310_vm8, %v15868_v12, 0.0 }
 0xa2f   : > { %v15849_v54 = vpop.xlane.xlu1 %5839 }
 0xa30   : > { %5998 = vadd.xlane.f32.xlu2 %v5997_v6  ;;  %6498 = vrot.lane.b32.xlu1 %v18927_v11, %s11982_s8 }
 0xa31   : > { %v6160_v4 = vpop.f32.mrf.mxu0  ;;  %10820 = vmatmul.msk.bf16.vlgmr.msrb.gmra.mxu1 %vm1310_vm8, %v6118_v10 }
 0xa37   : > { %v5993_v30 = vpop.xlane.xlu1 %5992 }
 0xa3a   : > { %5851 = vmax.xlane.f32.xlu0 %v5850_v55 }
 0xa42   : > { %6004 = vadd.xlane.f32.xlu0 %v6003_v44  ;;  %v5929_v44 = vmul.f32 1.442695, %v5875_v17  ;;  %v18967_v17 = vld [vmem:[#allocation66_spill] sm:$0xff] }
 0xa48   : > { %6519 = vrot.lane.b32.xlu2 %v18921_v43, %s11982_s8  ;;  %v15855_v41 = vpop.f32.mrf.mxu0 }
 0xa49   : > { %18962 = vst [vmem:[#allocation20_spill] sm:$0xff] %v15855_v41 }
 0xa4f   : > { %v15859_v46 = vpop.f32.mrf.mxu3  ;;  %v6394_v53 = vpop.permute.xlu1 %6393 }
 0xa50   : > { %18963 = vst [vmem:[#allocation100_spill] sm:$0xff] %v15859_v46  ;;  %v6244_v34 = vpop.f32.mrf.mxu0  ;;  %v6399_v0 = vsel %vm2497_vm10, %v6394_v53, 0 }
 0xa51   : > { %6408 = vmatpush.bf16.msrb.mxu0 %v6399_v0 }
 0xa52   : > { %v5987_v33 = vpop.xlane.xlu2 %5986 }
 0xa53   : > { %11673 = vrcp.f32 %v5987_v33 }
 0xa54   : > { %11675 = vpow2.f32 %v5931_v35 }
 0xa55   : > { %v15864_v22 = vpop.f32.mrf.mxu1  ;;  %11677 = vrcp.f32 %v5993_v30 }
 0xa56   : > { %18964 = vst [vmem:[#allocation21_spill] sm:$0xff] %v15864_v22  ;;  %6477 = vrot.lane.b32.xlu0 %v18923_v42, %s11982_s8  ;;  %11679 = vpow2.f32 %v5929_v44 }
 0xa57   : > { %v6223_v26 = vpop.f32.mrf.mxu3  ;;  %v5837_v6 = vpop.xlane.xlu0 %5836 }
 0xa59   : > { %v11674_v28 = vpop.eup %11673 }
 0xa5a   : > { %v6089_v8 = vmul.f32 %v11674_v28, %v15737_v58  ;;  %v15873_v49 = vpop.xlane.xlu2 %5842  ;;  %6010 = vadd.xlane.f32.xlu1 %v6009_v63  ;;  %v15880_v4 = vpop.eup %11675  ;;  %v18966_v28 = vld [vmem:[#allocation107_spill] sm:$0xff] }
 0xa5b   : > { %v6018_v55 = vsel %vm1310_vm8, %v15880_v4, 0.0  ;;  %v11678_v62 = vpop.eup %11677 }
 0xa5c   : > { %v6121_v10 = vpack.c.bf16 %v6089_v8, %v6089_v8  ;;  %v6091_v34 = vmul.f32 %v11678_v62, %v15720_v29  ;;  %v15892_v61 = vpop.eup %11679  ;;  %v5874_v29 = vsub.f32 %v18966_v28, %v15703_v47 }
 0xa5d   : > { %v6265_v36 = vpop.f32.mrf.mxu1  ;;  %v6015_v30 = vsel %vm1310_vm8, %v15892_v61, 0.0 }
 0xa5e   : > { %6540 = vrot.lane.b32.xlu0 %v18925_v3, %s11982_s8  ;;  %10823 = vmatmul.msk.bf16.vlgmr.msrb.gmra.mxu0 %vm1310_vm8, %v6121_v10  ;;  %v6123_v37 = vpack.c.bf16 %v6091_v34, %v6091_v34  ;;  %v5927_v63 = vmul.f32 1.442695, %v5874_v29  ;;  %v5879_v29 = vsub.f32 %v15747_v14, %v5837_v6 }
 0xa5f   : > { %v5990_v53 = vpop.xlane.xlu0 %5989 }
 0xa60   : > { %11681 = vrcp.f32 %v5990_v53 }
 0xa62   : > { %v15884_v58 = vpop.xlane.xlu2 %5845  ;;  %6019 = vadd.xlane.f32.xlu1 %v6018_v55 }
 0xa63   : > { %v15888_v18 = vpop.f32.mrf.mxu3 }
 0xa64   : > { %18965 = vst [vmem:[#allocation112_spill] sm:$0xff] %v15888_v18 }
 0xa66   : > { %v11682_v26 = vpop.eup %11681 }
 0xa67   : > { %v5996_v35 = vpop.xlane.xlu0 %5995  ;;  %v6090_v8 = vmul.f32 %v11682_v26, %v15760_v2 }
 0xa68   : > { %11683 = vrcp.f32 %v5996_v35 }
 0xa69   : > { %v6122_v55 = vpack.c.bf16 %v6090_v8, %v6090_v8  ;;  %11685 = vpow2.f32 %v5927_v63  ;;  %v5937_v8 = vmul.f32 1.442695, %v5879_v29 }
 0xa6a   : > { %v6436_v20 = vpop.permute.xlu2 %6435 }
 0xa6b   : > { %v6441_v0 = vsel %vm2497_vm10, %v6436_v20, 0  ;;  %v6307_v33 = vpop.f32.mrf.mxu3 }
 0xa6c   : > { %6450 = vmatpush.bf16.msrb.mxu2 %v6441_v0 }
 0xa6e   : > { %v11684_v44 = vpop.eup %11683 }
 0xa6f   : > { %10825 = vmatmul.msk.bf16.vlgmr.msrb.gmra.mxu2 %vm1310_vm8, %v6123_v37  ;;  %v6092_v62 = vmul.f32 %v11684_v44, %v15773_v13  ;;  %v15906_v34 = vpop.eup %11685  ;;  %v18969_v37 = vld [vmem:[#allocation63_spill] sm:$0xff]  ;;  %v18996_v13 = vld [vmem:[#allocation17_spill] sm:$0xff] }
 0xa70   : > { %v6012_v0 = vsel %vm1310_vm8, %v15906_v34, 0.0 }
 0xa71   : > { %6016 = vadd.xlane.f32.xlu2 %v6015_v30  ;;  %v6124_v2 = vpack.c.bf16 %v6092_v62, %v6092_v62  ;;  %v5877_v62 = vsub.f32 %v15672_v38, %v15797_v50  ;;  %v5880_v38 = vsub.f32 %v15712_v57, %v15849_v54  ;;  %v5878_v57 = vsub.f32 %v15688_v9, %v15809_v52 }
 0xa7a   : > { %v6415_v10 = vpop.permute.xlu0 %6414  ;;  %v15908_v20 = vpop.xlane.xlu1 %5848 }
 0xa7b   : > { %v6420_v36 = vsel %vm2497_vm10, %v6415_v10, 0  ;;  %6603 = vrot.lane.b32.xlu1 %v18967_v17, %s11982_s8 }
 0xa7c   : > { %6429 = vmatpush.bf16.msra.mxu1 %v6420_v36 }
 0xa7f   : > { %10824 = vmatmul.msk.bf16.vlgmr.msra.gmra.mxu1 %vm1310_vm8, %v6122_v55  ;;  %v18972_v55 = vld [vmem:[#allocation58_spill] sm:$0xff] }
 0xa82   : > { %v6457_v53 = vpop.permute.xlu0 %6456  ;;  %v6002_v26 = vpop.xlane.xlu1 %6001 }
 0xa83   : > { %v6462_v47 = vsel %vm2497_vm10, %v6457_v53, 0  ;;  %11687 = vrcp.f32 %v6002_v26  ;;  %v18973_v26 = vld [vmem:[#allocation68_spill] sm:$0xff] }
 0xa84   : > { %6471 = vmatpush.bf16.msra.mxu3 %v6462_v47  ;;  %11689 = vpow2.f32 %v5937_v8 }
 0xa87   : > { %10826 = vmatmul.msk.bf16.vlgmr.msra.gmra.mxu3 %vm1310_vm8, %v6124_v2 }
 0xa88   : > { %6013 = vadd.xlane.f32.xlu0 %v6012_v0  ;;  %v15913_v33 = vpop.f32.mrf.mxu2  ;;  %v5933_v0 = vmul.f32 1.442695, %v5877_v62  ;;  %v5939_v62 = vmul.f32 1.442695, %v5880_v38 }
 0xa89   : > { %18968 = vst [vmem:[#allocation105_spill] sm:$0xff] %v15913_v33  ;;  %6582 = vrot.lane.b32.xlu2 %v18969_v37, %s11982_s8  ;;  %v11688_v44 = vpop.eup %11687 }
 0xa8a   : > { %v15919_v30 = vpop.f32.mrf.mxu0  ;;  %v6008_v36 = vpop.xlane.xlu1 %6007  ;;  %v6094_v14 = vmul.f32 %v11688_v44, %v15801_v45  ;;  %11691 = vpow2.f32 %v5933_v0 }
 0xa8b   : > { %18970 = vst [vmem:[#allocation111_spill] sm:$0xff] %v15919_v30  ;;  %v15930_v47 = vpop.eup %11689  ;;  %11693 = vpow2.f32 %v5939_v62 }
 0xa8c   : > { %v6126_v29 = vpack.c.bf16 %v6094_v14, %v6094_v14 }
 0xa90   : > { %v6202_v35 = vpop.f32.mrf.mxu2 }
 0xa92   : > { %v6328_v28 = vpop.f32.mrf.mxu0 }
 0xa93   : > { %v6027_v28 = vsel %vm1310_vm8, %v15930_v47, 0.0 }
 0xa98   : > { %v15922_v63 = vpop.f32.mrf.mxu2 }
 0xa99   : > { %18971 = vst [vmem:[#allocation99_spill] sm:$0xff] %v15922_v63 }
 0xa9c   : > { %6561 = vrot.lane.b32.xlu0 %v18972_v55, %s11982_s8 }
 0xaa0   : > { %v6286_v53 = vpop.f32.mrf.mxu2 }
 0xaa2   : > { %v6499_v2 = vpop.permute.xlu1 %6498 }
 0xaa3   : > { %v5999_v6 = vpop.xlane.xlu2 %5998  ;;  %v6504_v35 = vsel %vm2497_vm10, %v6499_v2, 0  ;;  %v15950_v2 = vpop.eup %11691 }
 0xaa4   : > { %6624 = vrot.lane.b32.xlu0 %v18973_v26, %s11982_s8  ;;  %6513 = vmatpush.bf16.msrb.mxu1 %v6504_v35  ;;  %v15958_v38 = vpop.eup %11693 }
 0xaa5   : > { %6028 = vadd.xlane.f32.xlu1 %v6027_v28  ;;  %v6021_v28 = vsel %vm1310_vm8, %v15950_v2, 0.0 }
 0xaa7   : > { %10828 = vmatmul.msk.bf16.vlgmr.msrb.gmra.mxu1 %vm1310_vm8, %v6126_v29 }
 0xaa8   : > { %v15940_v50 = vpop.f32.mrf.mxu2  ;;  %v15942_v45 = vpop.f32.mrf.mxu3 }
 0xaa9   : > { %18974 = vst [vmem:[#allocation108_spill] sm:$0xff] %v15940_v50 }
 0xaaa   : > { %18975 = vst [vmem:[#allocation96_spill] sm:$0xff] %v15942_v45 }
 0xaab   : > { %v6520_v44 = vpop.permute.xlu2 %6519 }
 0xaac   : > { %v6525_v53 = vsel %vm2497_vm10, %v6520_v44, 0 }
 0xaad   : > { %6534 = vmatpush.bf16.msra.mxu2 %v6525_v53  ;;  %v15948_v14 = vpop.xlane.xlu0 %5851  ;;  %v6030_v53 = vsel %vm1310_vm8, %v15958_v38, 0.0 }
 0xaae   : > { %v15952_v0 = vpop.f32.mrf.mxu1 }
 0xaaf   : > { %18976 = vst [vmem:[#allocation109_spill] sm:$0xff] %v15952_v0 }
 0xab0   : > { %v6370_v54 = vpop.f32.mrf.mxu2  ;;  %v6391_v35 = vpop.f32.mrf.mxu3 }
 0xab1   : > { %v18977_v35 = vld [vmem:[#allocation75_spill] sm:$0xff] }
 0xab2   : > { %6022 = vadd.xlane.f32.xlu2 %v6021_v28  ;;  %v5935_v28 = vmul.f32 1.442695, %v5878_v57 }
 0xab5   : > { %v6005_v29 = vpop.xlane.xlu0 %6004 }
 0xab6   : > { %11695 = vrcp.f32 %v6005_v29  ;;  %v6349_v44 = vpop.f32.mrf.mxu1 }
 0xab7   : > { %11697 = vrcp.f32 %v5999_v6 }
 0xab8   : > { %11699 = vpow2.f32 %v5935_v28 }
 0xab9   : > { %11701 = vrcp.f32 %v6008_v36 }
 0xaba   : > { %6031 = vadd.xlane.f32.xlu2 %v6030_v53 }
 0xabc   : > { %v11696_v8 = vpop.eup %11695 }
 0xabd   : > { %v6095_v62 = vmul.f32 %v11696_v8, %v15847_v39  ;;  %v11698_v29 = vpop.eup %11697 }
 0xabe   : > { %6666 = vrot.lane.b32.xlu1 %v18977_v35, %s11982_s8  ;;  %v6093_v44 = vmul.f32 %v11698_v29, %v15830_v19  ;;  %v15970_v15 = vpop.eup %11699  ;;  %v18978_v19 = vld [vmem:[#allocation10_spill] sm:$0xff] }
 0xabf   : > { %v6127_v54 = vpack.c.bf16 %v6095_v62, %v6095_v62  ;;  %v11702_v52 = vpop.eup %11701  ;;  %v6024_v39 = vsel %vm1310_vm8, %v15970_v15, 0.0 }
 0xac0   : > { %v6125_v9 = vpack.c.bf16 %v6093_v44, %v6093_v44  ;;  %v6096_v6 = vmul.f32 %v11702_v52, %v15811_v31  ;;  %v18980_v31 = vld [vmem:[#allocation77_spill] sm:$0xff] }
 0xac1   : > { %10829 = vmatmul.msk.bf16.vlgmr.msra.gmra.mxu2 %vm1310_vm8, %v6127_v54 }
 0xac2   : > { %v6128_v57 = vpack.c.bf16 %v6096_v6, %v6096_v6 }
 0xac8   : > { %v6478_v53 = vpop.permute.xlu0 %6477 }
 0xac9   : > { %v6483_v10 = vsel %vm2497_vm10, %v6478_v53, 0 }
 0xaca   : > { %6492 = vmatpush.bf16.msra.mxu0 %v6483_v10  ;;  %v5883_v10 = vsub.f32 %v15784_v23, %v15908_v20  ;;  %v5882_v23 = vsub.f32 %v15765_v21, %v15884_v58  ;;  %v18981_v20 = vld [vmem:[#allocation5_spill] sm:$0xff]  ;;  %v5884_v21 = vsub.f32 %v15843_v7, %v15948_v14 }
 0xacc   : > { %v5945_v62 = vmul.f32 1.442695, %v5883_v10 }
 0xacd   : > { %10827 = vmatmul.msk.bf16.vlgmr.msra.gmra.mxu0 %vm1310_vm8, %v6125_v9  ;;  %v6011_v28 = vpop.xlane.xlu1 %6010 }
 0xace   : > { %6025 = vadd.xlane.f32.xlu0 %v6024_v39  ;;  %11703 = vpow2.f32 %v5945_v62 }
 0xad0   : > { %v6541_v8 = vpop.permute.xlu0 %6540 }
 0xad1   : > { %v6546_v36 = vsel %vm2497_vm10, %v6541_v8, 0  ;;  %v5943_v8 = vmul.f32 1.442695, %v5882_v23 }
 0xad2   : > { %6687 = vrot.lane.b32.xlu2 %v18978_v19, %s11982_s8  ;;  %6555 = vmatpush.bf16.msrb.mxu3 %v6546_v36 }
 0xad4   : > { %v15986_v53 = vpop.eup %11703 }
 0xad5   : > { %10830 = vmatmul.msk.bf16.vlgmr.msrb.gmra.mxu3 %vm1310_vm8, %v6128_v57  ;;  %v6020_v9 = vpop.xlane.xlu1 %6019  ;;  %v6039_v52 = vsel %vm1310_vm8, %v15986_v53, 0.0 }
 0xadb   : > { %v15982_v54 = vpop.f32.mrf.mxu0 }
 0xadc   : > { %18979 = vst [vmem:[#allocation97_spill] sm:$0xff] %v15982_v54 }
 0xae2   : > { %6645 = vrot.lane.b32.xlu0 %v18980_v31, %s11982_s8 }
 0xae3   : > { %v6412_v29 = vpop.f32.mrf.mxu0 }
 0xae4   : > { %v6017_v44 = vpop.xlane.xlu2 %6016 }
 0xae5   : > { %11705 = vrcp.f32 %v6017_v44  ;;  %v5947_v44 = vmul.f32 1.442695, %v5884_v21 }
 0xae6   : > { %11707 = vpow2.f32 %v5943_v8 }
 0xae7   : > { %11709 = vpow2.f32 %v5947_v44 }
 0xae8   : > { %6040 = vadd.xlane.f32.xlu1 %v6039_v52 }
 0xaea   : > { %6708 = vrot.lane.b32.xlu0 %v18981_v20, %s11982_s8 }
 0xaeb   : > { %v11706_v39 = vpop.eup %11705 }
 0xaec   : > { %v6583_v6 = vpop.permute.xlu2 %6582  ;;  %v6099_v36 = vmul.f32 %v11706_v39, %v15892_v61  ;;  %v16002_v52 = vpop.eup %11707 }
 0xaed   : > { %v6588_v57 = vsel %vm2497_vm10, %v6583_v6, 0  ;;  %v6604_v10 = vpop.permute.xlu1 %6603  ;;  %v6036_v23 = vsel %vm1310_vm8, %v16002_v52, 0.0  ;;  %v16010_v14 = vpop.eup %11709 }
 0xaee   : > { %6597 = vmatpush.bf16.msra.mxu1 %v6588_v57  ;;  %v6609_v62 = vsel %vm2497_vm10, %v6604_v10, 0  ;;  %v6131_v58 = vpack.c.bf16 %v6099_v36, %v6099_v36  ;;  %v5881_v36 = vsub.f32 %v15756_v32, %v15873_v49  ;;  %v18984_v57 = vld [vmem:[#allocation7_spill] sm:$0xff]  ;;  %v6042_v10 = vsel %vm1310_vm8, %v16010_v14, 0.0  ;;  %v18985_v32 = vld [vmem:[#allocation12_spill] sm:$0xff] }
 0xaef   : > { %6618 = vmatpush.bf16.msrb.mxu2 %v6609_v62 }
 0xaf0   : > { %v5941_v44 = vmul.f32 1.442695, %v5881_v36 }
 0xaf2   : > { %v15999_v29 = vpop.f32.mrf.mxu2  ;;  %10833 = vmatmul.msk.bf16.vlgmr.msrb.gmra.mxu2 %vm1310_vm8, %v6131_v58 }
 0xaf3   : > { %18982 = vst [vmem:[#allocation48_spill] sm:$0xff] %v15999_v29 }
 0xafa   : > { %v6454_v61 = vpop.f32.mrf.mxu2 }
 0xafb   : > { %6037 = vadd.xlane.f32.xlu2 %v6036_v23  ;;  %v6014_v39 = vpop.xlane.xlu0 %6013 }
 0xafc   : > { %11711 = vrcp.f32 %v6014_v39  ;;  %v16006_v6 = vpop.f32.mrf.mxu1 }
 0xafd   : > { %18983 = vst [vmem:[#allocation83_spill] sm:$0xff] %v16006_v6  ;;  %11713 = vrcp.f32 %v6011_v28 }
 0xafe   : > { %11715 = vpow2.f32 %v5941_v44 }
 0xaff   : > { %11717 = vrcp.f32 %v6020_v9 }
 0xb01   : > { %6750 = vrot.lane.b32.xlu1 %v18984_v57, %s11982_s8 }
 0xb02   : > { %v11712_v8 = vpop.eup %11711 }
 0xb03   : > { %v6098_v62 = vmul.f32 %v11712_v8, %v15906_v34  ;;  %6043 = vadd.xlane.f32.xlu2 %v6042_v10  ;;  %v11714_v61 = vpop.eup %11713 }
 0xb04   : > { %v6433_v21 = vpop.f32.mrf.mxu1  ;;  %v6097_v34 = vmul.f32 %v11714_v61, %v15868_v12  ;;  %v16028_v8 = vpop.eup %11715 }
 0xb05   : > { %v6130_v58 = vpack.c.bf16 %v6098_v62, %v6098_v62  ;;  %v11718_v10 = vpop.eup %11717  ;;  %v18987_v62 = vld [vmem:[#allocation11_spill] sm:$0xff] }
 0xb06   : > { %v6129_v36 = vpack.c.bf16 %v6097_v34, %v6097_v34  ;;  %v6100_v12 = vmul.f32 %v11718_v10, %v15880_v4  ;;  %v18988_v34 = vld [vmem:[#allocation3_spill] sm:$0xff] }
 0xb07   : > { %10832 = vmatmul.msk.bf16.vlgmr.msra.gmra.mxu1 %vm1310_vm8, %v6130_v58  ;;  %v6033_v58 = vsel %vm1310_vm8, %v16028_v8, 0.0 }
 0xb08   : > { %v6132_v61 = vpack.c.bf16 %v6100_v12, %v6100_v12  ;;  %v18994_v12 = vld [vmem:[#allocation4_spill] sm:$0xff] }
 0xb09   : > { %6815 = vrot.lane.b32.xlu1 %v18985_v32, %s11983_s9 }
 0xb0a   : > { %v16022_v49 = vpop.f32.mrf.mxu3 }
 0xb0b   : > { %18986 = vst [vmem:[#allocation31_spill] sm:$0xff] %v16022_v49 }
 0xb0e   : > { %v6562_v28 = vpop.permute.xlu0 %6561 }
 0xb0f   : > { %v6567_v39 = vsel %vm2497_vm10, %v6562_v28, 0  ;;  %v18989_v28 = vld [vmem:[#allocation19_spill] sm:$0xff] }
 0xb10   : > { %6576 = vmatpush.bf16.msrb.mxu0 %v6567_v39  ;;  %v18990_v39 = vld [vmem:[#allocation8_spill] sm:$0xff] }
 0xb11   : > { %6884 = vrot.lane.b32.xlu1 %v18987_v62, %s11983_s9 }
 0xb12   : > { %v6475_v21 = vpop.f32.mrf.mxu3 }
 0xb13   : > { %10831 = vmatmul.msk.bf16.vlgmr.msrb.gmra.mxu0 %vm1310_vm8, %v6129_v36  ;;  %v18992_v21 = vld [vmem:[#allocation6_spill] sm:$0xff] }
 0xb14   : > { %6034 = vadd.xlane.f32.xlu0 %v6033_v58  ;;  %v18993_v58 = vld [vmem:[#allocation9_spill] sm:$0xff] }
 0xb16   : > { %v6625_v9 = vpop.permute.xlu0 %6624 }
 0xb17   : > { %v6630_v44 = vsel %vm2497_vm10, %v6625_v9, 0 }
 0xb18   : > { %6639 = vmatpush.bf16.msra.mxu3 %v6630_v44  ;;  %v6029_v10 = vpop.xlane.xlu1 %6028 }
 0xb19   : > { %6859 = vrot.lane.b32.xlu1 %v18988_v34, %s11984_s10  ;;  %11719 = vrcp.f32 %v6029_v10 }
 0xb1b   : > { %6771 = vrot.lane.b32.xlu2 %v18989_v28, %s11982_s8  ;;  %10834 = vmatmul.msk.bf16.vlgmr.msra.gmra.mxu3 %vm1310_vm8, %v6132_v61  ;;  %v18995_v61 = vld [vmem:[#allocation22_spill] sm:$0xff] }
 0xb1f   : > { %v11720_v23 = vpop.eup %11719 }
 0xb20   : > { %v6103_v10 = vmul.f32 %v11720_v23, %v15930_v47  ;;  %v18997_v47 = vld [vmem:[#allocation26_spill] sm:$0xff] }
 0xb21   : > { %6930 = vrot.lane.b32.xlu1 %v18990_v39, %s11983_s9 }
 0xb23   : > { %6861 = vrot.lane.b32.xlu2 %v18988_v34, %s11983_s9 }
 0xb24   : > { %v16046_v36 = vpop.f32.mrf.mxu1 }
 0xb25   : > { %v6023_v4 = vpop.xlane.xlu2 %6022  ;;  %18991 = vst [vmem:[#allocation34_spill] sm:$0xff] %v16046_v36 }
 0xb28   : > { %6729 = vrot.lane.b32.xlu0 %v18992_v21, %s11982_s8 }
 0xb29   : > { %6905 = vrot.lane.b32.xlu1 %v18993_v58, %s11984_s10 }
 0xb2b   : > { %6836 = vrot.lane.b32.xlu2 %v18994_v12, %s11984_s10 }
 0xb2c   : > { %v6517_v44 = vpop.f32.mrf.mxu1 }
 0xb2d   : > { %v6032_v9 = vpop.xlane.xlu2 %6031  ;;  %v6135_v44 = vpack.c.bf16 %v6103_v10, %v6103_v10 }
 0xb30   : > { %6792 = vrot.lane.b32.xlu0 %v18995_v61, %s11982_s8  ;;  %v6667_v7 = vpop.permute.xlu1 %6666 }
 0xb31   : > { %v6672_v40 = vsel %vm2497_vm10, %v6667_v7, 0  ;;  %6974 = vrot.lane.b32.xlu1 %v18996_v13, %s11984_s10 }
 0xb32   : > { %6681 = vmatpush.bf16.msrb.mxu1 %v6672_v40 }
 0xb33   : > { %6907 = vrot.lane.b32.xlu2 %v18993_v58, %s11983_s9 }
 0xb35   : > { %v6688_v29 = vpop.permute.xlu2 %6687 }
 0xb36   : > { %v6693_v49 = vsel %vm2497_vm10, %v6688_v29, 0 }
 0xb37   : > { %6702 = vmatpush.bf16.msra.mxu2 %v6693_v49 }
 0xb38   : > { %6838 = vrot.lane.b32.xlu0 %v18994_v12, %s11983_s9 }
 0xb39   : > { %7045 = vrot.lane.b32.xlu1 %v18907_v51, %s11983_s9 }
 0xb3a   : > { %10837 = vmatmul.msk.bf16.vlgmr.msra.gmra.mxu2 %vm1310_vm8, %v6135_v44 }
 0xb3b   : > { %6976 = vrot.lane.b32.xlu2 %v18996_v13, %s11983_s9 }
 0xb40   : > { %6813 = vrot.lane.b32.xlu0 %v18985_v32, %s11984_s10 }
 0xb41   : > { %v6026_v40 = vpop.xlane.xlu0 %6025  ;;  %7020 = vrot.lane.b32.xlu1 %v18909_v24, %s11984_s10 }
 0xb42   : > { %11721 = vrcp.f32 %v6026_v40 }
 0xb43   : > { %6951 = vrot.lane.b32.xlu2 %v18997_v47, %s11984_s10  ;;  %11723 = vrcp.f32 %v6023_v4 }
 0xb44   : > { %v16076_v29 = vpop.f32.mrf.mxu2  ;;  %11725 = vrcp.f32 %v6032_v9 }
 0xb45   : > { %18998 = vst [vmem:[#allocation28_spill] sm:$0xff] %v16076_v29 }
 0xb48   : > { %v11722_v7 = vpop.eup %11721  ;;  %6882 = vrot.lane.b32.xlu0 %v18987_v62, %s11984_s10 }
 0xb49   : > { %v6102_v49 = vmul.f32 %v11722_v7, %v15970_v15  ;;  %7091 = vrot.lane.b32.xlu1 %v18915_v16, %s11983_s9  ;;  %v11724_v54 = vpop.eup %11723 }
 0xb4a   : > { %v16083_v23 = vpop.f32.mrf.mxu0  ;;  %v6101_v4 = vmul.f32 %v11724_v54, %v15950_v2 }
 0xb4b   : > { %18999 = vst [vmem:[#allocation23_spill] sm:$0xff] %v16083_v23  ;;  %v6134_v10 = vpack.c.bf16 %v6102_v49, %v6102_v49  ;;  %7022 = vrot.lane.b32.xlu2 %v18909_v24, %s11983_s9 }
 0xb4c   : > { %v6538_v40 = vpop.f32.mrf.mxu2 }
 0xb4d   : > { %10836 = vmatmul.msk.bf16.vlgmr.msrb.gmra.mxu1 %vm1310_vm8, %v6134_v10  ;;  %v6133_v40 = vpack.c.bf16 %v6101_v4, %v6101_v4  ;;  %v11726_v10 = vpop.eup %11725 }
 0xb4e   : > { %v6104_v2 = vmul.f32 %v11726_v10, %v15958_v38 }
 0xb50   : > { %6953 = vrot.lane.b32.xlu0 %v18997_v47, %s11983_s9  ;;  %v6136_v4 = vpack.c.bf16 %v6104_v2, %v6104_v2 }
 0xb51   : > { %7137 = vrot.lane.b32.xlu1 %v18914_v1, %s11983_s9 }
 0xb52   : > { %v6496_v15 = vpop.f32.mrf.mxu0 }
 0xb53   : > { %6997 = vrot.lane.b32.xlu2 %v18912_v56, %s11984_s10 }
 0xb54   : > { %v6646_v7 = vpop.permute.xlu0 %6645 }
 0xb55   : > { %v6651_v49 = vsel %vm2497_vm10, %v6646_v7, 0 }
 0xb56   : > { %6660 = vmatpush.bf16.msra.mxu0 %v6651_v49 }
 0xb58   : > { %6928 = vrot.lane.b32.xlu0 %v18990_v39, %s11984_s10  ;;  %v16100_v44 = vpop.f32.mrf.mxu3 }
 0xb59   : > { %19000 = vst [vmem:[#allocation43_spill] sm:$0xff] %v16100_v44  ;;  %10835 = vmatmul.msk.bf16.vlgmr.msra.gmra.mxu0 %vm1310_vm8, %v6133_v40  ;;  %7183 = vrot.lane.b32.xlu1 %v18923_v42, %s11983_s9 }
 0xb5b   : > { %7066 = vrot.lane.b32.xlu2 %v18908_v60, %s11984_s10  ;;  %v6041_v38 = vpop.xlane.xlu1 %6040 }
 0xb5c   : > { %v6709_v54 = vpop.permute.xlu0 %6708 }
 0xb5d   : > { %v6714_v15 = vsel %vm2497_vm10, %v6709_v54, 0 }
 0xb5e   : > { %6723 = vmatpush.bf16.msrb.mxu3 %v6714_v15 }
 0xb60   : > { %6999 = vrot.lane.b32.xlu0 %v18912_v56, %s11983_s9  ;;  %v6559_v7 = vpop.f32.mrf.mxu3 }
 0xb61   : > { %10838 = vmatmul.msk.bf16.vlgmr.msrb.gmra.mxu3 %vm1310_vm8, %v6136_v4  ;;  %7181 = vrot.lane.b32.xlu1 %v18923_v42, %s11984_s10 }
 0xb63   : > { %7114 = vrot.lane.b32.xlu2 %v18919_v25, %s11983_s9 }
 0xb68   : > { %7068 = vrot.lane.b32.xlu0 %v18908_v60, %s11983_s9 }
 0xb69   : > { %7273 = vrot.lane.b32.xlu1 %v18972_v55, %s11984_s10 }
 0xb6b   : > { %7112 = vrot.lane.b32.xlu2 %v18919_v25, %s11984_s10 }
 0xb6e   : > { %v6038_v49 = vpop.xlane.xlu2 %6037 }
 0xb6f   : > { %11727 = vrcp.f32 %v6038_v49 }
 0xb70   : > { %7043 = vrot.lane.b32.xlu0 %v18907_v51, %s11984_s10  ;;  %11729 = vrcp.f32 %v6041_v38 }
 0xb71   : > { %7204 = vrot.lane.b32.xlu1 %v18927_v11, %s11984_s10 }
 0xb73   : > { %7158 = vrot.lane.b32.xlu2 %v18913_v48, %s11984_s10  ;;  %v6751_v40 = vpop.permute.xlu1 %6750 }
 0xb74   : > { %v6756_v2 = vsel %vm2497_vm10, %v6751_v40, 0 }
 0xb75   : > { %v11728_v10 = vpop.eup %11727  ;;  %v16132_v4 = vpop.f32.mrf.mxu2  ;;  %6765 = vmatpush.bf16.msra.mxu1 %v6756_v2 }
 0xb76   : > { %v6106_v54 = vmul.f32 %v11728_v10, %v16002_v52  ;;  %v6044_v15 = vpop.xlane.xlu2 %6043  ;;  %19001 = vst [vmem:[#allocation39_spill] sm:$0xff] %v16132_v4  ;;  %v11730_v49 = vpop.eup %11729 }
 0xb77   : > { %v6107_v52 = vmul.f32 %v11730_v49, %v15986_v53 }
 0xb78   : > { %v6138_v7 = vpack.c.bf16 %v6106_v54, %v6106_v54  ;;  %7089 = vrot.lane.b32.xlu0 %v18915_v16, %s11984_s10 }
 0xb79   : > { %7250 = vrot.lane.b32.xlu1 %v18925_v3, %s11984_s10  ;;  %v6139_v54 = vpack.c.bf16 %v6107_v52, %v6107_v52 }
 0xb7a   : > { %10840 = vmatmul.msk.bf16.vlgmr.msra.gmra.mxu1 %vm1310_vm8, %v6138_v7 }
 0xb7b   : > { %7206 = vrot.lane.b32.xlu2 %v18927_v11, %s11983_s9  ;;  %v6816_v38 = vpop.permute.xlu1 %6815 }
 0xb7d   : > { %v6622_v10 = vpop.f32.mrf.mxu2 }
 0xb7e   : > { %v6772_v40 = vpop.permute.xlu2 %6771 }
 0xb7f   : > { %v6777_v2 = vsel %vm2497_vm10, %v6772_v40, 0 }
 0xb80   : > { %7160 = vrot.lane.b32.xlu0 %v18913_v48, %s11983_s9  ;;  %6786 = vmatpush.bf16.msrb.mxu2 %v6777_v2 }
 0xb81   : > { %7298 = vrot.lane.b32.xlu1 %v18969_v37, %s11983_s9 }
 0xb83   : > { %7252 = vrot.lane.b32.xlu2 %v18925_v3, %s11983_s9  ;;  %10841 = vmatmul.msk.bf16.vlgmr.msrb.gmra.mxu2 %vm1310_vm8, %v6139_v54  ;;  %v6885_v7 = vpop.permute.xlu1 %6884 }
 0xb84   : > { %v16150_v9 = vpop.f32.mrf.mxu1 }
 0xb85   : > { %19002 = vst [vmem:[#allocation41_spill] sm:$0xff] %v16150_v9 }
 0xb86   : > { %v6862_v53 = vpop.permute.xlu2 %6861 }
 0xb87   : > { %v6867_v49 = vsel %vm1310_vm8, %v6862_v53, 0  ;;  %v6035_v10 = vpop.xlane.xlu0 %6034 }
 0xb88   : > { %7135 = vrot.lane.b32.xlu0 %v18914_v1, %s11984_s10  ;;  %6876 = vmatpush.bf16.xpose.msra.mxu2 %v6867_v49  ;;  %11731 = vrcp.f32 %v6035_v10 }
 0xb89   : > { %7344 = vrot.lane.b32.xlu1 %v18973_v26, %s11983_s9  ;;  %11733 = vrcp.f32 %v6044_v15 }
 0xb8b   : > { %7227 = vrot.lane.b32.xlu2 %v18921_v43, %s11984_s10  ;;  %v6860_v52 = vpop.permute.xlu1 %6859 }
 0xb8c   : > { %v6601_v40 = vpop.f32.mrf.mxu1 }
 0xb8e   : > { %v6837_v2 = vpop.permute.xlu2 %6836  ;;  %v11732_v40 = vpop.eup %11731 }
 0xb8f   : > { %v6105_v44 = vmul.f32 %v11732_v40, %v16028_v8  ;;  %v11734_v36 = vpop.eup %11733 }
 0xb90   : > { %7275 = vrot.lane.b32.xlu0 %v18972_v55, %s11983_s9  ;;  %v16161_v54 = vpop.f32.mrf.mxu0 }
 0xb91   : > { %19003 = vst [vmem:[#allocation37_spill] sm:$0xff] %v16161_v54  ;;  %7342 = vrot.lane.b32.xlu1 %v18973_v26, %s11984_s10  ;;  %v6821_v54 = vsel %vm1310_vm8, %v6816_v38, 0 }
 0xb93   : > { %7459 = vrot.lane.b32.xlu2 %v18992_v21, %s11983_s9  ;;  %10845 = vmatmul.msk.bf16.vlgmr.msra.gmra.mxu2 %vm1310_vm8, %v6860_v52  ;;  %v6931_v49 = vpop.permute.xlu1 %6930  ;;  %v6137_v52 = vpack.c.bf16 %v6105_v44, %v6105_v44 }
 0xb96   : > { %v6908_v29 = vpop.permute.xlu2 %6907 }
 0xb98   : > { %7229 = vrot.lane.b32.xlu0 %v18921_v43, %s11983_s9  ;;  %v6580_v10 = vpop.f32.mrf.mxu0 }
 0xb99   : > { %v6913_v10 = vsel %vm1310_vm8, %v6908_v29, 0 }
 0xb9a   : > { %v6730_v23 = vpop.permute.xlu0 %6729 }
 0xb9b   : > { %v6735_v53 = vsel %vm2497_vm10, %v6730_v23, 0  ;;  %7321 = vrot.lane.b32.xlu2 %v18967_v17, %s11983_s9  ;;  %v6906_v9 = vpop.permute.xlu1 %6905  ;;  %v6108_v23 = vmul.f32 %v11734_v36, %v16010_v14 }
 0xb9c   : > { %6744 = vmatpush.bf16.msrb.mxu0 %v6735_v53 }
 0xb9d   : > { %v6140_v53 = vpack.c.bf16 %v6108_v23, %v6108_v23 }
 0xb9e   : > { %v6977_v15 = vpop.permute.xlu2 %6976  ;;  %v16177_v6 = vpop.f32.mrf.mxu3 }
 0xb9f   : > { %19004 = vst [vmem:[#allocation51_spill] sm:$0xff] %v16177_v6  ;;  %10839 = vmatmul.msk.bf16.vlgmr.msrb.gmra.mxu0 %vm1310_vm8, %v6137_v52  ;;  %v6982_v8 = vsel %vm1310_vm8, %v6977_v15, 0 }
 0xba0   : > { %6830 = vmatpush.bf16.xpose.msra.mxu0 %v6821_v54  ;;  %7367 = vrot.lane.b32.xlu0 %v18980_v31, %s11983_s9  ;;  %v6890_v54 = vsel %vm1310_vm8, %v6885_v7, 0 }
 0xba2   : > { %v6793_v38 = vpop.permute.xlu0 %6792 }
 0xba3   : > { %v6798_v44 = vsel %vm2497_vm10, %v6793_v38, 0  ;;  %7319 = vrot.lane.b32.xlu2 %v18967_v17, %s11984_s10  ;;  %v6975_v29 = vpop.permute.xlu1 %6974 }
 0xba4   : > { %6807 = vmatpush.bf16.msra.mxu3 %v6798_v44 }
 0xba6   : > { %v6952_v40 = vpop.permute.xlu2 %6951  ;;  %v6643_v52 = vpop.f32.mrf.mxu3 }
 0xba7   : > { %10842 = vmatmul.msk.bf16.vlgmr.msra.gmra.mxu3 %vm1310_vm8, %v6140_v53 }
 0xba8   : > { %6922 = vmatpush.bf16.xpose.msrb.mxu0 %v6913_v10  ;;  %6899 = vmatpush.bf16.xpose.msrb.mxu3 %v6890_v54  ;;  %v6936_v10 = vsel %vm1310_vm8, %v6931_v49, 0 }
 0xba9   : > { %7365 = vrot.lane.b32.xlu0 %v18980_v31, %s11984_s10 }
 0xbaa   : > { %v6839_v14 = vpop.permute.xlu0 %6838 }
 0xbab   : > { %v6844_v36 = vsel %vm1310_vm8, %v6839_v14, 0  ;;  %v7046_v7 = vpop.permute.xlu1 %7045 }
 0xbac   : > { %6853 = vmatpush.bf16.xpose.msrb.mxu1 %v6844_v36 }
 0xbae   : > { %v7023_v23 = vpop.permute.xlu2 %7022 }
 0xbaf   : > { %v7028_v15 = vsel %vm1310_vm8, %v7023_v23, 0 }
 0xbb0   : > { %6991 = vmatpush.bf16.xpose.msra.mxu3 %v6982_v8 }
 0xbb1   : > { %7457 = vrot.lane.b32.xlu0 %v18992_v21, %s11984_s10 }
 0xbb2   : > { %v6814_v38 = vpop.permute.xlu0 %6813 }
 0xbb3   : > { %10843 = vmatmul.msk.bf16.vlgmr.msra.gmra.mxu0 %vm1310_vm8, %v6814_v38  ;;  %10844 = vmatmul.msk.bf16.vlgmr.msrb.gmra.mxu1 %vm1310_vm8, %v6837_v2  ;;  %v7021_v8 = vpop.permute.xlu1 %7020  ;;  %v7051_v2 = vsel %vm1310_vm8, %v7046_v7, 0 }
 0xbb4   : > { %6945 = vmatpush.bf16.xpose.msra.mxu1 %v6936_v10 }
 0xbb6   : > { %v6998_v44 = vpop.permute.xlu2 %6997 }
 0xbb9   : > { %7296 = vrot.lane.b32.xlu0 %v18969_v37, %s11984_s10 }
 0xbba   : > { %v6883_v49 = vpop.permute.xlu0 %6882 }
 0xbbb   : > { %10846 = vmatmul.msk.bf16.vlgmr.msrb.gmra.mxu3 %vm1310_vm8, %v6883_v49  ;;  %v7092_v54 = vpop.permute.xlu1 %7091 }
 0xbbc   : > { %7037 = vmatpush.bf16.xpose.msrb.mxu1 %v7028_v15  ;;  %v7097_v6 = vsel %vm1310_vm8, %v7092_v54, 0 }
 0xbbd   : > { %v16204_v53 = vpop.f32.mrf.mxu2 }
 0xbbe   : > { %19005 = vst [vmem:[#allocation46_spill] sm:$0xff] %v16204_v53  ;;  %v7067_v52 = vpop.permute.xlu2 %7066 }
 0xbc2   : > { %v6954_v14 = vpop.permute.xlu0 %6953 }
 0xbc3   : > { %v6959_v36 = vsel %vm1310_vm8, %v6954_v14, 0  ;;  %10847 = vmatmul.msk.bf16.vlgmr.msrb.gmra.mxu0 %vm1310_vm8, %v6906_v9  ;;  %v7138_v10 = vpop.permute.xlu1 %7137 }
 0xbc4   : > { %6968 = vmatpush.bf16.xpose.msrb.mxu2 %v6959_v36  ;;  %v7143_v14 = vsel %vm1310_vm8, %v7138_v10, 0 }
 0xbc5   : > { %v6706_v23 = vpop.f32.mrf.mxu2 }
 0xbc6   : > { %v7115_v38 = vpop.permute.xlu2 %7114 }
 0xbc7   : > { %v7120_v49 = vsel %vm1310_vm8, %v7115_v38, 0 }
 0xbca   : > { %v16209_v15 = vpop.f32.mrf.mxu1  ;;  %v6929_v4 = vpop.permute.xlu0 %6928 }
 0xbcb   : > { %19006 = vst [vmem:[#allocation55_spill] sm:$0xff] %v16209_v15  ;;  %10848 = vmatmul.msk.bf16.vlgmr.msra.gmra.mxu1 %vm1310_vm8, %v6929_v4  ;;  %10849 = vmatmul.msk.bf16.vlgmr.msrb.gmra.mxu2 %vm1310_vm8, %v6952_v40  ;;  %v7184_v9 = vpop.permute.xlu1 %7183 }
 0xbcc   : > { %7060 = vmatpush.bf16.xpose.msra.mxu2 %v7051_v2  ;;  %10850 = vmatmul.msk.bf16.vlgmr.msra.gmra.mxu3 %vm1310_vm8, %v6975_v29  ;;  %v7189_v10 = vsel %vm1310_vm8, %v7184_v9, 0 }
 0xbcd   : > { %7129 = vmatpush.bf16.xpose.msra.mxu1 %v7120_v49 }
 0xbce   : > { %v7113_v7 = vpop.permute.xlu2 %7112 }
 0xbd2   : > { %v6685_v36 = vpop.f32.mrf.mxu1  ;;  %v7000_v2 = vpop.permute.xlu0 %6999 }
 0xbd3   : > { %v7005_v23 = vsel %vm1310_vm8, %v7000_v2, 0  ;;  %v7182_v50 = vpop.permute.xlu1 %7181 }
 0xbd4   : > { %7152 = vmatpush.bf16.xpose.msrb.mxu2 %v7143_v14  ;;  %7014 = vmatpush.bf16.xpose.msra.mxu0 %v7005_v23 }
 0xbd6   : > { %v7159_v4 = vpop.permute.xlu2 %7158  ;;  %v16218_v38 = vpop.f32.mrf.mxu0 }
 0xbd7   : > { %19007 = vst [vmem:[#allocation49_spill] sm:$0xff] %v16218_v38 }
 0xbda   : > { %v7069_v29 = vpop.permute.xlu0 %7068 }
 0xbdb   : > { %v7074_v49 = vsel %vm1310_vm8, %v7069_v29, 0  ;;  %10851 = vmatmul.msk.bf16.vlgmr.msra.gmra.mxu0 %vm1310_vm8, %v6998_v44  ;;  %10852 = vmatmul.msk.bf16.vlgmr.msrb.gmra.mxu1 %vm1310_vm8, %v7021_v8  ;;  %v7274_v14 = vpop.permute.xlu1 %7273 }
 0xbdc   : > { %7106 = vmatpush.bf16.xpose.msrb.mxu0 %v7097_v6  ;;  %7083 = vmatpush.bf16.xpose.msrb.mxu3 %v7074_v49 }
 0xbde   : > { %v7207_v54 = vpop.permute.xlu2 %7206  ;;  %v6664_v6 = vpop.f32.mrf.mxu0 }
 0xbdf   : > { %v7212_v36 = vsel %vm1310_vm8, %v7207_v54, 0 }
 0xbe0   : > { %7221 = vmatpush.bf16.xpose.msrb.mxu1 %v7212_v36 }
 0xbe2   : > { %v7044_v2 = vpop.permute.xlu0 %7043 }
 0xbe3   : > { %10853 = vmatmul.msk.bf16.vlgmr.msra.gmra.mxu2 %vm1310_vm8, %v7044_v2  ;;  %10854 = vmatmul.msk.bf16.vlgmr.msrb.gmra.mxu3 %vm1310_vm8, %v7067_v52  ;;  %v7205_v9 = vpop.permute.xlu1 %7204 }
 0xbe4   : > { %7198 = vmatpush.bf16.xpose.msra.mxu0 %v7189_v10  ;;  %v16229_v23 = vpop.f32.mrf.mxu3 }
 0xbe5   : > { %19008 = vst [vmem:[#allocation85_spill] sm:$0xff] %v16229_v23 }
 0xbe6   : > { %v7253_v29 = vpop.permute.xlu2 %7252 }
 0xbe7   : > { %v7258_v36 = vsel %vm1310_vm8, %v7253_v29, 0 }
 0xbea   : > { %v7090_v8 = vpop.permute.xlu0 %7089 }
 0xbeb   : > { %10855 = vmatmul.msk.bf16.vlgmr.msrb.gmra.mxu0 %vm1310_vm8, %v7090_v8  ;;  %10856 = vmatmul.msk.bf16.vlgmr.msra.gmra.mxu1 %vm1310_vm8, %v7113_v7  ;;  %v7251_v10 = vpop.permute.xlu1 %7250 }
 0xbec   : > { %v6727_v49 = vpop.f32.mrf.mxu3 }
 0xbee   : > { %v7228_v2 = vpop.permute.xlu2 %7227 }
 0xbf2   : > { %v7161_v54 = vpop.permute.xlu0 %7160 }
 0xbf3   : > { %v7166_v6 = vsel %vm1310_vm8, %v7161_v54, 0  ;;  %v7299_v52 = vpop.permute.xlu1 %7298 }
 0xbf4   : > { %7175 = vmatpush.bf16.xpose.msra.mxu3 %v7166_v6  ;;  %v7304_v40 = vsel %vm1310_vm8, %v7299_v52, 0 }
 0xbf5   : > { %7313 = vmatpush.bf16.xpose.msra.mxu1 %v7304_v40 }
 0xbf6   : > { %v7460_v29 = vpop.permute.xlu2 %7459 }
 0xbf7   : > { %v16238_v44 = vpop.f32.mrf.mxu1 }
 0xbf8   : > { %19009 = vst [vmem:[#allocation107_spill] sm:$0xff] %v16238_v44 }
 0xbfa   : > { %v7136_v53 = vpop.permute.xlu0 %7135 }
 0xbfb   : > { %10857 = vmatmul.msk.bf16.vlgmr.msrb.gmra.mxu2 %vm1310_vm8, %v7136_v53  ;;  %10858 = vmatmul.msk.bf16.vlgmr.msra.gmra.mxu3 %vm1310_vm8, %v7159_v4  ;;  %v7345_v7 = vpop.permute.xlu1 %7344 }
 0xbfc   : > { %7267 = vmatpush.bf16.xpose.msrb.mxu3 %v7258_v36  ;;  %10859 = vmatmul.msk.bf16.vlgmr.msra.gmra.mxu0 %vm1310_vm8, %v7182_v50  ;;  %v7350_v8 = vsel %vm1310_vm8, %v7345_v7, 0 }
 0xbfd   : > { %10860 = vmatmul.msk.bf16.vlgmr.msrb.gmra.mxu1 %vm1310_vm8, %v7205_v9 }
 0xbfe   : > { %v7322_v36 = vpop.permute.xlu2 %7321 }
 0xbff   : > { %v6769_v49 = vpop.f32.mrf.mxu1  ;;  %v7327_v50 = vsel %vm1310_vm8, %v7322_v36, 0 }
 0xc02   : > { %v7276_v54 = vpop.permute.xlu0 %7275 }
 0xc03   : > { %v7281_v40 = vsel %vm1310_vm8, %v7276_v54, 0  ;;  %v7343_v54 = vpop.permute.xlu1 %7342 }
 0xc04   : > { %7359 = vmatpush.bf16.xpose.msra.mxu3 %v7350_v8  ;;  %7290 = vmatpush.bf16.xpose.msrb.mxu0 %v7281_v40  ;;  %v7465_v8 = vsel %vm1310_vm8, %v7460_v29, 0 }
 0xc06   : > { %v16246_v6 = vpop.f32.mrf.mxu2 }
 0xc07   : > { %19010 = vst [vmem:[#allocation58_spill] sm:$0xff] %v16246_v6 }
 0xc0a   : > { %v7230_v53 = vpop.permute.xlu0 %7229 }
 0xc0b   : > { %v7235_v4 = vsel %vm1310_vm8, %v7230_v53, 0  ;;  %10862 = vmatmul.msk.bf16.vlgmr.msrb.gmra.mxu3 %vm1310_vm8, %v7251_v10  ;;  %v7320_v53 = vpop.permute.xlu2 %7319 }
 0xc0c   : > { %10863 = vmatmul.msk.bf16.vlgmr.msrb.gmra.mxu0 %vm1310_vm8, %v7274_v14  ;;  %7244 = vmatpush.bf16.xpose.msra.mxu2 %v7235_v4 }
 0xc0e   : > { %v6790_v9 = vpop.f32.mrf.mxu2 }
 0xc12   : > { %v7368_v52 = vpop.permute.xlu0 %7367 }
 0xc13   : > { %v7373_v7 = vsel %vm1310_vm8, %v7368_v52, 0  ;;  %10861 = vmatmul.msk.bf16.vlgmr.msra.gmra.mxu2 %vm1310_vm8, %v7228_v2 }
 0xc14   : > { %7336 = vmatpush.bf16.xpose.msrb.mxu2 %v7327_v50  ;;  %7382 = vmatpush.bf16.xpose.msra.mxu0 %v7373_v7 }
 0xc16   : > { %v6878_v49 = vpop.f32.mrf.mxu2 }
 0xc17   : > { %v16257_v10 = vsel %vm13682_vm9, %v6878_v49, -1e+30 }
 0xc18   : > { %v7587_v14 = vsel %vm1310_vm8, %v16257_v10, -inf }
 0xc19   : > { %7588 = vmax.xlane.f32.xlu1 %v7587_v14 }
 0xc1b   : > { %v7366_v40 = vpop.permute.xlu0 %7365  ;;  %10866 = vmatmul.msk.bf16.vlgmr.msra.gmra.mxu3 %vm1310_vm8, %v7343_v54 }
 0xc1c   : > { %7474 = vmatpush.bf16.xpose.msrb.mxu0 %v7465_v8  ;;  %v16263_v2 = vpop.f32.mrf.mxu0 }
 0xc1d   : > { %10867 = vmatmul.msk.bf16.vlgmr.msra.gmra.mxu0 %vm1310_vm8, %v7366_v40  ;;  %19011 = vst [vmem:[#allocation77_spill] sm:$0xff] %v16263_v2 }
 0xc1e   : > { %v6880_v36 = vpop.f32.mrf.mxu2 }
 0xc23   : > { %v7458_v4 = vpop.permute.xlu0 %7457  ;;  %10865 = vmatmul.msk.bf16.vlgmr.msrb.gmra.mxu2 %vm1310_vm8, %v7320_v53 }
 0xc24   : > { %v6748_v50 = vpop.f32.mrf.mxu0 }
 0xc2a   : > { %v16268_v9 = vpop.f32.mrf.mxu3 }
 0xc2b   : > { %19012 = vst [vmem:[#allocation12_spill] sm:$0xff] %v16268_v9  ;;  %v7297_v52 = vpop.permute.xlu0 %7296 }
 0xc2c   : > { %10864 = vmatmul.msk.bf16.vlgmr.msra.gmra.mxu1 %vm1310_vm8, %v7297_v52 }
 0xc2d   : > { %10871 = vmatmul.msk.bf16.vlgmr.msrb.gmra.mxu0 %vm1310_vm8, %v7458_v4 }
 0xc30   : > { %v6832_v8 = vpop.f32.mrf.mxu0  ;;  %v6855_v49 = vpop.f32.mrf.mxu1 }
 0xc31   : > { %v16276_v14 = vsel %vm13682_vm9, %v6832_v8, -1e+30  ;;  %v16280_v54 = vsel %vm13682_vm9, %v6855_v49, -1e+30 }
 0xc32   : > { %v7581_v40 = vsel %vm1310_vm8, %v16276_v14, -inf  ;;  %v7584_v36 = vsel %vm1310_vm8, %v16280_v54, -inf  ;;  %7413 = vrot.lane.b32.xlu1 %v18978_v19, %s11983_s9  ;;  %v6811_v53 = vpop.f32.mrf.mxu3 }
 0xc33   : > { %7585 = vmax.xlane.f32.xlu2 %v7584_v36  ;;  %7582 = vmax.xlane.f32.xlu0 %v7581_v40 }
 0xc38   : > { %v6834_v4 = vpop.f32.mrf.mxu0  ;;  %v6857_v50 = vpop.f32.mrf.mxu1 }
 0xc3a   : > { %7434 = vrot.lane.b32.xlu1 %v18981_v20, %s11984_s10 }
 0xc3e   : > { %v6901_v52 = vpop.f32.mrf.mxu3 }
 0xc3f   : > { %v16292_v8 = vsel %vm13682_vm9, %v6901_v52, -1e+30 }
 0xc40   : > { %v7590_v49 = vsel %vm1310_vm8, %v16292_v8, -inf  ;;  %v6924_v7 = vpop.f32.mrf.mxu0 }
 0xc41   : > { %7591 = vmax.xlane.f32.xlu0 %v7590_v49  ;;  %v16326_v45 = vsel %vm13682_vm9, %v6924_v7, -1e+30 }
 0xc42   : > { %7482 = vrot.lane.b32.xlu1 %v18984_v57, %s11983_s9  ;;  %v7593_v0 = vsel %vm1310_vm8, %v16326_v45, -inf }
 0xc46   : > { %v6903_v36 = vpop.f32.mrf.mxu3 }
 0xc48   : > { %v6926_v40 = vpop.f32.mrf.mxu0  ;;  %v6947_v53 = vpop.f32.mrf.mxu1 }
 0xc49   : > { %v16344_v7 = vsel %vm13682_vm9, %v6947_v53, -1e+30 }
 0xc4b   : > { %7390 = vrot.lane.b32.xlu2 %v18977_v35, %s11983_s9 }
 0xc4e   : > { %v6970_v4 = vpop.f32.mrf.mxu2 }
 0xc4f   : > { %v6993_v50 = vpop.f32.mrf.mxu3  ;;  %v16316_v44 = vsel %vm13682_vm9, %v6970_v4, -1e+30 }
 0xc50   : > { %v6949_v29 = vpop.f32.mrf.mxu1 }
 0xc53   : > { %7388 = vrot.lane.b32.xlu2 %v18977_v35, %s11984_s10 }
 0xc55   : > { %7436 = vrot.lane.b32.xlu0 %v18981_v20, %s11983_s9 }
 0xc56   : > { %v6972_v52 = vpop.f32.mrf.mxu2 }
 0xc57   : > { %v6995_v49 = vpop.f32.mrf.mxu3 }
 0xc58   : > { %v16304_v6 = vpop.f32.mrf.mxu0  ;;  %v16306_v9 = vpop.f32.mrf.mxu1  ;;  %v7599_v49 = vsel %vm1310_vm8, %v16316_v44, -inf }
 0xc5d   : > { %7411 = vrot.lane.b32.xlu0 %v18978_v19, %s11984_s10 }
 0xc60   : > { %v7018_v36 = vpop.f32.mrf.mxu0  ;;  %v7041_v40 = vpop.f32.mrf.mxu1 }
 0xc66   : > { %v16310_v2 = vpop.f32.mrf.mxu2  ;;  %v16312_v29 = vpop.f32.mrf.mxu3 }
 0xc68   : > { %v16318_v23 = vpop.f32.mrf.mxu0  ;;  %v16320_v52 = vpop.f32.mrf.mxu1 }
 0xc6c   : > { %7600 = vmax.xlane.f32.xlu1 %v7599_v49 }
 0xc6e   : > { %v7064_v38 = vpop.f32.mrf.mxu2  ;;  %v7087_v15 = vpop.f32.mrf.mxu3 }
 0xc6f   : > { %v16340_v15 = vsel %vm13682_vm9, %v6993_v50, -1e+30 }
 0xc70   : > { %v7110_v36 = vpop.f32.mrf.mxu0  ;;  %v7133_v40 = vpop.f32.mrf.mxu1 }
 0xc71   : > { %v7602_v36 = vsel %vm1310_vm8, %v16340_v15, -inf }
 0xc79   : > { %v16328_v30 = vpop.f32.mrf.mxu0 }
 0xc7a   : > { %v16330_v4 = vpop.f32.mrf.mxu1 }
 0xc7c   : > { %7594 = vmax.xlane.f32.xlu2 %v7593_v0  ;;  %v7596_v0 = vsel %vm1310_vm8, %v16344_v7, -inf }
 0xc7e   : > { %v16334_v20 = vpop.f32.mrf.mxu2  ;;  %v16336_v63 = vpop.f32.mrf.mxu3 }
 0xc81   : > { %v7202_v38 = vpop.f32.mrf.mxu0 }
 0xc82   : > { %v7225_v49 = vpop.f32.mrf.mxu1 }
 0xc84   : > { %7603 = vmax.xlane.f32.xlu2 %v7602_v36 }
 0xc85   : > { %7528 = vrot.lane.b32.xlu1 %v18995_v61, %s11983_s9 }
 0xc86   : > { %v7156_v40 = vpop.f32.mrf.mxu2  ;;  %v7179_v18 = vpop.f32.mrf.mxu3 }
 0xc87   : > { %7597 = vmax.xlane.f32.xlu0 %v7596_v0 }
 0xc89   : > { %v16352_v50 = vpop.f32.mrf.mxu0 }
 0xc8c   : > { %v7589_v18 = vpop.xlane.xlu1 %7588 }
 0xc8d   : > { %7503 = vrot.lane.b32.xlu1 %v18989_v28, %s11984_s10 }
 0xc8e   : > { %v16356_v53 = vpop.f32.mrf.mxu3 }
 0xc91   : > { %v7294_v38 = vpop.f32.mrf.mxu0 }
 0xc95   : > { %7526 = vrot.lane.b32.xlu1 %v18995_v61, %s11984_s10 }
 0xc96   : > { %v16360_v49 = vpop.f32.mrf.mxu2  ;;  %v7271_v36 = vpop.f32.mrf.mxu3 }
 0xc9a   : > { %v16362_v19 = vpop.f32.mrf.mxu0 }
 0xc9b   : > { %7480 = vrot.lane.b32.xlu0 %v18984_v57, %s11984_s10 }
 0xc9c   : > { %7505 = vrot.lane.b32.xlu2 %v18989_v28, %s11983_s9 }
 0xc9d   : > { %7965 = vrot.lane.b32.xlu1 %v18985_v32, %s11985_s11 }
 0xc9e   : > { %v7248_v0 = vpop.f32.mrf.mxu2  ;;  %v16370_v40 = vpop.f32.mrf.mxu3 }
 0xca2   : > { %v7386_v38 = vpop.f32.mrf.mxu0 }
 0xca4   : > { %v7414_v61 = vpop.permute.xlu1 %7413 }
 0xca5   : > { %v7419_v36 = vsel %vm1310_vm8, %v7414_v61, 0  ;;  %7986 = vrot.lane.b32.xlu1 %v18994_v12, %s11985_s11 }
 0xca6   : > { %v7586_v41 = vpop.xlane.xlu2 %7585  ;;  %v16375_v57 = vpop.f32.mrf.mxu2  ;;  %7428 = vmatpush.bf16.xpose.msra.mxu2 %v7419_v36 }
 0xca7   : > { %v7363_v22 = vpop.f32.mrf.mxu3  ;;  %v7583_v35 = vpop.xlane.xlu0 %7582  ;;  %v7678_v12 = vsub.f32 %v16280_v54, %v7586_v41  ;;  %v16402_v54 = vsel %vm13682_vm9, %v16306_v9, -1e+30  ;;  %v16417_v9 = vsel %vm13682_vm9, %v16304_v6, -1e+30 }
 0xca8   : > { %v7677_v46 = vsub.f32 %v16276_v14, %v7583_v35 }
 0xca9   : > { %v16377_v28 = vpop.f32.mrf.mxu1  ;;  %v7711_v36 = vmul.f32 1.442695, %v7678_v12 }
 0xcaa   : > { %v16379_v5 = vpop.f32.mrf.mxu0  ;;  %v7709_v37 = vmul.f32 1.442695, %v7677_v46 }
 0xcab   : > { %11735 = vpow2.f32 %v7711_v36  ;;  %v7605_v36 = vsel %vm1310_vm8, %v16417_v9, -inf }
 0xcac   : > { %v7435_v32 = vpop.permute.xlu1 %7434  ;;  %11737 = vpow2.f32 %v7709_v37 }
 0xcae   : > { %v7391_v0 = vpop.permute.xlu2 %7390  ;;  %v7340_v59 = vpop.f32.mrf.mxu2 }
 0xcaf   : > { %v7396_v38 = vsel %vm1310_vm8, %v7391_v0, 0  ;;  %v7679_v0 = vsub.f32 %v16257_v10, %v7589_v18  ;;  %v7608_v18 = vsel %vm1310_vm8, %v16402_v54, -inf }
 0xcb0   : > { %7405 = vmatpush.bf16.xpose.msrb.mxu1 %v7396_v38 }
 0xcb1   : > { %v7317_v33 = vpop.f32.mrf.mxu1  ;;  %v7713_v38 = vmul.f32 1.442695, %v7679_v0  ;;  %v16388_v41 = vpop.eup %11735 }
 0xcb2   : > { %v7478_v61 = vpop.f32.mrf.mxu0  ;;  %v16390_v35 = vpop.eup %11737 }
 0xcb3   : > { %11739 = vpow2.f32 %v7713_v38  ;;  %v7773_v46 = vsel %vm1310_vm8, %v16390_v35, 0.0 }
 0xcb4   : > { %v7483_v26 = vpop.permute.xlu1 %7482  ;;  %v7592_v59 = vpop.xlane.xlu0 %7591 }
 0xcb5   : > { %v7488_v22 = vsel %vm1310_vm8, %v7483_v26, 0  ;;  %v7680_v33 = vsub.f32 %v16292_v8, %v7592_v59  ;;  %v7776_v26 = vsel %vm1310_vm8, %v16388_v41, 0.0 }
 0xcb6   : > { %v7389_v17 = vpop.permute.xlu2 %7388 }
 0xcb7   : > { %10868 = vmatmul.msk.bf16.vlgmr.msrb.gmra.mxu1 %vm1310_vm8, %v7389_v17  ;;  %v7715_v14 = vmul.f32 1.442695, %v7680_v33 }
 0xcb8   : > { %7497 = vmatpush.bf16.xpose.msra.mxu1 %v7488_v22 }
 0xcb9   : > { %11741 = vpow2.f32 %v7715_v14  ;;  %v16397_v10 = vpop.eup %11739 }
 0xcba   : > { %v7779_v61 = vsel %vm1310_vm8, %v16397_v10, 0.0 }
 0xcbf   : > { %v16404_v8 = vpop.eup %11741 }
 0xcc0   : > { %v7782_v12 = vsel %vm1310_vm8, %v16404_v8, 0.0 }
 0xcc5   : > { %7777 = vadd.xlane.f32.xlu2 %v7776_v26  ;;  %7774 = vadd.xlane.f32.xlu0 %v7773_v46 }
 0xcc7   : > { %v7437_v17 = vpop.permute.xlu0 %7436 }
 0xcc8   : > { %v7442_v37 = vsel %vm1310_vm8, %v7437_v17, 0 }
 0xcc9   : > { %7451 = vmatpush.bf16.xpose.msrb.mxu3 %v7442_v37 }
 0xccd   : > { %7609 = vmax.xlane.f32.xlu2 %v7608_v18  ;;  %7780 = vadd.xlane.f32.xlu0 %v7779_v61 }
 0xccf   : > { %7783 = vadd.xlane.f32.xlu1 %v7782_v12  ;;  %v7412_v22 = vpop.permute.xlu0 %7411 }
 0xcd0   : > { %10869 = vmatmul.msk.bf16.vlgmr.msra.gmra.mxu2 %vm1310_vm8, %v7412_v22  ;;  %10870 = vmatmul.msk.bf16.vlgmr.msrb.gmra.mxu3 %vm1310_vm8, %v7435_v32 }
 0xcd5   : > { %7606 = vmax.xlane.f32.xlu0 %v7605_v36 }
 0xcdf   : > { %v7601_v59 = vpop.xlane.xlu1 %7600 }
 0xce0   : > { %v7683_v61 = vsub.f32 %v16316_v44, %v7601_v59  ;;  %v16448_v44 = vsel %vm13682_vm9, %v16318_v23, -1e+30 }
 0xce5   : > { %8028 = vrot.lane.b32.xlu2 %v18987_v62, %s11985_s11 }
 0xce9   : > { %8007 = vrot.lane.b32.xlu0 %v18988_v34, %s11985_s11 }
 0xcef   : > { %v7595_v0 = vpop.xlane.xlu2 %7594 }
 0xcf0   : > { %v7681_v33 = vsub.f32 %v16326_v45, %v7595_v0  ;;  %v16443_v0 = vsel %vm13682_vm9, %v16312_v29, -1e+30  ;;  %v16459_v29 = vsel %vm13682_vm9, %v16310_v2, -1e+30 }
 0xcf2   : > { %v7717_v32 = vmul.f32 1.442695, %v7681_v33  ;;  %v7614_v33 = vsel %vm1310_vm8, %v16443_v0, -inf }
 0xcf4   : > { %11743 = vpow2.f32 %v7717_v32 }
 0xcf7   : > { %v7604_v38 = vpop.xlane.xlu2 %7603  ;;  %v7529_v14 = vpop.permute.xlu1 %7528 }
 0xcf8   : > { %v7534_v6 = vsel %vm1310_vm8, %v7529_v14, 0  ;;  %v7684_v59 = vsub.f32 %v16340_v15, %v7604_v38  ;;  %v7617_v14 = vsel %vm1310_vm8, %v16448_v44, -inf }
 0xcf9   : > { %7543 = vmatpush.bf16.xpose.msra.mxu3 %v7534_v6 }
 0xcfa   : > { %v16427_v26 = vpop.eup %11743  ;;  %v7598_v46 = vpop.xlane.xlu0 %7597  ;;  %v7723_v6 = vmul.f32 1.442695, %v7684_v59 }
 0xcfb   : > { %v7682_v17 = vsub.f32 %v16344_v7, %v7598_v46  ;;  %v7785_v62 = vsel %vm1310_vm8, %v16427_v26, 0.0  ;;  %v7721_v7 = vmul.f32 1.442695, %v7683_v61  ;;  %v7611_v46 = vsel %vm1310_vm8, %v16459_v29, -inf }
 0xcfc   : > { %7786 = vadd.xlane.f32.xlu1 %v7785_v62 }
 0xcfd   : > { %v7719_v34 = vmul.f32 1.442695, %v7682_v17 }
 0xcff   : > { %11745 = vpow2.f32 %v7719_v34  ;;  %v7506_v37 = vpop.permute.xlu2 %7505  ;;  %v7504_v45 = vpop.permute.xlu1 %7503 }
 0xd00   : > { %v7511_v18 = vsel %vm1310_vm8, %v7506_v37, 0  ;;  %11747 = vpow2.f32 %v7721_v7 }
 0xd01   : > { %7520 = vmatpush.bf16.xpose.msrb.mxu2 %v7511_v18  ;;  %11749 = vpow2.f32 %v7723_v6 }
 0xd05   : > { %v16434_v12 = vpop.eup %11745 }
 0xd06   : > { %v7788_v22 = vsel %vm1310_vm8, %v16434_v12, 0.0  ;;  %v16462_v38 = vpop.eup %11747 }
 0xd07   : > { %v7527_v36 = vpop.permute.xlu1 %7526  ;;  %7789 = vadd.xlane.f32.xlu1 %v7788_v22  ;;  %v7791_v17 = vsel %vm1310_vm8, %v16462_v38, 0.0  ;;  %v16469_v34 = vpop.eup %11749 }
 0xd08   : > { %10873 = vmatmul.msk.bf16.vlgmr.msrb.gmra.mxu2 %vm1310_vm8, %v7504_v45  ;;  %10874 = vmatmul.msk.bf16.vlgmr.msra.gmra.mxu3 %vm1310_vm8, %v7527_v36  ;;  %v7794_v37 = vsel %vm1310_vm8, %v16469_v34, 0.0 }
 0xd0d   : > { %v7481_v32 = vpop.permute.xlu0 %7480 }
 0xd0e   : > { %7615 = vmax.xlane.f32.xlu2 %v7614_v33  ;;  %10872 = vmatmul.msk.bf16.vlgmr.msra.gmra.mxu1 %vm1310_vm8, %v7481_v32 }
 0xd0f   : > { %v7966_v23 = vpop.permute.xlu1 %7965  ;;  %7618 = vmax.xlane.f32.xlu1 %v7617_v14 }
 0xd10   : > { %v7971_v15 = vsel %vm2497_vm10, %v7966_v23, 0 }
 0xd11   : > { %7980 = vmatpush.bf16.msra.mxu0 %v7971_v15 }
 0xd13   : > { %7612 = vmax.xlane.f32.xlu0 %v7611_v46 }
 0xd16   : > { %7792 = vadd.xlane.f32.xlu2 %v7791_v17 }
 0xd17   : > { %v7987_v62 = vpop.permute.xlu1 %7986 }
 0xd18   : > { %v7992_v2 = vsel %vm2497_vm10, %v7987_v62, 0 }
 0xd19   : > { %8001 = vmatpush.bf16.msrb.mxu1 %v7992_v2 }
 0xd1e   : > { %7795 = vadd.xlane.f32.xlu2 %v7794_v37 }
 0xd27   : > { %8070 = vrot.lane.b32.xlu0 %v18990_v39, %s11985_s11 }
 0xd28   : > { %8049 = vrot.lane.b32.xlu1 %v18993_v58, %s11985_s11 }
 0xd2f   : > { %8112 = vrot.lane.b32.xlu0 %v18996_v13, %s11985_s11 }
 0xd34   : > { %v16479_v45 = vpop.f32.mrf.mxu1 }
 0xd36   : > { %8091 = vrot.lane.b32.xlu2 %v18997_v47, %s11985_s11 }
 0xd38   : > { %v7778_v18 = vpop.xlane.xlu2 %7777  ;;  %v7775_v61 = vpop.xlane.xlu0 %7774 }
 0xd39   : > { %11751 = vrcp.f32 %v7778_v18 }
 0xd3a   : > { %11753 = vrcp.f32 %v7775_v61 }
 0xd3c   : > { %v7409_v22 = vpop.f32.mrf.mxu1 }
 0xd3f   : > { %v11752_v36 = vpop.eup %11751 }
 0xd40   : > { %v11754_v7 = vpop.eup %11753  ;;  %v7902_v39 = vmul.f32 %v11752_v36, %v16388_v41  ;;  %v7610_v59 = vpop.xlane.xlu2 %7609 }
 0xd41   : > { %v7901_v58 = vmul.f32 %v11754_v7, %v16390_v35  ;;  %v7781_v14 = vpop.xlane.xlu0 %7780  ;;  %v16492_v35 = vsel %vm13682_vm9, %v16320_v52, -1e+30  ;;  %v7686_v17 = vsub.f32 %v16402_v54, %v7610_v59  ;;  %v16506_v52 = vsel %vm13682_vm9, %v16328_v30, -1e+30 }
 0xd42   : > { %v7934_v33 = vpack.c.bf16 %v7902_v39, %v7902_v39  ;;  %v7784_v32 = vpop.xlane.xlu1 %7783  ;;  %v7620_v2 = vsel %vm1310_vm8, %v16492_v35, -inf  ;;  %v16511_v54 = vsel %vm13682_vm9, %v16336_v63, -1e+30  ;;  %v7629_v22 = vsel %vm1310_vm8, %v16506_v52, -inf }
 0xd43   : > { %v7933_v13 = vpack.c.bf16 %v7901_v58, %v7901_v58  ;;  %11755 = vrcp.f32 %v7784_v32  ;;  %v7626_v36 = vsel %vm1310_vm8, %v16511_v54, -inf  ;;  %v16520_v30 = vsel %vm13682_vm9, %v16334_v20, -1e+30 }
 0xd44   : > { %10876 = vmatmul.msk.bf16.vlgmr.msrb.gmra.mxu1 %vm1310_vm8, %v7934_v33  ;;  %11757 = vrcp.f32 %v7781_v14 }
 0xd45   : > { %10875 = vmatmul.msk.bf16.vlgmr.msra.gmra.mxu0 %vm1310_vm8, %v7933_v13  ;;  %v7623_v13 = vsel %vm1310_vm8, %v16520_v30, -inf }
 0xd48   : > { %v8029_v47 = vpop.permute.xlu2 %8028 }
 0xd49   : > { %v11756_v23 = vpop.eup %11755  ;;  %v8034_v6 = vsel %vm2497_vm10, %v8029_v47, 0  ;;  %v7607_v46 = vpop.xlane.xlu0 %7606  ;;  %v16538_v47 = vsel %vm13682_vm9, %v16352_v50, -1e+30 }
 0xd4a   : > { %v7904_v15 = vmul.f32 %v11756_v23, %v16404_v8  ;;  %8043 = vmatpush.bf16.msrb.mxu3 %v8034_v6  ;;  %v7685_v62 = vsub.f32 %v16417_v9, %v7607_v46  ;;  %v7727_v8 = vmul.f32 1.442695, %v7686_v17  ;;  %v11758_v9 = vpop.eup %11757  ;;  %v7641_v23 = vsel %vm1310_vm8, %v16538_v47, -inf }
 0xd4b   : > { %v7903_v7 = vmul.f32 %v11758_v9, %v16397_v10 }
 0xd4c   : > { %v7936_v41 = vpack.c.bf16 %v7904_v15, %v7904_v15  ;;  %v7725_v61 = vmul.f32 1.442695, %v7685_v62  ;;  %11759 = vpow2.f32 %v7727_v8 }
 0xd4d   : > { %v7935_v14 = vpack.c.bf16 %v7903_v7, %v7903_v7 }
 0xd4e   : > { %10878 = vmatmul.msk.bf16.vlgmr.msrb.gmra.mxu3 %vm1310_vm8, %v7936_v41  ;;  %11761 = vpow2.f32 %v7725_v61 }
 0xd52   : > { %7621 = vmax.xlane.f32.xlu1 %v7620_v2  ;;  %v16523_v58 = vpop.eup %11759 }
 0xd53   : > { %v16499_v37 = vpop.f32.mrf.mxu2  ;;  %v16501_v18 = vpop.f32.mrf.mxu3  ;;  %v7800_v20 = vsel %vm1310_vm8, %v16523_v58, 0.0 }
 0xd54   : > { %v16526_v32 = vpop.eup %11761 }
 0xd55   : > { %v7797_v10 = vsel %vm1310_vm8, %v16526_v32, 0.0 }
 0xd59   : > { %7630 = vmax.xlane.f32.xlu0 %v7629_v22 }
 0xd5a   : > { %7627 = vmax.xlane.f32.xlu1 %v7626_v36 }
 0xd5b   : > { %v7432_v63 = vpop.f32.mrf.mxu2  ;;  %v7455_v39 = vpop.f32.mrf.mxu3 }
 0xd5c   : > { %v8008_v59 = vpop.permute.xlu0 %8007 }
 0xd5d   : > { %v8013_v33 = vsel %vm2497_vm10, %v8008_v59, 0 }
 0xd5e   : > { %8022 = vmatpush.bf16.msra.mxu2 %v8013_v33 }
 0xd5f   : > { %7624 = vmax.xlane.f32.xlu2 %v7623_v13 }
 0xd61   : > { %10877 = vmatmul.msk.bf16.vlgmr.msra.gmra.mxu2 %vm1310_vm8, %v7935_v14  ;;  %7801 = vadd.xlane.f32.xlu0 %v7800_v20 }
 0xd62   : > { %7798 = vadd.xlane.f32.xlu1 %v7797_v10 }
 0xd6a   : > { %7642 = vmax.xlane.f32.xlu1 %v7641_v23 }
 0xd6f   : > { %v7787_v6 = vpop.xlane.xlu1 %7786 }
 0xd75   : > { %8133 = vrot.lane.b32.xlu0 %v18912_v56, %s11985_s11 }
 0xd77   : > { %8154 = vrot.lane.b32.xlu2 %v18909_v24, %s11985_s11 }
 0xd7a   : > { %v7790_v50 = vpop.xlane.xlu1 %7789 }
 0xd7f   : > { %8196 = vrot.lane.b32.xlu2 %v18908_v60, %s11985_s11 }
 0xd81   : > { %v7616_v15 = vpop.xlane.xlu2 %7615 }
 0xd82   : > { %v7688_v17 = vsub.f32 %v16443_v0, %v7616_v15  ;;  %v7619_v9 = vpop.xlane.xlu1 %7618 }
 0xd84   : > { %v7731_v24 = vmul.f32 1.442695, %v7688_v17 }
 0xd86   : > { %v7613_v41 = vpop.xlane.xlu0 %7612 }
 0xd87   : > { %v7687_v46 = vsub.f32 %v16459_v29, %v7613_v41 }
 0xd89   : > { %v7729_v62 = vmul.f32 1.442695, %v7687_v46  ;;  %v7793_v2 = vpop.xlane.xlu2 %7792 }
 0xd8b   : > { %11763 = vpow2.f32 %v7729_v62  ;;  %v16550_v8 = vpop.f32.mrf.mxu1  ;;  %v16552_v56 = vpop.f32.mrf.mxu2  ;;  %v7689_v62 = vsub.f32 %v16448_v44, %v7619_v9  ;;  %v16586_v44 = vsel %vm13682_vm9, %v16356_v53, -1e+30  ;;  %v16591_v9 = vsel %vm13682_vm9, %v16362_v19, -1e+30 }
 0xd8c   : > { %v16554_v61 = vpop.f32.mrf.mxu3  ;;  %11765 = vrcp.f32 %v7787_v6 }
 0xd8d   : > { %11767 = vrcp.f32 %v7793_v2 }
 0xd8e   : > { %11769 = vrcp.f32 %v7790_v50  ;;  %v16572_v50 = vsel %vm13682_vm9, %v16330_v4, -1e+30 }
 0xd8f   : > { %11771 = vpow2.f32 %v7731_v24  ;;  %v7632_v2 = vsel %vm1310_vm8, %v16572_v50, -inf }
 0xd91   : > { %v16556_v60 = vpop.eup %11763  ;;  %v7796_v29 = vpop.xlane.xlu2 %7795 }
 0xd92   : > { %v7803_v0 = vsel %vm1310_vm8, %v16556_v60, 0.0  ;;  %v11766_v7 = vpop.eup %11765  ;;  %11773 = vrcp.f32 %v7796_v29  ;;  %v7733_v29 = vmul.f32 1.442695, %v7689_v62 }
 0xd93   : > { %v7501_v22 = vpop.f32.mrf.mxu1  ;;  %v7524_v36 = vpop.f32.mrf.mxu2  ;;  %7804 = vadd.xlane.f32.xlu1 %v7803_v0  ;;  %v7905_v23 = vmul.f32 %v11766_v7, %v16427_v26  ;;  %v7653_v7 = vsel %vm1310_vm8, %v16591_v9, -inf }
 0xd94   : > { %v7547_v63 = vpop.f32.mrf.mxu3  ;;  %v11768_v39 = vpop.eup %11767  ;;  %11775 = vpow2.f32 %v7733_v29 }
 0xd95   : > { %v11770_v59 = vpop.eup %11769  ;;  %v7907_v13 = vmul.f32 %v11768_v39, %v16462_v38  ;;  %v7937_v24 = vpack.c.bf16 %v7905_v23, %v7905_v23 }
 0xd96   : > { %v16560_v33 = vpop.eup %11771  ;;  %v7906_v14 = vmul.f32 %v11770_v59, %v16434_v12 }
 0xd97   : > { %v7806_v46 = vsel %vm1310_vm8, %v16560_v33, 0.0  ;;  %v7939_v12 = vpack.c.bf16 %v7907_v13, %v7907_v13 }
 0xd98   : > { %v11774_v26 = vpop.eup %11773  ;;  %v7938_v17 = vpack.c.bf16 %v7906_v14, %v7906_v14 }
 0xd99   : > { %v8092_v20 = vpop.permute.xlu2 %8091  ;;  %v8071_v10 = vpop.permute.xlu0 %8070  ;;  %v7908_v4 = vmul.f32 %v11774_v26, %v16469_v34  ;;  %v7638_v34 = vsel %vm1310_vm8, %v16586_v44, -inf  ;;  %v16623_v26 = vsel %vm13682_vm9, %v16379_v5, -1e+30 }
 0xd9a   : > { %v8097_v6 = vsel %vm2497_vm10, %v8092_v20, 0  ;;  %v8076_v15 = vsel %vm2497_vm10, %v8071_v10, 0  ;;  %v8050_v41 = vpop.permute.xlu1 %8049  ;;  %v16598_v53 = vpop.eup %11775 }
 0xd9b   : > { %v8055_v38 = vsel %vm2497_vm10, %v8050_v41, 0  ;;  %8106 = vmatpush.bf16.msrb.mxu2 %v8097_v6  ;;  %7807 = vadd.xlane.f32.xlu1 %v7806_v46  ;;  %v7940_v36 = vpack.c.bf16 %v7908_v4, %v7908_v4  ;;  %v7809_v63 = vsel %vm1310_vm8, %v16598_v53, 0.0  ;;  %v16631_v4 = vsel %vm13682_vm9, %v16360_v49, -1e+30 }
 0xd9c   : > { %8085 = vmatpush.bf16.msra.mxu1 %v8076_v15  ;;  %8064 = vmatpush.bf16.msrb.mxu0 %v8055_v38 }
 0xd9e   : > { %10881 = vmatmul.msk.bf16.vlgmr.msrb.gmra.mxu2 %vm1310_vm8, %v7939_v12 }
 0xd9f   : > { %10880 = vmatmul.msk.bf16.vlgmr.msra.gmra.mxu1 %vm1310_vm8, %v7938_v17  ;;  %7633 = vmax.xlane.f32.xlu0 %v7632_v2  ;;  %v7665_v2 = vsel %vm1310_vm8, %v16623_v26, -inf }
 0xda0   : > { %10879 = vmatmul.msk.bf16.vlgmr.msrb.gmra.mxu0 %vm1310_vm8, %v7937_v24 }
 0xda1   : > { %v8113_v0 = vpop.permute.xlu0 %8112 }
 0xda2   : > { %v8118_v22 = vsel %vm2497_vm10, %v8113_v0, 0 }
 0xda3   : > { %8127 = vmatpush.bf16.msra.mxu3 %v8118_v22 }
 0xda6   : > { %10882 = vmatmul.msk.bf16.vlgmr.msra.gmra.mxu3 %vm1310_vm8, %v7940_v36  ;;  %v7635_v36 = vsel %vm1310_vm8, %v16631_v4, -inf }
 0xda7   : > { %7639 = vmax.xlane.f32.xlu0 %v7638_v34 }
 0xda8   : > { %7654 = vmax.xlane.f32.xlu2 %v7653_v7 }
 0xdaf   : > { %7810 = vadd.xlane.f32.xlu0 %v7809_v63 }
 0xdb4   : > { %8175 = vrot.lane.b32.xlu1 %v18907_v51, %s11985_s11 }
 0xdc0   : > { %8217 = vrot.lane.b32.xlu2 %v18915_v16, %s11985_s11 }
 0xdc1   : > { %v16606_v19 = vpop.f32.mrf.mxu1 }
 0xdc2   : > { %v16608_v39 = vpop.f32.mrf.mxu0 }
 0xdc3   : > { %v11048_v59 = vpack.i.bf16 %v16606_v19, %v16608_v39 }
 0xdc5   : > { %v7622_v13 = vpop.xlane.xlu1 %7621 }
 0xdc6   : > { %v7690_v14 = vsub.f32 %v16492_v35, %v7622_v13 }
 0xdc8   : > { %v7735_v20 = vmul.f32 1.442695, %v7690_v14 }
 0xdc9   : > { %v8005_v10 = vpop.f32.mrf.mxu1 }
 0xdca   : > { %11777 = vpow2.f32 %v7735_v20  ;;  %v7984_v23 = vpop.f32.mrf.mxu0 }
 0xdcc   : > { %v7631_v6 = vpop.xlane.xlu0 %7630 }
 0xdcd   : > { %v7628_v15 = vpop.xlane.xlu1 %7627  ;;  %v7693_v38 = vsub.f32 %v16506_v52, %v7631_v6 }
 0xdce   : > { %v7692_v17 = vsub.f32 %v16511_v54, %v7628_v15 }
 0xdcf   : > { %v7741_v62 = vmul.f32 1.442695, %v7693_v38 }
 0xdd0   : > { %v16613_v51 = vpop.eup %11777  ;;  %v7739_v0 = vmul.f32 1.442695, %v7692_v17 }
 0xdd1   : > { %v16615_v41 = vpop.f32.mrf.mxu3  ;;  %v7812_v16 = vsel %vm1310_vm8, %v16613_v51, 0.0 }
 0xdd2   : > { %v7625_v46 = vpop.xlane.xlu2 %7624  ;;  %7813 = vadd.xlane.f32.xlu0 %v7812_v16 }
 0xdd3   : > { %v7691_v5 = vsub.f32 %v16520_v30, %v7625_v46 }
 0xdd4   : > { %v7802_v12 = vpop.xlane.xlu0 %7801 }
 0xdd5   : > { %11779 = vrcp.f32 %v7802_v12  ;;  %v7799_v35 = vpop.xlane.xlu1 %7798  ;;  %v7737_v63 = vmul.f32 1.442695, %v7691_v5 }
 0xdd6   : > { %11781 = vpow2.f32 %v7741_v62 }
 0xdd7   : > { %11783 = vrcp.f32 %v7799_v35 }
 0xdd8   : > { %11785 = vpow2.f32 %v7739_v0 }
 0xdd9   : > { %v8047_v24 = vpop.f32.mrf.mxu3  ;;  %11787 = vpow2.f32 %v7737_v63 }
 0xdda   : > { %v8155_v52 = vpop.permute.xlu2 %8154  ;;  %7666 = vmax.xlane.f32.xlu0 %v7665_v2  ;;  %v16669_v24 = vsel %vm13682_vm9, %v16377_v28, -1e+30 }
 0xddb   : > { %v11780_v29 = vpop.eup %11779  ;;  %v8160_v22 = vsel %vm2497_vm10, %v8155_v52, 0  ;;  %v7644_v52 = vsel %vm1310_vm8, %v16669_v24, -inf }
 0xddc   : > { %v7910_v54 = vmul.f32 %v11780_v29, %v16523_v58  ;;  %8169 = vmatpush.bf16.msrb.mxu1 %v8160_v22  ;;  %v16640_v13 = vpop.eup %11781 }
 0xddd   : > { %v7643_v34 = vpop.xlane.xlu1 %7642  ;;  %v11784_v30 = vpop.eup %11783 }
 0xdde   : > { %v7942_v7 = vpack.c.bf16 %v7910_v54, %v7910_v54  ;;  %7636 = vmax.xlane.f32.xlu1 %v7635_v36  ;;  %v7697_v49 = vsub.f32 %v16538_v47, %v7643_v34  ;;  %v16645_v23 = vpop.eup %11785  ;;  %v7821_v47 = vsel %vm1310_vm8, %v16640_v13, 0.0  ;;  %v7909_v15 = vmul.f32 %v11784_v30, %v16526_v32 }
 0xddf   : > { %v7818_v38 = vsel %vm1310_vm8, %v16645_v23, 0.0  ;;  %v16655_v12 = vpop.eup %11787 }
 0xde0   : > { %10884 = vmatmul.msk.bf16.vlgmr.msrb.gmra.mxu1 %vm1310_vm8, %v7942_v7  ;;  %v7749_v20 = vmul.f32 1.442695, %v7697_v49  ;;  %v7941_v35 = vpack.c.bf16 %v7909_v15, %v7909_v15  ;;  %v7815_v32 = vsel %vm1310_vm8, %v16655_v12, 0.0 }
 0xde2   : > { %v8197_v14 = vpop.permute.xlu2 %8196  ;;  %11789 = vpow2.f32 %v7749_v20 }
 0xde3   : > { %v8202_v58 = vsel %vm2497_vm10, %v8197_v14, 0 }
 0xde4   : > { %v16643_v10 = vpop.f32.mrf.mxu2  ;;  %8211 = vmatpush.bf16.msrb.mxu3 %v8202_v58 }
 0xde5   : > { %v11063_v6 = vpack.i.bf16 %v16615_v41, %v16643_v10 }
 0xde6   : > { %7822 = vadd.xlane.f32.xlu1 %v7821_v47  ;;  %v16698_v47 = vsel %vm13682_vm9, %v16375_v57, -1e+30 }
 0xde7   : > { %v8134_v16 = vpop.permute.xlu0 %8133 }
 0xde8   : > { %v8139_v46 = vsel %vm2497_vm10, %v8134_v16, 0  ;;  %v16658_v62 = vpop.eup %11789 }
 0xde9   : > { %7819 = vadd.xlane.f32.xlu2 %v7818_v38  ;;  %8148 = vmatpush.bf16.msra.mxu0 %v8139_v46  ;;  %v7833_v2 = vsel %vm1310_vm8, %v16658_v62, 0.0 }
 0xdec   : > { %v8026_v17 = vpop.f32.mrf.mxu2  ;;  %10883 = vmatmul.msk.bf16.vlgmr.msra.gmra.mxu0 %vm1310_vm8, %v7941_v35  ;;  %v7647_v35 = vsel %vm1310_vm8, %v16698_v47, -inf }
 0xdee   : > { %8238 = vrot.lane.b32.xlu0 %v18919_v25, %s11985_s11  ;;  %7816 = vadd.xlane.f32.xlu1 %v7815_v32 }
 0xdf1   : > { %7834 = vadd.xlane.f32.xlu2 %v7833_v2 }
 0xdf6   : > { %8301 = vrot.lane.b32.xlu0 %v18923_v42, %s11985_s11  ;;  %7645 = vmax.xlane.f32.xlu1 %v7644_v52 }
 0xdfe   : > { %8280 = vrot.lane.b32.xlu0 %v18913_v48, %s11985_s11 }
 0xe06   : > { %v7805_v25 = vpop.xlane.xlu1 %7804 }
 0xe0e   : > { %v7808_v29 = vpop.xlane.xlu1 %7807 }
 0xe0f   : > { %11791 = vrcp.f32 %v7808_v29  ;;  %8259 = vrot.lane.b32.xlu1 %v18914_v1, %s11985_s11 }
 0xe12   : > { %v7634_v0 = vpop.xlane.xlu0 %7633 }
 0xe13   : > { %v7694_v28 = vsub.f32 %v16572_v50, %v7634_v0 }
 0xe15   : > { %v11792_v22 = vpop.eup %11791  ;;  %v7743_v5 = vmul.f32 1.442695, %v7694_v28 }
 0xe16   : > { %v7912_v54 = vmul.f32 %v11792_v22, %v16560_v33 }
 0xe17   : > { %11793 = vpow2.f32 %v7743_v5  ;;  %v16719_v5 = vsel %vm13682_vm9, %v16370_v40, -1e+30 }
 0xe18   : > { %v7944_v36 = vpack.c.bf16 %v7912_v54, %v7912_v54  ;;  %11795 = vrcp.f32 %v7805_v25 }
 0xe1a   : > { %10886 = vmatmul.msk.bf16.vlgmr.msrb.gmra.mxu3 %vm1310_vm8, %v7944_v36  ;;  %v7640_v42 = vpop.xlane.xlu0 %7639 }
 0xe1b   : > { %v7655_v34 = vpop.xlane.xlu2 %7654  ;;  %v7696_v36 = vsub.f32 %v16586_v44, %v7640_v42 }
 0xe1c   : > { %v16682_v48 = vpop.f32.mrf.mxu1  ;;  %v7701_v1 = vsub.f32 %v16591_v9, %v7655_v34 }
 0xe1d   : > { %v16684_v7 = vpop.eup %11793  ;;  %v16686_v49 = vpop.f32.mrf.mxu0  ;;  %v7747_v34 = vmul.f32 1.442695, %v7696_v36 }
 0xe1e   : > { %v11078_v50 = vpack.i.bf16 %v16682_v48, %v16686_v49  ;;  %v7824_v33 = vsel %vm1310_vm8, %v16684_v7, 0.0  ;;  %v11796_v14 = vpop.eup %11795  ;;  %v7757_v30 = vmul.f32 1.442695, %v7701_v1 }
 0xe1f   : > { %7825 = vadd.xlane.f32.xlu2 %v7824_v33  ;;  %v7911_v16 = vmul.f32 %v11796_v14, %v16556_v60 }
 0xe21   : > { %v16693_v63 = vpop.f32.mrf.mxu2  ;;  %v7943_v2 = vpack.c.bf16 %v7911_v16, %v7911_v16  ;;  %v16749_v16 = vsel %vm13682_vm9, %v16479_v45, -1e+30 }
 0xe22   : > { %v7811_v20 = vpop.xlane.xlu0 %7810 }
 0xe23   : > { %11797 = vrcp.f32 %v7811_v20  ;;  %v8218_v58 = vpop.permute.xlu2 %8217 }
 0xe24   : > { %v8223_v9 = vsel %vm2497_vm10, %v8218_v58, 0  ;;  %v8089_v15 = vpop.f32.mrf.mxu1  ;;  %11799 = vpow2.f32 %v7757_v30 }
 0xe25   : > { %v8068_v46 = vpop.f32.mrf.mxu0  ;;  %8232 = vmatpush.bf16.msrb.mxu0 %v8223_v9  ;;  %11801 = vpow2.f32 %v7747_v34 }
 0xe26   : > { %v8176_v38 = vpop.permute.xlu1 %8175 }
 0xe27   : > { %v8181_v17 = vsel %vm2497_vm10, %v8176_v38, 0 }
 0xe28   : > { %7648 = vmax.xlane.f32.xlu0 %v7647_v35  ;;  %8190 = vmatpush.bf16.msra.mxu2 %v8181_v17 }
 0xe29   : > { %v11798_v32 = vpop.eup %11797  ;;  %v8110_v57 = vpop.f32.mrf.mxu2 }
 0xe2a   : > { %v16705_v52 = vpop.f32.mrf.mxu3  ;;  %v7913_v25 = vmul.f32 %v11798_v32, %v16598_v53  ;;  %v16711_v29 = vpop.eup %11799  ;;  %v7650_v53 = vsel %vm1310_vm8, %v16719_v5, -inf }
 0xe2b   : > { %v11093_v60 = vpack.i.bf16 %v16705_v52, %v16693_v63  ;;  %10885 = vmatmul.msk.bf16.vlgmr.msra.gmra.mxu2 %vm1310_vm8, %v7943_v2  ;;  %v7845_v28 = vsel %vm1310_vm8, %v16711_v29, 0.0  ;;  %v16734_v44 = vpop.eup %11801  ;;  %v19044_v63 = vld [vmem:[#allocation59_spill] sm:$0xff] }
 0xe2c   : > { %v7945_v0 = vpack.c.bf16 %v7913_v25, %v7913_v25 }
 0xe2e   : > { %10887 = vmatmul.msk.bf16.vlgmr.msrb.gmra.mxu0 %vm1310_vm8, %v7945_v0 }
 0xe30   : > { %7846 = vadd.xlane.f32.xlu0 %v7845_v28 }
 0xe32   : > { %v8131_v22 = vpop.f32.mrf.mxu3 }
 0xe37   : > { %8385 = vrot.lane.b32.xlu2 %v18972_v55, %s11985_s11 }
 0xe39   : > { %7651 = vmax.xlane.f32.xlu1 %v7650_v53 }
 0xe44   : > { %8322 = vrot.lane.b32.xlu0 %v18927_v11, %s11985_s11 }
 0xe45   : > { %v7814_v54 = vpop.xlane.xlu0 %7813 }
 0xe46   : > { %11803 = vrcp.f32 %v7814_v54 }
 0xe4c   : > { %8343 = vrot.lane.b32.xlu0 %v18921_v43, %s11985_s11  ;;  %v11804_v42 = vpop.eup %11803 }
 0xe4d   : > { %v7667_v40 = vpop.xlane.xlu0 %7666 }
 0xe4e   : > { %v7705_v14 = vsub.f32 %v16623_v26, %v7667_v40  ;;  %v7830_v26 = vsel %vm1310_vm8, %v16734_v44, 0.0 }
 0xe50   : > { %v7765_v11 = vmul.f32 1.442695, %v7705_v14 }
 0xe51   : > { %v7637_v1 = vpop.xlane.xlu1 %7636 }
 0xe52   : > { %v7695_v33 = vsub.f32 %v16631_v4, %v7637_v1 }
 0xe54   : > { %v7745_v55 = vmul.f32 1.442695, %v7695_v33  ;;  %8364 = vrot.lane.b32.xlu0 %v18925_v3, %s11985_s11  ;;  %v7914_v3 = vmul.f32 %v11804_v42, %v16613_v51  ;;  %v7656_v51 = vsel %vm1310_vm8, %v16749_v16, -inf }
 0xe56   : > { %11805 = vpow2.f32 %v7745_v55  ;;  %v7946_v38 = vpack.c.bf16 %v7914_v3, %v7914_v3 }
 0xe57   : > { %11807 = vpow2.f32 %v7765_v11  ;;  %v16776_v11 = vsel %vm13682_vm9, %v16499_v37, -1e+30  ;;  %v19013_v37 = vld [vmem:[#allocation63_spill] sm:$0xff] }
 0xe59   : > { %v7823_v30 = vpop.xlane.xlu1 %7822 }
 0xe5a   : > { %11809 = vrcp.f32 %v7823_v30  ;;  %v7659_v30 = vsel %vm1310_vm8, %v16776_v11, -inf }
 0xe5c   : > { %v16736_v43 = vpop.eup %11805  ;;  %v7820_v35 = vpop.xlane.xlu2 %7819 }
 0xe5d   : > { %v16738_v20 = vpop.f32.mrf.mxu1  ;;  %v7827_v4 = vsel %vm1310_vm8, %v16736_v43, 0.0  ;;  %v16751_v46 = vpop.eup %11807  ;;  %11811 = vrcp.f32 %v7820_v35 }
 0xe5e   : > { %7828 = vadd.xlane.f32.xlu1 %v7827_v4  ;;  %v7857_v45 = vsel %vm1310_vm8, %v16751_v46, 0.0 }
 0xe60   : > { %7831 = vadd.xlane.f32.xlu2 %v7830_v26  ;;  %v8239_v58 = vpop.permute.xlu0 %8238  ;;  %v11810_v17 = vpop.eup %11809 }
 0xe61   : > { %v8244_v9 = vsel %vm2497_vm10, %v8239_v58, 0  ;;  %v7817_v15 = vpop.xlane.xlu1 %7816  ;;  %v7917_v2 = vmul.f32 %v11810_v17, %v16640_v13 }
 0xe62   : > { %8253 = vmatpush.bf16.msra.mxu1 %v8244_v9 }
 0xe63   : > { %v7949_v54 = vpack.c.bf16 %v7917_v2, %v7917_v2  ;;  %v11812_v36 = vpop.eup %11811 }
 0xe64   : > { %v7916_v13 = vmul.f32 %v11812_v36, %v16645_v23  ;;  %v7835_v58 = vpop.xlane.xlu2 %7834 }
 0xe65   : > { %v8173_v32 = vpop.f32.mrf.mxu1  ;;  %10888 = vmatmul.msk.bf16.vlgmr.msra.gmra.mxu1 %vm1310_vm8, %v7946_v38  ;;  %v19015_v38 = vld [vmem:[#allocation56_spill] sm:$0xff] }
 0xe66   : > { %7657 = vmax.xlane.f32.xlu1 %v7656_v51  ;;  %v7948_v55 = vpack.c.bf16 %v7916_v13, %v7916_v13 }
 0xe68   : > { %7858 = vadd.xlane.f32.xlu2 %v7857_v45  ;;  %v8302_v57 = vpop.permute.xlu0 %8301 }
 0xe69   : > { %v8307_v25 = vsel %vm2497_vm10, %v8302_v57, 0  ;;  %v7646_v0 = vpop.xlane.xlu1 %7645  ;;  %v16760_v28 = vpop.f32.mrf.mxu0  ;;  %v16806_v57 = vsel %vm13682_vm9, %v16501_v18, -1e+30 }
 0xe6a   : > { %v7698_v22 = vsub.f32 %v16669_v24, %v7646_v0  ;;  %v11108_v53 = vpack.i.bf16 %v16738_v20, %v16760_v28  ;;  %8316 = vmatpush.bf16.msra.mxu0 %v8307_v25  ;;  %v7662_v0 = vsel %vm1310_vm8, %v16806_v57, -inf  ;;  %v19051_v28 = vld [vmem:[#allocation114_spill] sm:$0xff] }
 0xe6c   : > { %v7751_v34 = vmul.f32 1.442695, %v7698_v22 }
 0xe6d   : > { %10891 = vmatmul.msk.bf16.vlgmr.msra.gmra.mxu0 %vm1310_vm8, %v7949_v54 }
 0xe6e   : > { %11813 = vpow2.f32 %v7751_v34 }
 0xe6f   : > { %11815 = vrcp.f32 %v7817_v15 }
 0xe70   : > { %v8281_v1 = vpop.permute.xlu0 %8280  ;;  %11817 = vrcp.f32 %v7835_v58  ;;  %v19020_v58 = vld [vmem:[#allocation57_spill] sm:$0xff] }
 0xe71   : > { %v8286_v40 = vsel %vm2497_vm10, %v8281_v1, 0  ;;  %v8152_v33 = vpop.f32.mrf.mxu0 }
 0xe72   : > { %8295 = vmatpush.bf16.msra.mxu3 %v8286_v40  ;;  %v19018_v40 = vld [vmem:[#allocation68_spill] sm:$0xff] }
 0xe74   : > { %v16768_v14 = vpop.eup %11813 }
 0xe75   : > { %10890 = vmatmul.msk.bf16.vlgmr.msra.gmra.mxu3 %vm1310_vm8, %v7948_v55  ;;  %v7836_v24 = vsel %vm1310_vm8, %v16768_v14, 0.0  ;;  %v11816_v23 = vpop.eup %11815 }
 0xe76   : > { %7837 = vadd.xlane.f32.xlu2 %v7836_v24  ;;  %v7915_v42 = vmul.f32 %v11816_v23, %v16655_v12  ;;  %v11818_v15 = vpop.eup %11817  ;;  %v19014_v12 = vld [vmem:[#allocation81_spill] sm:$0xff] }
 0xe77   : > { %v19016_v35 = vpack.i.bf16 %v19014_v12, %v19015_v38  ;;  %v19022_v12 = vld [vmem:[#allocation100_spill] sm:$0xff]  ;;  %v19023_v38 = vld [vmem:[#allocation105_spill] sm:$0xff] }
 0xe78   : > { %v7947_v26 = vpack.c.bf16 %v7915_v42, %v7915_v42 }
 0xe7e   : > { %7660 = vmax.xlane.f32.xlu0 %v7659_v30 }
 0xe7f   : > { %8469 = vrot.lane.b32.xlu1 %v18980_v31, %s11985_s11  ;;  %v7921_v31 = vmul.f32 %v11818_v15, %v16658_v62 }
 0xe81   : > { %v8260_v4 = vpop.permute.xlu1 %8259 }
 0xe82   : > { %v8265_v3 = vsel %vm2497_vm10, %v8260_v4, 0 }
 0xe83   : > { %8274 = vmatpush.bf16.msrb.mxu2 %v8265_v3 }
 0xe86   : > { %10889 = vmatmul.msk.bf16.vlgmr.msrb.gmra.mxu2 %vm1310_vm8, %v7947_v26 }
 0xe8e   : > { %8553 = vrot.lane.b32.xlu2 %v18992_v21, %s11985_s11  ;;  %v7953_v21 = vpack.c.bf16 %v7921_v31, %v7921_v31 }
 0xe92   : > { %8406 = vrot.lane.b32.xlu0 %v19013_v37, %s11985_s11  ;;  %v7826_v9 = vpop.xlane.xlu2 %7825  ;;  %v16846_v37 = vsel %vm13682_vm9, %v16554_v61, -1e+30  ;;  %v19025_v61 = vld [vmem:[#allocation75_spill] sm:$0xff] }
 0xe93   : > { %v7674_v31 = vsel %vm1310_vm8, %v16846_v37, -inf }
 0xe9a   : > { %11039 = vrot.lane.b32.xlu0 %v19016_v35, %s11986_s12  ;;  %v8386_v17 = vpop.permute.xlu2 %8385  ;;  %v19024_v35 = vpack.i.bf16 %v19022_v12, %v19023_v38 }
 0xe9b   : > { %v8391_v51 = vsel %vm2497_vm10, %v8386_v17, 0  ;;  %v7649_v32 = vpop.xlane.xlu0 %7648 }
 0xe9c   : > { %8400 = vmatpush.bf16.msrb.mxu0 %v8391_v51  ;;  %v7699_v45 = vsub.f32 %v16698_v47, %v7649_v32  ;;  %v19017_v47 = vld [vmem:[#allocation66_spill] sm:$0xff] }
 0xe9d   : > { %v16795_v2 = vpop.f32.mrf.mxu3 }
 0xe9e   : > { %v7753_v62 = vmul.f32 1.442695, %v7699_v45  ;;  %v19027_v45 = vld [vmem:[#allocation98_spill] sm:$0xff] }
 0xe9f   : > { %10895 = vmatmul.msk.bf16.vlgmr.msrb.gmra.mxu0 %vm1310_vm8, %v7953_v21  ;;  %v19026_v21 = vld [vmem:[#allocation102_spill] sm:$0xff] }
 0xea0   : > { %11819 = vpow2.f32 %v7753_v62  ;;  %v19028_v62 = vpack.i.bf16 %v19026_v21, %v19027_v45 }
 0xea1   : > { %11821 = vrcp.f32 %v7826_v9 }
 0xea2   : > { %11049 = vrot.lane.b32.xlu0 %v11048_v59, %s11987_s13 }
 0xea3   : > { %v7847_v54 = vpop.xlane.xlu0 %7846 }
 0xea5   : > { %v8215_v25 = vpop.f32.mrf.mxu3 }
 0xea6   : > { %v16814_v39 = vpop.eup %11819 }
 0xea7   : > { %v7839_v13 = vsel %vm1310_vm8, %v16814_v39, 0.0  ;;  %v11822_v1 = vpop.eup %11821 }
 0xea8   : > { %v7918_v55 = vmul.f32 %v11822_v1, %v16684_v7 }
 0xea9   : > { %7663 = vmax.xlane.f32.xlu1 %v7662_v0 }
 0xeaa   : > { %8427 = vrot.lane.b32.xlu0 %v19017_v47, %s11985_s11  ;;  %v7950_v26 = vpack.c.bf16 %v7918_v55, %v7918_v55 }
 0xeab   : > { %v16812_v22 = vpop.f32.mrf.mxu0 }
 0xeac   : > { %v7652_v19 = vpop.xlane.xlu1 %7651 }
 0xead   : > { %v7700_v59 = vsub.f32 %v16719_v5, %v7652_v19  ;;  %v16828_v5 = vsel %vm13682_vm9, %v16550_v8, -1e+30  ;;  %v19019_v8 = vld [vmem:[#allocation69_spill] sm:$0xff] }
 0xeae   : > { %v16817_v18 = vpop.f32.mrf.mxu2  ;;  %v7668_v4 = vsel %vm1310_vm8, %v16828_v5, -inf  ;;  %v19021_v7 = vpack.i.bf16 %v19019_v8, %v19020_v58 }
 0xeaf   : > { %v7755_v36 = vmul.f32 1.442695, %v7700_v59  ;;  %v11123_v34 = vpack.i.bf16 %v16795_v2, %v16817_v18 }
 0xeb1   : > { %11823 = vpow2.f32 %v7755_v36  ;;  %7840 = vadd.xlane.f32.xlu1 %v7839_v13 }
 0xeb2   : > { %8448 = vrot.lane.b32.xlu0 %v19018_v40, %s11985_s11 }
 0xeb3   : > { %v8236_v33 = vpop.f32.mrf.mxu0 }
 0xeb6   : > { %v8194_v24 = vpop.f32.mrf.mxu2  ;;  %v8323_v23 = vpop.permute.xlu0 %8322 }
 0xeb7   : > { %v16831_v30 = vpop.eup %11823  ;;  %v8328_v42 = vsel %vm2497_vm10, %v8323_v23, 0 }
 0xeb8   : > { %8337 = vmatpush.bf16.msrb.mxu1 %v8328_v42  ;;  %v7842_v3 = vsel %vm1310_vm8, %v16831_v30, 0.0 }
 0xeb9   : > { %7843 = vadd.xlane.f32.xlu2 %v7842_v3  ;;  %7669 = vmax.xlane.f32.xlu1 %v7668_v4 }
 0xeba   : > { %11054 = vrot.lane.b32.xlu0 %v19021_v7, %s11986_s12 }
 0xebb   : > { %10892 = vmatmul.msk.bf16.vlgmr.msrb.gmra.mxu1 %vm1310_vm8, %v7950_v26 }
 0xebe   : > { %v8344_v9 = vpop.permute.xlu0 %8343 }
 0xebf   : > { %v8349_v15 = vsel %vm2497_vm10, %v8344_v9, 0 }
 0xec0   : > { %8358 = vmatpush.bf16.msra.mxu2 %v8349_v15 }
 0xec1   : > { %7675 = vmax.xlane.f32.xlu2 %v7674_v31 }
 0xec2   : > { %11059 = vrot.lane.b32.xlu0 %v19024_v35, %s11988_s14 }
 0xec6   : > { %v8365_v17 = vpop.permute.xlu0 %8364 }
 0xec7   : > { %v8370_v51 = vsel %vm2497_vm10, %v8365_v17, 0 }
 0xec8   : > { %8379 = vmatpush.bf16.msrb.mxu3 %v8370_v51 }
 0xeca   : > { %8490 = vrot.lane.b32.xlu0 %v19025_v61, %s11985_s11 }
 0xed1   : > { %v7829_v32 = vpop.xlane.xlu1 %7828 }
 0xed2   : > { %11825 = vrcp.f32 %v7829_v32  ;;  %11044 = vrot.lane.b32.xlu1 %v19028_v62, %s11988_s14 }
 0xed3   : > { %v7832_v25 = vpop.xlane.xlu2 %7831 }
 0xed4   : > { %11827 = vrcp.f32 %v7832_v25 }
 0xed8   : > { %v11826_v0 = vpop.eup %11825 }
 0xed9   : > { %v7919_v47 = vmul.f32 %v11826_v0, %v16736_v43  ;;  %v7658_v19 = vpop.xlane.xlu1 %7657 }
 0xeda   : > { %v11828_v59 = vpop.eup %11827  ;;  %v7702_v36 = vsub.f32 %v16749_v16, %v7658_v19  ;;  %v19030_v19 = vld [vmem:[#allocation67_spill] sm:$0xff] }
 0xedb   : > { %v7951_v13 = vpack.c.bf16 %v7919_v47, %v7919_v47  ;;  %v7920_v1 = vmul.f32 %v11828_v59, %v16734_v44  ;;  %v7859_v55 = vpop.xlane.xlu2 %7858  ;;  %v19029_v47 = vld [vmem:[#allocation72_spill] sm:$0xff] }
 0xedc   : > { %v7759_v40 = vmul.f32 1.442695, %v7702_v36  ;;  %v19031_v59 = vpack.i.bf16 %v19029_v47, %v19030_v19 }
 0xedd   : > { %v7952_v33 = vpack.c.bf16 %v7920_v1, %v7920_v1  ;;  %10893 = vmatmul.msk.bf16.vlgmr.msra.gmra.mxu2 %vm1310_vm8, %v7951_v13 }
 0xede   : > { %11829 = vpow2.f32 %v7759_v40 }
 0xedf   : > { %10894 = vmatmul.msk.bf16.vlgmr.msrb.gmra.mxu3 %vm1310_vm8, %v7952_v33  ;;  %11831 = vrcp.f32 %v7847_v54  ;;  %v19032_v33 = vld [vmem:[#allocation21_spill] sm:$0xff] }
 0xee0   : > { %11833 = vrcp.f32 %v7859_v55  ;;  %v19033_v55 = vld [vmem:[#allocation20_spill] sm:$0xff] }
 0xee2   : > { %v16867_v24 = vpop.f32.mrf.mxu1 }
 0xee3   : > { %v11138_v43 = vpack.i.bf16 %v16867_v24, %v16812_v22 }
 0xee4   : > { %v16871_v23 = vpop.eup %11829 }
 0xee5   : > { %v7848_v16 = vsel %vm1310_vm8, %v16871_v23, 0.0  ;;  %v11832_v3 = vpop.eup %11831 }
 0xee6   : > { %7849 = vadd.xlane.f32.xlu2 %v7848_v16  ;;  %v7925_v26 = vmul.f32 %v11832_v3, %v16711_v29  ;;  %v16885_v29 = vsel %vm13682_vm9, %v16552_v56, -1e+30  ;;  %v19034_v16 = vpack.i.bf16 %v19032_v33, %v19033_v55  ;;  %v19035_v3 = vld [vmem:[#allocation10_spill] sm:$0xff] }
 0xee7   : > { %v7671_v17 = vsel %vm1310_vm8, %v16885_v29, -inf  ;;  %v19043_v55 = vld [vmem:[#allocation54_spill] sm:$0xff] }
 0xee8   : > { %v7957_v38 = vpack.c.bf16 %v7925_v26, %v7925_v26 }
 0xee9   : > { %v7838_v44 = vpop.xlane.xlu2 %7837 }
 0xeea   : > { %v8257_v42 = vpop.f32.mrf.mxu1  ;;  %v16875_v4 = vpop.f32.mrf.mxu0 }
 0xef1   : > { %v8470_v8 = vpop.permute.xlu1 %8469  ;;  %v8554_v58 = vpop.permute.xlu2 %8553 }
 0xef2   : > { %v8475_v7 = vsel %vm2497_vm10, %v8470_v8, 0  ;;  %v8559_v9 = vsel %vm2497_vm10, %v8554_v58, 0  ;;  %v7661_v15 = vpop.xlane.xlu0 %7660  ;;  %v8320_v31 = vpop.f32.mrf.mxu0  ;;  %v10992_v58 = vld [vmem:[%s18424_s3 + $0x8] sm:$0xff] }
 0xef3   : > { %v7703_v12 = vsub.f32 %v16776_v11, %v7661_v15  ;;  %8484 = vmatpush.bf16.msra.mxu0 %v8475_v7  ;;  %v11834_v11 = vpop.eup %11833 }
 0xef4   : > { %v7929_v61 = vmul.f32 %v11834_v11, %v16751_v46  ;;  %v19037_v11 = vld [vmem:[#allocation92_spill] sm:$0xff] }
 0xef5   : > { %v7761_v54 = vmul.f32 1.442695, %v7703_v12 }
 0xef6   : > { %10899 = vmatmul.msk.bf16.vlgmr.msra.gmra.mxu0 %vm1310_vm8, %v7957_v38  ;;  %v7961_v45 = vpack.c.bf16 %v7929_v61, %v7929_v61 }
 0xef7   : > { %8568 = vmatpush.bf16.msrb.mxu0 %v8559_v9  ;;  %11835 = vpow2.f32 %v7761_v54  ;;  %v10991_v9 = vld [vmem:[%s18424_s3] sm:$0xff] }
 0xef8   : > { %v16887_v35 = vpop.f32.mrf.mxu3  ;;  %11837 = vrcp.f32 %v7838_v44 }
 0xefb   : > { %9205 = vmatpush.bf16.msra.mxu0 %v10992_v58 }
 0xefc   : > { %7672 = vmax.xlane.f32.xlu1 %v7671_v17  ;;  %v19036_v17 = vld [vmem:[#allocation94_spill] sm:$0xff] }
 0xefd   : > { %v16891_v51 = vpop.eup %11835 }
 0xefe   : > { %11064 = vrot.lane.b32.xlu2 %v11063_v6, %s11987_s13  ;;  %v7851_v27 = vsel %vm1310_vm8, %v16891_v51, 0.0  ;;  %v11838_v56 = vpop.eup %11837 }
 0xeff   : > { %7852 = vadd.xlane.f32.xlu0 %v7851_v27  ;;  %v7922_v21 = vmul.f32 %v11838_v56, %v16768_v14  ;;  %v19038_v27 = vpack.i.bf16 %v19036_v17, %v19037_v11  ;;  %9206 = vmatpush.bf16.msra.mxu0 %v10991_v9  ;;  %v19047_v9 = vld [vmem:[#allocation89_spill] sm:$0xff] }
 0xf00   : > { %v8299_v32 = vpop.f32.mrf.mxu3 }
 0xf01   : > { %v7954_v0 = vpack.c.bf16 %v7922_v21, %v7922_v21 }
 0xf04   : > { %v8407_v62 = vpop.permute.xlu0 %8406 }
 0xf05   : > { %v8412_v25 = vsel %vm2497_vm10, %v8407_v62, 0  ;;  %v19040_v62 = vld [vmem:[#allocation99_spill] sm:$0xff] }
 0xf06   : > { %8421 = vmatpush.bf16.msra.mxu1 %v8412_v25  ;;  %10903 = vmatmul.msk.bf16.vlgmr.msrb.gmra.mxu0 %vm1310_vm8, %v7961_v45  ;;  %v19039_v45 = vld [vmem:[#allocation112_spill] sm:$0xff] }
 0xf09   : > { %v16903_v41 = vpop.f32.mrf.mxu2  ;;  %10896 = vmatmul.msk.bf16.vlgmr.msra.gmra.mxu1 %vm1310_vm8, %v7954_v0 }
 0xf0a   : > { %v11153_v10 = vpack.i.bf16 %v16887_v35, %v16903_v41 }
 0xf0c   : > { %v16908_v6 = vpop.permute.xlu0 %11039 }
 0xf11   : > { %v8278_v46 = vpop.f32.mrf.mxu2 }
 0xf13   : > { %11079 = vrot.lane.b32.xlu0 %v11078_v50, %s11987_s13 }
 0xf14   : > { %v16914_v14 = vpop.permute.xlu0 %11049 }
 0xf15   : > { %11069 = vrot.lane.b32.xlu1 %v19031_v59, %s11986_s12 }
 0xf1c   : > { %v7664_v36 = vpop.xlane.xlu1 %7663  ;;  %v16920_v13 = vpop.f32.mrf.mxu0 }
 0xf1d   : > { %v7704_v1 = vsub.f32 %v16806_v57, %v7664_v36  ;;  %v8428_v40 = vpop.permute.xlu0 %8427  ;;  %11074 = vrot.lane.b32.xlu1 %v19034_v16, %s11988_s14  ;;  %v11042_v36 = vunpack.i.h.bf16 %v16908_v6 }
 0xf1e   : > { %v8433_v48 = vsel %vm2497_vm10, %v8428_v40, 0  ;;  %v11041_v40 = vunpack.i.l.bf16 %v16908_v6 }
 0xf1f   : > { %v7763_v49 = vmul.f32 1.442695, %v7704_v1  ;;  %8442 = vmatpush.bf16.msrb.mxu2 %v8433_v48  ;;  %v19042_v1 = vld [vmem:[#allocation5_spill] sm:$0xff]  ;;  %v9022_v16 = vsel %vm1310_vm8, %v19043_v55, %v11042_v36  ;;  %v19052_v36 = vld [vmem:[#allocation103_spill] sm:$0xff] }
 0xf20   : > { %v9021_v52 = vsel %vm1310_vm8, %v19044_v63, %v11041_v40 }
 0xf21   : > { %11839 = vpow2.f32 %v7763_v49 }
 0xf24   : > { %v8404_v50 = vpop.f32.mrf.mxu0  ;;  %v7841_v44 = vpop.xlane.xlu1 %7840 }
 0xf25   : > { %11841 = vrcp.f32 %v7841_v44  ;;  %v8449_v42 = vpop.permute.xlu0 %8448  ;;  %8511 = vrot.lane.b32.xlu1 %v19035_v3, %s11985_s11  ;;  %v11051_v50 = vunpack.i.l.bf16 %v16914_v14 }
 0xf26   : > { %v8454_v57 = vsel %vm2497_vm10, %v8449_v42, 0 }
 0xf27   : > { %v16931_v26 = vpop.eup %11839  ;;  %8463 = vmatpush.bf16.msra.mxu3 %v8454_v57 }
 0xf28   : > { %v7854_v8 = vsel %vm1310_vm8, %v16931_v26, 0.0 }
 0xf29   : > { %7855 = vadd.xlane.f32.xlu2 %v7854_v8  ;;  %v19045_v8 = vld [vmem:[#allocation7_spill] sm:$0xff] }
 0xf2b   : > { %v11842_v7 = vpop.eup %11841 }
 0xf2c   : > { %v7923_v15 = vmul.f32 %v11842_v7, %v16814_v39  ;;  %v7844_v31 = vpop.xlane.xlu2 %7843  ;;  %v7670_v12 = vpop.xlane.xlu1 %7669  ;;  %v19046_v7 = vld [vmem:[#allocation76_spill] sm:$0xff] }
 0xf2d   : > { %11843 = vrcp.f32 %v7844_v31  ;;  %v7706_v38 = vsub.f32 %v16828_v5, %v7670_v12  ;;  %v11055_v54 = vpop.permute.xlu0 %11054  ;;  %11084 = vrot.lane.b32.xlu1 %v19038_v27, %s11986_s12  ;;  %v19041_v5 = vpack.i.bf16 %v19039_v45, %v19040_v62  ;;  %v19050_v45 = vld [vmem:[#allocation113_spill] sm:$0xff] }
 0xf2e   : > { %v7955_v56 = vpack.c.bf16 %v7923_v15, %v7923_v15  ;;  %v11057_v31 = vunpack.i.h.bf16 %v11055_v54  ;;  %v11056_v12 = vunpack.i.l.bf16 %v11055_v54 }
 0xf2f   : > { %v7767_v61 = vmul.f32 1.442695, %v7706_v38 }
 0xf30   : > { %10897 = vmatmul.msk.bf16.vlgmr.msrb.gmra.mxu2 %vm1310_vm8, %v7955_v56  ;;  %v9024_v20 = vsel %vm1310_vm8, %v19050_v45, %v11057_v31 }
 0xf31   : > { %11845 = vpow2.f32 %v7767_v61 }
 0xf33   : > { %v11844_v32 = vpop.eup %11843 }
 0xf34   : > { %v7924_v39 = vmul.f32 %v11844_v32, %v16831_v30  ;;  %v7676_v58 = vpop.xlane.xlu2 %7675  ;;  %v19049_v32 = vld [vmem:[#allocation22_spill] sm:$0xff] }
 0xf35   : > { %v11060_v21 = vpop.permute.xlu0 %11059  ;;  %11089 = vrot.lane.b32.xlu1 %v19041_v5, %s11988_s14  ;;  %v7708_v27 = vsub.f32 %v16846_v37, %v7676_v58 }
 0xf36   : > { %v7956_v25 = vpack.c.bf16 %v7924_v39, %v7924_v39  ;;  %v11062_v38 = vunpack.i.h.bf16 %v11060_v21  ;;  %v11061_v17 = vunpack.i.l.bf16 %v11060_v21 }
 0xf37   : > { %v16956_v46 = vpop.eup %11845 }
 0xf38   : > { %v16953_v0 = vpop.f32.mrf.mxu1  ;;  %10898 = vmatmul.msk.bf16.vlgmr.msra.gmra.mxu3 %vm1310_vm8, %v7956_v25  ;;  %v7860_v47 = vsel %vm1310_vm8, %v16956_v46, 0.0  ;;  %v9057_v37 = vsel %vm9053_vm12, %v9024_v20, %v11062_v38  ;;  %v19059_v38 = vld [vmem:[#allocation90_spill] sm:$0xff] }
 0xf39   : > { %v11168_v22 = vpack.i.bf16 %v16953_v0, %v16875_v4  ;;  %v19057_v0 = vld [vmem:[#allocation27_spill] sm:$0xff] }
 0xf3d   : > { %7861 = vadd.xlane.f32.xlu0 %v7860_v47  ;;  %v8491_v19 = vpop.permute.xlu0 %8490  ;;  %11094 = vrot.lane.b32.xlu1 %v11093_v60, %s11987_s13  ;;  %v11052_v60 = vunpack.i.h.bf16 %v16914_v14  ;;  %v19048_v14 = vpack.i.bf16 %v19046_v7, %v19047_v9  ;;  %v7771_v47 = vmul.f32 1.442695, %v7708_v27  ;;  %v19056_v9 = vld [vmem:[#allocation13_spill] sm:$0xff] }
 0xf3e   : > { %v8496_v30 = vsel %vm2497_vm10, %v8491_v19, 0 }
 0xf3f   : > { %8505 = vmatpush.bf16.msrb.mxu1 %v8496_v30 }
 0xf40   : > { %v8341_v59 = vpop.f32.mrf.mxu1 }
 0xf41   : > { %8532 = vrot.lane.b32.xlu2 %v19042_v1, %s11985_s11  ;;  %v19053_v1 = vld [vmem:[#allocation70_spill] sm:$0xff] }
 0xf42   : > { %v19054_v40 = vpack.i.bf16 %v19052_v36, %v19053_v1 }
 0xf44   : > { %v11045_v33 = vpop.permute.xlu1 %11044 }
 0xf45   : > { %v11047_v48 = vunpack.i.h.bf16 %v11045_v33  ;;  %v11046_v49 = vunpack.i.l.bf16 %v11045_v33 }
 0xf47   : > { %v9054_v44 = vsel %vm9053_vm12, %v9021_v52, %v11046_v49  ;;  %v9055_v42 = vsel %vm9053_vm12, %v9022_v16, %v11047_v48 }
 0xf48   : > { %v9087_v6 = vsel %vm9086_vm11, %v9054_v44, %v11051_v50  ;;  %v9088_v3 = vsel %vm9086_vm11, %v9055_v42, %v11052_v60 }
 0xf49   : > { %v9119_v57 = vpack.c.bf16 %v9088_v3, %v9087_v6  ;;  %8574 = vrot.lane.b32.xlu2 %v19045_v8, %s11985_s11 }
 0xf4b   : > { %10915 = vmatmul.msk.bf16.vlgmr.msra.gmra.mxu0 %vm321_vm0, %v9119_v57 }
 0xf51   : > { %11099 = vrot.lane.b32.xlu0 %v19048_v14, %s11986_s12 }
 0xf59   : > { %11109 = vrot.lane.b32.xlu0 %v11108_v53, %s11987_s13  ;;  %v7850_v15 = vpop.xlane.xlu2 %7849  ;;  %v9023_v53 = vsel %vm1310_vm8, %v19051_v28, %v11056_v12  ;;  %v19058_v12 = vld [vmem:[#allocation79_spill] sm:$0xff] }
 0xf5a   : > { %11847 = vrcp.f32 %v7850_v15  ;;  %v9056_v21 = vsel %vm9053_vm12, %v9023_v53, %v11061_v17  ;;  %v19060_v17 = vpack.i.bf16 %v19058_v12, %v19059_v38  ;;  %v19084_v12 = vld [vmem:[#allocation84_spill] sm:$0xff]  ;;  %v19085_v38 = vld [vmem:[#allocation18_spill] sm:$0xff] }
 0xf5b   : > { %11849 = vpow2.f32 %v7771_v47  ;;  %v19068_v47 = vld [vmem:[#allocation108_spill] sm:$0xff] }
 0xf60   : > { %v11848_v11 = vpop.eup %11847  ;;  %v8360_v56 = vpop.f32.mrf.mxu2 }
 0xf61   : > { %v7926_v61 = vmul.f32 %v11848_v11, %v16871_v23  ;;  %8616 = vrot.lane.b32.xlu0 %v19049_v32, %s11985_s11  ;;  %v11065_v39 = vpop.permute.xlu2 %11064  ;;  %v17008_v55 = vpop.eup %11849  ;;  %v19061_v32 = vld [vmem:[#allocation109_spill] sm:$0xff] }
 0xf62   : > { %v11067_v62 = vunpack.i.h.bf16 %v11065_v39  ;;  %v11066_v54 = vunpack.i.l.bf16 %v11065_v39  ;;  %v8381_v5 = vpop.f32.mrf.mxu3  ;;  %v7866_v49 = vsel %vm1310_vm8, %v17008_v55, 0.0  ;;  %v19062_v39 = vld [vmem:[#allocation111_spill] sm:$0xff] }
 0xf63   : > { %v7958_v25 = vpack.c.bf16 %v7926_v61, %v7926_v61  ;;  %v11183_v41 = vpack.i.bf16 %v8381_v5, %v8360_v56  ;;  %v19063_v45 = vpack.i.bf16 %v19061_v32, %v19062_v39  ;;  %v19064_v5 = vld [vmem:[#allocation29_spill] sm:$0xff] }
 0xf64   : > { %v9089_v23 = vsel %vm9086_vm11, %v9056_v21, %v11066_v54  ;;  %v9090_v19 = vsel %vm9086_vm11, %v9057_v37, %v11067_v62  ;;  %v19065_v21 = vld [vmem:[#allocation74_spill] sm:$0xff] }
 0xf65   : > { %v9120_v30 = vpack.c.bf16 %v9090_v19, %v9089_v23  ;;  %10900 = vmatmul.msk.bf16.vlgmr.msrb.gmra.mxu1 %vm1310_vm8, %v7958_v25  ;;  %v19066_v37 = vpack.i.bf16 %v19064_v5, %v19065_v21  ;;  %v19070_v19 = vld [vmem:[#allocation82_spill] sm:$0xff] }
 0xf67   : > { %10916 = vmatmul.msk.bf16.gmra.mxu0 %vm321_vm0, %v9120_v30  ;;  %v19071_v30 = vld [vmem:[#allocation106_spill] sm:$0xff] }
 0xf68   : > { %v8362_v59 = vpop.f32.mrf.mxu2 }
 0xf69   : > { %11114 = vrot.lane.b32.xlu0 %v19054_v40, %s11986_s12  ;;  %v19072_v59 = vpack.i.bf16 %v19070_v19, %v19071_v30  ;;  %v19099_v30 = vld [vmem:[#allocation104_spill] sm:$0xff] }
 0xf6a   : > { %v8383_v33 = vpop.f32.mrf.mxu3 }
 0xf6f   : > { %v7673_v16 = vpop.xlane.xlu1 %7672 }
 0xf70   : > { %v7707_v48 = vsub.f32 %v16885_v29, %v7673_v16  ;;  %v19073_v16 = vld [vmem:[#allocation83_spill] sm:$0xff] }
 0xf71   : > { %11124 = vrot.lane.b32.xlu0 %v11123_v34, %s11987_s13 }
 0xf72   : > { %v7769_v63 = vmul.f32 1.442695, %v7707_v48  ;;  %7867 = vadd.xlane.f32.xlu2 %v7866_v49  ;;  %v7853_v34 = vpop.xlane.xlu0 %7852  ;;  %v19074_v48 = vld [vmem:[#allocation97_spill] sm:$0xff] }
 0xf73   : > { %v17017_v52 = vpop.f32.mrf.mxu0  ;;  %v19075_v49 = vpack.i.bf16 %v19073_v16, %v19074_v48  ;;  %v19105_v48 = vld [vmem:[#allocation55_spill] sm:$0xff] }
 0xf74   : > { %11851 = vpow2.f32 %v7769_v63 }
 0xf75   : > { %11853 = vrcp.f32 %v7853_v34  ;;  %v19077_v34 = vld [vmem:[#allocation86_spill] sm:$0xff] }
 0xf79   : > { %11139 = vrot.lane.b32.xlu0 %v11138_v43, %s11987_s13  ;;  %v19055_v43 = vld [vmem:[#allocation19_spill] sm:$0xff] }
 0xf7a   : > { %v17023_v60 = vpop.eup %11851 }
 0xf7b   : > { %v8488_v29 = vpop.f32.mrf.mxu0  ;;  %v7863_v2 = vsel %vm1310_vm8, %v17023_v60, 0.0  ;;  %v11854_v11 = vpop.eup %11853 }
 0xf7c   : > { %7864 = vadd.xlane.f32.xlu1 %v7863_v2  ;;  %v7927_v20 = vmul.f32 %v11854_v11, %v16891_v51  ;;  %v19067_v51 = vld [vmem:[#allocation96_spill] sm:$0xff]  ;;  %v19076_v2 = vld [vmem:[#allocation38_spill] sm:$0xff] }
 0xf7e   : > { %v7959_v54 = vpack.c.bf16 %v7927_v20, %v7927_v20 }
 0xf81   : > { %11154 = vrot.lane.b32.xlu0 %v11153_v10, %s11987_s13 }
 0xf83   : > { %v17031_v18 = vpop.f32.mrf.mxu0 }
 0xf85   : > { %v11080_v3 = vpop.permute.xlu0 %11079 }
 0xf86   : > { %v8423_v50 = vpop.f32.mrf.mxu1  ;;  %v11082_v58 = vunpack.i.h.bf16 %v11080_v3  ;;  %v11081_v7 = vunpack.i.l.bf16 %v11080_v3  ;;  %v19080_v3 = vld [vmem:[#allocation48_spill] sm:$0xff] }
 0xf87   : > { %v11070_v24 = vpop.permute.xlu1 %11069  ;;  %v11198_v28 = vpack.i.bf16 %v8423_v50, %v16920_v13  ;;  %v19069_v13 = vpack.i.bf16 %v19067_v51, %v19068_v47  ;;  %v19078_v50 = vpack.i.bf16 %v19076_v2, %v19077_v34 }
 0xf88   : > { %v11072_v42 = vunpack.i.h.bf16 %v11070_v24  ;;  %v11071_v6 = vunpack.i.l.bf16 %v11070_v24 }
 0xf89   : > { %11169 = vrot.lane.b32.xlu0 %v11168_v22, %s11987_s13 }
 0xf8a   : > { %8595 = vrot.lane.b32.xlu2 %v19055_v43, %s11985_s11  ;;  %v9026_v4 = vsel %vm1310_vm8, %v19056_v9, %v11072_v42  ;;  %v9025_v14 = vsel %vm1310_vm8, %v19057_v0, %v11071_v6  ;;  %v19079_v6 = vld [vmem:[#allocation31_spill] sm:$0xff] }
 0xf8b   : > { %v8572_v44 = vpop.f32.mrf.mxu0 }
 0xf8e   : > { %v8425_v35 = vpop.f32.mrf.mxu1 }
 0xf8f   : > { %v11075_v10 = vpop.permute.xlu1 %11074  ;;  %v19081_v35 = vpack.i.bf16 %v19079_v6, %v19080_v3 }
 0xf90   : > { %v11077_v57 = vunpack.i.h.bf16 %v11075_v10  ;;  %v11076_v8 = vunpack.i.l.bf16 %v11075_v10  ;;  %v19082_v10 = vld [vmem:[#allocation15_spill] sm:$0xff] }
 0xf91   : > { %11184 = vrot.lane.b32.xlu0 %v11183_v41, %s11987_s13 }
 0xf92   : > { %v9058_v15 = vsel %vm9053_vm12, %v9025_v14, %v11076_v8  ;;  %v9059_v31 = vsel %vm9053_vm12, %v9026_v4, %v11077_v57  ;;  %11129 = vrot.lane.b32.xlu2 %v19060_v17, %s11986_s12  ;;  %v19083_v8 = vld [vmem:[#allocation36_spill] sm:$0xff]  ;;  %v19086_v17 = vpack.i.bf16 %v19084_v12, %v19085_v38 }
 0xf93   : > { %v9091_v27 = vsel %vm9086_vm11, %v9058_v15, %v11081_v7  ;;  %v9092_v56 = vsel %vm9086_vm11, %v9059_v31, %v11082_v58 }
 0xf94   : > { %v9121_v61 = vpack.c.bf16 %v9092_v56, %v9091_v27  ;;  %v19087_v56 = vld [vmem:[#allocation34_spill] sm:$0xff] }
 0xf95   : > { %11104 = vrot.lane.b32.xlu1 %v19063_v45, %s11988_s14 }
 0xf96   : > { %10917 = vmatmul.msk.bf16.gmra.mxu0 %vm321_vm0, %v9121_v61  ;;  %v19088_v61 = vld [vmem:[#allocation23_spill] sm:$0xff] }
 0xf97   : > { %v8512_v53 = vpop.permute.xlu1 %8511  ;;  %v19089_v32 = vpack.i.bf16 %v19087_v56, %v19088_v61 }
 0xf98   : > { %v8517_v62 = vsel %vm2497_vm10, %v8512_v53, 0  ;;  %v19091_v53 = vld [vmem:[#allocation87_spill] sm:$0xff] }
 0xf99   : > { %11199 = vrot.lane.b32.xlu0 %v11198_v28, %s11987_s13  ;;  %8526 = vmatpush.bf16.msra.mxu2 %v8517_v62  ;;  %v19090_v28 = vld [vmem:[#allocation91_spill] sm:$0xff] }
 0xf9a   : > { %11144 = vrot.lane.b32.xlu2 %v19066_v37, %s11986_s12  ;;  %v19092_v62 = vpack.i.bf16 %v19090_v28, %v19091_v53  ;;  %v19093_v37 = vld [vmem:[#allocation43_spill] sm:$0xff]  ;;  %v19108_v53 = vld [vmem:[#allocation52_spill] sm:$0xff] }
 0xf9c   : > { %v7856_v25 = vpop.xlane.xlu2 %7855  ;;  %10901 = vmatmul.msk.bf16.vlgmr.msra.gmra.mxu2 %vm1310_vm8, %v7959_v54 }
 0xf9d   : > { %11855 = vrcp.f32 %v7856_v25  ;;  %11119 = vrot.lane.b32.xlu1 %v19069_v13, %s11988_s14  ;;  %v19094_v25 = vld [vmem:[#allocation28_spill] sm:$0xff]  ;;  %v19096_v13 = vld [vmem:[#allocation41_spill] sm:$0xff] }
 0xf9e   : > { %v19095_v51 = vpack.i.bf16 %v19093_v37, %v19094_v25 }
 0xf9f   : > { %v11085_v23 = vpop.permute.xlu1 %11084 }
 0xfa0   : > { %v11087_v22 = vunpack.i.h.bf16 %v11085_v23 }
 0xfa2   : > { %11159 = vrot.lane.b32.xlu2 %v19072_v59, %s11986_s12  ;;  %v9028_v57 = vsel %vm1310_vm8, %v19082_v10, %v11087_v22  ;;  %v19100_v59 = vld [vmem:[#allocation88_spill] sm:$0xff] }
 0xfa3   : > { %v11856_v36 = vpop.eup %11855 }
 0xfa4   : > { %v7928_v1 = vmul.f32 %v11856_v36, %v16931_v26  ;;  %v8533_v40 = vpop.permute.xlu2 %8532  ;;  %v11086_v26 = vunpack.i.l.bf16 %v11085_v23  ;;  %v19097_v23 = vld [vmem:[#allocation37_spill] sm:$0xff]  ;;  %v19101_v36 = vpack.i.bf16 %v19099_v30, %v19100_v59 }
 0xfa5   : > { %v8538_v33 = vsel %vm2497_vm10, %v8533_v40, 0  ;;  %11134 = vrot.lane.b32.xlu1 %v19075_v49, %s11988_s14  ;;  %v19098_v19 = vpack.i.bf16 %v19096_v13, %v19097_v23  ;;  %v19102_v40 = vld [vmem:[#allocation51_spill] sm:$0xff]  ;;  %v19106_v49 = vld [vmem:[#allocation49_spill] sm:$0xff]  ;;  %v19111_v13 = vld [vmem:[#allocation46_spill] sm:$0xff] }
 0xfa6   : > { %v7960_v63 = vpack.c.bf16 %v7928_v1, %v7928_v1  ;;  %8547 = vmatpush.bf16.msrb.mxu3 %v8538_v33  ;;  %v9027_v58 = vsel %vm1310_vm8, %v19083_v8, %v11086_v26  ;;  %v19103_v33 = vld [vmem:[#allocation39_spill] sm:$0xff]  ;;  %v17140_v26 = vld [vmem:[%s18422_s1 + $0x4] ss:$0 sm:$0xff] }
 0xfa7   : > { %v11090_v29 = vpop.permute.xlu1 %11089  ;;  %v19104_v16 = vpack.i.bf16 %v19102_v40, %v19103_v33  ;;  %v19113_v40 = vld [vmem:[#allocation95_spill] sm:$0xff]  ;;  %v19114_v33 = vld [vmem:[#allocation53_spill] sm:$0xff] }
 0xfa8   : > { %v11092_v43 = vunpack.i.h.bf16 %v11090_v29  ;;  %v11091_v44 = vunpack.i.l.bf16 %v11090_v29 }
 0xfa9   : > { %10902 = vmatmul.msk.bf16.vlgmr.msrb.gmra.mxu3 %vm1310_vm8, %v7960_v63  ;;  %v19107_v63 = vpack.i.bf16 %v19105_v48, %v19106_v49 }
 0xfaa   : > { %11174 = vrot.lane.b32.xlu2 %v19078_v50, %s11986_s12  ;;  %v9060_v0 = vsel %vm9053_vm12, %v9027_v58, %v11091_v44  ;;  %v9061_v14 = vsel %vm9053_vm12, %v9028_v57, %v11092_v43  ;;  %v11929_v50 = vld [vmem:[%s12045_s30] sm:$0xff]  ;;  %v11930_v58 = vld [vmem:[%s12045_s30 + $0x18] sm:$0xff] }
 0xfac   : > { %v8575_v24 = vpop.permute.xlu2 %8574 }
 0xfad   : > { %v8580_v42 = vsel %vm2497_vm10, %v8575_v24, 0  ;;  %11149 = vrot.lane.b32.xlu1 %v19081_v35, %s11988_s14 }
 0xfae   : > { %8589 = vmatpush.bf16.msra.mxu1 %v8580_v42 }
 0xfaf   : > { %v11095_v41 = vpop.permute.xlu1 %11094 }
 0xfb0   : > { %v11097_v7 = vunpack.i.h.bf16 %v11095_v41  ;;  %v11096_v9 = vunpack.i.l.bf16 %v11095_v41  ;;  %v7862_v4 = vpop.xlane.xlu0 %7861 }
 0xfb1   : > { %11857 = vrcp.f32 %v7862_v4  ;;  %v11931_v4 = vld [vmem:[%s12045_s30 + $0x8] sm:$0xff] }
 0xfb2   : > { %v9093_v15 = vsel %vm9086_vm11, %v9060_v0, %v11096_v9  ;;  %v9094_v31 = vsel %vm9086_vm11, %v9061_v14, %v11097_v7  ;;  %11189 = vrot.lane.b32.xlu2 %v19086_v17, %s11986_s12 }
 0xfb3   : > { %v9122_v11 = vpack.c.bf16 %v9094_v31, %v9093_v15  ;;  %v8444_v27 = vpop.f32.mrf.mxu2 }
 0xfb5   : > { %11164 = vrot.lane.b32.xlu1 %v19089_v32, %s11988_s14  ;;  %10918 = vmatmul.msk.bf16.gmra.mxu0 %vm321_vm0, %v9122_v11  ;;  %v11932_v32 = vld [vmem:[%s12045_s30 + $0x10] sm:$0xff] }
 0xfb7   : > { %v11858_v39 = vpop.eup %11857 }
 0xfb8   : > { %v7930_v45 = vmul.f32 %v11858_v39, %v16956_v46 }
 0xfba   : > { %v7962_v20 = vpack.c.bf16 %v7930_v45, %v7930_v45  ;;  %11204 = vrot.lane.b32.xlu2 %v19092_v62, %s11986_s12 }
 0xfbb   : > { %v8446_v54 = vpop.f32.mrf.mxu2  ;;  %v8465_v5 = vpop.f32.mrf.mxu3 }
 0xfbc   : > { %v11213_v21 = vpack.i.bf16 %v8465_v5, %v8444_v27  ;;  %10904 = vmatmul.msk.bf16.vlgmr.msra.gmra.mxu1 %vm1310_vm8, %v7962_v20  ;;  %v19109_v54 = vld [vmem:[#allocation35_spill] sm:$0xff] }
 0xfbd   : > { %11179 = vrot.lane.b32.xlu1 %v19095_v51, %s11988_s14 }
 0xfbe   : > { %11214 = vrot.lane.b32.xlu0 %v11213_v21, %s11987_s13 }
 0xfc3   : > { %v11100_v46 = vpop.permute.xlu0 %11099  ;;  %v8467_v47 = vpop.f32.mrf.mxu3 }
 0xfc4   : > { %v11102_v56 = vunpack.i.h.bf16 %v11100_v46  ;;  %v11101_v61 = vunpack.i.l.bf16 %v11100_v46  ;;  %v19110_v47 = vld [vmem:[#allocation85_spill] sm:$0xff] }
 0xfc5   : > { %11194 = vrot.lane.b32.xlu1 %v19098_v19, %s11988_s14  ;;  %v19112_v23 = vpack.i.bf16 %v19110_v47, %v19111_v13  ;;  %v19120_v13 = vld [vmem:[#allocation107_spill] sm:$0xff] }
 0xfc6   : > { %11219 = vrot.lane.b32.xlu0 %v19101_v36, %s11986_s12  ;;  %v9030_v62 = vsel %vm1310_vm8, %v19108_v53, %v11102_v56  ;;  %v9029_v5 = vsel %vm1310_vm8, %v19109_v54, %v11101_v61  ;;  %v19119_v56 = vld [vmem:[#allocation44_spill] sm:$0xff] }
 0xfc8   : > { %v9208_v29 = vpop.f32.mrf.mxu0 }
 0xfc9   : > { %v9288_v22 = vadd.f32 %v11929_v50, %v9208_v29  ;;  %v11933_v50 = vld [vmem:[%s12045_s30 + $0x20] sm:$0xff] }
 0xfcb   : > { %v17125_v1 = vpop.permute.xlu0 %11109  ;;  %v17143_v43 = vadd.f32 %v17140_v26, %v9288_v22 }
 0xfcc   : > { %v11112_v21 = vunpack.i.h.bf16 %v17125_v1 }
 0xfcd   : > { %11209 = vrot.lane.b32.xlu1 %v19104_v16, %s11988_s14  ;;  %v9353_v42 = vsel %vm321_vm0, %v17143_v43, 0.0  ;;  %v19115_v16 = vpack.i.bf16 %v19113_v40, %v19114_v33 }
 0xfce   : > { %11224 = vrot.lane.b32.xlu0 %v19107_v63, %s11988_s14 }
 0xfd0   : > { %v9210_v24 = vpop.f32.mrf.mxu0 }
 0xfd1   : > { %v9289_v0 = vadd.f32 %v11931_v4, %v9210_v24  ;;  %v19116_v24 = vld [vmem:[#allocation115_spill] sm:$0xff] }
 0xfd3   : > { %v8617_v2 = vpop.permute.xlu0 %8616  ;;  %v17160_v12 = vadd.f32 %v17140_v26, %v9289_v0 }
 0xfd4   : > { %v8622_v34 = vsel %vm2497_vm10, %v8617_v2, 0 }
 0xfd5   : > { %8631 = vmatpush.bf16.msra.mxu3 %v8622_v34  ;;  %v9356_v17 = vsel %vm321_vm0, %v17160_v12, 0.0 }
 0xfdb   : > { %v11115_v37 = vpop.permute.xlu0 %11114 }
 0xfdc   : > { %v11117_v48 = vunpack.i.h.bf16 %v11115_v37  ;;  %v11116_v49 = vunpack.i.l.bf16 %v11115_v37 }
 0xfe2   : > { %v8507_v44 = vpop.f32.mrf.mxu1 }
 0xfe3   : > { %v11228_v6 = vpack.i.bf16 %v8507_v44, %v17017_v52  ;;  %9354 = vadd.xlane.f32.xlu2 %v9353_v42  ;;  %v11125_v34 = vpop.permute.xlu0 %11124  ;;  %v9032_v44 = vsel %vm1310_vm8, %v19116_v24, %v11117_v48  ;;  %v19117_v42 = vld [vmem:[#allocation30_spill] sm:$0xff] }
 0xfe4   : > { %v9213_v3 = vpop.f32.mrf.mxu0 }
 0xfe5   : > { %v7868_v35 = vpop.xlane.xlu2 %7867  ;;  %11229 = vrot.lane.b32.xlu0 %v11228_v6, %s11987_s13  ;;  %v9290_v39 = vadd.f32 %v11932_v32, %v9213_v3  ;;  %v9031_v6 = vsel %vm1310_vm8, %v19117_v42, %v11116_v49  ;;  %v11935_v49 = vld [vmem:[%s12045_s30 + $0x30] sm:$0xff] }
 0xfe6   : > { %11859 = vrcp.f32 %v7868_v35 }
 0xfe7   : > { %v17174_v25 = vadd.f32 %v17140_v26, %v9290_v39 }
 0xfe9   : > { %v9359_v36 = vsel %vm321_vm0, %v17174_v25, 0.0 }
 0xfea   : > { %v8509_v41 = vpop.f32.mrf.mxu1 }
 0xfec   : > { %v11860_v10 = vpop.eup %11859  ;;  %v9215_v57 = vpop.f32.mrf.mxu0 }
 0xfed   : > { %v7932_v8 = vmul.f32 %v11860_v10, %v17008_v55  ;;  %v9291_v7 = vadd.f32 %v11930_v58, %v9215_v57  ;;  %v8596_v9 = vpop.permute.xlu2 %8595  ;;  %v11127_v10 = vunpack.i.h.bf16 %v11125_v34  ;;  %v11126_v57 = vunpack.i.l.bf16 %v11125_v34  ;;  %v19123_v34 = vld [vmem:[#allocation24_spill] sm:$0xff] }
 0xfee   : > { %v8601_v14 = vsel %vm2497_vm10, %v8596_v9, 0 }
 0xfef   : > { %v7964_v15 = vpack.c.bf16 %v7932_v8, %v7932_v8  ;;  %v17154_v52 = vadd.f32 %v17140_v26, %v9291_v7  ;;  %v7865_v31 = vpop.xlane.xlu1 %7864  ;;  %8610 = vmatpush.bf16.msrb.mxu2 %v8601_v14 }
 0xff0   : > { %11861 = vrcp.f32 %v7865_v31 }
 0xff1   : > { %10906 = vmatmul.msk.bf16.vlgmr.msra.gmra.mxu3 %vm1310_vm8, %v7964_v15  ;;  %v9362_v55 = vsel %vm321_vm0, %v17154_v52, 0.0 }
 0xff2   : > { %9363 = vadd.xlane.f32.xlu2 %v9362_v55 }
 0xff5   : > { %v11130_v4 = vpop.permute.xlu2 %11129 }
 0xff6   : > { %v11862_v38 = vpop.eup %11861  ;;  %v11132_v15 = vunpack.i.h.bf16 %v11130_v4  ;;  %v11131_v31 = vunpack.i.l.bf16 %v11130_v4 }
 0xff7   : > { %v7931_v11 = vmul.f32 %v11862_v38, %v17023_v60  ;;  %9357 = vadd.xlane.f32.xlu1 %v9356_v17  ;;  %v11111_v60 = vunpack.i.l.bf16 %v17125_v1  ;;  %v11140_v17 = vpop.permute.xlu0 %11139 }
 0xff8   : > { %v9033_v61 = vsel %vm1310_vm8, %v19119_v56, %v11131_v31 }
 0xff9   : > { %v7963_v27 = vpack.c.bf16 %v7931_v11, %v7931_v11  ;;  %v19118_v11 = vld [vmem:[#allocation42_spill] sm:$0xff] }
 0xffb   : > { %10905 = vmatmul.msk.bf16.vlgmr.msrb.gmra.mxu2 %vm1310_vm8, %v7963_v27  ;;  %v9034_v27 = vsel %vm1310_vm8, %v19118_v11, %v11132_v15 }
0x1007   : > { %v11105_v45 = vpop.permute.xlu1 %11104 }
0x1008   : > { %v11107_v20 = vunpack.i.h.bf16 %v11105_v45  ;;  %v11106_v28 = vunpack.i.l.bf16 %v11105_v45  ;;  %v11142_v45 = vunpack.i.h.bf16 %v11140_v17 }
0x100a   : > { %v9062_v51 = vsel %vm9053_vm12, %v9029_v5, %v11106_v28  ;;  %v9063_v46 = vsel %vm9053_vm12, %v9030_v62, %v11107_v20  ;;  %11239 = vrot.lane.b32.xlu2 %v19112_v23, %s11988_s14  ;;  %v11141_v20 = vunpack.i.l.bf16 %v11140_v17  ;;  %v11145_v62 = vpop.permute.xlu2 %11144  ;;  %v19121_v23 = vld [vmem:[#allocation77_spill] sm:$0xff] }
0x100b   : > { %v9095_v19 = vsel %vm9086_vm11, %v9062_v51, %v11111_v60  ;;  %v9096_v30 = vsel %vm9086_vm11, %v9063_v46, %v11112_v21  ;;  %v11934_v21 = vld [vmem:[%s12045_s30 + $0x28] sm:$0xff] }
0x100c   : > { %v9123_v59 = vpack.c.bf16 %v9096_v30, %v9095_v19  ;;  %v19122_v19 = vpack.i.bf16 %v19120_v13, %v19121_v23 }
0x100e   : > { %10919 = vmatmul.msk.bf16.gmra.mxu0 %vm321_vm0, %v9123_v59  ;;  %v11147_v59 = vunpack.i.h.bf16 %v11145_v62 }
0x100f   : > { %v11120_v1 = vpop.permute.xlu1 %11119  ;;  %9360 = vadd.xlane.f32.xlu0 %v9359_v36  ;;  %v11146_v36 = vunpack.i.l.bf16 %v11145_v62 }
0x1010   : > { %11234 = vrot.lane.b32.xlu1 %v19115_v16, %s11986_s12  ;;  %v11122_v63 = vunpack.i.h.bf16 %v11120_v1  ;;  %v11121_v29 = vunpack.i.l.bf16 %v11120_v1 }
0x1012   : > { %v9064_v3 = vsel %vm9053_vm12, %v9031_v6, %v11121_v29  ;;  %v9065_v35 = vsel %vm9053_vm12, %v9032_v44, %v11122_v63  ;;  %v11160_v48 = vpop.permute.xlu2 %11159  ;;  %v11155_v29 = vpop.permute.xlu0 %11154 }
0x1013   : > { %v9218_v2 = vpop.f32.mrf.mxu0  ;;  %v9097_v58 = vsel %vm9086_vm11, %v9064_v3, %v11126_v57  ;;  %v9098_v7 = vsel %vm9086_vm11, %v9065_v35, %v11127_v10  ;;  %v11157_v3 = vunpack.i.h.bf16 %v11155_v29  ;;  %v11156_v35 = vunpack.i.l.bf16 %v11155_v29  ;;  %v19125_v10 = vld [vmem:[#allocation110_spill] sm:$0xff]  ;;  %v19126_v57 = vld [vmem:[#allocation45_spill] sm:$0xff] }
0x1014   : > { %v9292_v22 = vadd.f32 %v11933_v50, %v9218_v2  ;;  %v9124_v9 = vpack.c.bf16 %v9098_v7, %v9097_v58  ;;  %v9036_v50 = vsel %vm1310_vm8, %v19123_v34, %v11147_v59  ;;  %v11161_v56 = vunpack.i.l.bf16 %v11160_v48 }
0x1016   : > { %v17199_v41 = vadd.f32 %v17140_v26, %v9292_v22  ;;  %v19124_v22 = vld [vmem:[#allocation16_spill] sm:$0xff] }
0x1017   : > { %v11135_v0 = vpop.permute.xlu1 %11134  ;;  %v9035_v24 = vsel %vm1310_vm8, %v19124_v22, %v11146_v36 }
0x1018   : > { %v9365_v8 = vsel %vm321_vm0, %v17199_v41, 0.0  ;;  %v11137_v55 = vunpack.i.h.bf16 %v11135_v0  ;;  %v11136_v38 = vunpack.i.l.bf16 %v11135_v0 }
0x1019   : > { %9366 = vadd.xlane.f32.xlu0 %v9365_v8  ;;  %v19127_v8 = vpack.i.bf16 %v19125_v10, %v19126_v57  ;;  %v19135_v57 = vld [vmem:[#allocation2_spill] sm:$0xff] }
0x101a   : > { %v9067_v32 = vsel %vm9053_vm12, %v9034_v27, %v11137_v55  ;;  %v9066_v39 = vsel %vm9053_vm12, %v9033_v61, %v11136_v38  ;;  %v11175_v55 = vpop.permute.xlu2 %11174  ;;  %v11162_v27 = vunpack.i.h.bf16 %v11160_v48  ;;  %v19131_v48 = vld [vmem:[#allocation61_spill] sm:$0xff] }
0x101b   : > { %v9220_v28 = vpop.f32.mrf.mxu0  ;;  %v9099_v54 = vsel %vm9086_vm11, %v9066_v39, %v11141_v20  ;;  %v9100_v5 = vsel %vm9086_vm11, %v9067_v32, %v11142_v45  ;;  %v11170_v32 = vpop.permute.xlu0 %11169  ;;  %v11176_v59 = vunpack.i.l.bf16 %v11175_v55 }
0x101c   : > { %v9293_v60 = vadd.f32 %v11934_v21, %v9220_v28  ;;  %v9125_v51 = vpack.c.bf16 %v9100_v5, %v9099_v54  ;;  %v19128_v28 = vld [vmem:[#allocation64_spill] sm:$0xff]  ;;  %v11172_v21 = vunpack.i.h.bf16 %v11170_v32 }
0x101e   : > { %10920 = vmatmul.msk.bf16.gmra.mxu0 %vm321_vm0, %v9124_v9  ;;  %v17216_v47 = vadd.f32 %v17140_v26, %v9293_v60  ;;  %v11171_v60 = vunpack.i.l.bf16 %v11170_v32 }
0x101f   : > { %v8528_v14 = vpop.f32.mrf.mxu2  ;;  %v11150_v30 = vpop.permute.xlu1 %11149 }
0x1020   : > { %v11152_v1 = vunpack.i.h.bf16 %v11150_v30  ;;  %v11151_v40 = vunpack.i.l.bf16 %v11150_v30  ;;  %v9368_v16 = vsel %vm321_vm0, %v17216_v47, 0.0  ;;  %v11177_v30 = vunpack.i.h.bf16 %v11175_v55 }
0x1022   : > { %v9069_v44 = vsel %vm9053_vm12, %v9036_v50, %v11152_v1  ;;  %v9068_v42 = vsel %vm9053_vm12, %v9035_v24, %v11151_v40 }
0x1023   : > { %v9101_v7 = vsel %vm9086_vm11, %v9068_v42, %v11156_v35  ;;  %v9102_v9 = vsel %vm9086_vm11, %v9069_v44, %v11157_v3  ;;  %v11185_v13 = vpop.permute.xlu0 %11184  ;;  %v19132_v3 = vld [vmem:[#allocation101_spill] sm:$0xff] }
0x1024   : > { %v9126_v31 = vpack.c.bf16 %v9102_v9, %v9101_v7  ;;  %v11187_v34 = vunpack.i.h.bf16 %v11185_v13  ;;  %v11186_v50 = vunpack.i.l.bf16 %v11185_v13  ;;  %v19133_v35 = vld [vmem:[#allocation93_spill] sm:$0xff] }
0x1025   : > { %v19134_v10 = vpack.i.bf16 %v19132_v3, %v19133_v35 }
0x1027   : > { %v8530_v53 = vpop.f32.mrf.mxu2  ;;  %v11165_v11 = vpop.permute.xlu1 %11164 }
0x1028   : > { %v11167_v39 = vunpack.i.h.bf16 %v11165_v11  ;;  %v11166_v45 = vunpack.i.l.bf16 %v11165_v11  ;;  %v19129_v53 = vld [vmem:[#allocation50_spill] sm:$0xff] }
0x1029   : > { %v9037_v62 = vsel %vm1310_vm8, %v19129_v53, %v11161_v56 }
0x102a   : > { %v9070_v5 = vsel %vm9053_vm12, %v9037_v62, %v11166_v45 }
0x102c   : > { %v8549_v37 = vpop.f32.mrf.mxu3 }
0x102d   : > { %v11243_v46 = vpack.i.bf16 %v8549_v37, %v8528_v14  ;;  %11254 = vrot.lane.b32.xlu0 %v19122_v19, %s11988_s14  ;;  %v11936_v14 = vld [vmem:[%s12045_s30 + $0x38] sm:$0xff]  ;;  %v11190_v37 = vpop.permute.xlu2 %11189 }
0x102e   : > { %10921 = vmatmul.msk.bf16.gmra.mxu0 %vm321_vm0, %v9125_v51  ;;  %v9103_v51 = vsel %vm9086_vm11, %v9070_v5, %v11171_v60 }
0x102f   : > { %11244 = vrot.lane.b32.xlu1 %v11243_v46, %s11987_s13  ;;  %v11180_v19 = vpop.permute.xlu1 %11179 }
0x1030   : > { %v11182_v1 = vunpack.i.h.bf16 %v11180_v19  ;;  %v11181_v40 = vunpack.i.l.bf16 %v11180_v19 }
0x1032   : > { %v9223_v33 = vpop.f32.mrf.mxu0 }
0x1033   : > { %v9294_v63 = vadd.f32 %v11935_v49, %v9223_v33  ;;  %9369 = vadd.xlane.f32.xlu2 %v9368_v16  ;;  %v19130_v33 = vld [vmem:[#allocation14_spill] sm:$0xff]  ;;  %v9039_v49 = vsel %vm1310_vm8, %v19131_v48, %v11176_v59  ;;  %v19138_v59 = vld [vmem:[#allocation25_spill] sm:$0xff] }
0x1034   : > { %v8551_v2 = vpop.f32.mrf.mxu3  ;;  %v9040_v16 = vsel %vm1310_vm8, %v19130_v33, %v11177_v30 }
0x1035   : > { %v17234_v6 = vadd.f32 %v17140_v26, %v9294_v63  ;;  %v11205_v36 = vpop.permute.xlu2 %11204  ;;  %v11200_v63 = vpop.permute.xlu0 %11199  ;;  %v9073_v29 = vsel %vm9053_vm12, %v9040_v16, %v11182_v1  ;;  %v9072_v2 = vsel %vm9053_vm12, %v9039_v49, %v11181_v40  ;;  %v19139_v40 = vld [vmem:[#allocation33_spill] sm:$0xff] }
0x1036   : > { %v9105_v44 = vsel %vm9086_vm11, %v9072_v2, %v11186_v50  ;;  %v9106_v42 = vsel %vm9086_vm11, %v9073_v29, %v11187_v34  ;;  %v11201_v45 = vunpack.i.l.bf16 %v11200_v63 }
0x1037   : > { %11249 = vrot.lane.b32.xlu1 %v19127_v8, %s11986_s12  ;;  %v9371_v0 = vsel %vm321_vm0, %v17234_v6, 0.0  ;;  %v11195_v22 = vpop.permute.xlu1 %11194 }
0x1039   : > { %v8591_v58 = vpop.f32.mrf.mxu1 }
0x103a   : > { %v9225_v4 = vpop.f32.mrf.mxu0  ;;  %v11258_v38 = vpack.i.bf16 %v8591_v58, %v17031_v18  ;;  %v9038_v18 = vsel %vm1310_vm8, %v19128_v28, %v11162_v27  ;;  %v9128_v58 = vpack.c.bf16 %v9106_v42, %v9105_v44  ;;  %v19137_v27 = vld [vmem:[#allocation60_spill] sm:$0xff]  ;;  %v19141_v44 = vld [vmem:[#allocation58_spill] sm:$0xff] }
0x103b   : > { %v9295_v15 = vadd.f32 %v11936_v14, %v9225_v4  ;;  %9372 = vadd.xlane.f32.xlu2 %v9371_v0  ;;  %v9071_v54 = vsel %vm9053_vm12, %v9038_v18, %v11167_v39  ;;  %v11192_v4 = vunpack.i.h.bf16 %v11190_v37  ;;  %v11191_v0 = vunpack.i.l.bf16 %v11190_v37 }
0x103c   : > { %v9104_v46 = vsel %vm9086_vm11, %v9071_v54, %v11172_v21  ;;  %v11197_v14 = vunpack.i.h.bf16 %v11195_v22  ;;  %v11202_v39 = vunpack.i.h.bf16 %v11200_v63  ;;  %v11207_v37 = vunpack.i.h.bf16 %v11205_v36 }
0x103d   : > { %v17247_v17 = vadd.f32 %v17140_v26, %v9295_v15  ;;  %v9127_v23 = vpack.c.bf16 %v9104_v46, %v9103_v51  ;;  %v11215_v7 = vpop.permute.xlu0 %11214  ;;  %v11196_v15 = vunpack.i.l.bf16 %v11195_v22  ;;  %v9041_v56 = vsel %vm1310_vm8, %v19137_v27, %v11191_v0 }
0x103e   : > { %10922 = vmatmul.msk.bf16.gmra.mxu0 %vm321_vm0, %v9126_v31  ;;  %v11206_v51 = vunpack.i.l.bf16 %v11205_v36  ;;  %v9044_v1 = vsel %vm1310_vm8, %v19138_v59, %v11207_v37  ;;  %v11217_v49 = vunpack.i.h.bf16 %v11215_v7  ;;  %v11216_v63 = vunpack.i.l.bf16 %v11215_v7  ;;  %v19145_v59 = vld [vmem:[#allocation32_spill] sm:$0xff] }
0x103f   : > { %11259 = vrot.lane.b32.xlu1 %v11258_v38, %s11987_s13  ;;  %v9374_v20 = vsel %vm321_vm0, %v17247_v17, 0.0  ;;  %v11210_v31 = vpop.permute.xlu1 %11209  ;;  %v19136_v38 = vld [vmem:[#allocation62_spill] sm:$0xff]  ;;  %v9074_v32 = vsel %vm9053_vm12, %v9041_v56, %v11196_v15 }
0x1040   : > { %v9042_v11 = vsel %vm1310_vm8, %v19136_v38, %v11192_v4  ;;  %v9107_v18 = vsel %vm9086_vm11, %v9074_v32, %v11201_v45  ;;  %v11212_v13 = vunpack.i.h.bf16 %v11210_v31  ;;  %v9043_v33 = vsel %vm1310_vm8, %v19139_v40, %v11206_v51  ;;  %v19146_v40 = vld [vmem:[#allocation73_spill] sm:$0xff] }
0x1041   : > { %v8593_v61 = vpop.f32.mrf.mxu1 }
0x1042   : > { %v9075_v61 = vsel %vm9053_vm12, %v9042_v11, %v11197_v14  ;;  %v9077_v16 = vsel %vm9053_vm12, %v9044_v1, %v11212_v13  ;;  %v19144_v11 = vld [vmem:[#allocation65_spill] sm:$0xff] }
0x1043   : > { %9375 = vadd.xlane.f32.xlu2 %v9374_v20  ;;  %v9108_v53 = vsel %vm9086_vm11, %v9075_v61, %v11202_v39  ;;  %v9110_v29 = vsel %vm9086_vm11, %v9077_v16, %v11217_v49 }
0x1044   : > { %v9129_v5 = vpack.c.bf16 %v9108_v53, %v9107_v18 }
0x1045   : > { %v11220_v20 = vpop.permute.xlu0 %11219 }
0x1046   : > { %v11222_v35 = vunpack.i.h.bf16 %v11220_v20 }
0x104d   : > { %v11225_v19 = vpop.permute.xlu0 %11224 }
0x104e   : > { %10923 = vmatmul.msk.bf16.gmra.mxu0 %vm321_vm0, %v9127_v23  ;;  %v11211_v23 = vunpack.i.l.bf16 %v11210_v31  ;;  %v11226_v7 = vunpack.i.l.bf16 %v11225_v19 }
0x1050   : > { %v9076_v48 = vsel %vm9053_vm12, %v9043_v33, %v11211_v23 }
0x1051   : > { %v9109_v36 = vsel %vm9086_vm11, %v9076_v48, %v11216_v63 }
0x1052   : > { %v9130_v50 = vpack.c.bf16 %v9110_v29, %v9109_v36 }
0x1056   : > { %v9355_v24 = vpop.xlane.xlu2 %9354 }
0x1057   : > { %v9449_v8 = vmul.f32 %v9355_v24, %v19135_v57  ;;  %v11230_v2 = vpop.permute.xlu0 %11229  ;;  %v19140_v24 = vld [vmem:[#allocation12_spill] sm:$0xff] }
0x1058   : > { %v19142_v42 = vpack.i.bf16 %v19140_v24, %v19141_v44  ;;  %v11232_v0 = vunpack.i.h.bf16 %v11230_v2  ;;  %v11231_v14 = vunpack.i.l.bf16 %v11230_v2 }
0x1059   : > { %v17277_v9 = vsub.f32 %v17143_v43, %v9449_v8 }
0x105b   : > { %11264 = vrot.lane.b32.xlu2 %v19134_v10, %s11986_s12  ;;  %v9513_v55 = vmul.f32 %v17277_v9, %v17277_v9  ;;  %v11221_v10 = vunpack.i.l.bf16 %v11220_v20 }
0x105d   : > { %v9545_v28 = vsel %vm321_vm0, %v9513_v55, 0.0  ;;  %v19143_v55 = vld [vmem:[#allocation71_spill] sm:$0xff]  ;;  %v9045_v27 = vsel %vm1310_vm8, %v19144_v11, %v11221_v10  ;;  %v11938_v10 = vld [vmem:[%s12045_s30 + $0x40] sm:$0xff] }
0x105e   : > { %10924 = vmatmul.msk.bf16.gmra.mxu0 %vm321_vm0, %v9128_v58  ;;  %v11227_v58 = vunpack.i.h.bf16 %v11225_v19  ;;  %v9046_v38 = vsel %vm1310_vm8, %v19143_v55, %v11222_v35  ;;  %v9078_v61 = vsel %vm9053_vm12, %v9045_v27, %v11226_v7 }
0x105f   : > { %v9111_v39 = vsel %vm9086_vm11, %v9078_v61, %v11231_v14 }
0x1060   : > { %v9079_v32 = vsel %vm9053_vm12, %v9046_v38, %v11227_v58 }
0x1061   : > { %v9112_v45 = vsel %vm9086_vm11, %v9079_v32, %v11232_v0  ;;  %v11939_v32 = vld [vmem:[%s12045_s30 + $0x50] sm:$0xff] }
0x1062   : > { %v9131_v18 = vpack.c.bf16 %v9112_v45, %v9111_v39 }
0x1069   : > { %9546 = vadd.xlane.f32.xlu1 %v9545_v28 }
0x106a   : > { %v9358_v62 = vpop.xlane.xlu1 %9357 }
0x106b   : > { %v9450_v54 = vmul.f32 %v9358_v62, %v19135_v57  ;;  %v9364_v62 = vpop.xlane.xlu2 %9363 }
0x106d   : > { %v17292_v21 = vsub.f32 %v17160_v12, %v9450_v54  ;;  %v11937_v54 = vld [vmem:[%s12045_s30 + $0x48] sm:$0xff] }
0x106e   : > { %10925 = vmatmul.msk.bf16.gmra.mxu0 %vm321_vm0, %v9129_v5 }
0x106f   : > { %v9514_v60 = vmul.f32 %v17292_v21, %v17292_v21 }
0x1071   : > { %v9548_v46 = vsel %vm321_vm0, %v9514_v60, 0.0 }
0x1072   : > { %9549 = vadd.xlane.f32.xlu0 %v9548_v46 }
0x1073   : > { %v11240_v19 = vpop.permute.xlu2 %11239 }
0x1074   : > { %v8633_v30 = vpop.f32.mrf.mxu3  ;;  %v11242_v16 = vunpack.i.h.bf16 %v11240_v19  ;;  %v11241_v48 = vunpack.i.l.bf16 %v11240_v19 }
0x107c   : > { %v8635_v34 = vpop.f32.mrf.mxu3 }
0x107e   : > { %v8612_v22 = vpop.f32.mrf.mxu2  ;;  %10926 = vmatmul.msk.bf16.gmra.mxu0 %vm321_vm0, %v9130_v50 }
0x107f   : > { %v11273_v4 = vpack.i.bf16 %v8633_v30, %v8612_v22  ;;  %v9452_v30 = vmul.f32 %v9364_v62, %v19135_v57  ;;  %v19147_v62 = vld [vmem:[#allocation80_spill] sm:$0xff] }
0x1081   : > { %v17340_v29 = vsub.f32 %v17154_v52, %v9452_v30 }
0x1082   : > { %11269 = vrot.lane.b32.xlu1 %v19142_v42, %s11988_s14  ;;  %v9361_v3 = vpop.xlane.xlu0 %9360  ;;  %v11235_v51 = vpop.permute.xlu1 %11234  ;;  %s17922_s14 = scalar_lea.vmem %s18428_s7, %s10624_s27 }
0x1083   : > { %v9451_v8 = vmul.f32 %v9361_v3, %v19135_v57  ;;  %v11237_v13 = vunpack.i.h.bf16 %v11235_v51  ;;  %v11236_v23 = vunpack.i.l.bf16 %v11235_v51  ;;  %v9516_v7 = vmul.f32 %v17340_v29, %v17340_v29 }
0x1085   : > { %v17313_v15 = vsub.f32 %v17174_v25, %v9451_v8  ;;  %v9048_v1 = vsel %vm1310_vm8, %v19145_v59, %v11237_v13  ;;  %v9047_v33 = vsel %vm1310_vm8, %v19146_v40, %v11236_v23  ;;  %v9554_v38 = vsel %vm321_vm0, %v9516_v7, 0.0  ;;  %v11940_v40 = vld [vmem:[%s12045_s30 + $0x58] sm:$0xff] }
0x1086   : > { %v8614_v31 = vpop.f32.mrf.mxu2  ;;  %11274 = vrot.lane.b32.xlu0 %v11273_v4, %s11987_s13  ;;  %v9080_v34 = vsel %vm9053_vm12, %v9047_v33, %v11241_v48  ;;  %v9081_v50 = vsel %vm9053_vm12, %v9048_v1, %v11242_v16 }
0x1087   : > { %v9515_v56 = vmul.f32 %v17313_v15, %v17313_v15 }
0x1089   : > { %v9551_v20 = vsel %vm321_vm0, %v9515_v56, 0.0 }
0x108a   : > { %9552 = vadd.xlane.f32.xlu2 %v9551_v20 }
0x108b   : > { %v9228_v28 = vpop.f32.mrf.mxu0 }
0x108c   : > { %v9367_v2 = vpop.xlane.xlu0 %9366  ;;  %v9296_v8 = vadd.f32 %v11938_v10, %v9228_v28 }
0x108d   : > { %v9453_v3 = vmul.f32 %v9367_v2, %v19135_v57 }
0x108e   : > { %10927 = vmatmul.msk.bf16.gmra.mxu0 %vm321_vm0, %v9131_v18  ;;  %v17359_v31 = vadd.f32 %v17140_v26, %v9296_v8 }
0x108f   : > { %v17356_v14 = vsub.f32 %v17199_v41, %v9453_v3 }
0x1091   : > { %v9517_v28 = vmul.f32 %v17356_v14, %v17356_v14 }
0x1093   : > { %v9230_v53 = vpop.f32.mrf.mxu0  ;;  %v9557_v1 = vsel %vm321_vm0, %v9517_v28, 0.0 }
0x1094   : > { %v9297_v5 = vadd.f32 %v11937_v54, %v9230_v53  ;;  %v9377_v53 = vsel %vm321_vm0, %v17359_v31, 0.0 }
0x1096   : > { %v17330_v60 = vadd.f32 %v17140_v26, %v9297_v5  ;;  %v19148_v5 = vld [vmem:[#allocation40_spill] sm:$0xff] }
0x1098   : > { %v9380_v37 = vsel %vm321_vm0, %v17330_v60, 0.0 }
0x1099   : > { %9381 = vadd.xlane.f32.xlu2 %v9380_v37 }
0x109b   : > { %v9233_v46 = vpop.f32.mrf.mxu0 }
0x109c   : > { %v9298_v39 = vadd.f32 %v11939_v32, %v9233_v46 }
0x109e   : > { %v17379_v19 = vadd.f32 %v17140_v26, %v9298_v39 }
0x109f   : > { %v11255_v45 = vpop.permute.xlu0 %11254 }
0x10a0   : > { %v11257_v51 = vunpack.i.h.bf16 %v11255_v45  ;;  %v11256_v46 = vunpack.i.l.bf16 %v11255_v45 }
0x10a1   : > { %v11245_v49 = vpop.permute.xlu1 %11244 }
0x10a2   : > { %v11247_v63 = vunpack.i.h.bf16 %v11245_v49  ;;  %v11246_v36 = vunpack.i.l.bf16 %v11245_v49 }
0x10a3   : > { %v9235_v22 = vpop.f32.mrf.mxu0 }
0x10a4   : > { %v9113_v24 = vsel %vm9086_vm11, %v9080_v34, %v11246_v36  ;;  %v9114_v44 = vsel %vm9086_vm11, %v9081_v50, %v11247_v63  ;;  %v9299_v33 = vadd.f32 %v11940_v40, %v9235_v22  ;;  %v11941_v50 = vld [vmem:[%s12045_s30 + $0x68] sm:$0xff] }
0x10a5   : > { %v9132_v42 = vpack.c.bf16 %v9114_v44, %v9113_v24 }
0x10a6   : > { %v9370_v35 = vpop.xlane.xlu2 %9369 }
0x10a7   : > { %v9454_v58 = vmul.f32 %v9370_v35, %v19135_v57  ;;  %10928 = vmatmul.msk.bf16.gmra.mxu0 %vm321_vm0, %v9132_v42  ;;  %v17392_v42 = vadd.f32 %v17140_v26, %v9299_v33  ;;  %v9383_v35 = vsel %vm321_vm0, %v17379_v19, 0.0 }
0x10a9   : > { %v17353_v4 = vsub.f32 %v17216_v47, %v9454_v58  ;;  %v11250_v0 = vpop.permute.xlu1 %11249  ;;  %v11942_v58 = vld [vmem:[%s12045_s30 + $0x60] sm:$0xff] }
0x10aa   : > { %v11252_v27 = vunpack.i.h.bf16 %v11250_v0  ;;  %v11251_v56 = vunpack.i.l.bf16 %v11250_v0 }
0x10ab   : > { %v9238_v55 = vpop.f32.mrf.mxu0  ;;  %v9518_v11 = vmul.f32 %v17353_v4, %v17353_v4 }
0x10ac   : > { %9555 = vadd.xlane.f32.xlu1 %v9554_v38  ;;  %v9050_v54 = vsel %vm1310_vm8, %v19147_v62, %v11252_v27  ;;  %v9049_v37 = vsel %vm1310_vm8, %v19148_v5, %v11251_v56  ;;  %v9300_v7 = vadd.f32 %v11942_v58, %v9238_v55  ;;  %v9386_v38 = vsel %vm321_vm0, %v17392_v42, 0.0  ;;  %v11943_v27 = vld [vmem:[%s12045_s30 + $0x70] sm:$0xff]  ;;  %v10994_v62 = vld [vmem:[%s18425_s4 + $0x8] sm:$0xff]  ;;  %v19150_v58 = vld [vmem:[#allocation78_spill] sm:$0xff] }
0x10ad   : > { %v9560_v61 = vsel %vm321_vm0, %v9518_v11, 0.0  ;;  %v9082_v16 = vsel %vm9053_vm12, %v9049_v37, %v11256_v46  ;;  %v9083_v48 = vsel %vm9053_vm12, %v9050_v54, %v11257_v51  ;;  %10213 = vmatpush.bf16.msrb.mxu1 %v10994_v62  ;;  %11005 = vmatpush.bf16.msrb.mxu3 %v10994_v62 }
0x10ae   : > { %v9373_v20 = vpop.xlane.xlu2 %9372  ;;  %9561 = vadd.xlane.f32.xlu2 %v9560_v61  ;;  %v17413_v32 = vadd.f32 %v17140_v26, %v9300_v7 }
0x10af   : > { %v9455_v18 = vmul.f32 %v9373_v20, %v19135_v57 }
0x10b0   : > { %9378 = vadd.xlane.f32.xlu0 %v9377_v53  ;;  %v9389_v45 = vsel %vm321_vm0, %v17413_v32, 0.0 }
0x10b1   : > { %v17376_v13 = vsub.f32 %v17234_v6, %v9455_v18  ;;  %v11260_v23 = vpop.permute.xlu1 %11259 }
0x10b2   : > { %v11262_v30 = vunpack.i.h.bf16 %v11260_v23  ;;  %v11261_v59 = vunpack.i.l.bf16 %v11260_v23 }
0x10b3   : > { %v9240_v49 = vpop.f32.mrf.mxu0  ;;  %v9519_v63 = vmul.f32 %v17376_v13, %v17376_v13 }
0x10b4   : > { %v9115_v36 = vsel %vm9086_vm11, %v9082_v16, %v11261_v59  ;;  %v9116_v2 = vsel %vm9086_vm11, %v9083_v48, %v11262_v30  ;;  %9558 = vadd.xlane.f32.xlu1 %v9557_v1  ;;  %v9301_v24 = vadd.f32 %v11941_v50, %v9240_v49 }
0x10b5   : > { %v9133_v34 = vpack.c.bf16 %v9116_v2, %v9115_v36  ;;  %v9563_v44 = vsel %vm321_vm0, %v9519_v63, 0.0  ;;  %v10993_v2 = vld [vmem:[%s18425_s4] sm:$0xff] }
0x10b6   : > { %v9376_v22 = vpop.xlane.xlu2 %9375  ;;  %9564 = vadd.xlane.f32.xlu2 %v9563_v44  ;;  %v17399_v10 = vadd.f32 %v17140_v26, %v9301_v24  ;;  %10214 = vmatpush.bf16.msrb.mxu1 %v10993_v2 }
0x10b7   : > { %v9456_v3 = vmul.f32 %v9376_v22, %v19135_v57  ;;  %10929 = vmatmul.msk.bf16.gmra.mxu0 %vm321_vm0, %v9133_v34  ;;  %11006 = vmatpush.bf16.msrb.mxu3 %v10993_v2 }
0x10b8   : > { %9384 = vadd.xlane.f32.xlu0 %v9383_v35  ;;  %v9392_v61 = vsel %vm321_vm0, %v17399_v10, 0.0 }
0x10b9   : > { %v17402_v8 = vsub.f32 %v17247_v17, %v9456_v3  ;;  %v19149_v3 = vld [vmem:[#allocation47_spill] sm:$0xff] }
0x10bb   : > { %v9243_v0 = vpop.f32.mrf.mxu0  ;;  %v9520_v11 = vmul.f32 %v17402_v8, %v17402_v8 }
0x10bc   : > { %9387 = vadd.xlane.f32.xlu1 %v9386_v38  ;;  %v9302_v56 = vadd.f32 %v11943_v27, %v9243_v0  ;;  %v17438_v0 = vld [vmem:[%s18422_s1 + $0x2] ss:$0 sm:$0xff] }
0x10bd   : > { %v9566_v39 = vsel %vm321_vm0, %v9520_v11, 0.0 }
0x10be   : > { %9393 = vadd.xlane.f32.xlu2 %v9392_v61  ;;  %v17417_v55 = vadd.f32 %v17140_v26, %v9302_v56  ;;  %v11265_v40 = vpop.permute.xlu2 %11264 }
0x10bf   : > { %v11267_v49 = vunpack.i.h.bf16 %v11265_v40  ;;  %v11266_v63 = vunpack.i.l.bf16 %v11265_v40 }
0x10c0   : > { %9567 = vadd.xlane.f32.xlu0 %v9566_v39  ;;  %v9395_v20 = vsel %vm321_vm0, %v17417_v55, 0.0 }
0x10c1   : > { %v9052_v35 = vsel %vm1310_vm8, %v19149_v3, %v11267_v49  ;;  %v9051_v7 = vsel %vm1310_vm8, %v19150_v58, %v11266_v63 }
0x10c4   : > { %9390 = vadd.xlane.f32.xlu1 %v9389_v45 }
0x10c6   : > { %9396 = vadd.xlane.f32.xlu2 %v9395_v20 }
0x10dc   : > { %v9547_v28 = vpop.xlane.xlu1 %9546 }
0x10dd   : > { %v9641_v18 = vmul.f32 %v9547_v28, %v19135_v57 }
0x10df   : > { %v9673_v53 = vadd.f32 1e-05, %v9641_v18 }
0x10e1   : > { %11863 = vrsqrt.f32 %v9673_v53  ;;  %vm9711_vm14 = vweird.f32 %v9673_v53 }
0x10e5   : > { %v9550_v54 = vpop.xlane.xlu0 %9549 }
0x10e6   : > { %v9642_v5 = vmul.f32 %v9550_v54, %v19135_v57 }
0x10e7   : > { %v11864_v37 = vpop.eup %11863 }
0x10e8   : > { %v9706_v51 = vmul.f32 %v11864_v37, %v9673_v53  ;;  %v9674_v46 = vadd.f32 1e-05, %v9642_v5  ;;  %vm9712_vm13 = vweird.f32 %v11864_v37  ;;  %v17448_v53 = vld [vmem:[%s18422_s1 + $0x3] ss:$0 sm:$0xff] }
0x10e9   : > { %vm9713_vm15 = vmor %vm9711_vm14, %vm9712_vm13 }
0x10ea   : > { %v9707_v23 = vmul.f32 %v11864_v37, %v9706_v51  ;;  %11865 = vrsqrt.f32 %v9674_v46  ;;  %vm9721_vm2 = vweird.f32 %v9674_v46 }
0x10ec   : > { %v9708_v30 = vmul.f32 0.5, %v9707_v23 }
0x10ee   : > { %v9709_v59 = vsub.f32 1.5, %v9708_v30  ;;  %v9245_v30 = vpop.f32.mrf.mxu0 }
0x10f0   : > { %v11866_v1 = vpop.eup %11865  ;;  %v9710_v33 = vmul.f32 %v11864_v37, %v9709_v59 }
0x10f1   : > { %v9716_v16 = vmul.f32 %v11866_v1, %v9674_v46  ;;  %vm9722_vm1 = vweird.f32 %v11866_v1 }
0x10f2   : > { %v9714_v34 = vsel %vm9713_vm15, %v11864_v37, %v9710_v33  ;;  %vm9723_vm3 = vmor %vm9721_vm2, %vm9722_vm1 }
0x10f3   : > { %v9717_v48 = vmul.f32 %v11866_v1, %v9716_v16  ;;  %v10025_v38 = vmul.f32 %v9714_v34, %v17277_v9 }
0x10f4   : > { %v11270_v36 = vpop.permute.xlu1 %11269 }
0x10f5   : > { %v9718_v50 = vmul.f32 0.5, %v9717_v48  ;;  %v11272_v24 = vunpack.i.h.bf16 %v11270_v36  ;;  %v11271_v44 = vunpack.i.l.bf16 %v11270_v36  ;;  %v10058_v9 = vmul.f32 %v17438_v0, %v10025_v38 }
0x10f6   : > { %v9248_v48 = vpop.f32.mrf.mxu0 }
0x10f7   : > { %v9719_v22 = vsub.f32 1.5, %v9718_v50  ;;  %v9084_v39 = vsel %vm9053_vm12, %v9051_v7, %v11271_v44  ;;  %v9085_v45 = vsel %vm9053_vm12, %v9052_v35, %v11272_v24  ;;  %v10091_v37 = vadd.f32 %v17448_v53, %v10058_v9 }
0x10f8   : > { %v11275_v11 = vpop.permute.xlu0 %11274 }
0x10f9   : > { %v9720_v27 = vmul.f32 %v11866_v1, %v9719_v22  ;;  %v11277_v56 = vunpack.i.h.bf16 %v11275_v11  ;;  %v11276_v61 = vunpack.i.l.bf16 %v11275_v11 }
0x10fb   : > { %v9724_v20 = vsel %vm9723_vm3, %v11866_v1, %v9720_v27  ;;  %v9117_v28 = vsel %vm9086_vm11, %v9084_v39, %v11276_v61  ;;  %v9118_v18 = vsel %vm9086_vm11, %v9085_v45, %v11277_v56 }
0x10fc   : > { %v10026_v62 = vmul.f32 %v9724_v20, %v17292_v21  ;;  %v9134_v54 = vpack.c.bf16 %v9118_v18, %v9117_v28  ;;  %v11944_v18 = vld [vmem:[%s12045_s30 + $0x78] sm:$0xff] }
0x10fd   : > { %v9553_v23 = vpop.xlane.xlu2 %9552  ;;  %v9303_v9 = vadd.f32 %v11944_v18, %v9245_v30 }
0x10fe   : > { %v10059_v5 = vmul.f32 %v17438_v0, %v10026_v62  ;;  %10930 = vmatmul.msk.bf16.gmra.mxu0 %vm321_vm0, %v9134_v54  ;;  %v9643_v59 = vmul.f32 %v9553_v23, %v19135_v57  ;;  %v9250_v2 = vpop.f32.mrf.mxu0 }
0x1100   : > { %v10092_v51 = vadd.f32 %v17448_v53, %v10059_v5  ;;  %v9675_v21 = vadd.f32 1e-05, %v9643_v59 }
0x1102   : > { %v10123_v46 = vpack.c.bf16 %v10092_v51, %v10091_v37  ;;  %11867 = vrsqrt.f32 %v9675_v21  ;;  %vm9731_vm5 = vweird.f32 %v9675_v21 }
0x1104   : > { %10939 = vmatmul.msk.bf16.vlgmr.msrb.gmra.mxu1 %vm321_vm0, %v10123_v46 }
0x1106   : > { %v17474_v27 = vpop.f32.mrf.mxu0 }
0x1108   : > { %v11868_v63 = vpop.eup %11867 }
0x1109   : > { %v9726_v36 = vmul.f32 %v11868_v63, %v9675_v21  ;;  %vm9732_vm4 = vweird.f32 %v11868_v63 }
0x110a   : > { %vm17493_vm6 = vmor %vm9731_vm5, %vm9732_vm4 }
0x110b   : > { %v9727_v34 = vmul.f32 %v11868_v63, %v9726_v36 }
0x110c   : > { %v9382_v1 = vpop.xlane.xlu2 %9381 }
0x110d   : > { %v9458_v40 = vmul.f32 %v9382_v1, %v19135_v57  ;;  %v9728_v35 = vmul.f32 0.5, %v9727_v34 }
0x110f   : > { %v17460_v33 = vsub.f32 %v17330_v60, %v9458_v40  ;;  %v9729_v56 = vsub.f32 1.5, %v9728_v35  ;;  %v17491_v40 = vadd.f32 %v17140_v26, %v9303_v9  ;;  %v11945_v35 = vld [vmem:[%s12045_s30 + $0x80] sm:$0xff] }
0x1111   : > { %v9522_v16 = vmul.f32 %v17460_v33, %v17460_v33  ;;  %v9730_v5 = vmul.f32 %v11868_v63, %v9729_v56 }
0x1113   : > { %v9572_v49 = vsel %vm321_vm0, %v9522_v16, 0.0  ;;  %v9734_v36 = vsel %vm17493_vm6, %v11868_v63, %v9730_v5 }
0x1114   : > { %9573 = vadd.xlane.f32.xlu1 %v9572_v49 }
0x111f   : > { %v9556_v50 = vpop.xlane.xlu1 %9555 }
0x1120   : > { %v9644_v24 = vmul.f32 %v9556_v50, %v19135_v57 }
0x1121   : > { %v9562_v44 = vpop.xlane.xlu2 %9561 }
0x1122   : > { %v9676_v22 = vadd.f32 1e-05, %v9644_v24  ;;  %v9646_v3 = vmul.f32 %v9562_v44, %v19135_v57 }
0x1123   : > { %v9379_v58 = vpop.xlane.xlu0 %9378 }
0x1124   : > { %11869 = vrsqrt.f32 %v9676_v22  ;;  %v17467_v7 = vadd.f32 1e-05, %v9646_v3  ;;  %v9457_v38 = vmul.f32 %v9379_v58, %v19135_v57  ;;  %v9304_v58 = vadd.f32 %v11945_v35, %v9248_v48 }
0x1125   : > { %vm9741_vm8 = vweird.f32 %v9676_v22 }
0x1126   : > { %11871 = vrsqrt.f32 %v17467_v7  ;;  %v17472_v11 = vsub.f32 %v17359_v31, %v9457_v38  ;;  %v11946_v38 = vld [vmem:[%s12045_s30 + $0x88] sm:$0xff]  ;;  %vm9761_vm13 = vweird.f32 %v17467_v7 }
0x1127   : > { %v9559_v61 = vpop.xlane.xlu1 %9558  ;;  %v9305_v56 = vadd.f32 %v11946_v38, %v9250_v2 }
0x1128   : > { %v9645_v39 = vmul.f32 %v9559_v61, %v19135_v57  ;;  %v9521_v45 = vmul.f32 %v17472_v11, %v17472_v11  ;;  %v17510_v61 = vpop.f32.mrf.mxu0 }
0x1129   : > { %v9565_v20 = vpop.xlane.xlu2 %9564 }
0x112a   : > { %v11870_v28 = vpop.eup %11869  ;;  %v17480_v62 = vadd.f32 1e-05, %v9645_v39  ;;  %v9569_v54 = vsel %vm321_vm0, %v9521_v45, 0.0  ;;  %v9647_v51 = vmul.f32 %v9565_v20, %v19135_v57  ;;  %v10027_v20 = vmul.f32 %v9734_v36, %v17313_v15 }
0x112b   : > { %v9736_v37 = vmul.f32 %v11870_v28, %v9676_v22  ;;  %9570 = vadd.xlane.f32.xlu0 %v9569_v54  ;;  %v9385_v46 = vpop.xlane.xlu0 %9384  ;;  %vm9742_vm7 = vweird.f32 %v11870_v28  ;;  %v9398_v54 = vsel %vm321_vm0, %v17491_v40, 0.0  ;;  %v17531_v22 = vadd.f32 %v17140_v26, %v9305_v56 }
0x112c   : > { %v17484_v23 = vpop.eup %11871  ;;  %11873 = vrsqrt.f32 %v17480_v62  ;;  %v9459_v59 = vmul.f32 %v9385_v46, %v19135_v57  ;;  %v17502_v50 = vadd.f32 1e-05, %v9647_v51  ;;  %vm9743_vm9 = vmor %vm9741_vm8, %vm9742_vm7  ;;  %v17528_v46 = vadd.f32 %v17140_v26, %v9304_v58 }
0x112d   : > { %v9737_v30 = vmul.f32 %v11870_v28, %v9736_v37  ;;  %v9756_v1 = vmul.f32 %v17484_v23, %v17467_v7  ;;  %19154 = vst [vmem:[#allocation3_spill] sm:$0xff] %v17531_v22  ;;  %vm9762_vm11 = vweird.f32 %v17484_v23  ;;  %vm9751_vm12 = vweird.f32 %v17480_v62 }
0x112e   : > { %v17498_v49 = vsub.f32 %v17379_v19, %v9459_v59  ;;  %11875 = vrsqrt.f32 %v17502_v50  ;;  %19153 = vst [vmem:[#allocation11_spill] sm:$0xff] %v17528_v46  ;;  %v9401_v38 = vsel %vm321_vm0, %v17528_v46, 0.0  ;;  %vm17591_vm15 = vmor %vm9761_vm13, %vm9762_vm11  ;;  %vm9771_vm5 = vweird.f32 %v17502_v50 }
0x112f   : > { %v9738_v34 = vmul.f32 0.5, %v9737_v30  ;;  %v9388_v21 = vpop.xlane.xlu1 %9387  ;;  %v9757_v24 = vmul.f32 %v17484_v23, %v9756_v1 }
0x1130   : > { %v9460_v44 = vmul.f32 %v9388_v21, %v19135_v57  ;;  %v9523_v3 = vmul.f32 %v17498_v49, %v17498_v49 }
0x1131   : > { %v9739_v39 = vsub.f32 1.5, %v9738_v34  ;;  %v9394_v63 = vpop.xlane.xlu2 %9393  ;;  %v9758_v15 = vmul.f32 0.5, %v9757_v24  ;;  %v10060_v34 = vmul.f32 %v17438_v0, %v10027_v20  ;;  %v9258_v20 = vpop.f32.mrf.mxu0 }
0x1132   : > { %v17512_v45 = vpop.eup %11873  ;;  %v17516_v18 = vsub.f32 %v17392_v42, %v9460_v44  ;;  %v9575_v9 = vsel %vm321_vm0, %v9523_v3, 0.0  ;;  %v9462_v16 = vmul.f32 %v9394_v63, %v19135_v57  ;;  %v11947_v3 = vld [vmem:[%s12045_s30 + $0x90] sm:$0xff] }
0x1133   : > { %v9740_v48 = vmul.f32 %v11870_v28, %v9739_v39  ;;  %v9746_v2 = vmul.f32 %v17512_v45, %v17480_v62  ;;  %v9568_v5 = vpop.xlane.xlu0 %9567  ;;  %9576 = vadd.xlane.f32.xlu1 %v9575_v9  ;;  %9399 = vadd.xlane.f32.xlu0 %v9398_v54  ;;  %v9306_v35 = vadd.f32 %v11947_v3, %v17474_v27  ;;  %v9759_v26 = vsub.f32 1.5, %v9758_v15 }
0x1134   : > { %v9648_v37 = vmul.f32 %v9568_v5, %v19135_v57  ;;  %v9524_v51 = vmul.f32 %v17516_v18, %v17516_v18  ;;  %vm9752_vm10 = vweird.f32 %v17512_v45  ;;  %v17551_v39 = vsub.f32 %v17399_v10, %v9462_v16 }
0x1135   : > { %v9744_v59 = vsel %vm9743_vm9, %v11870_v28, %v9740_v48  ;;  %v9747_v30 = vmul.f32 %v17512_v45, %v9746_v2  ;;  %v17543_v28 = vpop.eup %11875  ;;  %v9404_v27 = vsel %vm321_vm0, %v17531_v22, 0.0  ;;  %v10093_v63 = vadd.f32 %v17448_v53, %v10060_v34  ;;  %vm17577_vm14 = vmor %vm9751_vm12, %vm9752_vm10 }
0x1136   : > { %v10028_v1 = vmul.f32 %v9744_v59, %v17340_v29  ;;  %v17536_v36 = vadd.f32 1e-05, %v9648_v37  ;;  %v9578_v44 = vsel %vm321_vm0, %v9524_v51, 0.0  ;;  %v9760_v5 = vmul.f32 %v17484_v23, %v9759_v26  ;;  %v17569_v37 = vld [vmem:[%s18422_s1 + $0x4] ss:$0 sm:$0xff] }
0x1137   : > { %v9748_v21 = vmul.f32 0.5, %v9747_v30  ;;  %v9391_v24 = vpop.xlane.xlu1 %9390  ;;  %9579 = vadd.xlane.f32.xlu2 %v9578_v44  ;;  %v9766_v15 = vmul.f32 %v17543_v28, %v17502_v50  ;;  %v17572_v51 = vadd.f32 %v17569_v37, %v9306_v35  ;;  %v9526_v7 = vmul.f32 %v17551_v39, %v17551_v39  ;;  %v11949_v44 = vld [vmem:[%s12045_s30 + $0x98] sm:$0xff] }
0x1138   : > { %11877 = vrsqrt.f32 %v17536_v36  ;;  %v9461_v58 = vmul.f32 %v9391_v24, %v19135_v57  ;;  %v10061_v56 = vmul.f32 %v17438_v0, %v10028_v1  ;;  %v9307_v3 = vadd.f32 %v11949_v44, %v17510_v61 }
0x1139   : > { %v9749_v29 = vsub.f32 1.5, %v9748_v21  ;;  %v9397_v48 = vpop.xlane.xlu2 %9396  ;;  %19155 = vst [vmem:[#allocation8_spill] sm:$0xff] %v17572_v51  ;;  %v9764_v35 = vsel %vm17591_vm15, %v17484_v23, %v9760_v5  ;;  %v9767_v26 = vmul.f32 %v17543_v28, %v9766_v15  ;;  %v9407_v23 = vsel %vm321_vm0, %v17572_v51, 0.0  ;;  %v11000_v15 = vld [vmem:[%s18427_s6 + $0x28] sm:$0xff] }
0x113a   : > { %v17558_v54 = vsub.f32 %v17413_v32, %v9461_v58  ;;  %v10094_v2 = vadd.f32 %v17448_v53, %v10061_v56  ;;  %v9463_v16 = vmul.f32 %v9397_v48, %v19135_v57  ;;  %v11001_v56 = vld [vmem:[%s18427_s6 + $0x30] sm:$0xff]  ;;  %vm9772_vm2 = vweird.f32 %v17543_v28 }
0x113b   : > { %v9750_v9 = vmul.f32 %v17512_v45, %v9749_v29  ;;  %9402 = vadd.xlane.f32.xlu0 %v9401_v38  ;;  %9405 = vadd.xlane.f32.xlu1 %v9404_v27  ;;  %v9584_v27 = vsel %vm321_vm0, %v9526_v7, 0.0  ;;  %v9768_v48 = vmul.f32 0.5, %v9767_v26  ;;  %vm9781_vm3 = vweird.f32 %v17536_v36  ;;  %vm9773_vm6 = vmor %vm9771_vm5, %vm9772_vm2 }
0x113c   : > { %v10124_v62 = vpack.c.bf16 %v10094_v2, %v10093_v63  ;;  %v9525_v34 = vmul.f32 %v17558_v54, %v17558_v54  ;;  %v17614_v61 = vsub.f32 %v17417_v55, %v9463_v16  ;;  %v9260_v2 = vpop.f32.mrf.mxu0 }
0x113d   : > { %v9754_v1 = vsel %vm17577_vm14, %v17512_v45, %v9750_v9  ;;  %v11002_v45 = vld [vmem:[%s18427_s6 + $0x38] sm:$0xff]  ;;  %v17621_v9 = vadd.f32 %v17569_v37, %v9307_v3 }
0x113e   : > { %v17581_v30 = vpop.eup %11877  ;;  %10940 = vmatmul.msk.bf16.gmra.mxu1 %vm321_vm0, %v10124_v62  ;;  %v9581_v29 = vsel %vm321_vm0, %v9525_v34, 0.0  ;;  %v10029_v58 = vmul.f32 %v9754_v1, %v17356_v14  ;;  %10409 = vmatpush.bf16.msra.mxu2 %v11002_v45  ;;  %v10030_v14 = vmul.f32 %v9764_v35, %v17353_v4  ;;  %v9527_v4 = vmul.f32 %v17614_v61, %v17614_v61  ;;  %v11950_v1 = vld [vmem:[%s12045_s30 + $0xa0] sm:$0xff] }
0x113f   : > { %v9776_v24 = vmul.f32 %v17581_v30, %v17536_v36  ;;  %9582 = vadd.xlane.f32.xlu2 %v9581_v29  ;;  %11007 = vmatpush.bf16.msra.mxu3 %v11002_v45  ;;  %19160 = vst [vmem:[#allocation6_spill] sm:$0xff] %v17621_v9  ;;  %v9308_v16 = vadd.f32 %v11950_v1, %v9258_v20  ;;  %v9769_v34 = vsub.f32 1.5, %v9768_v48  ;;  %v9410_v7 = vsel %vm321_vm0, %v17621_v9, 0.0  ;;  %v10996_v1 = vld [vmem:[%s18427_s6 + $0x8] sm:$0xff] }
0x1140   : > { %v10062_v5 = vmul.f32 %v17438_v0, %v10029_v58  ;;  %v10063_v62 = vmul.f32 %v17438_v0, %v10030_v14  ;;  %vm9782_vm1 = vweird.f32 %v17581_v30  ;;  %v9587_v3 = vsel %vm321_vm0, %v9527_v4, 0.0  ;;  %v11952_v14 = vld [vmem:[%s12045_s30 + $0xb0] sm:$0xff]  ;;  %v10998_v4 = vld [vmem:[%s18427_s6 + $0x18] sm:$0xff] }
0x1141   : > { %v9777_v38 = vmul.f32 %v17581_v30, %v9776_v24  ;;  %v11951_v24 = vld [vmem:[%s12045_s30 + $0xa8] sm:$0xff]  ;;  %v17640_v35 = vadd.f32 %v17569_v37, %v9308_v16  ;;  %v9770_v26 = vmul.f32 %v17543_v28, %v9769_v34  ;;  %vm9783_vm4 = vmor %vm9781_vm3, %vm9782_vm1  ;;  %v10995_v16 = vld [vmem:[%s18427_s6] sm:$0xff] }
0x1142   : > { %10410 = vmatpush.bf16.msra.mxu2 %v11001_v56  ;;  %v10095_v21 = vadd.f32 %v17448_v53, %v10062_v5  ;;  %v9309_v45 = vadd.f32 %v11951_v24, %v9260_v2  ;;  %v10096_v20 = vadd.f32 %v17448_v53, %v10063_v62  ;;  %v10997_v62 = vld [vmem:[%s18427_s6 + $0x10] sm:$0xff] }
0x1143   : > { %v9778_v63 = vmul.f32 0.5, %v9777_v38  ;;  %9585 = vadd.xlane.f32.xlu0 %v9584_v27  ;;  %9408 = vadd.xlane.f32.xlu1 %v9407_v23  ;;  %v9774_v27 = vsel %vm9773_vm6, %v17543_v28, %v9770_v26  ;;  %v9413_v23 = vsel %vm321_vm0, %v17640_v35, 0.0 }
0x1144   : > { %11008 = vmatpush.bf16.msra.mxu3 %v11001_v56  ;;  %v10125_v29 = vpack.c.bf16 %v10096_v20, %v10095_v21  ;;  %v17646_v58 = vadd.f32 %v17569_v37, %v9309_v45  ;;  %v9263_v56 = vpop.f32.mrf.mxu0  ;;  %v10031_v50 = vmul.f32 %v9774_v27, %v17376_v13  ;;  %v10999_v13 = vld [vmem:[%s18427_s6 + $0x20] sm:$0xff] }
0x1145   : > { %v9779_v59 = vsub.f32 1.5, %v9778_v63  ;;  %v9310_v63 = vadd.f32 %v11952_v14, %v9263_v56 }
0x1146   : > { %10411 = vmatpush.bf16.msra.mxu2 %v11000_v15  ;;  %v9416_v48 = vsel %vm321_vm0, %v17646_v58, 0.0  ;;  %v10064_v28 = vmul.f32 %v17438_v0, %v10031_v50 }
0x1147   : > { %9411 = vadd.xlane.f32.xlu2 %v9410_v7  ;;  %v9780_v44 = vmul.f32 %v17581_v30, %v9779_v59  ;;  %v17661_v2 = vadd.f32 %v17569_v37, %v9310_v63  ;;  %v17687_v7 = vld [vmem:[%s18426_s5] ss:$0 sm:$0xff] }
0x1148   : > { %11009 = vmatpush.bf16.msra.mxu3 %v11000_v15  ;;  %v10097_v15 = vadd.f32 %v17448_v53, %v10064_v28 }
0x1149   : > { %v9784_v38 = vsel %vm9783_vm4, %v17581_v30, %v9780_v44 }
0x114a   : > { %v10032_v36 = vmul.f32 %v9784_v38, %v17402_v8  ;;  %v9419_v8 = vsel %vm321_vm0, %v17661_v2, 0.0  ;;  %10412 = vmatpush.bf16.msra.mxu2 %v10999_v13 }
0x114b   : > { %9588 = vadd.xlane.f32.xlu0 %v9587_v3 }
0x114c   : > { %v10065_v30 = vmul.f32 %v17438_v0, %v10032_v36  ;;  %11010 = vmatpush.bf16.msra.mxu3 %v10999_v13  ;;  %v9265_v20 = vpop.f32.mrf.mxu0 }
0x114e   : > { %10941 = vmatmul.msk.bf16.gmra.mxu1 %vm321_vm0, %v10125_v29  ;;  %v10098_v5 = vadd.f32 %v17448_v53, %v10065_v30  ;;  %10413 = vmatpush.bf16.msra.mxu2 %v10998_v4 }
0x114f   : > { %9414 = vadd.xlane.f32.xlu2 %v9413_v23 }
0x1150   : > { %v10126_v59 = vpack.c.bf16 %v10098_v5, %v10097_v15  ;;  %11011 = vmatpush.bf16.msra.mxu3 %v10998_v4 }
0x1152   : > { %10414 = vmatpush.bf16.msra.mxu2 %v10997_v62 }
0x1153   : > { %9417 = vadd.xlane.f32.xlu0 %v9416_v48 }
0x1154   : > { %11012 = vmatpush.bf16.msra.mxu3 %v10997_v62  ;;  %v17692_v27 = vpop.f32.mrf.mxu0 }
0x1156   : > { %10415 = vmatpush.bf16.msra.mxu2 %v10996_v1 }
0x1158   : > { %11013 = vmatpush.bf16.msra.mxu3 %v10996_v1 }
0x115a   : > { %10416 = vmatpush.bf16.msra.mxu2 %v10995_v16 }
0x115b   : > { %9420 = vadd.xlane.f32.xlu0 %v9419_v8 }
0x115c   : > { %11014 = vmatpush.bf16.msra.mxu3 %v10995_v16  ;;  %v17694_v48 = vpop.f32.mrf.mxu0 }
0x115e   : > { %10942 = vmatmul.msk.bf16.gmra.mxu1 %vm321_vm0, %v10126_v59 }
0x1164   : > { %v17697_v59 = vpop.f32.mrf.mxu0 }
0x1181   : > { %v10216_v34 = vpop.f32.mrf.mxu1 }
0x1182   : > { %v10217_v24 = vadd.f32 %v17687_v7, %v10216_v34 }
0x1184   : > { %v10296_v26 = vmax.f32 %v10217_v24, 0.0 }
0x1187   : > { %v9574_v21 = vpop.xlane.xlu1 %9573 }
0x1188   : > { %v9650_v45 = vmul.f32 %v9574_v21, %v19135_v57 }
0x1189   : > { %v10218_v44 = vpop.f32.mrf.mxu1 }
0x118a   : > { %v10219_v3 = vadd.f32 %v17687_v7, %v10218_v44  ;;  %v9682_v29 = vadd.f32 1e-05, %v9650_v45 }
0x118c   : > { %v10297_v38 = vmax.f32 %v10219_v3, 0.0  ;;  %11879 = vrsqrt.f32 %v9682_v29  ;;  %vm9801_vm8 = vweird.f32 %v9682_v29 }
0x118e   : > { %v10328_v56 = vpack.c.bf16 %v10297_v38, %v10296_v26 }
0x1190   : > { %10417 = vmatmul.bf16.vlgmr.msra.gmra.mxu2 %v10328_v56 }
0x1192   : > { %v11880_v23 = vpop.eup %11879 }
0x1193   : > { %v9796_v36 = vmul.f32 %v11880_v23, %v9682_v29  ;;  %vm9802_vm7 = vweird.f32 %v11880_v23 }
0x1194   : > { %vm9803_vm9 = vmor %vm9801_vm8, %vm9802_vm7 }
0x1195   : > { %v9797_v14 = vmul.f32 %v11880_v23, %v9796_v36 }
0x1197   : > { %v9798_v30 = vmul.f32 0.5, %v9797_v14 }
0x1199   : > { %v9799_v5 = vsub.f32 1.5, %v9798_v30 }
0x119b   : > { %v9800_v1 = vmul.f32 %v11880_v23, %v9799_v5 }
0x119d   : > { %v9804_v26 = vsel %vm9803_vm9, %v11880_v23, %v9800_v1 }
0x119e   : > { %v9571_v63 = vpop.xlane.xlu0 %9570  ;;  %v10034_v30 = vmul.f32 %v9804_v26, %v17460_v33 }
0x119f   : > { %v9649_v50 = vmul.f32 %v9571_v63, %v19135_v57 }
0x11a1   : > { %v9681_v28 = vadd.f32 1e-05, %v9649_v50 }
0x11a3   : > { %11881 = vrsqrt.f32 %v9681_v28  ;;  %vm9791_vm11 = vweird.f32 %v9681_v28 }
0x11a6   : > { %v9577_v8 = vpop.xlane.xlu1 %9576  ;;  %v9400_v15 = vpop.xlane.xlu0 %9399 }
0x11a7   : > { %v9651_v13 = vmul.f32 %v9577_v8, %v19135_v57  ;;  %v9464_v4 = vmul.f32 %v9400_v15, %v19135_v57  ;;  %v17719_v8 = vpop.f32.mrf.mxu0 }
0x11a9   : > { %v11882_v62 = vpop.eup %11881  ;;  %v17701_v16 = vadd.f32 1e-05, %v9651_v13  ;;  %v17704_v34 = vsub.f32 %v17491_v40, %v9464_v4 }
0x11aa   : > { %v9786_v21 = vmul.f32 %v11882_v62, %v9681_v28  ;;  %v9580_v24 = vpop.xlane.xlu2 %9579  ;;  %vm9792_vm10 = vweird.f32 %v11882_v62 }
0x11ab   : > { %11883 = vrsqrt.f32 %v17701_v16  ;;  %v9528_v45 = vmul.f32 %v17704_v34, %v17704_v34  ;;  %v9652_v3 = vmul.f32 %v9580_v24, %v19135_v57  ;;  %vm9793_vm12 = vmor %vm9791_vm11, %vm9792_vm10  ;;  %v11953_v24 = vld [vmem:[%s12045_s30 + $0xb8] sm:$0xff]  ;;  %vm9811_vm14 = vweird.f32 %v17701_v16 }
0x11ac   : > { %v9787_v44 = vmul.f32 %v11882_v62, %v9786_v21 }
0x11ad   : > { %v9590_v38 = vsel %vm321_vm0, %v9528_v45, 0.0  ;;  %v17711_v36 = vadd.f32 1e-05, %v9652_v3  ;;  %v9311_v45 = vadd.f32 %v11953_v24, %v9265_v20 }
0x11ae   : > { %v9788_v56 = vmul.f32 0.5, %v9787_v44  ;;  %v9403_v14 = vpop.xlane.xlu0 %9402  ;;  %v9406_v63 = vpop.xlane.xlu1 %9405  ;;  %9591 = vadd.xlane.f32.xlu1 %v9590_v38  ;;  %v10067_v38 = vmul.f32 %v17438_v0, %v10034_v30 }
0x11af   : > { %v9465_v29 = vmul.f32 %v9403_v14, %v19135_v57  ;;  %v9466_v50 = vmul.f32 %v9406_v63, %v19135_v57  ;;  %11885 = vrsqrt.f32 %v17711_v36  ;;  %vm9821_vm2 = vweird.f32 %v17711_v36 }
0x11b0   : > { %v9789_v5 = vsub.f32 1.5, %v9788_v56 }
0x11b1   : > { %v17717_v23 = vpop.eup %11883  ;;  %v17722_v15 = vsub.f32 %v17528_v46, %v9465_v29  ;;  %v17725_v13 = vsub.f32 %v17531_v22, %v9466_v50 }
0x11b2   : > { %v9790_v4 = vmul.f32 %v11882_v62, %v9789_v5  ;;  %v9806_v1 = vmul.f32 %v17717_v23, %v17701_v16  ;;  %v9583_v26 = vpop.xlane.xlu2 %9582  ;;  %vm9812_vm13 = vweird.f32 %v17717_v23 }
0x11b3   : > { %v9529_v33 = vmul.f32 %v17722_v15, %v17722_v15  ;;  %v9530_v21 = vmul.f32 %v17725_v13, %v17725_v13  ;;  %v9653_v56 = vmul.f32 %v9583_v26, %v19135_v57  ;;  %vm17771_vm15 = vmor %vm9811_vm14, %vm9812_vm13 }
0x11b4   : > { %v9794_v44 = vsel %vm9793_vm12, %v11882_v62, %v9790_v4  ;;  %v9807_v3 = vmul.f32 %v17717_v23, %v9806_v1 }
0x11b5   : > { %v10033_v28 = vmul.f32 %v9794_v44, %v17472_v11  ;;  %v9593_v14 = vsel %vm321_vm0, %v9529_v33, 0.0  ;;  %v9596_v63 = vsel %vm321_vm0, %v9530_v21, 0.0  ;;  %v11886_v29 = vpop.eup %11885  ;;  %v17741_v62 = vadd.f32 1e-05, %v9653_v56  ;;  %v11954_v56 = vld [vmem:[%s12045_s30 + $0xc0] sm:$0xff] }
0x11b6   : > { %v9808_v50 = vmul.f32 0.5, %v9807_v3  ;;  %v9586_v5 = vpop.xlane.xlu0 %9585  ;;  %9594 = vadd.xlane.f32.xlu1 %v9593_v14  ;;  %v9409_v22 = vpop.xlane.xlu1 %9408  ;;  %9597 = vadd.xlane.f32.xlu2 %v9596_v63  ;;  %v9816_v20 = vmul.f32 %v11886_v29, %v17711_v36  ;;  %v17745_v11 = vadd.f32 %v17569_v37, %v9311_v45  ;;  %v10100_v44 = vadd.f32 %v17448_v53, %v10067_v38  ;;  %v11955_v63 = vld [vmem:[%s12045_s30 + $0xc8] sm:$0xff] }
0x11b7   : > { %v9654_v30 = vmul.f32 %v9586_v5, %v19135_v57  ;;  %v9467_v1 = vmul.f32 %v9409_v22, %v19135_v57  ;;  %v10066_v33 = vmul.f32 %v17438_v0, %v10033_v28  ;;  %11887 = vrsqrt.f32 %v17741_v62  ;;  %v17761_v28 = vpop.f32.mrf.mxu0 }
0x11b8   : > { %v9809_v4 = vsub.f32 1.5, %v9808_v50  ;;  %v9817_v21 = vmul.f32 %v11886_v29, %v9816_v20  ;;  %v9312_v22 = vadd.f32 %v11954_v56, %v17692_v27  ;;  %v9313_v38 = vadd.f32 %v11955_v63, %v17694_v48 }
0x11b9   : > { %v17750_v24 = vadd.f32 1e-05, %v9654_v30  ;;  %v17756_v45 = vsub.f32 %v17572_v51, %v9467_v1  ;;  %v10099_v26 = vadd.f32 %v17448_v53, %v10066_v33  ;;  %vm9822_vm1 = vweird.f32 %v11886_v29 }
0x11ba   : > { %v9810_v3 = vmul.f32 %v17717_v23, %v9809_v4  ;;  %v9818_v14 = vmul.f32 0.5, %v9817_v21  ;;  %v9412_v50 = vpop.xlane.xlu2 %9411  ;;  %v9422_v48 = vsel %vm321_vm0, %v17745_v11, 0.0  ;;  %vm9823_vm3 = vmor %vm9821_vm2, %vm9822_vm1  ;;  %vm9831_vm8 = vweird.f32 %v17741_v62 }
0x11bb   : > { %11889 = vrsqrt.f32 %v17750_v24  ;;  %v10221_v5 = vpop.f32.mrf.mxu1  ;;  %v10127_v20 = vpack.c.bf16 %v10100_v44, %v10099_v26  ;;  %v9531_v30 = vmul.f32 %v17756_v45, %v17756_v45  ;;  %v9468_v1 = vmul.f32 %v9412_v50, %v19135_v57  ;;  %v11956_v50 = vld [vmem:[%s12045_s30 + $0xd0] sm:$0xff] }
0x11bc   : > { %v9819_v4 = vsub.f32 1.5, %v9818_v14  ;;  %v9814_v16 = vsel %vm17771_vm15, %v17717_v23, %v9810_v3  ;;  %v17792_v14 = vadd.f32 %v17569_v37, %v9312_v22  ;;  %v17795_v23 = vadd.f32 %v17569_v37, %v9313_v38 }
0x11bd   : > { %10943 = vmatmul.msk.bf16.gmra.mxu1 %vm321_vm0, %v10127_v20  ;;  %v9599_v21 = vsel %vm321_vm0, %v9531_v30, 0.0  ;;  %v17785_v44 = vpop.eup %11887  ;;  %v17789_v56 = vsub.f32 %v17621_v9, %v9468_v1  ;;  %v9314_v36 = vadd.f32 %v11956_v50, %v17697_v59  ;;  %v10035_v20 = vmul.f32 %v9814_v16, %v17498_v49  ;;  %v11957_v16 = vld [vmem:[%s12045_s30 + $0xd8] sm:$0xff] }
0x11be   : > { %v17782_v33 = vpop.xlane.xlu0 %9588  ;;  %9423 = vadd.xlane.f32.xlu1 %v9422_v48  ;;  %v9820_v26 = vmul.f32 %v11886_v29, %v9819_v4  ;;  %9600 = vadd.xlane.f32.xlu2 %v9599_v21  ;;  %v9826_v3 = vmul.f32 %v17785_v44, %v17741_v62  ;;  %v10222_v1 = vadd.f32 %v17687_v7, %v10221_v5  ;;  %vm9832_vm5 = vweird.f32 %v17785_v44 }
0x11bf   : > { %v9532_v22 = vmul.f32 %v17789_v56, %v17789_v56  ;;  %vm9841_vm6 = vweird.f32 %v17750_v24  ;;  %vm9833_vm9 = vmor %vm9831_vm8, %vm9832_vm5 }
0x11c0   : > { %v9824_v30 = vsel %vm9823_vm3, %v11886_v29, %v9820_v26  ;;  %v9827_v27 = vmul.f32 %v17785_v44, %v9826_v3  ;;  %v9425_v29 = vsel %vm321_vm0, %v17792_v14, 0.0  ;;  %v9315_v26 = vadd.f32 %v11957_v16, %v17719_v8 }
0x11c1   : > { %v17800_v63 = vpop.eup %11889  ;;  %v10036_v38 = vmul.f32 %v9824_v30, %v17516_v18  ;;  %v9602_v48 = vsel %vm321_vm0, %v9532_v22, 0.0  ;;  %v9428_v30 = vsel %vm321_vm0, %v17795_v23, 0.0  ;;  %v17824_v22 = vadd.f32 %v17569_v37, %v9314_v36 }
0x11c2   : > { %v9836_v4 = vmul.f32 %v17800_v63, %v17750_v24  ;;  %v9828_v21 = vmul.f32 0.5, %v9827_v27  ;;  %v9415_v50 = vpop.xlane.xlu2 %9414  ;;  %9603 = vadd.xlane.f32.xlu0 %v9602_v48  ;;  %v9280_v27 = vpop.f32.mrf.mxu0  ;;  %v10298_v48 = vmax.f32 %v10222_v1, 0.0  ;;  %v17833_v36 = vadd.f32 %v17569_v37, %v9315_v26 }
0x11c3   : > { %v10223_v49 = vpop.f32.mrf.mxu1  ;;  %v10069_v18 = vmul.f32 %v17438_v0, %v10036_v38  ;;  %v9469_v3 = vmul.f32 %v9415_v50, %v19135_v57  ;;  %19163 = vst [vmem:[#allocation9_spill] sm:$0xff] %v17824_v22  ;;  %v10068_v38 = vmul.f32 %v17438_v0, %v10035_v20  ;;  %vm9842_vm4 = vweird.f32 %v17800_v63 }
0x11c4   : > { %v9837_v59 = vmul.f32 %v17800_v63, %v9836_v4  ;;  %v10224_v5 = vadd.f32 %v17687_v7, %v10223_v49  ;;  %v9829_v51 = vsub.f32 1.5, %v9828_v21  ;;  %19164 = vst [vmem:[#allocation4_spill] sm:$0xff] %v17833_v36  ;;  %v9431_v21 = vsel %vm321_vm0, %v17824_v22, 0.0  ;;  %vm17848_vm7 = vmor %vm9841_vm6, %vm9842_vm4 }
0x11c5   : > { %v17828_v8 = vsub.f32 %v17640_v35, %v9469_v3  ;;  %v10102_v46 = vadd.f32 %v17448_v53, %v10069_v18  ;;  %v9434_v24 = vsel %vm321_vm0, %v17833_v36, 0.0 }
0x11c6   : > { %v9838_v4 = vmul.f32 0.5, %v9837_v59  ;;  %v9418_v9 = vpop.xlane.xlu0 %9417  ;;  %9426 = vadd.xlane.f32.xlu1 %v9425_v29  ;;  %v10299_v50 = vmax.f32 %v10224_v5, 0.0  ;;  %9429 = vadd.xlane.f32.xlu2 %v9428_v30  ;;  %v10101_v59 = vadd.f32 %v17448_v53, %v10068_v38  ;;  %v9830_v29 = vmul.f32 %v17785_v44, %v9829_v51  ;;  %v11958_v30 = vld [vmem:[%s12045_s30 + $0xe0] sm:$0xff] }
0x11c7   : > { %v9470_v49 = vmul.f32 %v9418_v9, %v19135_v57  ;;  %v9533_v9 = vmul.f32 %v17828_v8, %v17828_v8 }
0x11c8   : > { %v9839_v16 = vsub.f32 1.5, %v9838_v4  ;;  %v10329_v1 = vpack.c.bf16 %v10299_v50, %v10298_v48  ;;  %v10128_v5 = vpack.c.bf16 %v10102_v46, %v10101_v59  ;;  %v9316_v4 = vadd.f32 %v11958_v30, %v17761_v28  ;;  %v11959_v48 = vld [vmem:[%s12045_s30 + $0xe8] sm:$0xff] }
0x11c9   : > { %v17846_v18 = vsub.f32 %v17646_v58, %v9470_v49  ;;  %v9317_v38 = vadd.f32 %v11959_v48, %v9280_v27  ;;  %v9605_v28 = vsel %vm321_vm0, %v9533_v9, 0.0  ;;  %v9834_v62 = vsel %vm9833_vm9, %v17785_v44, %v9830_v29 }
0x11ca   : > { %v9840_v20 = vmul.f32 %v17800_v63, %v9839_v16  ;;  %10422 = vmatmul.bf16.gmra.mxu2 %v10329_v1  ;;  %9432 = vadd.xlane.f32.xlu0 %v9431_v21  ;;  %v9283_v50 = vpop.f32.mrf.mxu0  ;;  %v17871_v16 = vadd.f32 %v17569_v37, %v9316_v4 }
0x11cb   : > { %v10226_v3 = vpop.f32.mrf.mxu1  ;;  %v9534_v49 = vmul.f32 %v17846_v18, %v17846_v18  ;;  %v17874_v1 = vadd.f32 %v17569_v37, %v9317_v38 }
0x11cc   : > { %v9844_v51 = vsel %vm17848_vm7, %v17800_v63, %v9840_v20  ;;  %v10037_v20 = vmul.f32 %v9834_v62, %v17558_v54  ;;  %v10227_v21 = vadd.f32 %v17687_v7, %v10226_v3  ;;  %v9437_v26 = vsel %vm321_vm0, %v17871_v16, 0.0  ;;  %v11961_v62 = vld [vmem:[%s12045_s30 + $0xf8] sm:$0xff] }
0x11cd   : > { %10944 = vmatmul.msk.bf16.gmra.mxu1 %vm321_vm0, %v10128_v5  ;;  %v10038_v27 = vmul.f32 %v9844_v51, %v17551_v39  ;;  %v9608_v59 = vsel %vm321_vm0, %v9534_v49, 0.0  ;;  %v11960_v5 = vld [vmem:[%s12045_s30 + $0xf0] sm:$0xff]  ;;  %v9440_v54 = vsel %vm321_vm0, %v17874_v1, 0.0 }
0x11ce   : > { %v9421_v46 = vpop.xlane.xlu0 %9420  ;;  %9435 = vadd.xlane.f32.xlu1 %v9434_v24  ;;  %9606 = vadd.xlane.f32.xlu2 %v9605_v28  ;;  %v9318_v30 = vadd.f32 %v11960_v5, %v9283_v50  ;;  %v10070_v3 = vmul.f32 %v17438_v0, %v10037_v20  ;;  %v10300_v4 = vmax.f32 %v10227_v21, 0.0 }
0x11cf   : > { %v9471_v63 = vmul.f32 %v9421_v46, %v19135_v57  ;;  %v10071_v29 = vmul.f32 %v17438_v0, %v10038_v27 }
0x11d0   : > { %v17894_v28 = vadd.f32 %v17569_v37, %v9318_v30  ;;  %v10103_v50 = vadd.f32 %v17448_v53, %v10070_v3  ;;  %v9655_v30 = vmul.f32 %v17782_v33, %v19135_v57 }
0x11d1   : > { %v17879_v44 = vsub.f32 %v17661_v2, %v9471_v63  ;;  %v10104_v38 = vadd.f32 %v17448_v53, %v10071_v29 }
0x11d2   : > { %9609 = vadd.xlane.f32.xlu0 %v9608_v59  ;;  %v9285_v48 = vpop.f32.mrf.mxu0  ;;  %v9443_v20 = vsel %vm321_vm0, %v17894_v28, 0.0 }
0x11d3   : > { %v10228_v9 = vpop.f32.mrf.mxu1  ;;  %v9535_v24 = vmul.f32 %v17879_v44, %v17879_v44  ;;  %v9319_v63 = vadd.f32 %v11961_v62, %v9285_v48  ;;  %v10129_v27 = vpack.c.bf16 %v10104_v38, %v10103_v50 }
0x11d4   : > { %v10229_v39 = vadd.f32 %v17687_v7, %v10228_v9 }
0x11d5   : > { %v9611_v0 = vsel %vm321_vm0, %v9535_v24, 0.0  ;;  %v17903_v21 = vadd.f32 %v17569_v37, %v9319_v63  ;;  %v9687_v37 = vadd.f32 1e-05, %v9655_v30 }
0x11d6   : > { %9438 = vadd.xlane.f32.xlu1 %v9437_v26  ;;  %v10301_v51 = vmax.f32 %v10229_v39, 0.0  ;;  %9441 = vadd.xlane.f32.xlu2 %v9440_v54  ;;  %v17914_v54 = vld [vmem:[%s18422_s1 + $0x5] ss:$0 sm:$0xff] }
0x11d7   : > { %v9446_v59 = vsel %vm321_vm0, %v17903_v21, 0.0  ;;  %11891 = vrsqrt.f32 %v9687_v37  ;;  %vm9851_vm11 = vweird.f32 %v9687_v37 }
0x11d8   : > { %v10330_v46 = vpack.c.bf16 %v10301_v51, %v10300_v4 }
0x11da   : > { %10427 = vmatmul.bf16.gmra.mxu2 %v10330_v46  ;;  %9612 = vadd.xlane.f32.xlu0 %v9611_v0 }
0x11db   : > { %v10231_v49 = vpop.f32.mrf.mxu1 }
0x11dc   : > { %v10232_v53 = vadd.f32 %v17687_v7, %v10231_v49 }
0x11dd   : > { %10945 = vmatmul.msk.bf16.gmra.mxu1 %vm321_vm0, %v10129_v27  ;;  %v11892_v51 = vpop.eup %11891 }
0x11de   : > { %9444 = vadd.xlane.f32.xlu2 %v9443_v20  ;;  %v10302_v39 = vmax.f32 %v10232_v53, 0.0  ;;  %v9846_v48 = vmul.f32 %v11892_v51, %v9687_v37  ;;  %vm9852_vm10 = vweird.f32 %v11892_v51 }
0x11df   : > { %vm9853_vm12 = vmor %vm9851_vm11, %vm9852_vm10 }
0x11e0   : > { %v9847_v50 = vmul.f32 %v11892_v51, %v9846_v48 }
0x11e2   : > { %9447 = vadd.xlane.f32.xlu0 %v9446_v59  ;;  %v9848_v0 = vmul.f32 0.5, %v9847_v50 }
0x11e3   : > { %v10233_v9 = vpop.f32.mrf.mxu1 }
0x11e4   : > { %v10234_v29 = vadd.f32 %v17687_v7, %v10233_v9  ;;  %v9849_v27 = vsub.f32 1.5, %v9848_v0 }
0x11e6   : > { %v10303_v26 = vmax.f32 %v10234_v29, 0.0  ;;  %v9850_v29 = vmul.f32 %v11892_v51, %v9849_v27 }
0x11e8   : > { %v10331_v5 = vpack.c.bf16 %v10303_v26, %v10302_v39  ;;  %v9854_v30 = vsel %vm9853_vm12, %v11892_v51, %v9850_v29 }
0x11e9   : > { %v10039_v48 = vmul.f32 %v9854_v30, %v17614_v61 }
0x11ea   : > { %10432 = vmatmul.bf16.gmra.mxu2 %v10331_v5 }
0x1213   : > { %v10418_v3 = vpop.f32.mrf.mxu2 }
0x1214   : > { %v10419_v4 = vadd.f32 %v17914_v54, %v10418_v3 }
0x1216   : > { %v10498_v33 = vadd.f32 %v10419_v4, %v17143_v43 }
0x1218   : > { %10530 = vst.msk [vmem:[%s17922_s14] sm:$0xff] %vm321_vm0, %v10498_v33 }
0x121b   : > { %v10420_v24 = vpop.f32.mrf.mxu2 }
0x121c   : > { %v10421_v38 = vadd.f32 %v17914_v54, %v10420_v24 }
0x121e   : > { %v10499_v46 = vadd.f32 %v10421_v38, %v17160_v12 }
0x1220   : > { %10531 = vst.msk [vmem:[%s17922_s14 + $0x8] sm:$0xff] %vm321_vm0, %v10499_v46 }
0x1221   : > { %v9592_v62 = vpop.xlane.xlu1 %9591 }
0x1222   : > { %v9656_v63 = vmul.f32 %v9592_v62, %v19135_v57 }
0x1224   : > { %v9688_v49 = vadd.f32 1e-05, %v9656_v63 }
0x1226   : > { %11893 = vrsqrt.f32 %v9688_v49  ;;  %vm9861_vm14 = vweird.f32 %v9688_v49 }
0x1229   : > { %v9595_v43 = vpop.xlane.xlu1 %9594  ;;  %v9598_v20 = vpop.xlane.xlu2 %9597 }
0x122a   : > { %v9657_v53 = vmul.f32 %v9595_v43, %v19135_v57  ;;  %v9658_v59 = vmul.f32 %v9598_v20, %v19135_v57 }
0x122c   : > { %v11894_v9 = vpop.eup %11893  ;;  %v17934_v12 = vadd.f32 1e-05, %v9657_v53  ;;  %v17936_v39 = vadd.f32 1e-05, %v9658_v59 }
0x122d   : > { %v9856_v26 = vmul.f32 %v11894_v9, %v9688_v49  ;;  %vm9862_vm13 = vweird.f32 %v11894_v9  ;;  %v17963_v49 = vld [vmem:[%s18422_s1 + $0x2] ss:$0 sm:$0xff] }
0x122e   : > { %11895 = vrsqrt.f32 %v17934_v12  ;;  %vm9863_vm15 = vmor %vm9861_vm14, %vm9862_vm13  ;;  %v10072_v59 = vmul.f32 %v17963_v49, %v10039_v48  ;;  %vm9871_vm3 = vweird.f32 %v17934_v12  ;;  %vm9881_vm5 = vweird.f32 %v17936_v39 }
0x122f   : > { %v9857_v5 = vmul.f32 %v11894_v9, %v9856_v26  ;;  %11897 = vrsqrt.f32 %v17936_v39 }
0x1231   : > { %v9858_v3 = vmul.f32 0.5, %v9857_v5  ;;  %v9424_v4 = vpop.xlane.xlu1 %9423  ;;  %v9601_v33 = vpop.xlane.xlu2 %9600 }
0x1232   : > { %v9472_v24 = vmul.f32 %v9424_v4, %v19135_v57  ;;  %v9659_v46 = vmul.f32 %v9601_v33, %v19135_v57 }
0x1233   : > { %v9859_v38 = vsub.f32 1.5, %v9858_v3 }
0x1234   : > { %v17943_v50 = vpop.eup %11895  ;;  %v17946_v37 = vsub.f32 %v17745_v11, %v9472_v24  ;;  %v17952_v0 = vadd.f32 1e-05, %v9659_v46 }
0x1235   : > { %v17948_v62 = vpop.eup %11897  ;;  %v9860_v63 = vmul.f32 %v11894_v9, %v9859_v38  ;;  %v9866_v51 = vmul.f32 %v17943_v50, %v17934_v12  ;;  %v9604_v53 = vpop.xlane.xlu0 %9603  ;;  %vm9872_vm1 = vweird.f32 %v17943_v50 }
0x1236   : > { %v9876_v61 = vmul.f32 %v17948_v62, %v17936_v39  ;;  %v9536_v27 = vmul.f32 %v17946_v37, %v17946_v37  ;;  %11899 = vrsqrt.f32 %v17952_v0  ;;  %v9660_v5 = vmul.f32 %v9604_v53, %v19135_v57  ;;  %vm18000_vm4 = vmor %vm9871_vm3, %vm9872_vm1 }
0x1237   : > { %v9864_v43 = vsel %vm9863_vm15, %v11894_v9, %v9860_v63  ;;  %v9867_v20 = vmul.f32 %v17943_v50, %v9866_v51  ;;  %v17978_v51 = vld [vmem:[%s18422_s1 + $0x3] ss:$0 sm:$0xff]  ;;  %vm9882_vm2 = vweird.f32 %v17948_v62  ;;  %vm9891_vm11 = vweird.f32 %v17952_v0 }
0x1238   : > { %v10040_v29 = vmul.f32 %v9864_v43, %v17704_v34  ;;  %v9877_v26 = vmul.f32 %v17948_v62, %v9876_v61  ;;  %v9614_v9 = vsel %vm321_vm0, %v9536_v27, 0.0  ;;  %v17970_v33 = vadd.f32 1e-05, %v9660_v5  ;;  %vm18010_vm6 = vmor %vm9881_vm5, %vm9882_vm2 }
0x1239   : > { %v9868_v30 = vmul.f32 0.5, %v9867_v20  ;;  %v9427_v3 = vpop.xlane.xlu1 %9426  ;;  %9615 = vadd.xlane.f32.xlu1 %v9614_v9  ;;  %v9430_v38 = vpop.xlane.xlu2 %9429  ;;  %v10105_v61 = vadd.f32 %v17978_v51, %v10072_v59 }
0x123a   : > { %v9878_v4 = vmul.f32 0.5, %v9877_v26  ;;  %v9473_v24 = vmul.f32 %v9427_v3, %v19135_v57  ;;  %v10073_v46 = vmul.f32 %v17963_v49, %v10040_v29  ;;  %v9474_v34 = vmul.f32 %v9430_v38, %v19135_v57  ;;  %v10236_v63 = vpop.f32.mrf.mxu1 }
0x123b   : > { %v9869_v48 = vsub.f32 1.5, %v9868_v30  ;;  %11901 = vrsqrt.f32 %v17970_v33  ;;  %v10237_v39 = vadd.f32 %v17687_v7, %v10236_v63  ;;  %vm9901_vm9 = vweird.f32 %v17970_v33 }
0x123c   : > { %v9879_v27 = vsub.f32 1.5, %v9878_v4  ;;  %v17984_v43 = vsub.f32 %v17792_v14, %v9473_v24  ;;  %v17986_v20 = vpop.eup %11899  ;;  %v17991_v29 = vsub.f32 %v17795_v23, %v9474_v34  ;;  %v10106_v26 = vadd.f32 %v17978_v51, %v10073_v46 }
0x123d   : > { %v9870_v53 = vmul.f32 %v17943_v50, %v9869_v48  ;;  %v9886_v5 = vmul.f32 %v17986_v20, %v17952_v0  ;;  %v9433_v3 = vpop.xlane.xlu0 %9432  ;;  %vm9892_vm8 = vweird.f32 %v17986_v20 }
0x123e   : > { %v9880_v59 = vmul.f32 %v17948_v62, %v9879_v27  ;;  %v9537_v9 = vmul.f32 %v17984_v43, %v17984_v43  ;;  %v10130_v4 = vpack.c.bf16 %v10106_v26, %v10105_v61  ;;  %v9538_v24 = vmul.f32 %v17991_v29, %v17991_v29  ;;  %vm18088_vm12 = vmor %vm9891_vm11, %vm9892_vm8 }
0x123f   : > { %v9874_v12 = vsel %vm18000_vm4, %v17943_v50, %v9870_v53  ;;  %v9475_v46 = vmul.f32 %v9433_v3, %v19135_v57  ;;  %v9887_v53 = vmul.f32 %v17986_v20, %v9886_v5 }
0x1240   : > { %v9884_v48 = vsel %vm18010_vm6, %v17948_v62, %v9880_v59  ;;  %10946 = vmatmul.msk.bf16.gmra.mxu1 %vm321_vm0, %v10130_v4  ;;  %v9617_v61 = vsel %vm321_vm0, %v9537_v9, 0.0  ;;  %v9620_v27 = vsel %vm321_vm0, %v9538_v24, 0.0  ;;  %v10041_v62 = vmul.f32 %v9874_v12, %v17722_v15 }
0x1241   : > { %v9436_v34 = vpop.xlane.xlu1 %9435  ;;  %v18022_v50 = vpop.eup %11901  ;;  %v18026_v26 = vsub.f32 %v17824_v22, %v9475_v46  ;;  %9618 = vadd.xlane.f32.xlu1 %v9617_v61  ;;  %9621 = vadd.xlane.f32.xlu2 %v9620_v27  ;;  %v10042_v38 = vmul.f32 %v9884_v48, %v17725_v13  ;;  %v9888_v12 = vmul.f32 0.5, %v9887_v53 }
0x1242   : > { %v9607_v30 = vpop.xlane.xlu2 %9606  ;;  %v9476_v3 = vmul.f32 %v9436_v34, %v19135_v57  ;;  %v9896_v63 = vmul.f32 %v18022_v50, %v17970_v33  ;;  %v10238_v9 = vpop.f32.mrf.mxu1  ;;  %v10304_v34 = vmax.f32 %v10237_v39, 0.0  ;;  %vm9902_vm7 = vweird.f32 %v18022_v50 }
0x1243   : > { %v9661_v59 = vmul.f32 %v9607_v30, %v19135_v57  ;;  %v10239_v5 = vadd.f32 %v17687_v7, %v10238_v9  ;;  %v9539_v24 = vmul.f32 %v18026_v26, %v18026_v26  ;;  %vm18073_vm10 = vmor %vm9901_vm9, %vm9902_vm7 }
0x1244   : > { %v18034_v4 = vsub.f32 %v17833_v36, %v9476_v3  ;;  %v9897_v46 = vmul.f32 %v18022_v50, %v9896_v63  ;;  %v10074_v36 = vmul.f32 %v17963_v49, %v10041_v62 }
0x1245   : > { %v18041_v15 = vadd.f32 1e-05, %v9661_v59  ;;  %v10305_v61 = vmax.f32 %v10239_v5, 0.0  ;;  %v9623_v27 = vsel %vm321_vm0, %v9539_v24, 0.0  ;;  %v9610_v9 = vpop.xlane.xlu0 %9609  ;;  %v10075_v59 = vmul.f32 %v17963_v49, %v10042_v38 }
0x1246   : > { %v9540_v30 = vmul.f32 %v18034_v4, %v18034_v4  ;;  %v9898_v3 = vmul.f32 0.5, %v9897_v46  ;;  %9624 = vadd.xlane.f32.xlu0 %v9623_v27  ;;  %v9662_v48 = vmul.f32 %v9610_v9, %v19135_v57  ;;  %v9889_v5 = vsub.f32 1.5, %v9888_v12 }
0x1247   : > { %11903 = vrsqrt.f32 %v18041_v15  ;;  %v10332_v13 = vpack.c.bf16 %v10305_v61, %v10304_v34  ;;  %v10107_v34 = vadd.f32 %v17978_v51, %v10074_v36  ;;  %v10108_v61 = vadd.f32 %v17978_v51, %v10075_v59 }
0x1248   : > { %v9626_v39 = vsel %vm321_vm0, %v9540_v30, 0.0  ;;  %v9899_v63 = vsub.f32 1.5, %v9898_v3  ;;  %v18051_v24 = vadd.f32 1e-05, %v9662_v48  ;;  %vm9911_vm2 = vweird.f32 %v18041_v15 }
0x1249   : > { %v9439_v53 = vpop.xlane.xlu1 %9438  ;;  %10437 = vmatmul.bf16.gmra.mxu2 %v10332_v13  ;;  %9627 = vadd.xlane.f32.xlu1 %v9626_v39 }
0x124a   : > { %v9477_v46 = vmul.f32 %v9439_v53, %v19135_v57  ;;  %v9442_v22 = vpop.xlane.xlu2 %9441  ;;  %v10241_v62 = vpop.f32.mrf.mxu1  ;;  %v9900_v30 = vmul.f32 %v18022_v50, %v9899_v63  ;;  %11905 = vrsqrt.f32 %v18051_v24  ;;  %v10131_v63 = vpack.c.bf16 %v10108_v61, %v10107_v34 }
0x124b   : > { %v9478_v27 = vmul.f32 %v9442_v22, %v19135_v57  ;;  %v9890_v22 = vmul.f32 %v17986_v20, %v9889_v5  ;;  %vm9921_vm15 = vweird.f32 %v18051_v24 }
0x124c   : > { %v18061_v38 = vsub.f32 %v17871_v16, %v9477_v46  ;;  %v9904_v33 = vsel %vm18073_vm10, %v18022_v50, %v9900_v30  ;;  %v10242_v50 = vadd.f32 %v17687_v7, %v10241_v62 }
0x124d   : > { %v18063_v12 = vpop.eup %11903  ;;  %v18066_v3 = vsub.f32 %v17874_v1, %v9478_v27  ;;  %v10423_v9 = vpop.f32.mrf.mxu2  ;;  %v9894_v0 = vsel %vm18088_vm12, %v17986_v20, %v9890_v22 }
0x124e   : > { %v9906_v36 = vmul.f32 %v18063_v12, %v18041_v15  ;;  %v10424_v48 = vadd.f32 %v17914_v54, %v10423_v9  ;;  %v18078_v39 = vpop.xlane.xlu0 %9612  ;;  %v9541_v53 = vmul.f32 %v18061_v38, %v18061_v38  ;;  %v10043_v20 = vmul.f32 %v9894_v0, %v17756_v45 }
0x124f   : > { %v9542_v59 = vmul.f32 %v18066_v3, %v18066_v3  ;;  %vm9912_vm14 = vweird.f32 %v18063_v12 }
0x1250   : > { %v10500_v46 = vadd.f32 %v10424_v48, %v17174_v25  ;;  %10947 = vmatmul.msk.bf16.gmra.mxu1 %vm321_vm0, %v10131_v63  ;;  %v9629_v27 = vsel %vm321_vm0, %v9541_v53, 0.0  ;;  %v11906_v61 = vpop.eup %11905  ;;  %v9907_v9 = vmul.f32 %v18063_v12, %v9906_v36  ;;  %v10044_v25 = vmul.f32 %v9904_v33, %v17789_v56  ;;  %vm9913_vm3 = vmor %vm9911_vm2, %vm9912_vm14 }
0x1251   : > { %v9632_v34 = vsel %vm321_vm0, %v9542_v59, 0.0  ;;  %9630 = vadd.xlane.f32.xlu2 %v9629_v27  ;;  %v9916_v13 = vmul.f32 %v11906_v61, %v18051_v24  ;;  %v10306_v59 = vmax.f32 %v10242_v50, 0.0  ;;  %v10076_v50 = vmul.f32 %v17963_v49, %v10043_v20 }
0x1252   : > { %v9445_v30 = vpop.xlane.xlu2 %9444  ;;  %9633 = vadd.xlane.f32.xlu0 %v9632_v34  ;;  %10532 = vst.msk [vmem:[%s17922_s14 + $0x10] sm:$0xff] %vm321_vm0, %v10500_v46  ;;  %v10243_v63 = vpop.f32.mrf.mxu1  ;;  %v9908_v62 = vmul.f32 0.5, %v9907_v9  ;;  %vm9922_vm13 = vweird.f32 %v11906_v61 }
0x1253   : > { %v9479_v48 = vmul.f32 %v9445_v30, %v19135_v57  ;;  %v10244_v53 = vadd.f32 %v17687_v7, %v10243_v63  ;;  %v9917_v22 = vmul.f32 %v11906_v61, %v9916_v13  ;;  %v10077_v30 = vmul.f32 %v17963_v49, %v10044_v25  ;;  %vm9923_vm1 = vmor %vm9921_vm15, %vm9922_vm13 }
0x1255   : > { %v18109_v36 = vsub.f32 %v17894_v28, %v9479_v48  ;;  %v10307_v5 = vmax.f32 %v10244_v53, 0.0  ;;  %v10425_v27 = vpop.f32.mrf.mxu2  ;;  %v9918_v56 = vmul.f32 0.5, %v9917_v22  ;;  %v9909_v48 = vsub.f32 1.5, %v9908_v62 }
0x1256   : > { %v10426_v33 = vadd.f32 %v17914_v54, %v10425_v27  ;;  %v9448_v46 = vpop.xlane.xlu0 %9447  ;;  %v10110_v25 = vadd.f32 %v17978_v51, %v10077_v30 }
0x1257   : > { %v9543_v34 = vmul.f32 %v18109_v36, %v18109_v36  ;;  %v10333_v63 = vpack.c.bf16 %v10307_v5, %v10306_v59  ;;  %v9480_v45 = vmul.f32 %v9448_v46, %v19135_v57  ;;  %v9919_v0 = vsub.f32 1.5, %v9918_v56 }
0x1258   : > { %v10501_v13 = vadd.f32 %v10426_v33, %v17154_v52  ;;  %v10109_v5 = vadd.f32 %v17978_v51, %v10076_v50  ;;  %v9910_v20 = vmul.f32 %v18063_v12, %v9909_v48 }
0x1259   : > { %v9635_v9 = vsel %vm321_vm0, %v9543_v34, 0.0  ;;  %v18120_v53 = vsub.f32 %v17903_v21, %v9480_v45  ;;  %10442 = vmatmul.bf16.gmra.mxu2 %v10333_v63  ;;  %v9920_v59 = vmul.f32 %v11906_v61, %v9919_v0 }
0x125a   : > { %9636 = vadd.xlane.f32.xlu1 %v9635_v9  ;;  %10533 = vst.msk [vmem:[%s17922_s14 + $0x18] sm:$0xff] %vm321_vm0, %v10501_v13  ;;  %v10246_v22 = vpop.f32.mrf.mxu1  ;;  %v10132_v33 = vpack.c.bf16 %v10110_v25, %v10109_v5  ;;  %v9914_v30 = vsel %vm9913_vm3, %v18063_v12, %v9910_v20 }
0x125b   : > { %v9544_v52 = vmul.f32 %v18120_v53, %v18120_v53  ;;  %v9924_v46 = vsel %vm9923_vm1, %v11906_v61, %v9920_v59  ;;  %v10247_v24 = vadd.f32 %v17687_v7, %v10246_v22  ;;  %v10045_v15 = vmul.f32 %v9914_v30, %v17828_v8 }
0x125c   : > { %v10046_v63 = vmul.f32 %v9924_v46, %v17846_v18 }
0x125d   : > { %v10428_v62 = vpop.f32.mrf.mxu2  ;;  %v9638_v27 = vsel %vm321_vm0, %v9544_v52, 0.0  ;;  %v10308_v61 = vmax.f32 %v10247_v24, 0.0  ;;  %v10078_v18 = vmul.f32 %v17963_v49, %v10045_v15 }
0x125e   : > { %v10429_v56 = vadd.f32 %v17914_v54, %v10428_v62  ;;  %9639 = vadd.xlane.f32.xlu2 %v9638_v27  ;;  %v10079_v12 = vmul.f32 %v17963_v49, %v10046_v63  ;;  %v9663_v62 = vmul.f32 %v18078_v39, %v19135_v57 }
0x125f   : > { %v10111_v8 = vadd.f32 %v17978_v51, %v10078_v18 }
0x1260   : > { %v10502_v34 = vadd.f32 %v10429_v56, %v17199_v41  ;;  %10948 = vmatmul.msk.bf16.gmra.mxu1 %vm321_vm0, %v10132_v33  ;;  %v9695_v27 = vadd.f32 1e-05, %v9663_v62 }
0x1262   : > { %10534 = vst.msk [vmem:[%s17922_s14 + $0x20] sm:$0xff] %vm321_vm0, %v10502_v34  ;;  %v10248_v45 = vpop.f32.mrf.mxu1  ;;  %11907 = vrsqrt.f32 %v9695_v27  ;;  %vm9931_vm5 = vweird.f32 %v9695_v27 }
0x1263   : > { %v10249_v0 = vadd.f32 %v17687_v7, %v10248_v45  ;;  %v10112_v7 = vadd.f32 %v17978_v51, %v10079_v12 }
0x1265   : > { %v10309_v13 = vmax.f32 %v10249_v0, 0.0  ;;  %v10430_v41 = vpop.f32.mrf.mxu2  ;;  %v10133_v59 = vpack.c.bf16 %v10112_v7, %v10111_v8 }
0x1266   : > { %v10431_v9 = vadd.f32 %v17914_v54, %v10430_v41 }
0x1267   : > { %v10334_v50 = vpack.c.bf16 %v10309_v13, %v10308_v61 }
0x1268   : > { %v10503_v48 = vadd.f32 %v10431_v9, %v17216_v47  ;;  %v11908_v56 = vpop.eup %11907 }
0x1269   : > { %10447 = vmatmul.bf16.gmra.mxu2 %v10334_v50  ;;  %v9926_v33 = vmul.f32 %v11908_v56, %v9695_v27  ;;  %vm9932_vm4 = vweird.f32 %v11908_v56 }
0x126a   : > { %10535 = vst.msk [vmem:[%s17922_s14 + $0x28] sm:$0xff] %vm321_vm0, %v10503_v48  ;;  %vm9933_vm6 = vmor %vm9931_vm5, %vm9932_vm4 }
0x126b   : > { %v9927_v46 = vmul.f32 %v11908_v56, %v9926_v33 }
0x126d   : > { %v10433_v22 = vpop.f32.mrf.mxu2  ;;  %v9928_v30 = vmul.f32 0.5, %v9927_v46 }
0x126e   : > { %v10434_v25 = vadd.f32 %v17914_v54, %v10433_v22 }
0x126f   : > { %v9929_v63 = vsub.f32 1.5, %v9928_v30 }
0x1270   : > { %v10504_v52 = vadd.f32 %v10434_v25, %v17234_v6  ;;  %10949 = vmatmul.msk.bf16.gmra.mxu1 %vm321_vm0, %v10133_v59 }
0x1272   : > { %10536 = vst.msk [vmem:[%s17922_s14 + $0x30] sm:$0xff] %vm321_vm0, %v10504_v52 }
0x1275   : > { %v10435_v47 = vpop.f32.mrf.mxu2 }
0x1276   : > { %v10436_v5 = vadd.f32 %v17914_v54, %v10435_v47 }
0x1278   : > { %v10505_v20 = vadd.f32 %v10436_v5, %v17247_v17  ;;  %v9930_v17 = vmul.f32 %v11908_v56, %v9929_v63 }
0x127a   : > { %10537 = vst.msk [vmem:[%s17922_s14 + $0x38] sm:$0xff] %vm321_vm0, %v10505_v20  ;;  %v9934_v12 = vsel %vm9933_vm6, %v11908_v56, %v9930_v17 }
0x127b   : > { %v10047_v8 = vmul.f32 %v9934_v12, %v17879_v44 }
0x127d   : > { %v10080_v56 = vmul.f32 %v17963_v49, %v10047_v8 }
0x12ac   : > { %v9616_v6 = vpop.xlane.xlu1 %9615 }
0x12ad   : > { %v9664_v34 = vmul.f32 %v9616_v6, %v19135_v57 }
0x12af   : > { %v9696_v24 = vadd.f32 1e-05, %v9664_v34 }
0x12b1   : > { %11909 = vrsqrt.f32 %v9696_v24  ;;  %vm9941_vm8 = vweird.f32 %v9696_v24 }
0x12b4   : > { %v9619_v45 = vpop.xlane.xlu1 %9618  ;;  %v9622_v0 = vpop.xlane.xlu2 %9621 }
0x12b5   : > { %v9665_v15 = vmul.f32 %v9619_v45, %v19135_v57  ;;  %v9666_v39 = vmul.f32 %v9622_v0, %v19135_v57 }
0x12b7   : > { %v11910_v61 = vpop.eup %11909  ;;  %v9697_v41 = vadd.f32 1e-05, %v9665_v15  ;;  %v18165_v9 = vadd.f32 1e-05, %v9666_v39  ;;  %v10113_v15 = vadd.f32 %v17978_v51, %v10080_v56 }
0x12b8   : > { %v9936_v13 = vmul.f32 %v11910_v61, %v9696_v24  ;;  %vm9942_vm7 = vweird.f32 %v11910_v61 }
0x12b9   : > { %11911 = vrsqrt.f32 %v9697_v41  ;;  %v9625_v48 = vpop.xlane.xlu0 %9624  ;;  %vm9943_vm9 = vmor %vm9941_vm8, %vm9942_vm7  ;;  %vm9951_vm12 = vweird.f32 %v9697_v41  ;;  %vm9961_vm14 = vweird.f32 %v18165_v9 }
0x12ba   : > { %v9937_v50 = vmul.f32 %v11910_v61, %v9936_v13  ;;  %11913 = vrsqrt.f32 %v18165_v9  ;;  %v9667_v18 = vmul.f32 %v9625_v48, %v19135_v57 }
0x12bc   : > { %v9938_v7 = vmul.f32 0.5, %v9937_v50  ;;  %v18170_v22 = vadd.f32 1e-05, %v9667_v18  ;;  %v9628_v25 = vpop.xlane.xlu1 %9627 }
0x12bd   : > { %v9668_v52 = vmul.f32 %v9628_v25, %v19135_v57  ;;  %v10251_v47 = vpop.f32.mrf.mxu1 }
0x12be   : > { %v9939_v59 = vsub.f32 1.5, %v9938_v7  ;;  %11915 = vrsqrt.f32 %v18170_v22  ;;  %vm9971_vm2 = vweird.f32 %v18170_v22 }
0x12bf   : > { %v18174_v5 = vpop.eup %11911  ;;  %v18176_v62 = vadd.f32 1e-05, %v9668_v52 }
0x12c0   : > { %v9940_v20 = vmul.f32 %v11910_v61, %v9939_v59  ;;  %v18178_v27 = vpop.eup %11913  ;;  %v9946_v44 = vmul.f32 %v18174_v5, %v9697_v41  ;;  %vm9952_vm10 = vweird.f32 %v18174_v5 }
0x12c1   : > { %v9956_v46 = vmul.f32 %v18178_v27, %v18165_v9  ;;  %11917 = vrsqrt.f32 %v18176_v62  ;;  %vm9962_vm11 = vweird.f32 %v18178_v27  ;;  %vm18217_vm13 = vmor %vm9951_vm12, %vm9952_vm10  ;;  %vm9981_vm5 = vweird.f32 %v18176_v62 }
0x12c2   : > { %v9944_v33 = vsel %vm9943_vm9, %v11910_v61, %v9940_v20  ;;  %v9947_v34 = vmul.f32 %v18174_v5, %v9946_v44  ;;  %vm18228_vm15 = vmor %vm9961_vm14, %vm9962_vm11 }
0x12c3   : > { %v10048_v6 = vmul.f32 %v9944_v33, %v17946_v37  ;;  %v9957_v30 = vmul.f32 %v18178_v27, %v9956_v46  ;;  %v18197_v37 = vld [vmem:[%s18426_s5] ss:$0 sm:$0xff] }
0x12c4   : > { %v18188_v24 = vpop.eup %11915  ;;  %v9948_v63 = vmul.f32 0.5, %v9947_v34  ;;  %v9631_v45 = vpop.xlane.xlu2 %9630  ;;  %v10252_v13 = vadd.f32 %v18197_v37, %v10251_v47 }
0x12c5   : > { %v9634_v0 = vpop.xlane.xlu0 %9633  ;;  %v10081_v17 = vmul.f32 %v17963_v49, %v10048_v6  ;;  %v9958_v39 = vmul.f32 0.5, %v9957_v30  ;;  %v9966_v61 = vmul.f32 %v18188_v24, %v18170_v22  ;;  %v9669_v12 = vmul.f32 %v9631_v45, %v19135_v57  ;;  %v10253_v50 = vpop.f32.mrf.mxu1 }
0x12c6   : > { %v9949_v48 = vsub.f32 1.5, %v9948_v63  ;;  %v9670_v18 = vmul.f32 %v9634_v0, %v19135_v57  ;;  %v10254_v52 = vadd.f32 %v18197_v37, %v10253_v50  ;;  %v10310_v30 = vmax.f32 %v10252_v13, 0.0 }
0x12c7   : > { %v11918_v7 = vpop.eup %11917  ;;  %v9959_v8 = vsub.f32 1.5, %v9958_v39  ;;  %v9967_v25 = vmul.f32 %v18188_v24, %v9966_v61  ;;  %v18205_v59 = vadd.f32 1e-05, %v9669_v12  ;;  %v10114_v56 = vadd.f32 %v17978_v51, %v10081_v17 }
0x12c8   : > { %v9950_v47 = vmul.f32 %v18174_v5, %v9949_v48  ;;  %v9976_v20 = vmul.f32 %v11918_v7, %v18176_v62  ;;  %v18210_v44 = vadd.f32 1e-05, %v9670_v18  ;;  %vm9972_vm1 = vweird.f32 %v18188_v24 }
0x12c9   : > { %v9960_v33 = vmul.f32 %v18178_v27, %v9959_v8  ;;  %v9968_v46 = vmul.f32 0.5, %v9967_v25  ;;  %11919 = vrsqrt.f32 %v18205_v59  ;;  %v10311_v0 = vmax.f32 %v10254_v52, 0.0  ;;  %vm9973_vm3 = vmor %vm9971_vm2, %vm9972_vm1 }
0x12ca   : > { %v9977_v34 = vmul.f32 %v11918_v7, %v9976_v20  ;;  %11921 = vrsqrt.f32 %v18210_v44  ;;  %v9954_v41 = vsel %vm18217_vm13, %v18174_v5, %v9950_v47  ;;  %v10134_v39 = vpack.c.bf16 %v10114_v56, %v10113_v15 }
0x12cb   : > { %v9969_v45 = vsub.f32 1.5, %v9968_v46  ;;  %v9964_v9 = vsel %vm18228_vm15, %v18178_v27, %v9960_v33  ;;  %v10335_v12 = vpack.c.bf16 %v10311_v0, %v10310_v30  ;;  %v10049_v8 = vmul.f32 %v9954_v41, %v17984_v43 }
0x12cc   : > { %v9978_v17 = vmul.f32 0.5, %v9977_v34  ;;  %v10438_v61 = vpop.f32.mrf.mxu2  ;;  %vm9982_vm4 = vweird.f32 %v11918_v7  ;;  %10950 = vmatmul.msk.bf16.gmra.mxu1 %vm321_vm0, %v10134_v39  ;;  %v10050_v43 = vmul.f32 %v9964_v9, %v17991_v29  ;;  %vm9991_vm7 = vweird.f32 %v18205_v59 }
0x12cd   : > { %v9637_v5 = vpop.xlane.xlu1 %9636  ;;  %v9970_v13 = vmul.f32 %v18188_v24, %v9969_v45  ;;  %v10439_v50 = vadd.f32 %v17914_v54, %v10438_v61  ;;  %v10256_v18 = vpop.f32.mrf.mxu1  ;;  %10452 = vmatmul.bf16.gmra.mxu2 %v10335_v12  ;;  %vm9983_vm6 = vmor %vm9981_vm5, %vm9982_vm4  ;;  %vm10001_vm8 = vweird.f32 %v18210_v44  ;;  %v10082_v29 = vmul.f32 %v17963_v49, %v10049_v8 }
0x12ce   : > { %v9671_v48 = vmul.f32 %v9637_v5, %v19135_v57  ;;  %v9979_v25 = vsub.f32 1.5, %v9978_v17  ;;  %v10257_v63 = vadd.f32 %v18197_v37, %v10256_v18 }
0x12cf   : > { %v18242_v22 = vpop.eup %11919  ;;  %v9974_v27 = vsel %vm9973_vm3, %v18188_v24, %v9970_v13  ;;  %v10506_v15 = vadd.f32 %v10439_v50, %v17359_v31 }
0x12d0   : > { %v18247_v52 = vadd.f32 1e-05, %v9671_v48  ;;  %v11922_v47 = vpop.eup %11921  ;;  %v10051_v20 = vmul.f32 %v9974_v27, %v18026_v26  ;;  %v9980_v56 = vmul.f32 %v11918_v7, %v9979_v25  ;;  %v9986_v33 = vmul.f32 %v18242_v22, %v18205_v59 }
0x12d1   : > { %v9996_v24 = vmul.f32 %v11922_v47, %v18210_v44  ;;  %10538 = vst.msk [vmem:[%s17922_s14 + $0x40] sm:$0xff] %vm321_vm0, %v10506_v15  ;;  %v9640_v31 = vpop.xlane.xlu2 %9639  ;;  %vm9992_vm9 = vweird.f32 %v18242_v22  ;;  %vm10002_vm10 = vweird.f32 %v11922_v47 }
0x12d2   : > { %11923 = vrsqrt.f32 %v18247_v52  ;;  %v9984_v62 = vsel %vm9983_vm6, %v11918_v7, %v9980_v56  ;;  %v9987_v46 = vmul.f32 %v18242_v22, %v9986_v33  ;;  %v10084_v26 = vmul.f32 %v17963_v49, %v10051_v20  ;;  %vm9993_vm11 = vmor %vm9991_vm7, %vm9992_vm9 }
0x12d3   : > { %v10052_v6 = vmul.f32 %v9984_v62, %v18034_v4  ;;  %v9997_v34 = vmul.f32 %v11922_v47, %v9996_v24  ;;  %v9672_v30 = vmul.f32 %v9640_v31, %v19135_v57  ;;  %v10083_v7 = vmul.f32 %v17963_v49, %v10050_v43  ;;  %vm10003_vm12 = vmor %vm10001_vm8, %vm10002_vm10 }
0x12d4   : > { %v9988_v41 = vmul.f32 0.5, %v9987_v46  ;;  %v10440_v45 = vpop.f32.mrf.mxu2  ;;  %v10115_v57 = vadd.f32 %v17978_v51, %v10082_v29  ;;  %v10117_v12 = vadd.f32 %v17978_v51, %v10084_v26  ;;  %v10312_v20 = vmax.f32 %v10257_v63, 0.0 }
0x12d5   : > { %v10085_v0 = vmul.f32 %v17963_v49, %v10052_v6  ;;  %v9998_v9 = vmul.f32 0.5, %v9997_v34  ;;  %v9704_v17 = vadd.f32 1e-05, %v9672_v30  ;;  %v10441_v39 = vadd.f32 %v17914_v54, %v10440_v45  ;;  %v10258_v61 = vpop.f32.mrf.mxu1 }
0x12d6   : > { %v9989_v5 = vsub.f32 1.5, %v9988_v41  ;;  %v10259_v4 = vadd.f32 %v18197_v37, %v10258_v61  ;;  %v10116_v27 = vadd.f32 %v17978_v51, %v10083_v7  ;;  %vm10011_vm2 = vweird.f32 %v18247_v52 }
0x12d7   : > { %v10118_v50 = vadd.f32 %v17978_v51, %v10085_v0  ;;  %v9999_v48 = vsub.f32 1.5, %v9998_v9  ;;  %11925 = vrsqrt.f32 %v9704_v17  ;;  %v10507_v25 = vadd.f32 %v10441_v39, %v17330_v60 }
0x12d8   : > { %v18271_v13 = vpop.eup %11923  ;;  %v9990_v18 = vmul.f32 %v18242_v22, %v9989_v5  ;;  %v10313_v56 = vmax.f32 %v10259_v4, 0.0  ;;  %v10135_v59 = vpack.c.bf16 %v10116_v27, %v10115_v57  ;;  %vm10021_vm15 = vweird.f32 %v9704_v17 }
0x12d9   : > { %v10006_v8 = vmul.f32 %v18271_v13, %v18247_v52  ;;  %v10136_v15 = vpack.c.bf16 %v10118_v50, %v10117_v12  ;;  %v10000_v43 = vmul.f32 %v11922_v47, %v9999_v48  ;;  %10539 = vst.msk [vmem:[%s17922_s14 + $0x48] sm:$0xff] %vm321_vm0, %v10507_v25  ;;  %vm10012_vm14 = vweird.f32 %v18271_v13 }
0x12da   : > { %v9994_v33 = vsel %vm9993_vm11, %v18242_v22, %v9990_v18  ;;  %v10336_v24 = vpack.c.bf16 %v10313_v56, %v10312_v20  ;;  %vm10013_vm3 = vmor %vm10011_vm2, %vm10012_vm14 }
0x12db   : > { %v10004_v60 = vsel %vm10003_vm12, %v11922_v47, %v10000_v43  ;;  %10952 = vmatmul.msk.bf16.vlgmr.msrb.gmra.mxu3 %vm321_vm0, %v10136_v15  ;;  %v10007_v31 = vmul.f32 %v18271_v13, %v10006_v8  ;;  %v10053_v29 = vmul.f32 %v9994_v33, %v18061_v38 }
0x12dc   : > { %v10443_v62 = vpop.f32.mrf.mxu2  ;;  %v10054_v22 = vmul.f32 %v10004_v60, %v18066_v3  ;;  %10951 = vmatmul.msk.bf16.gmra.mxu1 %vm321_vm0, %v10135_v59 }
0x12dd   : > { %v11926_v46 = vpop.eup %11925  ;;  %v10444_v26 = vadd.f32 %v17914_v54, %v10443_v62  ;;  %v10261_v44 = vpop.f32.mrf.mxu1  ;;  %10457 = vmatmul.bf16.gmra.mxu2 %v10336_v24  ;;  %v10008_v34 = vmul.f32 0.5, %v10007_v31  ;;  %v10086_v41 = vmul.f32 %v17963_v49, %v10053_v29 }
0x12de   : > { %v10016_v6 = vmul.f32 %v11926_v46, %v9704_v17  ;;  %v10087_v63 = vmul.f32 %v17963_v49, %v10054_v22  ;;  %v10262_v0 = vadd.f32 %v18197_v37, %v10261_v44  ;;  %vm10022_vm13 = vweird.f32 %v11926_v46 }
0x12df   : > { %v10508_v47 = vadd.f32 %v10444_v26, %v17379_v19  ;;  %v10009_v45 = vsub.f32 1.5, %v10008_v34  ;;  %v10119_v19 = vadd.f32 %v17978_v51, %v10086_v41  ;;  %vm10023_vm1 = vmor %vm10021_vm15, %vm10022_vm13 }
0x12e0   : > { %v10017_v30 = vmul.f32 %v11926_v46, %v10016_v6  ;;  %v10120_v61 = vadd.f32 %v17978_v51, %v10087_v63  ;;  %v10314_v48 = vmax.f32 %v10262_v0, 0.0 }
0x12e1   : > { %10540 = vst.msk [vmem:[%s17922_s14 + $0x50] sm:$0xff] %vm321_vm0, %v10508_v47  ;;  %v10010_v12 = vmul.f32 %v18271_v13, %v10009_v45 }
0x12e2   : > { %v10018_v38 = vmul.f32 0.5, %v10017_v30  ;;  %v10137_v18 = vpack.c.bf16 %v10120_v61, %v10119_v19  ;;  %v19179_v61 = vld [vmem:[#allocation11_spill] sm:$0xff] }
0x12e4   : > { %v10019_v3 = vsub.f32 1.5, %v10018_v38  ;;  %v10445_v7 = vpop.f32.mrf.mxu2 }
0x12e5   : > { %v10446_v9 = vadd.f32 %v17914_v54, %v10445_v7  ;;  %v10263_v39 = vpop.f32.mrf.mxu1 }
0x12e6   : > { %v10020_v5 = vmul.f32 %v11926_v46, %v10019_v3  ;;  %v10264_v4 = vadd.f32 %v18197_v37, %v10263_v39 }
0x12e7   : > { %v10509_v57 = vadd.f32 %v10446_v9, %v17392_v42  ;;  %v10014_v42 = vsel %vm10013_vm3, %v18271_v13, %v10010_v12 }
0x12e8   : > { %v10315_v50 = vmax.f32 %v10264_v4, 0.0  ;;  %v10024_v8 = vsel %vm10023_vm1, %v11926_v46, %v10020_v5  ;;  %v10055_v20 = vmul.f32 %v10014_v42, %v18109_v36 }
0x12e9   : > { %10541 = vst.msk [vmem:[%s17922_s14 + $0x58] sm:$0xff] %vm321_vm0, %v10509_v57  ;;  %v10056_v15 = vmul.f32 %v10024_v8, %v18120_v53 }
0x12ea   : > { %v10337_v25 = vpack.c.bf16 %v10315_v50, %v10314_v48  ;;  %v10088_v33 = vmul.f32 %v17963_v49, %v10055_v20  ;;  %v18350_v48 = vld [vmem:[%s18422_s1 + $0x5] ss:$0 sm:$0xff]  ;;  %v19181_v20 = vld [vmem:[#allocation8_spill] sm:$0xff] }
0x12eb   : > { %10953 = vmatmul.msk.bf16.gmra.mxu3 %vm321_vm0, %v10137_v18  ;;  %v10089_v52 = vmul.f32 %v17963_v49, %v10056_v15  ;;  %v19180_v18 = vld [vmem:[#allocation3_spill] sm:$0xff] }
0x12ec   : > { %v10448_v27 = vpop.f32.mrf.mxu2 }
0x12ed   : > { %v10449_v17 = vadd.f32 %v17914_v54, %v10448_v27  ;;  %v10266_v43 = vpop.f32.mrf.mxu1  ;;  %10462 = vmatmul.bf16.gmra.mxu2 %v10337_v25  ;;  %v10122_v31 = vadd.f32 %v17978_v51, %v10089_v52 }
0x12ee   : > { %v10267_v13 = vadd.f32 %v18197_v37, %v10266_v43 }
0x12ef   : > { %v10510_v56 = vadd.f32 %v10449_v17, %v17413_v32  ;;  %v10121_v32 = vadd.f32 %v17978_v51, %v10088_v33 }
0x12f0   : > { %v10316_v46 = vmax.f32 %v10267_v13, 0.0 }
0x12f1   : > { %10542 = vst.msk [vmem:[%s17922_s14 + $0x60] sm:$0xff] %vm321_vm0, %v10510_v56  ;;  %v10138_v49 = vpack.c.bf16 %v10122_v31, %v10121_v32 }
0x12f4   : > { %v10450_v60 = vpop.f32.mrf.mxu2 }
0x12f5   : > { %v10451_v53 = vadd.f32 %v17914_v54, %v10450_v60  ;;  %v10268_v24 = vpop.f32.mrf.mxu1 }
0x12f6   : > { %v10269_v36 = vadd.f32 %v18197_v37, %v10268_v24  ;;  %v19182_v24 = vld [vmem:[#allocation6_spill] sm:$0xff] }
0x12f7   : > { %v10511_v59 = vadd.f32 %v10451_v53, %v17399_v10 }
0x12f8   : > { %v10317_v62 = vmax.f32 %v10269_v36, 0.0 }
0x12f9   : > { %10543 = vst.msk [vmem:[%s17922_s14 + $0x68] sm:$0xff] %vm321_vm0, %v10511_v59 }
0x12fa   : > { %v10338_v29 = vpack.c.bf16 %v10317_v62, %v10316_v46 }
0x12fb   : > { %10954 = vmatmul.msk.bf16.gmra.mxu3 %vm321_vm0, %v10138_v49 }
0x12fd   : > { %10467 = vmatmul.bf16.gmra.mxu2 %v10338_v29 }
0x1349   : > { %v10271_v22 = vpop.f32.mrf.mxu1 }
0x134a   : > { %v10272_v26 = vadd.f32 %v18197_v37, %v10271_v22 }
0x134c   : > { %v10318_v34 = vmax.f32 %v10272_v26, 0.0 }
0x1350   : > { %v10453_v44 = vpop.f32.mrf.mxu2 }
0x1351   : > { %v10454_v6 = vadd.f32 %v17914_v54, %v10453_v44  ;;  %v10273_v10 = vpop.f32.mrf.mxu1 }
0x1352   : > { %v10274_v51 = vadd.f32 %v18197_v37, %v10273_v10 }
0x1353   : > { %v10512_v47 = vadd.f32 %v10454_v6, %v17417_v55 }
0x1354   : > { %v10319_v30 = vmax.f32 %v10274_v51, 0.0 }
0x1355   : > { %10544 = vst.msk [vmem:[%s17922_s14 + $0x70] sm:$0xff] %vm321_vm0, %v10512_v47 }
0x1356   : > { %v10339_v41 = vpack.c.bf16 %v10319_v30, %v10318_v34 }
0x1358   : > { %v10455_v63 = vpop.f32.mrf.mxu2  ;;  %10472 = vmatmul.bf16.gmra.mxu2 %v10339_v41 }
0x1359   : > { %v10456_v38 = vadd.f32 %v17914_v54, %v10455_v63  ;;  %v10276_v45 = vpop.f32.mrf.mxu1 }
0x135a   : > { %v10277_v0 = vadd.f32 %v18197_v37, %v10276_v45 }
0x135b   : > { %v10513_v3 = vadd.f32 %v10456_v38, %v17491_v40 }
0x135c   : > { %v10320_v4 = vmax.f32 %v10277_v0, 0.0 }
0x135d   : > { %10545 = vst.msk [vmem:[%s17922_s14 + $0x78] sm:$0xff] %vm321_vm0, %v10513_v3 }
0x135e   : > { %v10281_v7 = vpop.f32.mrf.mxu3 }
0x135f   : > { %v10282_v27 = vadd.f32 %v18197_v37, %v10281_v7 }
0x1360   : > { %v10458_v55 = vpop.f32.mrf.mxu2 }
0x1361   : > { %v10459_v9 = vadd.f32 %v17914_v54, %v10458_v55  ;;  %v10278_v39 = vpop.f32.mrf.mxu1  ;;  %v10322_v52 = vmax.f32 %v10282_v27, 0.0 }
0x1362   : > { %v10279_v19 = vadd.f32 %v18197_v37, %v10278_v39 }
0x1363   : > { %v10514_v5 = vadd.f32 %v10459_v9, %v19179_v61  ;;  %v19183_v61 = vld [vmem:[#allocation9_spill] sm:$0xff] }
0x1364   : > { %v10321_v57 = vmax.f32 %v10279_v19, 0.0 }
0x1365   : > { %10546 = vst.msk [vmem:[%s17922_s14 + $0x80] sm:$0xff] %vm321_vm0, %v10514_v5 }
0x1366   : > { %v10283_v12 = vpop.f32.mrf.mxu3  ;;  %v10340_v40 = vpack.c.bf16 %v10321_v57, %v10320_v4  ;;  %v19184_v57 = vld [vmem:[#allocation4_spill] sm:$0xff] }
0x1367   : > { %v10284_v42 = vadd.f32 %v18197_v37, %v10283_v12 }
0x1368   : > { %v10460_v50 = vpop.f32.mrf.mxu2  ;;  %10477 = vmatmul.bf16.vlgmr.msra.gmra.mxu3 %v10340_v40 }
0x1369   : > { %v10461_v54 = vadd.f32 %v18350_v48, %v10460_v50  ;;  %v10323_v43 = vmax.f32 %v10284_v42, 0.0 }
0x136b   : > { %v10515_v8 = vadd.f32 %v10461_v54, %v19180_v18  ;;  %v10341_v33 = vpack.c.bf16 %v10323_v43, %v10322_v52 }
0x136d   : > { %10547 = vst.msk [vmem:[%s17922_s14 + $0x88] sm:$0xff] %vm321_vm0, %v10515_v8 }
0x136e   : > { %v10286_v25 = vpop.f32.mrf.mxu3 }
0x136f   : > { %v10287_v59 = vadd.f32 %v18197_v37, %v10286_v25 }
0x1370   : > { %v10463_v15 = vpop.f32.mrf.mxu2 }
0x1371   : > { %v10464_v17 = vadd.f32 %v18350_v48, %v10463_v15  ;;  %v10324_v22 = vmax.f32 %v10287_v59, 0.0 }
0x1373   : > { %v10516_v56 = vadd.f32 %v10464_v17, %v19181_v20 }
0x1375   : > { %10548 = vst.msk [vmem:[%s17922_s14 + $0x90] sm:$0xff] %vm321_vm0, %v10516_v56 }
0x1376   : > { %v10288_v60 = vpop.f32.mrf.mxu3 }
0x1377   : > { %v10289_v36 = vadd.f32 %v18197_v37, %v10288_v60 }
0x1378   : > { %v10465_v13 = vpop.f32.mrf.mxu2  ;;  %10482 = vmatmul.bf16.gmra.mxu3 %v10341_v33 }
0x1379   : > { %v10466_v53 = vadd.f32 %v18350_v48, %v10465_v13  ;;  %v10325_v49 = vmax.f32 %v10289_v36, 0.0 }
0x137b   : > { %v10517_v31 = vadd.f32 %v10466_v53, %v19182_v24  ;;  %v10342_v26 = vpack.c.bf16 %v10325_v49, %v10324_v22 }
0x137d   : > { %10549 = vst.msk [vmem:[%s17922_s14 + $0x98] sm:$0xff] %vm321_vm0, %v10517_v31 }
0x137e   : > { %v10291_v62 = vpop.f32.mrf.mxu3 }
0x137f   : > { %v10292_v34 = vadd.f32 %v18197_v37, %v10291_v62 }
0x1380   : > { %v10468_v32 = vpop.f32.mrf.mxu2 }
0x1381   : > { %v10469_v46 = vadd.f32 %v18350_v48, %v10468_v32  ;;  %v10326_v30 = vmax.f32 %v10292_v34, 0.0 }
0x1383   : > { %v10518_v29 = vadd.f32 %v10469_v46, %v17640_v35 }
0x1385   : > { %10550 = vst.msk [vmem:[%s17922_s14 + $0xa0] sm:$0xff] %vm321_vm0, %v10518_v29 }
0x1386   : > { %v10293_v10 = vpop.f32.mrf.mxu3 }
0x1387   : > { %v10294_v47 = vadd.f32 %v18197_v37, %v10293_v10 }
0x1388   : > { %v10470_v44 = vpop.f32.mrf.mxu2  ;;  %10487 = vmatmul.bf16.gmra.mxu3 %v10342_v26 }
0x1389   : > { %v10471_v6 = vadd.f32 %v18350_v48, %v10470_v44  ;;  %v10327_v35 = vmax.f32 %v10294_v47, 0.0 }
0x138b   : > { %v10519_v51 = vadd.f32 %v10471_v6, %v17646_v58  ;;  %v10343_v41 = vpack.c.bf16 %v10327_v35, %v10326_v30 }
0x138d   : > { %10551 = vst.msk [vmem:[%s17922_s14 + $0xa8] sm:$0xff] %vm321_vm0, %v10519_v51 }
0x1398   : > { %10492 = vmatmul.bf16.gmra.mxu3 %v10343_v41 }
0x13db   : > { %v10473_v63 = vpop.f32.mrf.mxu2 }
0x13dc   : > { %v10474_v38 = vadd.f32 %v18350_v48, %v10473_v63 }
0x13de   : > { %v10520_v45 = vadd.f32 %v10474_v38, %v17661_v2 }
0x13e0   : > { %10552 = vst.msk [vmem:[%s17922_s14 + $0xb0] sm:$0xff] %vm321_vm0, %v10520_v45 }
0x13e3   : > { %v10475_v58 = vpop.f32.mrf.mxu2 }
0x13e4   : > { %v10476_v3 = vadd.f32 %v18350_v48, %v10475_v58 }
0x13e6   : > { %v10521_v7 = vadd.f32 %v10476_v3, %v17745_v11 }
0x13e8   : > { %10553 = vst.msk [vmem:[%s17922_s14 + $0xb8] sm:$0xff] %vm321_vm0, %v10521_v7 }
0x13eb   : > { %v10478_v37 = vpop.f32.mrf.mxu3 }
0x13ec   : > { %v10479_v0 = vadd.f32 %v18350_v48, %v10478_v37 }
0x13ee   : > { %v10522_v55 = vadd.f32 %v10479_v0, %v17792_v14 }
0x13f0   : > { %10554 = vst.msk [vmem:[%s17922_s14 + $0xc0] sm:$0xff] %vm321_vm0, %v10522_v55 }
0x13f3   : > { %v10480_v2 = vpop.f32.mrf.mxu3 }
0x13f4   : > { %v10481_v9 = vadd.f32 %v18350_v48, %v10480_v2 }
0x13f6   : > { %v10523_v39 = vadd.f32 %v10481_v9, %v17795_v23 }
0x13f8   : > { %10555 = vst.msk [vmem:[%s17922_s14 + $0xc8] sm:$0xff] %vm321_vm0, %v10523_v39 }
0x13fb   : > { %v10483_v11 = vpop.f32.mrf.mxu3 }
0x13fc   : > { %v10484_v19 = vadd.f32 %v18350_v48, %v10483_v11 }
0x13fe   : > { %v10524_v5 = vadd.f32 %v10484_v19, %v19183_v61 }
0x1400   : > { %10556 = vst.msk [vmem:[%s17922_s14 + $0xd0] sm:$0xff] %vm321_vm0, %v10524_v5 }
0x1403   : > { %v10485_v14 = vpop.f32.mrf.mxu3 }
0x1404   : > { %v10486_v4 = vadd.f32 %v18350_v48, %v10485_v14 }
0x1406   : > { %v10525_v12 = vadd.f32 %v10486_v4, %v19184_v57 }
0x1408   : > { %10557 = vst.msk [vmem:[%s17922_s14 + $0xd8] sm:$0xff] %vm321_vm0, %v10525_v12 }
0x140b   : > { %v10488_v23 = vpop.f32.mrf.mxu3 }
0x140c   : > { %v10489_v40 = vadd.f32 %v18350_v48, %v10488_v23 }
0x140e   : > { %v10526_v50 = vadd.f32 %v10489_v40, %v17871_v16 }
0x1410   : > { %10558 = vst.msk [vmem:[%s17922_s14 + $0xe0] sm:$0xff] %vm321_vm0, %v10526_v50 }
0x1413   : > { %v10490_v54 = vpop.f32.mrf.mxu3 }
0x1414   : > { %v10491_v18 = vadd.f32 %v18350_v48, %v10490_v54 }
0x1416   : > { %v10527_v8 = vadd.f32 %v10491_v18, %v17874_v1 }
0x1418   : > { %10559 = vst.msk [vmem:[%s17922_s14 + $0xe8] sm:$0xff] %vm321_vm0, %v10527_v8 }
0x141b   : > { %v10493_v25 = vpop.f32.mrf.mxu3 }
0x141c   : > { %v10494_v42 = vadd.f32 %v18350_v48, %v10493_v25 }
0x141e   : > { %v10528_v27 = vadd.f32 %v10494_v42, %v17894_v28 }
0x1420   : > { %10560 = vst.msk [vmem:[%s17922_s14 + $0xf0] sm:$0xff] %vm321_vm0, %v10528_v27 }
0x1423   : > { %v10495_v15 = vpop.f32.mrf.mxu3 }
0x1424   : > { %v10496_v17 = vadd.f32 %v18350_v48, %v10495_v15 }
0x1426   : > { %v10529_v16 = vadd.f32 %v10496_v17, %v17903_v21 }
0x1428   : > { %10561 = vst.msk [vmem:[%s17922_s14 + $0xf8] sm:$0xff] %vm321_vm0, %v10529_v16 }
0x1429 PF: > { %s17_s24 = sadd.s32 1, %s11972_s24  }
0x142a   : > { %p14_p4 = scmp.ge.s32.totalorder %s17_s24, 6  }
0x142c   :  { %16 = sbr.rel (!%p14_p4) target bundleno = 1 (0x1), region = 78 }

</bundles_post_ra>
